<compile_context>
chip_gen: v5e
topology: v5e:2x2
jax: 0.10.0
libtpu: 0.0.40
codegen_flags: <defaults>
</compile_context>

<pallas_src>
import math
from functools import partial

import jax
import jax.numpy as jnp
from jax.experimental import pallas as pl
from jax.experimental.pallas import tpu as pltpu

NUM_CLASSES = 1000


def _round_up(x, m):
    return ((x + m - 1) // m) * m


# ---------------------------------------------------------------------------
# Kernel 1: tiled matmul with fused bias + ReLU (bf16 operands, f32 accumulate)
# Used for the 7x7 stem conv (via im2col) and the 1x1 classifier conv.
# ---------------------------------------------------------------------------
def _mm_bias_relu_kernel(a_ref, b_ref, bias_ref, o_ref):
    acc = jnp.dot(a_ref[...], b_ref[...], preferred_element_type=jnp.float32)
    o_ref[...] = jnp.maximum(acc + bias_ref[...], 0.0).astype(o_ref.dtype)


def matmul_bias_relu(a, b, bias, *, out_dtype=jnp.bfloat16, tm=128, tn_max=512):
    """relu(a @ b + bias).  a:[M,K] b:[K,N] bias:[N] -> [M,N] in out_dtype.

    `a` is never padded in HBM: the last M block may be partial.  Pallas pads
    the *load* of that block (garbage rows feed the MXU) but clips the store,
    and output rows are independent, so garbage never reaches valid rows.
    Only the tiny weights/bias get padded so N is a multiple of 128
    (lane-dense stores).
    """
    M, K = a.shape
    K2, N = b.shape
    assert K == K2

    Np = _round_up(N, 128)
    if Np != N:
        b = jnp.pad(b, ((0, 0), (0, Np - N)))
        bias = jnp.pad(bias, (0, Np - N))

    tn = min(Np, tn_max)
    while Np % tn:
        tn -= 128
    tm = min(tm, _round_up(M, 16))

    a_bf = a.astype(jnp.bfloat16)
    b_bf = b.astype(jnp.bfloat16)
    bias2 = bias.astype(jnp.float32).reshape(1, Np)

    out = pl.pallas_call(
        _mm_bias_relu_kernel,
        out_shape=jax.ShapeDtypeStruct((M, Np), out_dtype),
        grid=(pl.cdiv(M, tm), Np // tn),
        in_specs=[
            pl.BlockSpec((tm, K), lambda i, j: (i, 0)),
            pl.BlockSpec((K, tn), lambda i, j: (0, j)),
            pl.BlockSpec((1, tn), lambda i, j: (0, j)),
        ],
        out_specs=pl.BlockSpec((tm, tn), lambda i, j: (i, j)),
        compiler_params=pltpu.CompilerParams(
            dimension_semantics=("parallel", "parallel")),
    )(a_bf, b_bf, bias2)
    return out if Np == N else out[:, :N]


# ---------------------------------------------------------------------------
# Kernel 2: fused chain of Fire modules on zero-padded flattened-NHWC
# activations.  One pallas_call per between-pool stage.
#
# Input xf is (N, P, Cin) with P = (H+2)*(W+2) and zero border rows.  For each
# fire, the squeeze output is staged in a halo-extended flat VMEM scratch so
# the 3x3 expand becomes ONE matmul on a lane-concatenated (P, 9*Sq) LHS.
# The activation between fires stays in VMEM (plain values); only the last
# fire's output is stored to HBM.
# ---------------------------------------------------------------------------
def _fire_stage_kernel(*args, num_fires, P, Wp, H, W, base):
    x_ref = args[0]
    fire_refs = args[1:1 + 6 * num_fires]
    o_ref = args[1 + 6 * num_fires]
    s_ext = args[2 + 6 * num_fires]

    # Interior-pixel mask from an in-kernel iota (no DMA'd mask input).
    # floor((r + 0.5) / Wp) is exact for the small row indices used here and
    # avoids integer div/mod in the kernel.
    rows = jax.lax.broadcasted_iota(jnp.int32, (P, 1), 0).astype(jnp.float32)
    y = jnp.floor((rows + 0.5) * (1.0 / Wp))
    xc = rows - y * Wp
    interior = (y >= 1.0) & (y <= float(H)) & (xc >= 1.0) & (xc <= float(W))

    # Zero only the HALO rows of the squeeze scratch (the interior rows are
    # fully overwritten by every fire before being read).  Unconditional so it
    # is correct when the "parallel" batch axis is split across TensorCores.
    ncols = s_ext.shape[1]
    tail = s_ext.shape[0] - (base + P)
    s_ext[:base, :] = jnp.zeros((base, ncols), s_ext.dtype)
    s_ext[base + P:, :] = jnp.zeros((tail, ncols), s_ext.dtype)

    x_val = x_ref[0]                                      # (P, Cin) bf16
    for f in range(num_fires):
        wsq, bsq, w1, b1, w3, b3 = fire_refs[6 * f:6 * f + 6]
        Sq = wsq.shape[1]

        # squeeze 1x1 + ReLU; border rows forced to exact zero (= conv zero pad)
        s = jnp.dot(x_val, wsq[...], preferred_element_type=jnp.float32)
        s = jnp.where(interior, jnp.maximum(s + bsq[...], 0.0), 0.0)
        s_bf = s.astype(jnp.bfloat16)
        s_ext[base:base + P, :Sq] = s_bf

        # expand 1x1
        e1 = jnp.dot(s_bf, w1[...], preferred_element_type=jnp.float32) + b1[...]

        # expand 3x3: lane-concatenate the 9 row-shifted taps into a (P, 9*Sq)
        # LHS and do a single matmul against the K-concatenated weights.
        taps = []
        for kh in range(3):
            for kw in range(3):
                if kh == 1 and kw == 1:
                    taps.append(s_bf)                      # centre tap, no shift
                else:
                    off = base + (kh - 1) * Wp + (kw - 1)
                    taps.append(s_ext[off:off + P, :Sq])
        s9 = jnp.concatenate(taps, axis=1)
        e3 = jnp.dot(s9, w3[...], preferred_element_type=jnp.float32) + b3[...]

        # fused ReLU + channel concat; border rows may be garbage but are
        # either re-masked by the next squeeze or dropped by from_padded_flat.
        x_val = jnp.maximum(jnp.concatenate([e1, e3], axis=-1), 0.0
                            ).astype(jnp.bfloat16)

    o_ref[0] = x_val


def fire_stage(xf, H, W, fire_params):
    """Run a chain of Fire modules on padded-flat activations in one pallas_call."""
    N, P, Cin0 = xf.shape
    Hp, Wp = H + 2, W + 2
    assert P == Hp * Wp

    base = _round_up(Wp + 1, 16)                    # sublane-aligned interior start
    scratch_rows = _round_up(base + P + Wp + 1, 16)

    flat_inputs = [xf.astype(jnp.bfloat16)]
    in_specs = [pl.BlockSpec((1, P, Cin0), lambda b: (b, 0, 0))]
    sq_max = 0
    cout = None
    cin = Cin0
    for fp in fire_params:
        wsq, bsq = fp["squeeze"]
        w1, b1 = fp["expand1x1"]
        w3, b3 = fp["expand3x3"]
        Sq, E1, E3 = wsq.shape[0], w1.shape[0], w3.shape[0]
        assert wsq.shape[1] == cin
        sq_max = max(sq_max, Sq)
        cout = E1 + E3

        wsq_m = wsq[:, :, 0, 0].T.astype(jnp.bfloat16)                       # (Cin, Sq)
        w1_m = w1[:, :, 0, 0].T.astype(jnp.bfloat16)                         # (Sq, E1)
        w3_m = (jnp.transpose(w3, (2, 3, 1, 0))                              # (3,3,Sq,E3)
                .reshape(9 * Sq, E3).astype(jnp.bfloat16))                   # tap-major K
        flat_inputs += [wsq_m, bsq.astype(jnp.float32).reshape(1, Sq),
                        w1_m, b1.astype(jnp.float32).reshape(1, E1),
                        w3_m, b3.astype(jnp.float32).reshape(1, E3)]
        in_specs += [
            pl.BlockSpec((cin, Sq), lambda b: (0, 0)),
            pl.BlockSpec((1, Sq), lambda b: (0, 0)),
            pl.BlockSpec((Sq, E1), lambda b: (0, 0)),
            pl.BlockSpec((1, E1), lambda b: (0, 0)),
            pl.BlockSpec((9 * Sq, E3), lambda b: (0, 0, )),
            pl.BlockSpec((1, E3), lambda b: (0, 0)),
        ]
        cin = cout

    kernel = partial(_fire_stage_kernel, num_fires=len(fire_params),
                     P=P, Wp=Wp, H=H, W=W, base=base)
    return pl.pallas_call(
        kernel,
        out_shape=jax.ShapeDtypeStruct((N, P, cout), jnp.bfloat16),
        grid=(N,),
        in_specs=in_specs,
        out_specs=pl.BlockSpec((1, P, cout), lambda b: (b, 0, 0)),
        scratch_shapes=[pltpu.VMEM((scratch_rows, sq_max), jnp.bfloat16)],
        compiler_params=pltpu.CompilerParams(
            dimension_semantics=("parallel",)),
    )(*flat_inputs)


# ---------------------------------------------------------------------------
# Stem conv (+ReLU) via im2col (glue) + Pallas matmul.
# ---------------------------------------------------------------------------
def conv2d_im2col_relu(x, w, b, *, stride=1, padding=0, out_dtype=jnp.bfloat16):
    # TODO(synk): at large resolutions, fuse the 7x7/stride-2 im2col into the
    # matmul kernel (halo BlockSpecs) to avoid the 49x patch expansion in HBM.
    N, H, W, Cin = x.shape
    Cout, Cin_w, kh, kw = w.shape
    assert Cin == Cin_w
    if padding > 0:
        x = jnp.pad(x, ((0, 0), (padding, padding), (padding, padding), (0, 0)))
    Hp, Wp = x.shape[1], x.shape[2]
    Ho = (Hp - kh) // stride + 1
    Wo = (Wp - kw) // stride + 1

    if kh == 1 and kw == 1 and stride == 1:
        patches = x.reshape(N * Ho * Wo, Cin)
    else:
        cols = []
        for dy in range(kh):
            for dx in range(kw):
                cols.append(x[:, dy:dy + Ho * stride:stride,
                              dx:dx + Wo * stride:stride, :])
        patches = jnp.stack(cols, axis=3).reshape(N * Ho * Wo, kh * kw * Cin)

    w_mat = jnp.transpose(w, (2, 3, 1, 0)).reshape(kh * kw * Cin, Cout)
    out = matmul_bias_relu(patches, w_mat, b, out_dtype=out_dtype)
    return out.reshape(N, Ho, Wo, Cout)


# ---------------------------------------------------------------------------
# MaxPool2d(kernel=3, stride=2, ceil_mode=True) and padded-flat layout glue.
# ---------------------------------------------------------------------------
def maxpool_ceil(x, k=3, s=2):
    # TODO(synk): fuse the pool + re-padding into the fire-stage kernel epilogue.
    N, H, W, C = x.shape
    Ho = -(-(H - k) // s) + 1
    Wo = -(-(W - k) // s) + 1
    ph = (Ho - 1) * s + k - H
    pw = (Wo - 1) * s + k - W
    return jax.lax.reduce_window(
        x, -jnp.inf, jax.lax.max,
        window_dimensions=(1, k, k, 1),
        window_strides=(1, s, s, 1),
        padding=((0, 0), (0, ph), (0, pw), (0, 0)))


def to_padded_flat(x):
    N, H, W, C = x.shape
    xp = jnp.pad(x, ((0, 0), (1, 1), (1, 1), (0, 0)))
    return xp.reshape(N, (H + 2) * (W + 2), C), H, W


def from_padded_flat(xf, H, W):
    N, P, C = xf.shape
    return xf.reshape(N, H + 2, W + 2, C)[:, 1:H + 1, 1:W + 1, :]


# ---------------------------------------------------------------------------
# Parameter init (deterministic, synthetic)
# ---------------------------------------------------------------------------
def _init_conv(key, cout, cin, kh, kw):
    k1, k2 = jax.random.split(key)
    fan_in = cin * kh * kw
    w = jax.random.normal(k1, (cout, cin, kh, kw), jnp.float32) / math.sqrt(fan_in)
    b = 0.01 * jax.random.normal(k2, (cout,), jnp.float32)
    return w, b


def init_params(key):
    fire_cfg = [
        (96, 16, 64, 64), (128, 16, 64, 64), (128, 32, 128, 128),
        (256, 32, 128, 128), (256, 48, 192, 192), (384, 48, 192, 192),
        (384, 64, 256, 256), (512, 64, 256, 256),
    ]
    keys = jax.random.split(key, 2 + 3 * len(fire_cfg))
    params = {}
    params["conv0"] = _init_conv(keys[0], 96, 3, 7, 7)
    params["cls"] = _init_conv(keys[1], NUM_CLASSES, 512, 1, 1)
    fires = []
    ki = 2
    for (cin, sq, e1, e3) in fire_cfg:
        fires.append({
            "squeeze": _init_conv(keys[ki], sq, cin, 1, 1),
            "expand1x1": _init_conv(keys[ki + 1], e1, sq, 1, 1),
            "expand3x3": _init_conv(keys[ki + 2], e3, sq, 3, 3),
        })
        ki += 3
    params["fires"] = fires
    return params


# ---------------------------------------------------------------------------
# Model forward
# ---------------------------------------------------------------------------
def squeezenet_forward(x_nchw, params):
    x = jnp.transpose(x_nchw, (0, 2, 3, 1)).astype(jnp.bfloat16)     # NCHW->NHWC
    x = conv2d_im2col_relu(x, *params["conv0"], stride=2)            # 7x7 s2 +ReLU
    x = maxpool_ceil(x)

    xf, H, W = to_padded_flat(x)
    xf = fire_stage(xf, H, W, params["fires"][0:3])                  # fires 0-2 fused
    x = maxpool_ceil(from_padded_flat(xf, H, W))

    xf, H, W = to_padded_flat(x)
    xf = fire_stage(xf, H, W, params["fires"][3:7])                  # fires 3-6 fused
    x = maxpool_ceil(from_padded_flat(xf, H, W))

    xf, H, W = to_padded_flat(x)
    xf = fire_stage(xf, H, W, params["fires"][7:8])                  # fire 7
    x = from_padded_flat(xf, H, W)

    # classifier: Dropout(p=0.0) is identity; 1x1 conv + ReLU + global avg pool
    N, H, W, C = x.shape
    wc, bc = params["cls"]
    logits = matmul_bias_relu(x.reshape(N * H * W, C), wc[:, :, 0, 0].T, bc,
                              out_dtype=jnp.float32)
    logits = logits.reshape(N, H, W, NUM_CLASSES)
    return jnp.mean(logits, axis=(1, 2))                             # (N, classes)


# ---------------------------------------------------------------------------
if __name__ == "__main__":
    key = jax.random.PRNGKey(0)
    k_in, k_par = jax.random.split(key)

    # Small input consistent with the module: batch=2, 3 channels, 32x32 spatial
    # (smallest spatial size that survives the stem conv + three ceil-mode pools).
    x = jax.random.normal(k_in, (2, 3, 32, 32), jnp.float32)
    params = init_params(k_par)

    fwd = jax.jit(squeezenet_forward)
    out = jax.block_until_ready(fwd(x, params))

    assert out.shape == (2, NUM_CLASSES), out.shape
    assert out.dtype == jnp.float32
    assert bool(jnp.all(jnp.isfinite(out)))
    print("KERNEL_OK")
</pallas_src>

<mosaic_0001>
module attributes {stable_mosaic.version = 11 : i64} {
  func.func @_mm_bias_relu_kernel(%arg0: i32, %arg1: i32, %arg2: memref<128x147xbf16, #tpu.memory_space<vmem>>, %arg3: memref<147x128xbf16, #tpu.memory_space<vmem>>, %arg4: memref<1x128xf32, #tpu.memory_space<vmem>>, %arg5: memref<128x128xbf16, #tpu.memory_space<vmem>>) attributes {dimension_semantics = [#tpu.dimension_semantics<parallel>, #tpu.dimension_semantics<parallel>], iteration_bounds = array<i64: 3, 1>, scalar_prefetch = 0 : i64, scratch_operands = 0 : i64, tpu.core_type = #tpu.core_type<tc>, window_params = [{transform_indices = @transform_0, window_bounds = array<i64: 128, 147>}, {transform_indices = @transform_1, window_bounds = array<i64: 147, 128>}, {transform_indices = @transform_2, window_bounds = array<i64: 1, 128>}, {transform_indices = @transform_3, window_bounds = array<i64: 128, 128>}]} {
    %c0 = arith.constant 0 : index
    %c0_0 = arith.constant 0 : index
    %0 = vector.load %arg2[%c0, %c0_0] : memref<128x147xbf16, #tpu.memory_space<vmem>>, vector<128x147xbf16>
    %c0_1 = arith.constant 0 : index
    %c0_2 = arith.constant 0 : index
    %1 = vector.load %arg3[%c0_1, %c0_2] : memref<147x128xbf16, #tpu.memory_space<vmem>>, vector<147x128xbf16>
    %cst = arith.constant dense<0.000000e+00> : vector<128x128xf32>
    %2 = tpu.matmul %0, %1, %cst {dimension_numbers = #tpu.dot_dimension_numbers<[1], [0], [0], [1], [0, 0, 1, 1], [], []>} : vector<128x147xbf16>, vector<147x128xbf16>, vector<128x128xf32> -> vector<128x128xf32>
    %c0_3 = arith.constant 0 : index
    %c0_4 = arith.constant 0 : index
    %3 = vector.load %arg4[%c0_3, %c0_4] : memref<1x128xf32, #tpu.memory_space<vmem>>, vector<1x128xf32>
    %4 = vector.broadcast %3 : vector<1x128xf32> to vector<128x128xf32>
    %5 = arith.addf %2, %4 : vector<128x128xf32>
    %cst_5 = arith.constant 0.000000e+00 : f32
    %6 = vector.broadcast %cst_5 : f32 to vector<128x128xf32>
    %7 = arith.maximumf %5, %6 : vector<128x128xf32>
    %8 = arith.truncf %7 : vector<128x128xf32> to vector<128x128xbf16>
    %c0_6 = arith.constant 0 : index
    %c0_7 = arith.constant 0 : index
    %9 = vector.load %arg5[%c0_6, %c0_7] : memref<128x128xbf16, #tpu.memory_space<vmem>>, vector<128x128xbf16>
    tpu.vector_store %arg5[%c0_6, %c0_7], %8 {strides = array<i32>} : memref<128x128xbf16, #tpu.memory_space<vmem>>, vector<128x128xbf16>,
    return
  }
  func.func @transform_0(%arg0: i32, %arg1: i32) -> (i32, i32) {
    %c0_i32 = arith.constant 0 : i32
    %c0_i32_0 = arith.constant 0 : i32
    return %arg0, %c0_i32 : i32, i32
  }
  func.func @transform_1(%arg0: i32, %arg1: i32) -> (i32, i32) {
    %c0_i32 = arith.constant 0 : i32
    %c0_i32_0 = arith.constant 0 : i32
    return %c0_i32, %arg1 : i32, i32
  }
  func.func @transform_2(%arg0: i32, %arg1: i32) -> (i32, i32) {
    %c0_i32 = arith.constant 0 : i32
    %c0_i32_0 = arith.constant 0 : i32
    return %c0_i32, %arg1 : i32, i32
  }
  func.func @transform_3(%arg0: i32, %arg1: i32) -> (i32, i32) {
    %c0_i32 = arith.constant 0 : i32
    return %arg0, %arg1 : i32, i32
  }
}

module attributes {stable_mosaic.version = 11 : i64} {
  func.func @_fire_stage_kernel(%arg0: i32, %arg1: memref<1x64x96xbf16, #tpu.memory_space<vmem>>, %arg2: memref<96x16xbf16, #tpu.memory_space<vmem>>, %arg3: memref<1x16xf32, #tpu.memory_space<vmem>>, %arg4: memref<16x64xbf16, #tpu.memory_space<vmem>>, %arg5: memref<1x64xf32, #tpu.memory_space<vmem>>, %arg6: memref<144x64xbf16, #tpu.memory_space<vmem>>, %arg7: memref<1x64xf32, #tpu.memory_space<vmem>>, %arg8: memref<128x16xbf16, #tpu.memory_space<vmem>>, %arg9: memref<1x16xf32, #tpu.memory_space<vmem>>, %arg10: memref<16x64xbf16, #tpu.memory_space<vmem>>, %arg11: memref<1x64xf32, #tpu.memory_space<vmem>>, %arg12: memref<144x64xbf16, #tpu.memory_space<vmem>>, %arg13: memref<1x64xf32, #tpu.memory_space<vmem>>, %arg14: memref<128x32xbf16, #tpu.memory_space<vmem>>, %arg15: memref<1x32xf32, #tpu.memory_space<vmem>>, %arg16: memref<32x128xbf16, #tpu.memory_space<vmem>>, %arg17: memref<1x128xf32, #tpu.memory_space<vmem>>, %arg18: memref<288x128xbf16, #tpu.memory_space<vmem>>, %arg19: memref<1x128xf32, #tpu.memory_space<vmem>>, %arg20: memref<1x64x256xbf16, #tpu.memory_space<vmem>>, %arg21: memref<96x32xbf16, #tpu.memory_space<vmem>>) attributes {dimension_semantics = [#tpu.dimension_semantics<parallel>], iteration_bounds = array<i64: 2>, scalar_prefetch = 0 : i64, scratch_operands = 1 : i64, tpu.core_type = #tpu.core_type<tc>, window_params = [{transform_indices = @transform_0, window_bounds = array<i64: 1, 64, 96>}, {pipeline_mode = #tpu.pipeline_mode<synchronous>, transform_indices = @transform_1, window_bounds = array<i64: 96, 16>}, {pipeline_mode = #tpu.pipeline_mode<synchronous>, transform_indices = @transform_2, window_bounds = array<i64: 1, 16>}, {pipeline_mode = #tpu.pipeline_mode<synchronous>, transform_indices = @transform_3, window_bounds = array<i64: 16, 64>}, {pipeline_mode = #tpu.pipeline_mode<synchronous>, transform_indices = @transform_4, window_bounds = array<i64: 1, 64>}, {pipeline_mode = #tpu.pipeline_mode<synchronous>, transform_indices = @transform_5, window_bounds = array<i64: 144, 64>}, {pipeline_mode = #tpu.pipeline_mode<synchronous>, transform_indices = @transform_6, window_bounds = array<i64: 1, 64>}, {pipeline_mode = #tpu.pipeline_mode<synchronous>, transform_indices = @transform_7, window_bounds = array<i64: 128, 16>}, {pipeline_mode = #tpu.pipeline_mode<synchronous>, transform_indices = @transform_8, window_bounds = array<i64: 1, 16>}, {pipeline_mode = #tpu.pipeline_mode<synchronous>, transform_indices = @transform_9, window_bounds = array<i64: 16, 64>}, {pipeline_mode = #tpu.pipeline_mode<synchronous>, transform_indices = @transform_10, window_bounds = array<i64: 1, 64>}, {pipeline_mode = #tpu.pipeline_mode<synchronous>, transform_indices = @transform_11, window_bounds = array<i64: 144, 64>}, {pipeline_mode = #tpu.pipeline_mode<synchronous>, transform_indices = @transform_12, window_bounds = array<i64: 1, 64>}, {pipeline_mode = #tpu.pipeline_mode<synchronous>, transform_indices = @transform_13, window_bounds = array<i64: 128, 32>}, {pipeline_mode = #tpu.pipeline_mode<synchronous>, transform_indices = @transform_14, window_bounds = array<i64: 1, 32>}, {pipeline_mode = #tpu.pipeline_mode<synchronous>, transform_indices = @transform_15, window_bounds = array<i64: 32, 128>}, {pipeline_mode = #tpu.pipeline_mode<synchronous>, transform_indices = @transform_16, window_bounds = array<i64: 1, 128>}, {pipeline_mode = #tpu.pipeline_mode<synchronous>, transform_indices = @transform_17, window_bounds = array<i64: 288, 128>}, {pipeline_mode = #tpu.pipeline_mode<synchronous>, transform_indices = @transform_18, window_bounds = array<i64: 1, 128>}, {transform_indices = @transform_19, window_bounds = array<i64: 1, 64, 256>}]} {
    %0 = tpu.iota {dimensions = array<i32: 0>} : vector<64x1xi32>
    %1 = arith.sitofp %0 : vector<64x1xi32> to vector<64x1xf32>
    %cst = arith.constant 5.000000e-01 : f32
    %2 = vector.broadcast %cst : f32 to vector<64x1xf32>
    %3 = arith.addf %1, %2 : vector<64x1xf32>
    %cst_0 = arith.constant 1.250000e-01 : f32
    %4 = vector.broadcast %cst_0 : f32 to vector<64x1xf32>
    %5 = arith.mulf %3, %4 : vector<64x1xf32>
    %6 = math.floor %5 : vector<64x1xf32>
    %cst_1 = arith.constant 8.000000e+00 : f32
    %7 = vector.broadcast %cst_1 : f32 to vector<64x1xf32>
    %8 = arith.mulf %6, %7 : vector<64x1xf32>
    %9 = arith.subf %1, %8 : vector<64x1xf32>
    %cst_2 = arith.constant 1.000000e+00 : f32
    %10 = vector.broadcast %cst_2 : f32 to vector<64x1xf32>
    %11 = arith.cmpf oge, %6, %10 : vector<64x1xf32>
    %cst_3 = arith.constant 6.000000e+00 : f32
    %12 = vector.broadcast %cst_3 : f32 to vector<64x1xf32>
    %13 = arith.cmpf ole, %6, %12 : vector<64x1xf32>
    %14 = arith.andi %11, %13 : vector<64x1xi1>
    %cst_4 = arith.constant 1.000000e+00 : f32
    %15 = vector.broadcast %cst_4 : f32 to vector<64x1xf32>
    %16 = arith.cmpf oge, %9, %15 : vector<64x1xf32>
    %17 = arith.andi %14, %16 : vector<64x1xi1>
    %cst_5 = arith.constant 6.000000e+00 : f32
    %18 = vector.broadcast %cst_5 : f32 to vector<64x1xf32>
    %19 = arith.cmpf ole, %9, %18 : vector<64x1xf32>
    %20 = arith.andi %17, %19 : vector<64x1xi1>
    %cst_6 = arith.constant 0.000000e+00 : bf16
    %21 = vector.broadcast %cst_6 : bf16 to vector<16x32xbf16>
    %c0 = arith.constant 0 : index
    %c0_7 = arith.constant 0 : index
    %22 = vector.load %arg21[%c0, %c0_7] : memref<96x32xbf16, #tpu.memory_space<vmem>>, vector<16x32xbf16>
    tpu.vector_store %arg21[%c0, %c0_7], %21 {strides = array<i32>} : memref<96x32xbf16, #tpu.memory_space<vmem>>, vector<16x32xbf16>,
    %cst_8 = arith.constant 0.000000e+00 : bf16
    %23 = vector.broadcast %cst_8 : bf16 to vector<16x32xbf16>
    %c80 = arith.constant 80 : index
    %c0_9 = arith.constant 0 : index
    %24 = vector.load %arg21[%c80, %c0_9] : memref<96x32xbf16, #tpu.memory_space<vmem>>, vector<16x32xbf16>
    tpu.vector_store %arg21[%c80, %c0_9], %23 {strides = array<i32>} : memref<96x32xbf16, #tpu.memory_space<vmem>>, vector<16x32xbf16>,
    %c0_10 = arith.constant 0 : index
    %c0_11 = arith.constant 0 : index
    %c0_12 = arith.constant 0 : index
    %25 = vector.load %arg1[%c0_10, %c0_11, %c0_12] : memref<1x64x96xbf16, #tpu.memory_space<vmem>>, vector<1x64x96xbf16>
    %26 = vector.shape_cast %25 : vector<1x64x96xbf16> to vector<64x96xbf16>
    %c0_13 = arith.constant 0 : index
    %c0_14 = arith.constant 0 : index
    %27 = vector.load %arg2[%c0_13, %c0_14] : memref<96x16xbf16, #tpu.memory_space<vmem>>, vector<96x16xbf16>
    %cst_15 = arith.constant dense<0.000000e+00> : vector<64x16xf32>
    %28 = tpu.matmul %26, %27, %cst_15 {dimension_numbers = #tpu.dot_dimension_numbers<[1], [0], [0], [1], [0, 0, 1, 1], [], []>} : vector<64x96xbf16>, vector<96x16xbf16>, vector<64x16xf32> -> vector<64x16xf32>
    %c0_16 = arith.constant 0 : index
    %c0_17 = arith.constant 0 : index
    %29 = vector.load %arg3[%c0_16, %c0_17] : memref<1x16xf32, #tpu.memory_space<vmem>>, vector<1x16xf32>
    %30 = vector.broadcast %29 : vector<1x16xf32> to vector<64x16xf32>
    %31 = arith.addf %28, %30 : vector<64x16xf32>
    %cst_18 = arith.constant 0.000000e+00 : f32
    %32 = vector.broadcast %cst_18 : f32 to vector<64x16xf32>
    %33 = arith.maximumf %31, %32 : vector<64x16xf32>
    %cst_19 = arith.constant 0.000000e+00 : f32
    %34 = vector.shape_cast %20 : vector<64x1xi1> to vector<64x1xi1>
    %35 = vector.broadcast %34 : vector<64x1xi1> to vector<64x16xi1>
    %36 = vector.broadcast %cst_19 : f32 to vector<64x16xf32>
    %37 = arith.select %35, %33, %36 : vector<64x16xi1>, vector<64x16xf32>
    %38 = arith.truncf %37 : vector<64x16xf32> to vector<64x16xbf16>
    %c16 = arith.constant 16 : index
    %c0_20 = arith.constant 0 : index
    %39 = vector.load %arg21[%c16, %c0_20] : memref<96x32xbf16, #tpu.memory_space<vmem>>, vector<64x16xbf16>
    tpu.vector_store %arg21[%c16, %c0_20], %38 {strides = array<i32>} : memref<96x32xbf16, #tpu.memory_space<vmem>>, vector<64x16xbf16>,
    %c0_21 = arith.constant 0 : index
    %c0_22 = arith.constant 0 : index
    %40 = vector.load %arg4[%c0_21, %c0_22] : memref<16x64xbf16, #tpu.memory_space<vmem>>, vector<16x64xbf16>
    %cst_23 = arith.constant dense<0.000000e+00> : vector<64x64xf32>
    %41 = tpu.matmul %38, %40, %cst_23 {dimension_numbers = #tpu.dot_dimension_numbers<[1], [0], [0], [1], [0, 0, 1, 1], [], []>} : vector<64x16xbf16>, vector<16x64xbf16>, vector<64x64xf32> -> vector<64x64xf32>
    %c0_24 = arith.constant 0 : index
    %c0_25 = arith.constant 0 : index
    %42 = vector.load %arg5[%c0_24, %c0_25] : memref<1x64xf32, #tpu.memory_space<vmem>>, vector<1x64xf32>
    %43 = vector.broadcast %42 : vector<1x64xf32> to vector<64x64xf32>
    %44 = arith.addf %41, %43 : vector<64x64xf32>
    %c7 = arith.constant 7 : index
    %c0_26 = arith.constant 0 : index
    %45 = vector.load %arg21[%c7, %c0_26] : memref<96x32xbf16, #tpu.memory_space<vmem>>, vector<64x16xbf16>
    %c8 = arith.constant 8 : index
    %c0_27 = arith.constant 0 : index
    %46 = vector.load %arg21[%c8, %c0_27] : memref<96x32xbf16, #tpu.memory_space<vmem>>, vector<64x16xbf16>
    %c9 = arith.constant 9 : index
    %c0_28 = arith.constant 0 : index
    %47 = vector.load %arg21[%c9, %c0_28] : memref<96x32xbf16, #tpu.memory_space<vmem>>, vector<64x16xbf16>
    %c15 = arith.constant 15 : index
    %c0_29 = arith.constant 0 : index
    %48 = vector.load %arg21[%c15, %c0_29] : memref<96x32xbf16, #tpu.memory_space<vmem>>, vector<64x16xbf16>
    %c17 = arith.constant 17 : index
    %c0_30 = arith.constant 0 : index
    %49 = vector.load %arg21[%c17, %c0_30] : memref<96x32xbf16, #tpu.memory_space<vmem>>, vector<64x16xbf16>
    %c23 = arith.constant 23 : index
    %c0_31 = arith.constant 0 : index
    %50 = vector.load %arg21[%c23, %c0_31] : memref<96x32xbf16, #tpu.memory_space<vmem>>, vector<64x16xbf16>
    %c24 = arith.constant 24 : index
    %c0_32 = arith.constant 0 : index
    %51 = vector.load %arg21[%c24, %c0_32] : memref<96x32xbf16, #tpu.memory_space<vmem>>, vector<64x16xbf16>
    %c25 = arith.constant 25 : index
    %c0_33 = arith.constant 0 : index
    %52 = vector.load %arg21[%c25, %c0_33] : memref<96x32xbf16, #tpu.memory_space<vmem>>, vector<64x16xbf16>
    %53 = tpu.concatenate %45, %46, %47, %48, %38, %49, %50, %51, %52 in 1 : vector<64x16xbf16>, vector<64x16xbf16>, vector<64x16xbf16>, vector<64x16xbf16>, vector<64x16xbf16>, vector<64x16xbf16>, vector<64x16xbf16>, vector<64x16xbf16>, vector<64x16xbf16> -> vector<64x144xbf16>
    %c0_34 = arith.constant 0 : index
    %c0_35 = arith.constant 0 : index
    %54 = vector.load %arg6[%c0_34, %c0_35] : memref<144x64xbf16, #tpu.memory_space<vmem>>, vector<144x64xbf16>
    %cst_36 = arith.constant dense<0.000000e+00> : vector<64x64xf32>
    %55 = tpu.matmul %53, %54, %cst_36 {dimension_numbers = #tpu.dot_dimension_numbers<[1], [0], [0], [1], [0, 0, 1, 1], [], []>} : vector<64x144xbf16>, vector<144x64xbf16>, vector<64x64xf32> -> vector<64x64xf32>
    %c0_37 = arith.constant 0 : index
    %c0_38 = arith.constant 0 : index
    %56 = vector.load %arg7[%c0_37, %c0_38] : memref<1x64xf32, #tpu.memory_space<vmem>>, vector<1x64xf32>
    %57 = vector.broadcast %56 : vector<1x64xf32> to vector<64x64xf32>
    %58 = arith.addf %55, %57 : vector<64x64xf32>
    %59 = tpu.concatenate %44, %58 in 1 : vector<64x64xf32>, vector<64x64xf32> -> vector<64x128xf32>
    %cst_39 = arith.constant 0.000000e+00 : f32
    %60 = vector.broadcast %cst_39 : f32 to vector<64x128xf32>
    %61 = arith.maximumf %59, %60 : vector<64x128xf32>
    %62 = arith.truncf %61 : vector<64x128xf32> to vector<64x128xbf16>
    %c0_40 = arith.constant 0 : index
    %c0_41 = arith.constant 0 : index
    %63 = vector.load %arg8[%c0_40, %c0_41] : memref<128x16xbf16, #tpu.memory_space<vmem>>, vector<128x16xbf16>
    %cst_42 = arith.constant dense<0.000000e+00> : vector<64x16xf32>
    %64 = tpu.matmul %62, %63, %cst_42 {dimension_numbers = #tpu.dot_dimension_numbers<[1], [0], [0], [1], [0, 0, 1, 1], [], []>} : vector<64x128xbf16>, vector<128x16xbf16>, vector<64x16xf32> -> vector<64x16xf32>
    %c0_43 = arith.constant 0 : index
    %c0_44 = arith.constant 0 : index
    %65 = vector.load %arg9[%c0_43, %c0_44] : memref<1x16xf32, #tpu.memory_space<vmem>>, vector<1x16xf32>
    %66 = vector.broadcast %65 : vector<1x16xf32> to vector<64x16xf32>
    %67 = arith.addf %64, %66 : vector<64x16xf32>
    %cst_45 = arith.constant 0.000000e+00 : f32
    %68 = vector.broadcast %cst_45 : f32 to vector<64x16xf32>
    %69 = arith.maximumf %67, %68 : vector<64x16xf32>
    %cst_46 = arith.constant 0.000000e+00 : f32
    %70 = vector.shape_cast %20 : vector<64x1xi1> to vector<64x1xi1>
    %71 = vector.broadcast %70 : vector<64x1xi1> to vector<64x16xi1>
    %72 = vector.broadcast %cst_46 : f32 to vector<64x16xf32>
    %73 = arith.select %71, %69, %72 : vector<64x16xi1>, vector<64x16xf32>
    %74 = arith.truncf %73 : vector<64x16xf32> to vector<64x16xbf16>
    %c16_47 = arith.constant 16 : index
    %c0_48 = arith.constant 0 : index
    %75 = vector.load %arg21[%c16_47, %c0_48] : memref<96x32xbf16, #tpu.memory_space<vmem>>, vector<64x16xbf16>
    tpu.vector_store %arg21[%c16_47, %c0_48], %74 {strides = array<i32>} : memref<96x32xbf16, #tpu.memory_space<vmem>>, vector<64x16xbf16>,
    %c0_49 = arith.constant 0 : index
    %c0_50 = arith.constant 0 : index
    %76 = vector.load %arg10[%c0_49, %c0_50] : memref<16x64xbf16, #tpu.memory_space<vmem>>, vector<16x64xbf16>
    %cst_51 = arith.constant dense<0.000000e+00> : vector<64x64xf32>
    %77 = tpu.matmul %74, %76, %cst_51 {dimension_numbers = #tpu.dot_dimension_numbers<[1], [0], [0], [1], [0, 0, 1, 1], [], []>} : vector<64x16xbf16>, vector<16x64xbf16>, vector<64x64xf32> -> vector<64x64xf32>
    %c0_52 = arith.constant 0 : index
    %c0_53 = arith.constant 0 : index
    %78 = vector.load %arg11[%c0_52, %c0_53] : memref<1x64xf32, #tpu.memory_space<vmem>>, vector<1x64xf32>
    %79 = vector.broadcast %78 : vector<1x64xf32> to vector<64x64xf32>
    %80 = arith.addf %77, %79 : vector<64x64xf32>
    %c7_54 = arith.constant 7 : index
    %c0_55 = arith.constant 0 : index
    %81 = vector.load %arg21[%c7_54, %c0_55] : memref<96x32xbf16, #tpu.memory_space<vmem>>, vector<64x16xbf16>
    %c8_56 = arith.constant 8 : index
    %c0_57 = arith.constant 0 : index
    %82 = vector.load %arg21[%c8_56, %c0_57] : memref<96x32xbf16, #tpu.memory_space<vmem>>, vector<64x16xbf16>
    %c9_58 = arith.constant 9 : index
    %c0_59 = arith.constant 0 : index
    %83 = vector.load %arg21[%c9_58, %c0_59] : memref<96x32xbf16, #tpu.memory_space<vmem>>, vector<64x16xbf16>
    %c15_60 = arith.constant 15 : index
    %c0_61 = arith.constant 0 : index
    %84 = vector.load %arg21[%c15_60, %c0_61] : memref<96x32xbf16, #tpu.memory_space<vmem>>, vector<64x16xbf16>
    %c17_62 = arith.constant 17 : index
    %c0_63 = arith.constant 0 : index
    %85 = vector.load %arg21[%c17_62, %c0_63] : memref<96x32xbf16, #tpu.memory_space<vmem>>, vector<64x16xbf16>
    %c23_64 = arith.constant 23 : index
    %c0_65 = arith.constant 0 : index
    %86 = vector.load %arg21[%c23_64, %c0_65] : memref<96x32xbf16, #tpu.memory_space<vmem>>, vector<64x16xbf16>
    %c24_66 = arith.constant 24 : index
    %c0_67 = arith.constant 0 : index
    %87 = vector.load %arg21[%c24_66, %c0_67] : memref<96x32xbf16, #tpu.memory_space<vmem>>, vector<64x16xbf16>
    %c25_68 = arith.constant 25 : index
    %c0_69 = arith.constant 0 : index
    %88 = vector.load %arg21[%c25_68, %c0_69] : memref<96x32xbf16, #tpu.memory_space<vmem>>, vector<64x16xbf16>
    %89 = tpu.concatenate %81, %82, %83, %84, %74, %85, %86, %87, %88 in 1 : vector<64x16xbf16>, vector<64x16xbf16>, vector<64x16xbf16>, vector<64x16xbf16>, vector<64x16xbf16>, vector<64x16xbf16>, vector<64x16xbf16>, vector<64x16xbf16>, vector<64x16xbf16> -> vector<64x144xbf16>
    %c0_70 = arith.constant 0 : index
    %c0_71 = arith.constant 0 : index
    %90 = vector.load %arg12[%c0_70, %c0_71] : memref<144x64xbf16, #tpu.memory_space<vmem>>, vector<144x64xbf16>
    %cst_72 = arith.constant dense<0.000000e+00> : vector<64x64xf32>
    %91 = tpu.matmul %89, %90, %cst_72 {dimension_numbers = #tpu.dot_dimension_numbers<[1], [0], [0], [1], [0, 0, 1, 1], [], []>} : vector<64x144xbf16>, vector<144x64xbf16>, vector<64x64xf32> -> vector<64x64xf32>
    %c0_73 = arith.constant 0 : index
    %c0_74 = arith.constant 0 : index
    %92 = vector.load %arg13[%c0_73, %c0_74] : memref<1x64xf32, #tpu.memory_space<vmem>>, vector<1x64xf32>
    %93 = vector.broadcast %92 : vector<1x64xf32> to vector<64x64xf32>
    %94 = arith.addf %91, %93 : vector<64x64xf32>
    %95 = tpu.concatenate %80, %94 in 1 : vector<64x64xf32>, vector<64x64xf32> -> vector<64x128xf32>
    %cst_75 = arith.constant 0.000000e+00 : f32
    %96 = vector.broadcast %cst_75 : f32 to vector<64x128xf32>
    %97 = arith.maximumf %95, %96 : vector<64x128xf32>
    %98 = arith.truncf %97 : vector<64x128xf32> to vector<64x128xbf16>
    %c0_76 = arith.constant 0 : index
    %c0_77 = arith.constant 0 : index
    %99 = vector.load %arg14[%c0_76, %c0_77] : memref<128x32xbf16, #tpu.memory_space<vmem>>, vector<128x32xbf16>
    %cst_78 = arith.constant dense<0.000000e+00> : vector<64x32xf32>
    %100 = tpu.matmul %98, %99, %cst_78 {dimension_numbers = #tpu.dot_dimension_numbers<[1], [0], [0], [1], [0, 0, 1, 1], [], []>} : vector<64x128xbf16>, vector<128x32xbf16>, vector<64x32xf32> -> vector<64x32xf32>
    %c0_79 = arith.constant 0 : index
    %c0_80 = arith.constant 0 : index
    %101 = vector.load %arg15[%c0_79, %c0_80] : memref<1x32xf32, #tpu.memory_space<vmem>>, vector<1x32xf32>
    %102 = vector.broadcast %101 : vector<1x32xf32> to vector<64x32xf32>
    %103 = arith.addf %100, %102 : vector<64x32xf32>
    %cst_81 = arith.constant 0.000000e+00 : f32
    %104 = vector.broadcast %cst_81 : f32 to vector<64x32xf32>
    %105 = arith.maximumf %103, %104 : vector<64x32xf32>
    %cst_82 = arith.constant 0.000000e+00 : f32
    %106 = vector.shape_cast %20 : vector<64x1xi1> to vector<64x1xi1>
    %107 = vector.broadcast %106 : vector<64x1xi1> to vector<64x32xi1>
    %108 = vector.broadcast %cst_82 : f32 to vector<64x32xf32>
    %109 = arith.select %107, %105, %108 : vector<64x32xi1>, vector<64x32xf32>
    %110 = arith.truncf %109 : vector<64x32xf32> to vector<64x32xbf16>
    %c16_83 = arith.constant 16 : index
    %c0_84 = arith.constant 0 : index
    %111 = vector.load %arg21[%c16_83, %c0_84] : memref<96x32xbf16, #tpu.memory_space<vmem>>, vector<64x32xbf16>
    tpu.vector_store %arg21[%c16_83, %c0_84], %110 {strides = array<i32>} : memref<96x32xbf16, #tpu.memory_space<vmem>>, vector<64x32xbf16>,
    %c0_85 = arith.constant 0 : index
    %c0_86 = arith.constant 0 : index
    %112 = vector.load %arg16[%c0_85, %c0_86] : memref<32x128xbf16, #tpu.memory_space<vmem>>, vector<32x128xbf16>
    %cst_87 = arith.constant dense<0.000000e+00> : vector<64x128xf32>
    %113 = tpu.matmul %110, %112, %cst_87 {dimension_numbers = #tpu.dot_dimension_numbers<[1], [0], [0], [1], [0, 0, 1, 1], [], []>} : vector<64x32xbf16>, vector<32x128xbf16>, vector<64x128xf32> -> vector<64x128xf32>
    %c0_88 = arith.constant 0 : index
    %c0_89 = arith.constant 0 : index
    %114 = vector.load %arg17[%c0_88, %c0_89] : memref<1x128xf32, #tpu.memory_space<vmem>>, vector<1x128xf32>
    %115 = vector.broadcast %114 : vector<1x128xf32> to vector<64x128xf32>
    %116 = arith.addf %113, %115 : vector<64x128xf32>
    %c7_90 = arith.constant 7 : index
    %c0_91 = arith.constant 0 : index
    %117 = vector.load %arg21[%c7_90, %c0_91] : memref<96x32xbf16, #tpu.memory_space<vmem>>, vector<64x32xbf16>
    %c8_92 = arith.constant 8 : index
    %c0_93 = arith.constant 0 : index
    %118 = vector.load %arg21[%c8_92, %c0_93] : memref<96x32xbf16, #tpu.memory_space<vmem>>, vector<64x32xbf16>
    %c9_94 = arith.constant 9 : index
    %c0_95 = arith.constant 0 : index
    %119 = vector.load %arg21[%c9_94, %c0_95] : memref<96x32xbf16, #tpu.memory_space<vmem>>, vector<64x32xbf16>
    %c15_96 = arith.constant 15 : index
    %c0_97 = arith.constant 0 : index
    %120 = vector.load %arg21[%c15_96, %c0_97] : memref<96x32xbf16, #tpu.memory_space<vmem>>, vector<64x32xbf16>
    %c17_98 = arith.constant 17 : index
    %c0_99 = arith.constant 0 : index
    %121 = vector.load %arg21[%c17_98, %c0_99] : memref<96x32xbf16, #tpu.memory_space<vmem>>, vector<64x32xbf16>
    %c23_100 = arith.constant 23 : index
    %c0_101 = arith.constant 0 : index
    %122 = vector.load %arg21[%c23_100, %c0_101] : memref<96x32xbf16, #tpu.memory_space<vmem>>, vector<64x32xbf16>
    %c24_102 = arith.constant 24 : index
    %c0_103 = arith.constant 0 : index
    %123 = vector.load %arg21[%c24_102, %c0_103] : memref<96x32xbf16, #tpu.memory_space<vmem>>, vector<64x32xbf16>
    %c25_104 = arith.constant 25 : index
    %c0_105 = arith.constant 0 : index
    %124 = vector.load %arg21[%c25_104, %c0_105] : memref<96x32xbf16, #tpu.memory_space<vmem>>, vector<64x32xbf16>
    %125 = tpu.concatenate %117, %118, %119, %120, %110, %121, %122, %123, %124 in 1 : vector<64x32xbf16>, vector<64x32xbf16>, vector<64x32xbf16>, vector<64x32xbf16>, vector<64x32xbf16>, vector<64x32xbf16>, vector<64x32xbf16>, vector<64x32xbf16>, vector<64x32xbf16> -> vector<64x288xbf16>
    %c0_106 = arith.constant 0 : index
    %c0_107 = arith.constant 0 : index
    %126 = vector.load %arg18[%c0_106, %c0_107] : memref<288x128xbf16, #tpu.memory_space<vmem>>, vector<288x128xbf16>
    %cst_108 = arith.constant dense<0.000000e+00> : vector<64x128xf32>
    %127 = tpu.matmul %125, %126, %cst_108 {dimension_numbers = #tpu.dot_dimension_numbers<[1], [0], [0], [1], [0, 0, 1, 1], [], []>} : vector<64x288xbf16>, vector<288x128xbf16>, vector<64x128xf32> -> vector<64x128xf32>
    %c0_109 = arith.constant 0 : index
    %c0_110 = arith.constant 0 : index
    %128 = vector.load %arg19[%c0_109, %c0_110] : memref<1x128xf32, #tpu.memory_space<vmem>>, vector<1x128xf32>
    %129 = vector.broadcast %128 : vector<1x128xf32> to vector<64x128xf32>
    %130 = arith.addf %127, %129 : vector<64x128xf32>
    %131 = tpu.concatenate %116, %130 in 1 : vector<64x128xf32>, vector<64x128xf32> -> vector<64x256xf32>
    %cst_111 = arith.constant 0.000000e+00 : f32
    %132 = vector.broadcast %cst_111 : f32 to vector<64x256xf32>
    %133 = arith.maximumf %131, %132 : vector<64x256xf32>
    %134 = arith.truncf %133 : vector<64x256xf32> to vector<64x256xbf16>
    %c0_112 = arith.constant 0 : index
    %c0_113 = arith.constant 0 : index
    %c0_114 = arith.constant 0 : index
    %135 = vector.load %arg20[%c0_112, %c0_113, %c0_114] : memref<1x64x256xbf16, #tpu.memory_space<vmem>>, vector<1x64x256xbf16>
    %136 = vector.shape_cast %135 : vector<1x64x256xbf16> to vector<64x256xbf16>
    %137 = vector.shape_cast %134 : vector<64x256xbf16> to vector<1x64x256xbf16>
    tpu.vector_store %arg20[%c0_112, %c0_113, %c0_114], %137 {strides = array<i32>} : memref<1x64x256xbf16, #tpu.memory_space<vmem>>, vector<1x64x256xbf16>,
    return
  }
  func.func @transform_0(%arg0: i32) -> (i32, i32, i32) {
    %c0_i32 = arith.constant 0 : i32
    %c0_i32_0 = arith.constant 0 : i32
    %c0_i32_1 = arith.constant 0 : i32
    return %arg0, %c0_i32, %c0_i32_0 : i32, i32, i32
  }
  func.func @transform_1(%arg0: i32) -> (i32, i32) {
    %c0_i32 = arith.constant 0 : i32
    %c0_i32_0 = arith.constant 0 : i32
    %c0_i32_1 = arith.constant 0 : i32
    return %c0_i32, %c0_i32_0 : i32, i32
  }
  func.func @transform_2(%arg0: i32) -> (i32, i32) {
    %c0_i32 = arith.constant 0 : i32
    %c0_i32_0 = arith.constant 0 : i32
    %c0_i32_1 = arith.constant 0 : i32
    return %c0_i32, %c0_i32_0 : i32, i32
  }
  func.func @transform_3(%arg0: i32) -> (i32, i32) {
    %c0_i32 = arith.constant 0 : i32
    %c0_i32_0 = arith.constant 0 : i32
    %c0_i32_1 = arith.constant 0 : i32
    return %c0_i32, %c0_i32_0 : i32, i32
  }
  func.func @transform_4(%arg0: i32) -> (i32, i32) {
    %c0_i32 = arith.constant 0 : i32
    %c0_i32_0 = arith.constant 0 : i32
    %c0_i32_1 = arith.constant 0 : i32
    return %c0_i32, %c0_i32_0 : i32, i32
  }
  func.func @transform_5(%arg0: i32) -> (i32, i32) {
    %c0_i32 = arith.constant 0 : i32
    %c0_i32_0 = arith.constant 0 : i32
    %c0_i32_1 = arith.constant 0 : i32
    return %c0_i32, %c0_i32_0 : i32, i32
  }
  func.func @transform_6(%arg0: i32) -> (i32, i32) {
    %c0_i32 = arith.constant 0 : i32
    %c0_i32_0 = arith.constant 0 : i32
    %c0_i32_1 = arith.constant 0 : i32
    return %c0_i32, %c0_i32_0 : i32, i32
  }
  func.func @transform_7(%arg0: i32) -> (i32, i32) {
    %c0_i32 = arith.constant 0 : i32
    %c0_i32_0 = arith.constant 0 : i32
    %c0_i32_1 = arith.constant 0 : i32
    return %c0_i32, %c0_i32_0 : i32, i32
  }
  func.func @transform_8(%arg0: i32) -> (i32, i32) {
    %c0_i32 = arith.constant 0 : i32
    %c0_i32_0 = arith.constant 0 : i32
    %c0_i32_1 = arith.constant 0 : i32
    return %c0_i32, %c0_i32_0 : i32, i32
  }
  func.func @transform_9(%arg0: i32) -> (i32, i32) {
    %c0_i32 = arith.constant 0 : i32
    %c0_i32_0 = arith.constant 0 : i32
    %c0_i32_1 = arith.constant 0 : i32
    return %c0_i32, %c0_i32_0 : i32, i32
  }
  func.func @transform_10(%arg0: i32) -> (i32, i32) {
    %c0_i32 = arith.constant 0 : i32
    %c0_i32_0 = arith.constant 0 : i32
    %c0_i32_1 = arith.constant 0 : i32
    return %c0_i32, %c0_i32_0 : i32, i32
  }
  func.func @transform_11(%arg0: i32) -> (i32, i32) {
    %c0_i32 = arith.constant 0 : i32
    %c0_i32_0 = arith.constant 0 : i32
    %c0_i32_1 = arith.constant 0 : i32
    return %c0_i32, %c0_i32_0 : i32, i32
  }
  func.func @transform_12(%arg0: i32) -> (i32, i32) {
    %c0_i32 = arith.constant 0 : i32
    %c0_i32_0 = arith.constant 0 : i32
    %c0_i32_1 = arith.constant 0 : i32
    return %c0_i32, %c0_i32_0 : i32, i32
  }
  func.func @transform_13(%arg0: i32) -> (i32, i32) {
    %c0_i32 = arith.constant 0 : i32
    %c0_i32_0 = arith.constant 0 : i32
    %c0_i32_1 = arith.constant 0 : i32
    return %c0_i32, %c0_i32_0 : i32, i32
  }
  func.func @transform_14(%arg0: i32) -> (i32, i32) {
    %c0_i32 = arith.constant 0 : i32
    %c0_i32_0 = arith.constant 0 : i32
    %c0_i32_1 = arith.constant 0 : i32
    return %c0_i32, %c0_i32_0 : i32, i32
  }
  func.func @transform_15(%arg0: i32) -> (i32, i32) {
    %c0_i32 = arith.constant 0 : i32
    %c0_i32_0 = arith.constant 0 : i32
    %c0_i32_1 = arith.constant 0 : i32
    return %c0_i32, %c0_i32_0 : i32, i32
  }
  func.func @transform_16(%arg0: i32) -> (i32, i32) {
    %c0_i32 = arith.constant 0 : i32
    %c0_i32_0 = arith.constant 0 : i32
    %c0_i32_1 = arith.constant 0 : i32
    return %c0_i32, %c0_i32_0 : i32, i32
  }
  func.func @transform_17(%arg0: i32) -> (i32, i32) {
    %c0_i32 = arith.constant 0 : i32
    %c0_i32_0 = arith.constant 0 : i32
    %c0_i32_1 = arith.constant 0 : i32
    return %c0_i32, %c0_i32_0 : i32, i32
  }
  func.func @transform_18(%arg0: i32) -> (i32, i32) {
    %c0_i32 = arith.constant 0 : i32
    %c0_i32_0 = arith.constant 0 : i32
    %c0_i32_1 = arith.constant 0 : i32
    return %c0_i32, %c0_i32_0 : i32, i32
  }
  func.func @transform_19(%arg0: i32) -> (i32, i32, i32) {
    %c0_i32 = arith.constant 0 : i32
    %c0_i32_0 = arith.constant 0 : i32
    %c0_i32_1 = arith.constant 0 : i32
    return %arg0, %c0_i32, %c0_i32_0 : i32, i32, i32
  }
}

module attributes {stable_mosaic.version = 11 : i64} {
  func.func @_fire_stage_kernel(%arg0: i32, %arg1: memref<1x25x256xbf16, #tpu.memory_space<vmem>>, %arg2: memref<256x32xbf16, #tpu.memory_space<vmem>>, %arg3: memref<1x32xf32, #tpu.memory_space<vmem>>, %arg4: memref<32x128xbf16, #tpu.memory_space<vmem>>, %arg5: memref<1x128xf32, #tpu.memory_space<vmem>>, %arg6: memref<288x128xbf16, #tpu.memory_space<vmem>>, %arg7: memref<1x128xf32, #tpu.memory_space<vmem>>, %arg8: memref<256x48xbf16, #tpu.memory_space<vmem>>, %arg9: memref<1x48xf32, #tpu.memory_space<vmem>>, %arg10: memref<48x192xbf16, #tpu.memory_space<vmem>>, %arg11: memref<1x192xf32, #tpu.memory_space<vmem>>, %arg12: memref<432x192xbf16, #tpu.memory_space<vmem>>, %arg13: memref<1x192xf32, #tpu.memory_space<vmem>>, %arg14: memref<384x48xbf16, #tpu.memory_space<vmem>>, %arg15: memref<1x48xf32, #tpu.memory_space<vmem>>, %arg16: memref<48x192xbf16, #tpu.memory_space<vmem>>, %arg17: memref<1x192xf32, #tpu.memory_space<vmem>>, %arg18: memref<432x192xbf16, #tpu.memory_space<vmem>>, %arg19: memref<1x192xf32, #tpu.memory_space<vmem>>, %arg20: memref<384x64xbf16, #tpu.memory_space<vmem>>, %arg21: memref<1x64xf32, #tpu.memory_space<vmem>>, %arg22: memref<64x256xbf16, #tpu.memory_space<vmem>>, %arg23: memref<1x256xf32, #tpu.memory_space<vmem>>, %arg24: memref<576x256xbf16, #tpu.memory_space<vmem>>, %arg25: memref<1x256xf32, #tpu.memory_space<vmem>>, %arg26: memref<1x25x512xbf16, #tpu.memory_space<vmem>>, %arg27: memref<48x64xbf16, #tpu.memory_space<vmem>>) attributes {dimension_semantics = [#tpu.dimension_semantics<parallel>], iteration_bounds = array<i64: 2>, scalar_prefetch = 0 : i64, scratch_operands = 1 : i64, tpu.core_type = #tpu.core_type<tc>, window_params = [{transform_indices = @transform_0, window_bounds = array<i64: 1, 25, 256>}, {pipeline_mode = #tpu.pipeline_mode<synchronous>, transform_indices = @transform_1, window_bounds = array<i64: 256, 32>}, {pipeline_mode = #tpu.pipeline_mode<synchronous>, transform_indices = @transform_2, window_bounds = array<i64: 1, 32>}, {pipeline_mode = #tpu.pipeline_mode<synchronous>, transform_indices = @transform_3, window_bounds = array<i64: 32, 128>}, {pipeline_mode = #tpu.pipeline_mode<synchronous>, transform_indices = @transform_4, window_bounds = array<i64: 1, 128>}, {pipeline_mode = #tpu.pipeline_mode<synchronous>, transform_indices = @transform_5, window_bounds = array<i64: 288, 128>}, {pipeline_mode = #tpu.pipeline_mode<synchronous>, transform_indices = @transform_6, window_bounds = array<i64: 1, 128>}, {pipeline_mode = #tpu.pipeline_mode<synchronous>, transform_indices = @transform_7, window_bounds = array<i64: 256, 48>}, {pipeline_mode = #tpu.pipeline_mode<synchronous>, transform_indices = @transform_8, window_bounds = array<i64: 1, 48>}, {pipeline_mode = #tpu.pipeline_mode<synchronous>, transform_indices = @transform_9, window_bounds = array<i64: 48, 192>}, {pipeline_mode = #tpu.pipeline_mode<synchronous>, transform_indices = @transform_10, window_bounds = array<i64: 1, 192>}, {pipeline_mode = #tpu.pipeline_mode<synchronous>, transform_indices = @transform_11, window_bounds = array<i64: 432, 192>}, {pipeline_mode = #tpu.pipeline_mode<synchronous>, transform_indices = @transform_12, window_bounds = array<i64: 1, 192>}, {pipeline_mode = #tpu.pipeline_mode<synchronous>, transform_indices = @transform_13, window_bounds = array<i64: 384, 48>}, {pipeline_mode = #tpu.pipeline_mode<synchronous>, transform_indices = @transform_14, window_bounds = array<i64: 1, 48>}, {pipeline_mode = #tpu.pipeline_mode<synchronous>, transform_indices = @transform_15, window_bounds = array<i64: 48, 192>}, {pipeline_mode = #tpu.pipeline_mode<synchronous>, transform_indices = @transform_16, window_bounds = array<i64: 1, 192>}, {pipeline_mode = #tpu.pipeline_mode<synchronous>, transform_indices = @transform_17, window_bounds = array<i64: 432, 192>}, {pipeline_mode = #tpu.pipeline_mode<synchronous>, transform_indices = @transform_18, window_bounds = array<i64: 1, 192>}, {pipeline_mode = #tpu.pipeline_mode<synchronous>, transform_indices = @transform_19, window_bounds = array<i64: 384, 64>}, {pipeline_mode = #tpu.pipeline_mode<synchronous>, transform_indices = @transform_20, window_bounds = array<i64: 1, 64>}, {pipeline_mode = #tpu.pipeline_mode<synchronous>, transform_indices = @transform_21, window_bounds = array<i64: 64, 256>}, {pipeline_mode = #tpu.pipeline_mode<synchronous>, transform_indices = @transform_22, window_bounds = array<i64: 1, 256>}, {pipeline_mode = #tpu.pipeline_mode<synchronous>, transform_indices = @transform_23, window_bounds = array<i64: 576, 256>}, {pipeline_mode = #tpu.pipeline_mode<synchronous>, transform_indices = @transform_24, window_bounds = array<i64: 1, 256>}, {transform_indices = @transform_25, window_bounds = array<i64: 1, 25, 512>}]} {
    %0 = tpu.iota {dimensions = array<i32: 0>} : vector<25x1xi32>
    %1 = arith.sitofp %0 : vector<25x1xi32> to vector<25x1xf32>
    %cst = arith.constant 5.000000e-01 : f32
    %2 = vector.broadcast %cst : f32 to vector<25x1xf32>
    %3 = arith.addf %1, %2 : vector<25x1xf32>
    %cst_0 = arith.constant 2.000000e-01 : f32
    %4 = vector.broadcast %cst_0 : f32 to vector<25x1xf32>
    %5 = arith.mulf %3, %4 : vector<25x1xf32>
    %6 = math.floor %5 : vector<25x1xf32>
    %cst_1 = arith.constant 5.000000e+00 : f32
    %7 = vector.broadcast %cst_1 : f32 to vector<25x1xf32>
    %8 = arith.mulf %6, %7 : vector<25x1xf32>
    %9 = arith.subf %1, %8 : vector<25x1xf32>
    %cst_2 = arith.constant 1.000000e+00 : f32
    %10 = vector.broadcast %cst_2 : f32 to vector<25x1xf32>
    %11 = arith.cmpf oge, %6, %10 : vector<25x1xf32>
    %cst_3 = arith.constant 3.000000e+00 : f32
    %12 = vector.broadcast %cst_3 : f32 to vector<25x1xf32>
    %13 = arith.cmpf ole, %6, %12 : vector<25x1xf32>
    %14 = arith.andi %11, %13 : vector<25x1xi1>
    %cst_4 = arith.constant 1.000000e+00 : f32
    %15 = vector.broadcast %cst_4 : f32 to vector<25x1xf32>
    %16 = arith.cmpf oge, %9, %15 : vector<25x1xf32>
    %17 = arith.andi %14, %16 : vector<25x1xi1>
    %cst_5 = arith.constant 3.000000e+00 : f32
    %18 = vector.broadcast %cst_5 : f32 to vector<25x1xf32>
    %19 = arith.cmpf ole, %9, %18 : vector<25x1xf32>
    %20 = arith.andi %17, %19 : vector<25x1xi1>
    %cst_6 = arith.constant 0.000000e+00 : bf16
    %21 = vector.broadcast %cst_6 : bf16 to vector<16x64xbf16>
    %c0 = arith.constant 0 : index
    %c0_7 = arith.constant 0 : index
    %22 = vector.load %arg27[%c0, %c0_7] : memref<48x64xbf16, #tpu.memory_space<vmem>>, vector<16x64xbf16>
    tpu.vector_store %arg27[%c0, %c0_7], %21 {strides = array<i32>} : memref<48x64xbf16, #tpu.memory_space<vmem>>, vector<16x64xbf16>,
    %cst_8 = arith.constant 0.000000e+00 : bf16
    %23 = vector.broadcast %cst_8 : bf16 to vector<7x64xbf16>
    %c41 = arith.constant 41 : index
    %c0_9 = arith.constant 0 : index
    %24 = vector.load %arg27[%c41, %c0_9] : memref<48x64xbf16, #tpu.memory_space<vmem>>, vector<7x64xbf16>
    tpu.vector_store %arg27[%c41, %c0_9], %23 {strides = array<i32>} : memref<48x64xbf16, #tpu.memory_space<vmem>>, vector<7x64xbf16>,
    %c0_10 = arith.constant 0 : index
    %c0_11 = arith.constant 0 : index
    %c0_12 = arith.constant 0 : index
    %25 = vector.load %arg1[%c0_10, %c0_11, %c0_12] : memref<1x25x256xbf16, #tpu.memory_space<vmem>>, vector<1x25x256xbf16>
    %26 = vector.shape_cast %25 : vector<1x25x256xbf16> to vector<25x256xbf16>
    %c0_13 = arith.constant 0 : index
    %c0_14 = arith.constant 0 : index
    %27 = vector.load %arg2[%c0_13, %c0_14] : memref<256x32xbf16, #tpu.memory_space<vmem>>, vector<256x32xbf16>
    %cst_15 = arith.constant dense<0.000000e+00> : vector<25x32xf32>
    %28 = tpu.matmul %26, %27, %cst_15 {dimension_numbers = #tpu.dot_dimension_numbers<[1], [0], [0], [1], [0, 0, 1, 1], [], []>} : vector<25x256xbf16>, vector<256x32xbf16>, vector<25x32xf32> -> vector<25x32xf32>
    %c0_16 = arith.constant 0 : index
    %c0_17 = arith.constant 0 : index
    %29 = vector.load %arg3[%c0_16, %c0_17] : memref<1x32xf32, #tpu.memory_space<vmem>>, vector<1x32xf32>
    %30 = vector.broadcast %29 : vector<1x32xf32> to vector<25x32xf32>
    %31 = arith.addf %28, %30 : vector<25x32xf32>
    %cst_18 = arith.constant 0.000000e+00 : f32
    %32 = vector.broadcast %cst_18 : f32 to vector<25x32xf32>
    %33 = arith.maximumf %31, %32 : vector<25x32xf32>
    %cst_19 = arith.constant 0.000000e+00 : f32
    %34 = vector.shape_cast %20 : vector<25x1xi1> to vector<25x1xi1>
    %35 = vector.broadcast %34 : vector<25x1xi1> to vector<25x32xi1>
    %36 = vector.broadcast %cst_19 : f32 to vector<25x32xf32>
    %37 = arith.select %35, %33, %36 : vector<25x32xi1>, vector<25x32xf32>
    %38 = arith.truncf %37 : vector<25x32xf32> to vector<25x32xbf16>
    %c16 = arith.constant 16 : index
    %c0_20 = arith.constant 0 : index
    %39 = vector.load %arg27[%c16, %c0_20] : memref<48x64xbf16, #tpu.memory_space<vmem>>, vector<25x32xbf16>
    tpu.vector_store %arg27[%c16, %c0_20], %38 {strides = array<i32>} : memref<48x64xbf16, #tpu.memory_space<vmem>>, vector<25x32xbf16>,
    %c0_21 = arith.constant 0 : index
    %c0_22 = arith.constant 0 : index
    %40 = vector.load %arg4[%c0_21, %c0_22] : memref<32x128xbf16, #tpu.memory_space<vmem>>, vector<32x128xbf16>
    %cst_23 = arith.constant dense<0.000000e+00> : vector<25x128xf32>
    %41 = tpu.matmul %38, %40, %cst_23 {dimension_numbers = #tpu.dot_dimension_numbers<[1], [0], [0], [1], [0, 0, 1, 1], [], []>} : vector<25x32xbf16>, vector<32x128xbf16>, vector<25x128xf32> -> vector<25x128xf32>
    %c0_24 = arith.constant 0 : index
    %c0_25 = arith.constant 0 : index
    %42 = vector.load %arg5[%c0_24, %c0_25] : memref<1x128xf32, #tpu.memory_space<vmem>>, vector<1x128xf32>
    %43 = vector.broadcast %42 : vector<1x128xf32> to vector<25x128xf32>
    %44 = arith.addf %41, %43 : vector<25x128xf32>
    %c10 = arith.constant 10 : index
    %c0_26 = arith.constant 0 : index
    %45 = vector.load %arg27[%c10, %c0_26] : memref<48x64xbf16, #tpu.memory_space<vmem>>, vector<25x32xbf16>
    %c11 = arith.constant 11 : index
    %c0_27 = arith.constant 0 : index
    %46 = vector.load %arg27[%c11, %c0_27] : memref<48x64xbf16, #tpu.memory_space<vmem>>, vector<25x32xbf16>
    %c12 = arith.constant 12 : index
    %c0_28 = arith.constant 0 : index
    %47 = vector.load %arg27[%c12, %c0_28] : memref<48x64xbf16, #tpu.memory_space<vmem>>, vector<25x32xbf16>
    %c15 = arith.constant 15 : index
    %c0_29 = arith.constant 0 : index
    %48 = vector.load %arg27[%c15, %c0_29] : memref<48x64xbf16, #tpu.memory_space<vmem>>, vector<25x32xbf16>
    %c17 = arith.constant 17 : index
    %c0_30 = arith.constant 0 : index
    %49 = vector.load %arg27[%c17, %c0_30] : memref<48x64xbf16, #tpu.memory_space<vmem>>, vector<25x32xbf16>
    %c20 = arith.constant 20 : index
    %c0_31 = arith.constant 0 : index
    %50 = vector.load %arg27[%c20, %c0_31] : memref<48x64xbf16, #tpu.memory_space<vmem>>, vector<25x32xbf16>
    %c21 = arith.constant 21 : index
    %c0_32 = arith.constant 0 : index
    %51 = vector.load %arg27[%c21, %c0_32] : memref<48x64xbf16, #tpu.memory_space<vmem>>, vector<25x32xbf16>
    %c22 = arith.constant 22 : index
    %c0_33 = arith.constant 0 : index
    %52 = vector.load %arg27[%c22, %c0_33] : memref<48x64xbf16, #tpu.memory_space<vmem>>, vector<25x32xbf16>
    %53 = tpu.concatenate %45, %46, %47, %48, %38, %49, %50, %51, %52 in 1 : vector<25x32xbf16>, vector<25x32xbf16>, vector<25x32xbf16>, vector<25x32xbf16>, vector<25x32xbf16>, vector<25x32xbf16>, vector<25x32xbf16>, vector<25x32xbf16>, vector<25x32xbf16> -> vector<25x288xbf16>
    %c0_34 = arith.constant 0 : index
    %c0_35 = arith.constant 0 : index
    %54 = vector.load %arg6[%c0_34, %c0_35] : memref<288x128xbf16, #tpu.memory_space<vmem>>, vector<288x128xbf16>
    %cst_36 = arith.constant dense<0.000000e+00> : vector<25x128xf32>
    %55 = tpu.matmul %53, %54, %cst_36 {dimension_numbers = #tpu.dot_dimension_numbers<[1], [0], [0], [1], [0, 0, 1, 1], [], []>} : vector<25x288xbf16>, vector<288x128xbf16>, vector<25x128xf32> -> vector<25x128xf32>
    %c0_37 = arith.constant 0 : index
    %c0_38 = arith.constant 0 : index
    %56 = vector.load %arg7[%c0_37, %c0_38] : memref<1x128xf32, #tpu.memory_space<vmem>>, vector<1x128xf32>
    %57 = vector.broadcast %56 : vector<1x128xf32> to vector<25x128xf32>
    %58 = arith.addf %55, %57 : vector<25x128xf32>
    %59 = tpu.concatenate %44, %58 in 1 : vector<25x128xf32>, vector<25x128xf32> -> vector<25x256xf32>
    %cst_39 = arith.constant 0.000000e+00 : f32
    %60 = vector.broadcast %cst_39 : f32 to vector<25x256xf32>
    %61 = arith.maximumf %59, %60 : vector<25x256xf32>
    %62 = arith.truncf %61 : vector<25x256xf32> to vector<25x256xbf16>
    %c0_40 = arith.constant 0 : index
    %c0_41 = arith.constant 0 : index
    %63 = vector.load %arg8[%c0_40, %c0_41] : memref<256x48xbf16, #tpu.memory_space<vmem>>, vector<256x48xbf16>
    %cst_42 = arith.constant dense<0.000000e+00> : vector<25x48xf32>
    %64 = tpu.matmul %62, %63, %cst_42 {dimension_numbers = #tpu.dot_dimension_numbers<[1], [0], [0], [1], [0, 0, 1, 1], [], []>} : vector<25x256xbf16>, vector<256x48xbf16>, vector<25x48xf32> -> vector<25x48xf32>
    %c0_43 = arith.constant 0 : index
    %c0_44 = arith.constant 0 : index
    %65 = vector.load %arg9[%c0_43, %c0_44] : memref<1x48xf32, #tpu.memory_space<vmem>>, vector<1x48xf32>
    %66 = vector.broadcast %65 : vector<1x48xf32> to vector<25x48xf32>
    %67 = arith.addf %64, %66 : vector<25x48xf32>
    %cst_45 = arith.constant 0.000000e+00 : f32
    %68 = vector.broadcast %cst_45 : f32 to vector<25x48xf32>
    %69 = arith.maximumf %67, %68 : vector<25x48xf32>
    %cst_46 = arith.constant 0.000000e+00 : f32
    %70 = vector.shape_cast %20 : vector<25x1xi1> to vector<25x1xi1>
    %71 = vector.broadcast %70 : vector<25x1xi1> to vector<25x48xi1>
    %72 = vector.broadcast %cst_46 : f32 to vector<25x48xf32>
    %73 = arith.select %71, %69, %72 : vector<25x48xi1>, vector<25x48xf32>
    %74 = arith.truncf %73 : vector<25x48xf32> to vector<25x48xbf16>
    %c16_47 = arith.constant 16 : index
    %c0_48 = arith.constant 0 : index
    %75 = vector.load %arg27[%c16_47, %c0_48] : memref<48x64xbf16, #tpu.memory_space<vmem>>, vector<25x48xbf16>
    tpu.vector_store %arg27[%c16_47, %c0_48], %74 {strides = array<i32>} : memref<48x64xbf16, #tpu.memory_space<vmem>>, vector<25x48xbf16>,
    %c0_49 = arith.constant 0 : index
    %c0_50 = arith.constant 0 : index
    %76 = vector.load %arg10[%c0_49, %c0_50] : memref<48x192xbf16, #tpu.memory_space<vmem>>, vector<48x192xbf16>
    %cst_51 = arith.constant dense<0.000000e+00> : vector<25x192xf32>
    %77 = tpu.matmul %74, %76, %cst_51 {dimension_numbers = #tpu.dot_dimension_numbers<[1], [0], [0], [1], [0, 0, 1, 1], [], []>} : vector<25x48xbf16>, vector<48x192xbf16>, vector<25x192xf32> -> vector<25x192xf32>
    %c0_52 = arith.constant 0 : index
    %c0_53 = arith.constant 0 : index
    %78 = vector.load %arg11[%c0_52, %c0_53] : memref<1x192xf32, #tpu.memory_space<vmem>>, vector<1x192xf32>
    %79 = vector.broadcast %78 : vector<1x192xf32> to vector<25x192xf32>
    %80 = arith.addf %77, %79 : vector<25x192xf32>
    %c10_54 = arith.constant 10 : index
    %c0_55 = arith.constant 0 : index
    %81 = vector.load %arg27[%c10_54, %c0_55] : memref<48x64xbf16, #tpu.memory_space<vmem>>, vector<25x48xbf16>
    %c11_56 = arith.constant 11 : index
    %c0_57 = arith.constant 0 : index
    %82 = vector.load %arg27[%c11_56, %c0_57] : memref<48x64xbf16, #tpu.memory_space<vmem>>, vector<25x48xbf16>
    %c12_58 = arith.constant 12 : index
    %c0_59 = arith.constant 0 : index
    %83 = vector.load %arg27[%c12_58, %c0_59] : memref<48x64xbf16, #tpu.memory_space<vmem>>, vector<25x48xbf16>
    %c15_60 = arith.constant 15 : index
    %c0_61 = arith.constant 0 : index
    %84 = vector.load %arg27[%c15_60, %c0_61] : memref<48x64xbf16, #tpu.memory_space<vmem>>, vector<25x48xbf16>
    %c17_62 = arith.constant 17 : index
    %c0_63 = arith.constant 0 : index
    %85 = vector.load %arg27[%c17_62, %c0_63] : memref<48x64xbf16, #tpu.memory_space<vmem>>, vector<25x48xbf16>
    %c20_64 = arith.constant 20 : index
    %c0_65 = arith.constant 0 : index
    %86 = vector.load %arg27[%c20_64, %c0_65] : memref<48x64xbf16, #tpu.memory_space<vmem>>, vector<25x48xbf16>
    %c21_66 = arith.constant 21 : index
    %c0_67 = arith.constant 0 : index
    %87 = vector.load %arg27[%c21_66, %c0_67] : memref<48x64xbf16, #tpu.memory_space<vmem>>, vector<25x48xbf16>
    %c22_68 = arith.constant 22 : index
    %c0_69 = arith.constant 0 : index
    %88 = vector.load %arg27[%c22_68, %c0_69] : memref<48x64xbf16, #tpu.memory_space<vmem>>, vector<25x48xbf16>
    %89 = tpu.concatenate %81, %82, %83, %84, %74, %85, %86, %87, %88 in 1 : vector<25x48xbf16>, vector<25x48xbf16>, vector<25x48xbf16>, vector<25x48xbf16>, vector<25x48xbf16>, vector<25x48xbf16>, vector<25x48xbf16>, vector<25x48xbf16>, vector<25x48xbf16> -> vector<25x432xbf16>
    %c0_70 = arith.constant 0 : index
    %c0_71 = arith.constant 0 : index
    %90 = vector.load %arg12[%c0_70, %c0_71] : memref<432x192xbf16, #tpu.memory_space<vmem>>, vector<432x192xbf16>
    %cst_72 = arith.constant dense<0.000000e+00> : vector<25x192xf32>
    %91 = tpu.matmul %89, %90, %cst_72 {dimension_numbers = #tpu.dot_dimension_numbers<[1], [0], [0], [1], [0, 0, 1, 1], [], []>} : vector<25x432xbf16>, vector<432x192xbf16>, vector<25x192xf32> -> vector<25x192xf32>
    %c0_73 = arith.constant 0 : index
    %c0_74 = arith.constant 0 : index
    %92 = vector.load %arg13[%c0_73, %c0_74] : memref<1x192xf32, #tpu.memory_space<vmem>>, vector<1x192xf32>
    %93 = vector.broadcast %92 : vector<1x192xf32> to vector<25x192xf32>
    %94 = arith.addf %91, %93 : vector<25x192xf32>
    %95 = tpu.concatenate %80, %94 in 1 : vector<25x192xf32>, vector<25x192xf32> -> vector<25x384xf32>
    %cst_75 = arith.constant 0.000000e+00 : f32
    %96 = vector.broadcast %cst_75 : f32 to vector<25x384xf32>
    %97 = arith.maximumf %95, %96 : vector<25x384xf32>
    %98 = arith.truncf %97 : vector<25x384xf32> to vector<25x384xbf16>
    %c0_76 = arith.constant 0 : index
    %c0_77 = arith.constant 0 : index
    %99 = vector.load %arg14[%c0_76, %c0_77] : memref<384x48xbf16, #tpu.memory_space<vmem>>, vector<384x48xbf16>
    %cst_78 = arith.constant dense<0.000000e+00> : vector<25x48xf32>
    %100 = tpu.matmul %98, %99, %cst_78 {dimension_numbers = #tpu.dot_dimension_numbers<[1], [0], [0], [1], [0, 0, 1, 1], [], []>} : vector<25x384xbf16>, vector<384x48xbf16>, vector<25x48xf32> -> vector<25x48xf32>
    %c0_79 = arith.constant 0 : index
    %c0_80 = arith.constant 0 : index
    %101 = vector.load %arg15[%c0_79, %c0_80] : memref<1x48xf32, #tpu.memory_space<vmem>>, vector<1x48xf32>
    %102 = vector.broadcast %101 : vector<1x48xf32> to vector<25x48xf32>
    %103 = arith.addf %100, %102 : vector<25x48xf32>
    %cst_81 = arith.constant 0.000000e+00 : f32
    %104 = vector.broadcast %cst_81 : f32 to vector<25x48xf32>
    %105 = arith.maximumf %103, %104 : vector<25x48xf32>
    %cst_82 = arith.constant 0.000000e+00 : f32
    %106 = vector.shape_cast %20 : vector<25x1xi1> to vector<25x1xi1>
    %107 = vector.broadcast %106 : vector<25x1xi1> to vector<25x48xi1>
    %108 = vector.broadcast %cst_82 : f32 to vector<25x48xf32>
    %109 = arith.select %107, %105, %108 : vector<25x48xi1>, vector<25x48xf32>
    %110 = arith.truncf %109 : vector<25x48xf32> to vector<25x48xbf16>
    %c16_83 = arith.constant 16 : index
    %c0_84 = arith.constant 0 : index
    %111 = vector.load %arg27[%c16_83, %c0_84] : memref<48x64xbf16, #tpu.memory_space<vmem>>, vector<25x48xbf16>
    tpu.vector_store %arg27[%c16_83, %c0_84], %110 {strides = array<i32>} : memref<48x64xbf16, #tpu.memory_space<vmem>>, vector<25x48xbf16>,
    %c0_85 = arith.constant 0 : index
    %c0_86 = arith.constant 0 : index
    %112 = vector.load %arg16[%c0_85, %c0_86] : memref<48x192xbf16, #tpu.memory_space<vmem>>, vector<48x192xbf16>
    %cst_87 = arith.constant dense<0.000000e+00> : vector<25x192xf32>
    %113 = tpu.matmul %110, %112, %cst_87 {dimension_numbers = #tpu.dot_dimension_numbers<[1], [0], [0], [1], [0, 0, 1, 1], [], []>} : vector<25x48xbf16>, vector<48x192xbf16>, vector<25x192xf32> -> vector<25x192xf32>
    %c0_88 = arith.constant 0 : index
    %c0_89 = arith.constant 0 : index
    %114 = vector.load %arg17[%c0_88, %c0_89] : memref<1x192xf32, #tpu.memory_space<vmem>>, vector<1x192xf32>
    %115 = vector.broadcast %114 : vector<1x192xf32> to vector<25x192xf32>
    %116 = arith.addf %113, %115 : vector<25x192xf32>
    %c10_90 = arith.constant 10 : index
    %c0_91 = arith.constant 0 : index
    %117 = vector.load %arg27[%c10_90, %c0_91] : memref<48x64xbf16, #tpu.memory_space<vmem>>, vector<25x48xbf16>
    %c11_92 = arith.constant 11 : index
    %c0_93 = arith.constant 0 : index
    %118 = vector.load %arg27[%c11_92, %c0_93] : memref<48x64xbf16, #tpu.memory_space<vmem>>, vector<25x48xbf16>
    %c12_94 = arith.constant 12 : index
    %c0_95 = arith.constant 0 : index
    %119 = vector.load %arg27[%c12_94, %c0_95] : memref<48x64xbf16, #tpu.memory_space<vmem>>, vector<25x48xbf16>
    %c15_96 = arith.constant 15 : index
    %c0_97 = arith.constant 0 : index
    %120 = vector.load %arg27[%c15_96, %c0_97] : memref<48x64xbf16, #tpu.memory_space<vmem>>, vector<25x48xbf16>
    %c17_98 = arith.constant 17 : index
    %c0_99 = arith.constant 0 : index
    %121 = vector.load %arg27[%c17_98, %c0_99] : memref<48x64xbf16, #tpu.memory_space<vmem>>, vector<25x48xbf16>
    %c20_100 = arith.constant 20 : index
    %c0_101 = arith.constant 0 : index
    %122 = vector.load %arg27[%c20_100, %c0_101] : memref<48x64xbf16, #tpu.memory_space<vmem>>, vector<25x48xbf16>
    %c21_102 = arith.constant 21 : index
    %c0_103 = arith.constant 0 : index
    %123 = vector.load %arg27[%c21_102, %c0_103] : memref<48x64xbf16, #tpu.memory_space<vmem>>, vector<25x48xbf16>
    %c22_104 = arith.constant 22 : index
    %c0_105 = arith.constant 0 : index
    %124 = vector.load %arg27[%c22_104, %c0_105] : memref<48x64xbf16, #tpu.memory_space<vmem>>, vector<25x48xbf16>
    %125 = tpu.concatenate %117, %118, %119, %120, %110, %121, %122, %123, %124 in 1 : vector<25x48xbf16>, vector<25x48xbf16>, vector<25x48xbf16>, vector<25x48xbf16>, vector<25x48xbf16>, vector<25x48xbf16>, vector<25x48xbf16>, vector<25x48xbf16>, vector<25x48xbf16> -> vector<25x432xbf16>
    %c0_106 = arith.constant 0 : index
    %c0_107 = arith.constant 0 : index
    %126 = vector.load %arg18[%c0_106, %c0_107] : memref<432x192xbf16, #tpu.memory_space<vmem>>, vector<432x192xbf16>
    %cst_108 = arith.constant dense<0.000000e+00> : vector<25x192xf32>
    %127 = tpu.matmul %125, %126, %cst_108 {dimension_numbers = #tpu.dot_dimension_numbers<[1], [0], [0], [1], [0, 0, 1, 1], [], []>} : vector<25x432xbf16>, vector<432x192xbf16>, vector<25x192xf32> -> vector<25x192xf32>
    %c0_109 = arith.constant 0 : index
    %c0_110 = arith.constant 0 : index
    %128 = vector.load %arg19[%c0_109, %c0_110] : memref<1x192xf32, #tpu.memory_space<vmem>>, vector<1x192xf32>
    %129 = vector.broadcast %128 : vector<1x192xf32> to vector<25x192xf32>
    %130 = arith.addf %127, %129 : vector<25x192xf32>
    %131 = tpu.concatenate %116, %130 in 1 : vector<25x192xf32>, vector<25x192xf32> -> vector<25x384xf32>
    %cst_111 = arith.constant 0.000000e+00 : f32
    %132 = vector.broadcast %cst_111 : f32 to vector<25x384xf32>
    %133 = arith.maximumf %131, %132 : vector<25x384xf32>
    %134 = arith.truncf %133 : vector<25x384xf32> to vector<25x384xbf16>
    %c0_112 = arith.constant 0 : index
    %c0_113 = arith.constant 0 : index
    %135 = vector.load %arg20[%c0_112, %c0_113] : memref<384x64xbf16, #tpu.memory_space<vmem>>, vector<384x64xbf16>
    %cst_114 = arith.constant dense<0.000000e+00> : vector<25x64xf32>
    %136 = tpu.matmul %134, %135, %cst_114 {dimension_numbers = #tpu.dot_dimension_numbers<[1], [0], [0], [1], [0, 0, 1, 1], [], []>} : vector<25x384xbf16>, vector<384x64xbf16>, vector<25x64xf32> -> vector<25x64xf32>
    %c0_115 = arith.constant 0 : index
    %c0_116 = arith.constant 0 : index
    %137 = vector.load %arg21[%c0_115, %c0_116] : memref<1x64xf32, #tpu.memory_space<vmem>>, vector<1x64xf32>
    %138 = vector.broadcast %137 : vector<1x64xf32> to vector<25x64xf32>
    %139 = arith.addf %136, %138 : vector<25x64xf32>
    %cst_117 = arith.constant 0.000000e+00 : f32
    %140 = vector.broadcast %cst_117 : f32 to vector<25x64xf32>
    %141 = arith.maximumf %139, %140 : vector<25x64xf32>
    %cst_118 = arith.constant 0.000000e+00 : f32
    %142 = vector.shape_cast %20 : vector<25x1xi1> to vector<25x1xi1>
    %143 = vector.broadcast %142 : vector<25x1xi1> to vector<25x64xi1>
    %144 = vector.broadcast %cst_118 : f32 to vector<25x64xf32>
    %145 = arith.select %143, %141, %144 : vector<25x64xi1>, vector<25x64xf32>
    %146 = arith.truncf %145 : vector<25x64xf32> to vector<25x64xbf16>
    %c16_119 = arith.constant 16 : index
    %c0_120 = arith.constant 0 : index
    %147 = vector.load %arg27[%c16_119, %c0_120] : memref<48x64xbf16, #tpu.memory_space<vmem>>, vector<25x64xbf16>
    tpu.vector_store %arg27[%c16_119, %c0_120], %146 {strides = array<i32>} : memref<48x64xbf16, #tpu.memory_space<vmem>>, vector<25x64xbf16>,
    %c0_121 = arith.constant 0 : index
    %c0_122 = arith.constant 0 : index
    %148 = vector.load %arg22[%c0_121, %c0_122] : memref<64x256xbf16, #tpu.memory_space<vmem>>, vector<64x256xbf16>
    %cst_123 = arith.constant dense<0.000000e+00> : vector<25x256xf32>
    %149 = tpu.matmul %146, %148, %cst_123 {dimension_numbers = #tpu.dot_dimension_numbers<[1], [0], [0], [1], [0, 0, 1, 1], [], []>} : vector<25x64xbf16>, vector<64x256xbf16>, vector<25x256xf32> -> vector<25x256xf32>
    %c0_124 = arith.constant 0 : index
    %c0_125 = arith.constant 0 : index
    %150 = vector.load %arg23[%c0_124, %c0_125] : memref<1x256xf32, #tpu.memory_space<vmem>>, vector<1x256xf32>
    %151 = vector.broadcast %150 : vector<1x256xf32> to vector<25x256xf32>
    %152 = arith.addf %149, %151 : vector<25x256xf32>
    %c10_126 = arith.constant 10 : index
    %c0_127 = arith.constant 0 : index
    %153 = vector.load %arg27[%c10_126, %c0_127] : memref<48x64xbf16, #tpu.memory_space<vmem>>, vector<25x64xbf16>
    %c11_128 = arith.constant 11 : index
    %c0_129 = arith.constant 0 : index
    %154 = vector.load %arg27[%c11_128, %c0_129] : memref<48x64xbf16, #tpu.memory_space<vmem>>, vector<25x64xbf16>
    %c12_130 = arith.constant 12 : index
    %c0_131 = arith.constant 0 : index
    %155 = vector.load %arg27[%c12_130, %c0_131] : memref<48x64xbf16, #tpu.memory_space<vmem>>, vector<25x64xbf16>
    %c15_132 = arith.constant 15 : index
    %c0_133 = arith.constant 0 : index
    %156 = vector.load %arg27[%c15_132, %c0_133] : memref<48x64xbf16, #tpu.memory_space<vmem>>, vector<25x64xbf16>
    %c17_134 = arith.constant 17 : index
    %c0_135 = arith.constant 0 : index
    %157 = vector.load %arg27[%c17_134, %c0_135] : memref<48x64xbf16, #tpu.memory_space<vmem>>, vector<25x64xbf16>
    %c20_136 = arith.constant 20 : index
    %c0_137 = arith.constant 0 : index
    %158 = vector.load %arg27[%c20_136, %c0_137] : memref<48x64xbf16, #tpu.memory_space<vmem>>, vector<25x64xbf16>
    %c21_138 = arith.constant 21 : index
    %c0_139 = arith.constant 0 : index
    %159 = vector.load %arg27[%c21_138, %c0_139] : memref<48x64xbf16, #tpu.memory_space<vmem>>, vector<25x64xbf16>
    %c22_140 = arith.constant 22 : index
    %c0_141 = arith.constant 0 : index
    %160 = vector.load %arg27[%c22_140, %c0_141] : memref<48x64xbf16, #tpu.memory_space<vmem>>, vector<25x64xbf16>
    %161 = tpu.concatenate %153, %154, %155, %156, %146, %157, %158, %159, %160 in 1 : vector<25x64xbf16>, vector<25x64xbf16>, vector<25x64xbf16>, vector<25x64xbf16>, vector<25x64xbf16>, vector<25x64xbf16>, vector<25x64xbf16>, vector<25x64xbf16>, vector<25x64xbf16> -> vector<25x576xbf16>
    %c0_142 = arith.constant 0 : index
    %c0_143 = arith.constant 0 : index
    %162 = vector.load %arg24[%c0_142, %c0_143] : memref<576x256xbf16, #tpu.memory_space<vmem>>, vector<576x256xbf16>
    %cst_144 = arith.constant dense<0.000000e+00> : vector<25x256xf32>
    %163 = tpu.matmul %161, %162, %cst_144 {dimension_numbers = #tpu.dot_dimension_numbers<[1], [0], [0], [1], [0, 0, 1, 1], [], []>} : vector<25x576xbf16>, vector<576x256xbf16>, vector<25x256xf32> -> vector<25x256xf32>
    %c0_145 = arith.constant 0 : index
    %c0_146 = arith.constant 0 : index
    %164 = vector.load %arg25[%c0_145, %c0_146] : memref<1x256xf32, #tpu.memory_space<vmem>>, vector<1x256xf32>
    %165 = vector.broadcast %164 : vector<1x256xf32> to vector<25x256xf32>
    %166 = arith.addf %163, %165 : vector<25x256xf32>
    %167 = tpu.concatenate %152, %166 in 1 : vector<25x256xf32>, vector<25x256xf32> -> vector<25x512xf32>
    %cst_147 = arith.constant 0.000000e+00 : f32
    %168 = vector.broadcast %cst_147 : f32 to vector<25x512xf32>
    %169 = arith.maximumf %167, %168 : vector<25x512xf32>
    %170 = arith.truncf %169 : vector<25x512xf32> to vector<25x512xbf16>
    %c0_148 = arith.constant 0 : index
    %c0_149 = arith.constant 0 : index
    %c0_150 = arith.constant 0 : index
    %171 = vector.load %arg26[%c0_148, %c0_149, %c0_150] : memref<1x25x512xbf16, #tpu.memory_space<vmem>>, vector<1x25x512xbf16>
    %172 = vector.shape_cast %171 : vector<1x25x512xbf16> to vector<25x512xbf16>
    %173 = vector.shape_cast %170 : vector<25x512xbf16> to vector<1x25x512xbf16>
    tpu.vector_store %arg26[%c0_148, %c0_149, %c0_150], %173 {strides = array<i32>} : memref<1x25x512xbf16, #tpu.memory_space<vmem>>, vector<1x25x512xbf16>,
    return
  }
  func.func @transform_0(%arg0: i32) -> (i32, i32, i32) {
    %c0_i32 = arith.constant 0 : i32
    %c0_i32_0 = arith.constant 0 : i32
    %c0_i32_1 = arith.constant 0 : i32
    return %arg0, %c0_i32, %c0_i32_0 : i32, i32, i32
  }
  func.func @transform_1(%arg0: i32) -> (i32, i32) {
    %c0_i32 = arith.constant 0 : i32
    %c0_i32_0 = arith.constant 0 : i32
    %c0_i32_1 = arith.constant 0 : i32
    return %c0_i32, %c0_i32_0 : i32, i32
  }
  func.func @transform_2(%arg0: i32) -> (i32, i32) {
    %c0_i32 = arith.constant 0 : i32
    %c0_i32_0 = arith.constant 0 : i32
    %c0_i32_1 = arith.constant 0 : i32
    return %c0_i32, %c0_i32_0 : i32, i32
  }
  func.func @transform_3(%arg0: i32) -> (i32, i32) {
    %c0_i32 = arith.constant 0 : i32
    %c0_i32_0 = arith.constant 0 : i32
    %c0_i32_1 = arith.constant 0 : i32
    return %c0_i32, %c0_i32_0 : i32, i32
  }
  func.func @transform_4(%arg0: i32) -> (i32, i32) {
    %c0_i32 = arith.constant 0 : i32
    %c0_i32_0 = arith.constant 0 : i32
    %c0_i32_1 = arith.constant 0 : i32
    return %c0_i32, %c0_i32_0 : i32, i32
  }
  func.func @transform_5(%arg0: i32) -> (i32, i32) {
    %c0_i32 = arith.constant 0 : i32
    %c0_i32_0 = arith.constant 0 : i32
    %c0_i32_1 = arith.constant 0 : i32
    return %c0_i32, %c0_i32_0 : i32, i32
  }
  func.func @transform_6(%arg0: i32) -> (i32, i32) {
    %c0_i32 = arith.constant 0 : i32
    %c0_i32_0 = arith.constant 0 : i32
    %c0_i32_1 = arith.constant 0 : i32
    return %c0_i32, %c0_i32_0 : i32, i32
  }
  func.func @transform_7(%arg0: i32) -> (i32, i32) {
    %c0_i32 = arith.constant 0 : i32
    %c0_i32_0 = arith.constant 0 : i32
    %c0_i32_1 = arith.constant 0 : i32
    return %c0_i32, %c0_i32_0 : i32, i32
  }
  func.func @transform_8(%arg0: i32) -> (i32, i32) {
    %c0_i32 = arith.constant 0 : i32
    %c0_i32_0 = arith.constant 0 : i32
    %c0_i32_1 = arith.constant 0 : i32
    return %c0_i32, %c0_i32_0 : i32, i32
  }
  func.func @transform_9(%arg0: i32) -> (i32, i32) {
    %c0_i32 = arith.constant 0 : i32
    %c0_i32_0 = arith.constant 0 : i32
    %c0_i32_1 = arith.constant 0 : i32
    return %c0_i32, %c0_i32_0 : i32, i32
  }
  func.func @transform_10(%arg0: i32) -> (i32, i32) {
    %c0_i32 = arith.constant 0 : i32
    %c0_i32_0 = arith.constant 0 : i32
    %c0_i32_1 = arith.constant 0 : i32
    return %c0_i32, %c0_i32_0 : i32, i32
  }
  func.func @transform_11(%arg0: i32) -> (i32, i32) {
    %c0_i32 = arith.constant 0 : i32
    %c0_i32_0 = arith.constant 0 : i32
    %c0_i32_1 = arith.constant 0 : i32
    return %c0_i32, %c0_i32_0 : i32, i32
  }
  func.func @transform_12(%arg0: i32) -> (i32, i32) {
    %c0_i32 = arith.constant 0 : i32
    %c0_i32_0 = arith.constant 0 : i32
    %c0_i32_1 = arith.constant 0 : i32
    return %c0_i32, %c0_i32_0 : i32, i32
  }
  func.func @transform_13(%arg0: i32) -> (i32, i32) {
    %c0_i32 = arith.constant 0 : i32
    %c0_i32_0 = arith.constant 0 : i32
    %c0_i32_1 = arith.constant 0 : i32
    return %c0_i32, %c0_i32_0 : i32, i32
  }
  func.func @transform_14(%arg0: i32) -> (i32, i32) {
    %c0_i32 = arith.constant 0 : i32
    %c0_i32_0 = arith.constant 0 : i32
    %c0_i32_1 = arith.constant 0 : i32
    return %c0_i32, %c0_i32_0 : i32, i32
  }
  func.func @transform_15(%arg0: i32) -> (i32, i32) {
    %c0_i32 = arith.constant 0 : i32
    %c0_i32_0 = arith.constant 0 : i32
    %c0_i32_1 = arith.constant 0 : i32
    return %c0_i32, %c0_i32_0 : i32, i32
  }
  func.func @transform_16(%arg0: i32) -> (i32, i32) {
    %c0_i32 = arith.constant 0 : i32
    %c0_i32_0 = arith.constant 0 : i32
    %c0_i32_1 = arith.constant 0 : i32
    return %c0_i32, %c0_i32_0 : i32, i32
  }
  func.func @transform_17(%arg0: i32) -> (i32, i32) {
    %c0_i32 = arith.constant 0 : i32
    %c0_i32_0 = arith.constant 0 : i32
    %c0_i32_1 = arith.constant 0 : i32
    return %c0_i32, %c0_i32_0 : i32, i32
  }
  func.func @transform_18(%arg0: i32) -> (i32, i32) {
    %c0_i32 = arith.constant 0 : i32
    %c0_i32_0 = arith.constant 0 : i32
    %c0_i32_1 = arith.constant 0 : i32
    return %c0_i32, %c0_i32_0 : i32, i32
  }
  func.func @transform_19(%arg0: i32) -> (i32, i32) {
    %c0_i32 = arith.constant 0 : i32
    %c0_i32_0 = arith.constant 0 : i32
    %c0_i32_1 = arith.constant 0 : i32
    return %c0_i32, %c0_i32_0 : i32, i32
  }
  func.func @transform_20(%arg0: i32) -> (i32, i32) {
    %c0_i32 = arith.constant 0 : i32
    %c0_i32_0 = arith.constant 0 : i32
    %c0_i32_1 = arith.constant 0 : i32
    return %c0_i32, %c0_i32_0 : i32, i32
  }
  func.func @transform_21(%arg0: i32) -> (i32, i32) {
    %c0_i32 = arith.constant 0 : i32
    %c0_i32_0 = arith.constant 0 : i32
    %c0_i32_1 = arith.constant 0 : i32
    return %c0_i32, %c0_i32_0 : i32, i32
  }
  func.func @transform_22(%arg0: i32) -> (i32, i32) {
    %c0_i32 = arith.constant 0 : i32
    %c0_i32_0 = arith.constant 0 : i32
    %c0_i32_1 = arith.constant 0 : i32
    return %c0_i32, %c0_i32_0 : i32, i32
  }
  func.func @transform_23(%arg0: i32) -> (i32, i32) {
    %c0_i32 = arith.constant 0 : i32
    %c0_i32_0 = arith.constant 0 : i32
    %c0_i32_1 = arith.constant 0 : i32
    return %c0_i32, %c0_i32_0 : i32, i32
  }
  func.func @transform_24(%arg0: i32) -> (i32, i32) {
    %c0_i32 = arith.constant 0 : i32
    %c0_i32_0 = arith.constant 0 : i32
    %c0_i32_1 = arith.constant 0 : i32
    return %c0_i32, %c0_i32_0 : i32, i32
  }
  func.func @transform_25(%arg0: i32) -> (i32, i32, i32) {
    %c0_i32 = arith.constant 0 : i32
    %c0_i32_0 = arith.constant 0 : i32
    %c0_i32_1 = arith.constant 0 : i32
    return %arg0, %c0_i32, %c0_i32_0 : i32, i32, i32
  }
}

module attributes {stable_mosaic.version = 11 : i64} {
  func.func @_fire_stage_kernel(%arg0: i32, %arg1: memref<1x9x512xbf16, #tpu.memory_space<vmem>>, %arg2: memref<512x64xbf16, #tpu.memory_space<vmem>>, %arg3: memref<1x64xf32, #tpu.memory_space<vmem>>, %arg4: memref<64x256xbf16, #tpu.memory_space<vmem>>, %arg5: memref<1x256xf32, #tpu.memory_space<vmem>>, %arg6: memref<576x256xbf16, #tpu.memory_space<vmem>>, %arg7: memref<1x256xf32, #tpu.memory_space<vmem>>, %arg8: memref<1x9x512xbf16, #tpu.memory_space<vmem>>, %arg9: memref<32x64xbf16, #tpu.memory_space<vmem>>) attributes {dimension_semantics = [#tpu.dimension_semantics<parallel>], iteration_bounds = array<i64: 2>, scalar_prefetch = 0 : i64, scratch_operands = 1 : i64, tpu.core_type = #tpu.core_type<tc>, window_params = [{transform_indices = @transform_0, window_bounds = array<i64: 1, 9, 512>}, {pipeline_mode = #tpu.pipeline_mode<synchronous>, transform_indices = @transform_1, window_bounds = array<i64: 512, 64>}, {pipeline_mode = #tpu.pipeline_mode<synchronous>, transform_indices = @transform_2, window_bounds = array<i64: 1, 64>}, {pipeline_mode = #tpu.pipeline_mode<synchronous>, transform_indices = @transform_3, window_bounds = array<i64: 64, 256>}, {pipeline_mode = #tpu.pipeline_mode<synchronous>, transform_indices = @transform_4, window_bounds = array<i64: 1, 256>}, {pipeline_mode = #tpu.pipeline_mode<synchronous>, transform_indices = @transform_5, window_bounds = array<i64: 576, 256>}, {pipeline_mode = #tpu.pipeline_mode<synchronous>, transform_indices = @transform_6, window_bounds = array<i64: 1, 256>}, {transform_indices = @transform_7, window_bounds = array<i64: 1, 9, 512>}]} {
    %0 = tpu.iota {dimensions = array<i32: 0>} : vector<9x1xi32>
    %1 = arith.sitofp %0 : vector<9x1xi32> to vector<9x1xf32>
    %cst = arith.constant 5.000000e-01 : f32
    %2 = vector.broadcast %cst : f32 to vector<9x1xf32>
    %3 = arith.addf %1, %2 : vector<9x1xf32>
    %cst_0 = arith.constant 0.333333343 : f32
    %4 = vector.broadcast %cst_0 : f32 to vector<9x1xf32>
    %5 = arith.mulf %3, %4 : vector<9x1xf32>
    %6 = math.floor %5 : vector<9x1xf32>
    %cst_1 = arith.constant 3.000000e+00 : f32
    %7 = vector.broadcast %cst_1 : f32 to vector<9x1xf32>
    %8 = arith.mulf %6, %7 : vector<9x1xf32>
    %9 = arith.subf %1, %8 : vector<9x1xf32>
    %cst_2 = arith.constant 1.000000e+00 : f32
    %10 = vector.broadcast %cst_2 : f32 to vector<9x1xf32>
    %11 = arith.cmpf oge, %6, %10 : vector<9x1xf32>
    %cst_3 = arith.constant 1.000000e+00 : f32
    %12 = vector.broadcast %cst_3 : f32 to vector<9x1xf32>
    %13 = arith.cmpf ole, %6, %12 : vector<9x1xf32>
    %14 = arith.andi %11, %13 : vector<9x1xi1>
    %cst_4 = arith.constant 1.000000e+00 : f32
    %15 = vector.broadcast %cst_4 : f32 to vector<9x1xf32>
    %16 = arith.cmpf oge, %9, %15 : vector<9x1xf32>
    %17 = arith.andi %14, %16 : vector<9x1xi1>
    %cst_5 = arith.constant 1.000000e+00 : f32
    %18 = vector.broadcast %cst_5 : f32 to vector<9x1xf32>
    %19 = arith.cmpf ole, %9, %18 : vector<9x1xf32>
    %20 = arith.andi %17, %19 : vector<9x1xi1>
    %cst_6 = arith.constant 0.000000e+00 : bf16
    %21 = vector.broadcast %cst_6 : bf16 to vector<16x64xbf16>
    %c0 = arith.constant 0 : index
    %c0_7 = arith.constant 0 : index
    %22 = vector.load %arg9[%c0, %c0_7] : memref<32x64xbf16, #tpu.memory_space<vmem>>, vector<16x64xbf16>
    tpu.vector_store %arg9[%c0, %c0_7], %21 {strides = array<i32>} : memref<32x64xbf16, #tpu.memory_space<vmem>>, vector<16x64xbf16>,
    %cst_8 = arith.constant 0.000000e+00 : bf16
    %23 = vector.broadcast %cst_8 : bf16 to vector<7x64xbf16>
    %c25 = arith.constant 25 : index
    %c0_9 = arith.constant 0 : index
    %24 = vector.load %arg9[%c25, %c0_9] : memref<32x64xbf16, #tpu.memory_space<vmem>>, vector<7x64xbf16>
    tpu.vector_store %arg9[%c25, %c0_9], %23 {strides = array<i32>} : memref<32x64xbf16, #tpu.memory_space<vmem>>, vector<7x64xbf16>,
    %c0_10 = arith.constant 0 : index
    %c0_11 = arith.constant 0 : index
    %c0_12 = arith.constant 0 : index
    %25 = vector.load %arg1[%c0_10, %c0_11, %c0_12] : memref<1x9x512xbf16, #tpu.memory_space<vmem>>, vector<1x9x512xbf16>
    %26 = vector.shape_cast %25 : vector<1x9x512xbf16> to vector<9x512xbf16>
    %c0_13 = arith.constant 0 : index
    %c0_14 = arith.constant 0 : index
    %27 = vector.load %arg2[%c0_13, %c0_14] : memref<512x64xbf16, #tpu.memory_space<vmem>>, vector<512x64xbf16>
    %cst_15 = arith.constant dense<0.000000e+00> : vector<9x64xf32>
    %28 = tpu.matmul %26, %27, %cst_15 {dimension_numbers = #tpu.dot_dimension_numbers<[1], [0], [0], [1], [0, 0, 1, 1], [], []>} : vector<9x512xbf16>, vector<512x64xbf16>, vector<9x64xf32> -> vector<9x64xf32>
    %c0_16 = arith.constant 0 : index
    %c0_17 = arith.constant 0 : index
    %29 = vector.load %arg3[%c0_16, %c0_17] : memref<1x64xf32, #tpu.memory_space<vmem>>, vector<1x64xf32>
    %30 = vector.broadcast %29 : vector<1x64xf32> to vector<9x64xf32>
    %31 = arith.addf %28, %30 : vector<9x64xf32>
    %cst_18 = arith.constant 0.000000e+00 : f32
    %32 = vector.broadcast %cst_18 : f32 to vector<9x64xf32>
    %33 = arith.maximumf %31, %32 : vector<9x64xf32>
    %cst_19 = arith.constant 0.000000e+00 : f32
    %34 = vector.shape_cast %20 : vector<9x1xi1> to vector<9x1xi1>
    %35 = vector.broadcast %34 : vector<9x1xi1> to vector<9x64xi1>
    %36 = vector.broadcast %cst_19 : f32 to vector<9x64xf32>
    %37 = arith.select %35, %33, %36 : vector<9x64xi1>, vector<9x64xf32>
    %38 = arith.truncf %37 : vector<9x64xf32> to vector<9x64xbf16>
    %c16 = arith.constant 16 : index
    %c0_20 = arith.constant 0 : index
    %39 = vector.load %arg9[%c16, %c0_20] : memref<32x64xbf16, #tpu.memory_space<vmem>>, vector<9x64xbf16>
    tpu.vector_store %arg9[%c16, %c0_20], %38 {strides = array<i32>} : memref<32x64xbf16, #tpu.memory_space<vmem>>, vector<9x64xbf16>,
    %c0_21 = arith.constant 0 : index
    %c0_22 = arith.constant 0 : index
    %40 = vector.load %arg4[%c0_21, %c0_22] : memref<64x256xbf16, #tpu.memory_space<vmem>>, vector<64x256xbf16>
    %cst_23 = arith.constant dense<0.000000e+00> : vector<9x256xf32>
    %41 = tpu.matmul %38, %40, %cst_23 {dimension_numbers = #tpu.dot_dimension_numbers<[1], [0], [0], [1], [0, 0, 1, 1], [], []>} : vector<9x64xbf16>, vector<64x256xbf16>, vector<9x256xf32> -> vector<9x256xf32>
    %c0_24 = arith.constant 0 : index
    %c0_25 = arith.constant 0 : index
    %42 = vector.load %arg5[%c0_24, %c0_25] : memref<1x256xf32, #tpu.memory_space<vmem>>, vector<1x256xf32>
    %43 = vector.broadcast %42 : vector<1x256xf32> to vector<9x256xf32>
    %44 = arith.addf %41, %43 : vector<9x256xf32>
    %c12 = arith.constant 12 : index
    %c0_26 = arith.constant 0 : index
    %45 = vector.load %arg9[%c12, %c0_26] : memref<32x64xbf16, #tpu.memory_space<vmem>>, vector<9x64xbf16>
    %c13 = arith.constant 13 : index
    %c0_27 = arith.constant 0 : index
    %46 = vector.load %arg9[%c13, %c0_27] : memref<32x64xbf16, #tpu.memory_space<vmem>>, vector<9x64xbf16>
    %c14 = arith.constant 14 : index
    %c0_28 = arith.constant 0 : index
    %47 = vector.load %arg9[%c14, %c0_28] : memref<32x64xbf16, #tpu.memory_space<vmem>>, vector<9x64xbf16>
    %c15 = arith.constant 15 : index
    %c0_29 = arith.constant 0 : index
    %48 = vector.load %arg9[%c15, %c0_29] : memref<32x64xbf16, #tpu.memory_space<vmem>>, vector<9x64xbf16>
    %c17 = arith.constant 17 : index
    %c0_30 = arith.constant 0 : index
    %49 = vector.load %arg9[%c17, %c0_30] : memref<32x64xbf16, #tpu.memory_space<vmem>>, vector<9x64xbf16>
    %c18 = arith.constant 18 : index
    %c0_31 = arith.constant 0 : index
    %50 = vector.load %arg9[%c18, %c0_31] : memref<32x64xbf16, #tpu.memory_space<vmem>>, vector<9x64xbf16>
    %c19 = arith.constant 19 : index
    %c0_32 = arith.constant 0 : index
    %51 = vector.load %arg9[%c19, %c0_32] : memref<32x64xbf16, #tpu.memory_space<vmem>>, vector<9x64xbf16>
    %c20 = arith.constant 20 : index
    %c0_33 = arith.constant 0 : index
    %52 = vector.load %arg9[%c20, %c0_33] : memref<32x64xbf16, #tpu.memory_space<vmem>>, vector<9x64xbf16>
    %53 = tpu.concatenate %45, %46, %47, %48, %38, %49, %50, %51, %52 in 1 : vector<9x64xbf16>, vector<9x64xbf16>, vector<9x64xbf16>, vector<9x64xbf16>, vector<9x64xbf16>, vector<9x64xbf16>, vector<9x64xbf16>, vector<9x64xbf16>, vector<9x64xbf16> -> vector<9x576xbf16>
    %c0_34 = arith.constant 0 : index
    %c0_35 = arith.constant 0 : index
    %54 = vector.load %arg6[%c0_34, %c0_35] : memref<576x256xbf16, #tpu.memory_space<vmem>>, vector<576x256xbf16>
    %cst_36 = arith.constant dense<0.000000e+00> : vector<9x256xf32>
    %55 = tpu.matmul %53, %54, %cst_36 {dimension_numbers = #tpu.dot_dimension_numbers<[1], [0], [0], [1], [0, 0, 1, 1], [], []>} : vector<9x576xbf16>, vector<576x256xbf16>, vector<9x256xf32> -> vector<9x256xf32>
    %c0_37 = arith.constant 0 : index
    %c0_38 = arith.constant 0 : index
    %56 = vector.load %arg7[%c0_37, %c0_38] : memref<1x256xf32, #tpu.memory_space<vmem>>, vector<1x256xf32>
    %57 = vector.broadcast %56 : vector<1x256xf32> to vector<9x256xf32>
    %58 = arith.addf %55, %57 : vector<9x256xf32>
    %59 = tpu.concatenate %44, %58 in 1 : vector<9x256xf32>, vector<9x256xf32> -> vector<9x512xf32>
    %cst_39 = arith.constant 0.000000e+00 : f32
    %60 = vector.broadcast %cst_39 : f32 to vector<9x512xf32>
    %61 = arith.maximumf %59, %60 : vector<9x512xf32>
    %62 = arith.truncf %61 : vector<9x512xf32> to vector<9x512xbf16>
    %c0_40 = arith.constant 0 : index
    %c0_41 = arith.constant 0 : index
    %c0_42 = arith.constant 0 : index
    %63 = vector.load %arg8[%c0_40, %c0_41, %c0_42] : memref<1x9x512xbf16, #tpu.memory_space<vmem>>, vector<1x9x512xbf16>
    %64 = vector.shape_cast %63 : vector<1x9x512xbf16> to vector<9x512xbf16>
    %65 = vector.shape_cast %62 : vector<9x512xbf16> to vector<1x9x512xbf16>
    tpu.vector_store %arg8[%c0_40, %c0_41, %c0_42], %65 {strides = array<i32>} : memref<1x9x512xbf16, #tpu.memory_space<vmem>>, vector<1x9x512xbf16>,
    return
  }
  func.func @transform_0(%arg0: i32) -> (i32, i32, i32) {
    %c0_i32 = arith.constant 0 : i32
    %c0_i32_0 = arith.constant 0 : i32
    %c0_i32_1 = arith.constant 0 : i32
    return %arg0, %c0_i32, %c0_i32_0 : i32, i32, i32
  }
  func.func @transform_1(%arg0: i32) -> (i32, i32) {
    %c0_i32 = arith.constant 0 : i32
    %c0_i32_0 = arith.constant 0 : i32
    %c0_i32_1 = arith.constant 0 : i32
    return %c0_i32, %c0_i32_0 : i32, i32
  }
  func.func @transform_2(%arg0: i32) -> (i32, i32) {
    %c0_i32 = arith.constant 0 : i32
    %c0_i32_0 = arith.constant 0 : i32
    %c0_i32_1 = arith.constant 0 : i32
    return %c0_i32, %c0_i32_0 : i32, i32
  }
  func.func @transform_3(%arg0: i32) -> (i32, i32) {
    %c0_i32 = arith.constant 0 : i32
    %c0_i32_0 = arith.constant 0 : i32
    %c0_i32_1 = arith.constant 0 : i32
    return %c0_i32, %c0_i32_0 : i32, i32
  }
  func.func @transform_4(%arg0: i32) -> (i32, i32) {
    %c0_i32 = arith.constant 0 : i32
    %c0_i32_0 = arith.constant 0 : i32
    %c0_i32_1 = arith.constant 0 : i32
    return %c0_i32, %c0_i32_0 : i32, i32
  }
  func.func @transform_5(%arg0: i32) -> (i32, i32) {
    %c0_i32 = arith.constant 0 : i32
    %c0_i32_0 = arith.constant 0 : i32
    %c0_i32_1 = arith.constant 0 : i32
    return %c0_i32, %c0_i32_0 : i32, i32
  }
  func.func @transform_6(%arg0: i32) -> (i32, i32) {
    %c0_i32 = arith.constant 0 : i32
    %c0_i32_0 = arith.constant 0 : i32
    %c0_i32_1 = arith.constant 0 : i32
    return %c0_i32, %c0_i32_0 : i32, i32
  }
  func.func @transform_7(%arg0: i32) -> (i32, i32, i32) {
    %c0_i32 = arith.constant 0 : i32
    %c0_i32_0 = arith.constant 0 : i32
    %c0_i32_1 = arith.constant 0 : i32
    return %arg0, %c0_i32, %c0_i32_0 : i32, i32, i32
  }
}

module attributes {stable_mosaic.version = 11 : i64} {
  func.func @_mm_bias_relu_kernel(%arg0: i32, %arg1: i32, %arg2: memref<16x512xbf16, #tpu.memory_space<vmem>>, %arg3: memref<512x512xbf16, #tpu.memory_space<vmem>>, %arg4: memref<1x512xf32, #tpu.memory_space<vmem>>, %arg5: memref<16x512xf32, #tpu.memory_space<vmem>>) attributes {dimension_semantics = [#tpu.dimension_semantics<parallel>, #tpu.dimension_semantics<parallel>], iteration_bounds = array<i64: 1, 2>, scalar_prefetch = 0 : i64, scratch_operands = 0 : i64, tpu.core_type = #tpu.core_type<tc>, window_params = [{transform_indices = @transform_0, window_bounds = array<i64: 16, 512>}, {transform_indices = @transform_1, window_bounds = array<i64: 512, 512>}, {transform_indices = @transform_2, window_bounds = array<i64: 1, 512>}, {transform_indices = @transform_3, window_bounds = array<i64: 16, 512>}]} {
    %c0 = arith.constant 0 : index
    %c0_0 = arith.constant 0 : index
    %0 = vector.load %arg2[%c0, %c0_0] : memref<16x512xbf16, #tpu.memory_space<vmem>>, vector<16x512xbf16>
    %c0_1 = arith.constant 0 : index
    %c0_2 = arith.constant 0 : index
    %1 = vector.load %arg3[%c0_1, %c0_2] : memref<512x512xbf16, #tpu.memory_space<vmem>>, vector<512x512xbf16>
    %cst = arith.constant dense<0.000000e+00> : vector<16x512xf32>
    %2 = tpu.matmul %0, %1, %cst {dimension_numbers = #tpu.dot_dimension_numbers<[1], [0], [0], [1], [0, 0, 1, 1], [], []>} : vector<16x512xbf16>, vector<512x512xbf16>, vector<16x512xf32> -> vector<16x512xf32>
    %c0_3 = arith.constant 0 : index
    %c0_4 = arith.constant 0 : index
    %3 = vector.load %arg4[%c0_3, %c0_4] : memref<1x512xf32, #tpu.memory_space<vmem>>, vector<1x512xf32>
    %4 = vector.broadcast %3 : vector<1x512xf32> to vector<16x512xf32>
    %5 = arith.addf %2, %4 : vector<16x512xf32>
    %cst_5 = arith.constant 0.000000e+00 : f32
    %6 = vector.broadcast %cst_5 : f32 to vector<16x512xf32>
    %7 = arith.maximumf %5, %6 : vector<16x512xf32>
    %c0_6 = arith.constant 0 : index
    %c0_7 = arith.constant 0 : index
    %8 = vector.load %arg5[%c0_6, %c0_7] : memref<16x512xf32, #tpu.memory_space<vmem>>, vector<16x512xf32>
    tpu.vector_store %arg5[%c0_6, %c0_7], %7 {strides = array<i32>} : memref<16x512xf32, #tpu.memory_space<vmem>>, vector<16x512xf32>,
    return
  }
  func.func @transform_0(%arg0: i32, %arg1: i32) -> (i32, i32) {
    %c0_i32 = arith.constant 0 : i32
    %c0_i32_0 = arith.constant 0 : i32
    return %arg0, %c0_i32 : i32, i32
  }
  func.func @transform_1(%arg0: i32, %arg1: i32) -> (i32, i32) {
    %c0_i32 = arith.constant 0 : i32
    %c0_i32_0 = arith.constant 0 : i32
    return %c0_i32, %arg1 : i32, i32
  }
  func.func @transform_2(%arg0: i32, %arg1: i32) -> (i32, i32) {
    %c0_i32 = arith.constant 0 : i32
    %c0_i32_0 = arith.constant 0 : i32
    return %c0_i32, %arg1 : i32, i32
  }
  func.func @transform_3(%arg0: i32, %arg1: i32) -> (i32, i32) {
    %c0_i32 = arith.constant 0 : i32
    return %arg0, %arg1 : i32, i32
  }
}

</mosaic_0001>

<bundles_post_ra>
// kernel: squeezenet_forward.5
= control target key start
LH: loop header
LB: loop body
LE: loop exit
PB: predicated region body
PF: predicated region fallthrough
CT: control target
= control target key end

     0   :  { %s1359_s12 = smov 0   ;;  %s1361_s13 = smov 0   ;;  %s1619_s0 = inlined_call_operand.vmem [shape: bf16[338,147], index: 0, kind: input, shape index: {}]   ;;  %s1620_s1 = inlined_call_operand.vmem [shape: bf16[147,128], index: 1, kind: input, shape index: {}]   ;;  %s1621_s2 = inlined_call_operand.vmem [shape: f32[1,128], index: 2, kind: input, shape index: {}]   ;;  %s1622_s3 = inlined_call_operand.vmem [shape: bf16[338,128], index: 3, kind: output, shape index: {}]  }
   0x1   :  { %s1363_s14 = smov 0   ;;  %s1365_s15 = smov 0  }
   0x2   :  { %s1367_s16 = smov 0  }
   0x3 LB: > { %s906_s17 = sadd.s32 4294967295, %s1304_s16   ;;  %s25_s18 = sadd.s32 1, %s1300_s15  ;;  %s1304_s16 = sphi %s1367_s16, %s13_s16   ;;  %s1300_s15 = sphi %s1365_s15, %s1632_s15   ;;  %s1296_s14 = sphi %s1363_s14, %s1631_s14   ;;  %s1292_s13 = sphi %s1361_s13, %s1630_s13   ;;  %s1288_s12 = sphi %s1359_s12, %s1629_s12  }
   0x4   : > { %p27_p0 = scmp.ge.s32.totalorder %s25_s18, 3  ;;  %s112_s19 = sadd.s32 1, %s1292_s13 }
   0x5   : > { %p122_p1 = scmp.ne.s32.totalorder %s1292_s13, %s1288_s12  ;;  %p123_p2 = scmp.eq.s32.totalorder %s906_s17, 2 }
   0x6   : > { %s1634_s18 = smov (%p27_p0, %s25_s18), 0  ;;  %p912_p4 = scmp.ge.s32.totalorder %s1304_s16, 1 }
   0x7   : > { %p1391_p3 = por %p123_p2, %p122_p1  ;;  %s107_s21 = ssub.s32 %s1300_s15, %s1634_s18 }
   0x8   : > { %p180_p5 = scmp.lt.s32.totalorder %s1304_s16, 4  ;;  %p110_p6 = scmp.eq.s32.totalorder %s107_s21, 0 }
   0xa   : > { %p181_p7 = pnand %p912_p4, %p180_p5 }
   0xb   : > { %s1400_s22 = scalar_select %p110_p6, %s1292_s13, %s112_s19  }
   0xc   : > { %184 = sbr.rel (%p181_p7) target bundleno = 294 (0x126), region = 32  ;;  %s1409_s27 = sshll.u32 (!%p181_p7), %s1296_s14, 4 }
   0xd   : > { %p222_p8 = scmp.lt.s32.totalorder (!%p181_p7), %s1409_s27, 42 }
  0x11   : > { %v1066_v0 = vld [vmem:[%s1620_s1 + $0x38] sm:$0xff]  ;;  %v280_v1 = vld [vmem:[%s1620_s1 + $0x48] sm:$0x3]  ;;  %vm439_vm0 = vcmask 1040384   ;;  %vm440_vm1 = vcmask 1041408   ;;  %v1065_v3 = vld [vmem:[%s1620_s1 + $0x30] sm:$0xff] }
  0x12   : > { %v394_v2 = vunpack.c.l.b16 %v280_v1  ;;  %446 = vmatpush.bf16.msra.mxu0 %v1066_v0  ;;  %1118 = vmatpush.bf16.msra.mxu2 %v1066_v0  ;;  %v1338_v4 = vmov 65535   ;;  %s223_s30 = scalar_select %p222_p8, %s1409_s27, 42  ;;  %v1064_v9 = vld [vmem:[%s1620_s1 + $0x28] sm:$0xff]  ;;  %v1067_v10 = vld [vmem:[%s1620_s1 + $0x40] sm:$0xff]  ;;  %vm414_vm2 = vcmask 154624   ;;  %v1062_v18 = vld [vmem:[%s1620_s1 + $0x18] sm:$0xff] }
  0x13   : > { %v441_v5 = vsel %vm439_vm0, 4294967295, %v1338_v4  ;;  %v1063_v14 = vld [vmem:[%s1620_s1 + $0x20] sm:$0xff]  ;;  %v1061_v19 = vld [vmem:[%s1620_s1 + $0x10] sm:$0xff]  ;;  %v1060_v20 = vld [vmem:[%s1620_s1 + $0x8] sm:$0xff]  ;;  %s1068_s9 = sshll.u32 (%p1391_p3), %s1296_s14, 6 }
  0x14   : > { %v404_v6 = vpack.c.b16 %v394_v2, %v394_v2  ;;  %v442_v7 = vsel %vm440_vm1, %v441_v5, 0  ;;  %s1042_s6 = sshll.u32 %s223_s30, 3  ;;  %v1059_v26 = vld [vmem:[%s1620_s1] sm:$0xff]  ;;  %s1521_s17 = scalar_lea.vmem (%p1391_p3), %s1622_s3, %s1068_s9  }
  0x15   : > { %s1425_s11 = scalar_lea.vmem %s1619_s0, %s1042_s6  ;;  %v1485_v4 = vld [vmem:[%s1621_s2] ss:$0 sm:$0xff]  ;;  %s213_s6 = sand.u32 1, %s1288_s12  }
  0x16   : > { %v444_v8 = vand.u32 %v442_v7, %v404_v6  ;;  %447 = vmatpush.bf16.msra.mxu0 %v1065_v3  ;;  %1119 = vmatpush.bf16.msra.mxu2 %v1065_v3  ;;  %v1043_v11 = vld [vmem:[%s1425_s11 + $0x4] sm:$0xf]  ;;  %v921_v12 = vld [vmem:[%s1425_s11 + $0x8] sm:$0xf0]  ;;  %v1053_v15 = vld [vmem:[%s1425_s11 + $0x54] sm:$0xf] }
  0x17   : > { %v924_v13 = vor.u32 %v1043_v11, %v921_v12  ;;  %v961_v16 = vld [vmem:[%s1425_s11 + $0x58] sm:$0xf0]  ;;  %v1045_v21 = vld [vmem:[%s1425_s11 + $0x14] sm:$0xf]  ;;  %v1055_v23 = vld [vmem:[%s1425_s11 + $0x64] sm:$0xf] }
  0x18   : > { %501 = vmatpush.bf16.msra.mxu1 %v444_v8  ;;  %1126 = vmatpush.bf16.msra.mxu3 %v444_v8  ;;  %v964_v17 = vor.u32 %v1053_v15, %v961_v16  ;;  %v929_v22 = vld [vmem:[%s1425_s11 + $0x18] sm:$0xf0]  ;;  %v969_v24 = vld [vmem:[%s1425_s11 + $0x68] sm:$0xf0]  ;;  %v919_v27 = vld [vmem:[%s1425_s11] sm:$0xf] }
  0x19   : > { %v932_v25 = vor.u32 %v1045_v21, %v929_v22  ;;  %v1044_v28 = vld [vmem:[%s1425_s11 + $0x4] sm:$0xf0]  ;;  %v951_v29 = vld [vmem:[%s1425_s11 + $0x40] sm:$0xf]  ;;  %v972_v31 = vor.u32 %v1055_v23, %v969_v24  ;;  %v1047_v34 = vld [vmem:[%s1425_s11 + $0x24] sm:$0xf] }
  0x1a   : > { %448 = vmatpush.bf16.msra.mxu0 %v1064_v9  ;;  %1120 = vmatpush.bf16.msra.mxu2 %v1064_v9  ;;  %v1052_v30 = vld [vmem:[%s1425_s11 + $0x44] sm:$0xf0]  ;;  %v920_v32 = vor.u32 %v1044_v28, %v919_v27  ;;  %v937_v35 = vld [vmem:[%s1425_s11 + $0x28] sm:$0xf0]  ;;  %v1057_v36 = vld [vmem:[%s1425_s11 + $0x74] sm:$0xf] }
  0x1b   : > { %v952_v33 = vor.u32 %v1052_v30, %v951_v29  ;;  %v977_v37 = vld [vmem:[%s1425_s11 + $0x78] sm:$0xf0]  ;;  %v940_v38 = vor.u32 %v1047_v34, %v937_v35  ;;  %v927_v39 = vld [vmem:[%s1425_s11 + $0x10] sm:$0xf]  ;;  %v1046_v40 = vld [vmem:[%s1425_s11 + $0x14] sm:$0xf0] }
  0x1c   : > { %502 = vmatpush.bf16.msra.mxu1 %v1067_v10  ;;  %1127 = vmatpush.bf16.msra.mxu3 %v1067_v10  ;;  %v959_v41 = vld [vmem:[%s1425_s11 + $0x50] sm:$0xf]  ;;  %v1054_v42 = vld [vmem:[%s1425_s11 + $0x54] sm:$0xf0]  ;;  %v980_v43 = vor.u32 %v1057_v36, %v977_v37  ;;  %v928_v44 = vor.u32 %v1046_v40, %v927_v39  ;;  %v1049_v46 = vld [vmem:[%s1425_s11 + $0x34] sm:$0xf] }
  0x1d   : > { %v960_v45 = vor.u32 %v1054_v42, %v959_v41  ;;  %v945_v47 = vld [vmem:[%s1425_s11 + $0x38] sm:$0xf0]  ;;  %v935_v49 = vld [vmem:[%s1425_s11 + $0x20] sm:$0xf]  ;;  %v1048_v50 = vld [vmem:[%s1425_s11 + $0x24] sm:$0xf0] }
  0x1e   : > { %449 = vmatpush.bf16.msra.mxu0 %v1063_v14  ;;  %1121 = vmatpush.bf16.msra.mxu2 %v1063_v14  ;;  %v948_v48 = vor.u32 %v1049_v46, %v945_v47  ;;  %v967_v51 = vld [vmem:[%s1425_s11 + $0x60] sm:$0xf]  ;;  %v1056_v52 = vld [vmem:[%s1425_s11 + $0x64] sm:$0xf0]  ;;  %v936_v53 = vor.u32 %v1048_v50, %v935_v49  ;;  %v1051_v55 = vld [vmem:[%s1425_s11 + $0x44] sm:$0xf] }
  0x1f   : > { %1017 = vmatmul.msk.bf16.vlgmr.msra.gmra.mxu1 %vm414_vm2, %v924_v13  ;;  %1022 = vmatmul.msk.bf16.vlgmr.msra.gmra.mxu3 %vm414_vm2, %v964_v17  ;;  %v968_v54 = vor.u32 %v1056_v52, %v967_v51  ;;  %v953_v56 = vld [vmem:[%s1425_s11 + $0x48] sm:$0xf0]  ;;  %v943_v58 = vld [vmem:[%s1425_s11 + $0x30] sm:$0xf]  ;;  %v1050_v59 = vld [vmem:[%s1425_s11 + $0x34] sm:$0xf0] }
  0x20   : > { %v956_v57 = vor.u32 %v1051_v55, %v953_v56  ;;  %v975_v60 = vld [vmem:[%s1425_s11 + $0x70] sm:$0xf]  ;;  %v1058_v61 = vld [vmem:[%s1425_s11 + $0x74] sm:$0xf0]  ;;  %v944_v62 = vor.u32 %v1050_v59, %v943_v58  ;;  %s913_s7 = sshll.u32 %s213_s6, 6  ;;  %s600_s12 = ssub.s32 (%p1391_p3), 43, %s1409_s27 }
  0x21   : > { %v976_v63 = vor.u32 %v1058_v61, %v975_v60  ;;  %s1490_s8 = scalar_lea.vmem [#allocation2], %s913_s7   ;;  %p601_p9 = scmp.lt.s32.totalorder (%p1391_p3), %s600_s12, 16 }
  0x22   : > { %450 = vmatpush.bf16.msra.mxu0 %v1062_v18  ;;  %1122 = vmatpush.bf16.msra.mxu2 %v1062_v18 }
  0x26   : > { %451 = vmatpush.bf16.msra.mxu0 %v1061_v19  ;;  %1123 = vmatpush.bf16.msra.mxu2 %v1061_v19 }
  0x2a   : > { %452 = vmatpush.bf16.msra.mxu0 %v1060_v20  ;;  %1124 = vmatpush.bf16.msra.mxu2 %v1060_v20 }
  0x2e   : > { %453 = vmatpush.bf16.msra.mxu0 %v1059_v26  ;;  %1125 = vmatpush.bf16.msra.mxu2 %v1059_v26 }
  0x2f   : > { %1018 = vmatmul.msk.bf16.gmra.mxu1 %vm414_vm2, %v932_v25  ;;  %1023 = vmatmul.msk.bf16.gmra.mxu3 %vm414_vm2, %v972_v31 }
  0x31   : > { %454 = vmatmul.bf16.vlgmr.msra.gmra.mxu0 %v920_v32  ;;  %474 = vmatmul.bf16.vlgmr.msra.gmra.mxu2 %v952_v33 }
  0x3f   : > { %1019 = vmatmul.msk.bf16.gmra.mxu1 %vm414_vm2, %v940_v38  ;;  %1024 = vmatmul.msk.bf16.gmra.mxu3 %vm414_vm2, %v980_v43 }
  0x41   : > { %459 = vmatmul.bf16.gmra.mxu0 %v928_v44  ;;  %479 = vmatmul.bf16.gmra.mxu2 %v960_v45 }
  0x4f   : > { %1020 = vmatmul.msk.bf16.gmra.mxu1 %vm414_vm2, %v948_v48 }
  0x51   : > { %464 = vmatmul.bf16.gmra.mxu0 %v936_v53  ;;  %484 = vmatmul.bf16.gmra.mxu2 %v968_v54 }
  0x5f   : > { %1021 = vmatmul.msk.bf16.gmra.mxu1 %vm414_vm2, %v956_v57 }
  0x61   : > { %469 = vmatmul.bf16.gmra.mxu0 %v944_v62  ;;  %489 = vmatmul.bf16.gmra.mxu2 %v976_v63 }
  0x9c   : > { %v504_v0 = vpop.f32.mrf.mxu1 }
  0xa2   : > { %v529_v17 = vpop.f32.mrf.mxu3 }
  0xa4   : > { %v506_v1 = vpop.f32.mrf.mxu1 }
  0xaa   : > { %v531_v25 = vpop.f32.mrf.mxu3 }
  0xac   : > { %v509_v2 = vpop.f32.mrf.mxu1 }
  0xae   : > { %v455_v3 = vpop.f32.mrf.mxu0 }
  0xaf   : > { %v456_v5 = vadd.f32 %v1485_v4, %v455_v3 }
  0xb1   : > { %v505_v9 = vadd.f32 %v504_v0, %v456_v5 }
  0xb2   : > { %v534_v37 = vpop.f32.mrf.mxu3 }
  0xb3   : > { %v544_v12 = vmax.f32 %v505_v9, 0.0 }
  0xb4   : > { %v511_v6 = vpop.f32.mrf.mxu1  ;;  %v475_v7 = vpop.f32.mrf.mxu2 }
  0xb5   : > { %v476_v58 = vadd.f32 %v1485_v4, %v475_v7 }
  0xb6   : > { %v457_v8 = vpop.f32.mrf.mxu0 }
  0xb7   : > { %v458_v10 = vadd.f32 %v1485_v4, %v457_v8 }
  0xb9   : > { %v507_v11 = vadd.f32 %v506_v1, %v458_v10 }
  0xba   : > { %v536_v51 = vpop.f32.mrf.mxu3 }
  0xbb   : > { %v545_v13 = vmax.f32 %v507_v11, 0.0 }
  0xbc   : > { %v514_v14 = vpop.f32.mrf.mxu1  ;;  %v477_v16 = vpop.f32.mrf.mxu2 }
  0xbd   : > { %v1074_v15 = vpack.c.bf16 %v545_v13, %v544_v12  ;;  %v478_v60 = vadd.f32 %v1485_v4, %v477_v16 }
  0xbe   : > { %v460_v18 = vpop.f32.mrf.mxu0 }
  0xbf   : > { %1075 = vst [vmem:[%s1490_s8] sm:$0xff] %v1074_v15   ;;  %v461_v19 = vadd.f32 %v1485_v4, %v460_v18 }
  0xc1   : > { %v510_v23 = vadd.f32 %v509_v2, %v461_v19 }
  0xc2   : > { %v539_v5 = vpop.f32.mrf.mxu3 }
  0xc3   : > { %v546_v28 = vmax.f32 %v510_v23, 0.0 }
  0xc4   : > { %v516_v20 = vpop.f32.mrf.mxu1  ;;  %v480_v21 = vpop.f32.mrf.mxu2 }
  0xc5   : > { %v481_v27 = vadd.f32 %v1485_v4, %v480_v21 }
  0xc6   : > { %v462_v22 = vpop.f32.mrf.mxu0 }
  0xc7   : > { %v463_v24 = vadd.f32 %v1485_v4, %v462_v22  ;;  %v530_v33 = vadd.f32 %v529_v17, %v481_v27 }
  0xc9   : > { %v512_v26 = vadd.f32 %v511_v6, %v463_v24  ;;  %v554_v38 = vmax.f32 %v530_v33, 0.0 }
  0xca   : > { %v541_v21 = vpop.f32.mrf.mxu3 }
  0xcb   : > { %v547_v29 = vmax.f32 %v512_v26, 0.0 }
  0xcc   : > { %v519_v30 = vpop.f32.mrf.mxu1  ;;  %v482_v32 = vpop.f32.mrf.mxu2 }
  0xcd   : > { %v1079_v31 = vpack.c.bf16 %v547_v29, %v546_v28  ;;  %v483_v34 = vadd.f32 %v1485_v4, %v482_v32 }
  0xce   : > { %v465_v35 = vpop.f32.mrf.mxu0 }
  0xcf   : > { %1111 = vst [vmem:[%s1490_s8 + $0x8] sm:$0xff] %v1079_v31   ;;  %v532_v36 = vadd.f32 %v531_v25, %v483_v34  ;;  %v466_v40 = vadd.f32 %v1485_v4, %v465_v35 }
  0xd1   : > { %v555_v39 = vmax.f32 %v532_v36, 0.0  ;;  %v515_v45 = vadd.f32 %v514_v14, %v466_v40 }
  0xd3   : > { %v1099_v42 = vpack.c.bf16 %v555_v39, %v554_v38  ;;  %v548_v49 = vmax.f32 %v515_v45, 0.0 }
  0xd4   : > { %v521_v41 = vpop.f32.mrf.mxu1  ;;  %v485_v43 = vpop.f32.mrf.mxu2 }
  0xd5   : > { %1115 = vst [vmem:[%s1490_s8 + $0x28] sm:$0xff] %v1099_v42   ;;  %v486_v48 = vadd.f32 %v1485_v4, %v485_v43 }
  0xd6   : > { %v467_v44 = vpop.f32.mrf.mxu0 }
  0xd7   : > { %v468_v46 = vadd.f32 %v1485_v4, %v467_v44  ;;  %v535_v55 = vadd.f32 %v534_v37, %v486_v48 }
  0xd9   : > { %v517_v47 = vadd.f32 %v516_v20, %v468_v46  ;;  %v556_v61 = vmax.f32 %v535_v55, 0.0 }
  0xdb   : > { %v549_v50 = vmax.f32 %v517_v47, 0.0 }
  0xdc   : > { %v524_v52 = vpop.f32.mrf.mxu1  ;;  %v487_v54 = vpop.f32.mrf.mxu2 }
  0xdd   : > { %v1084_v53 = vpack.c.bf16 %v549_v50, %v548_v49  ;;  %v488_v56 = vadd.f32 %v1485_v4, %v487_v54  ;;  %v525_v62 = vadd.f32 %v524_v52, %v476_v58 }
  0xde   : > { %v470_v57 = vpop.f32.mrf.mxu0 }
  0xdf   : > { %1112 = vst [vmem:[%s1490_s8 + $0x10] sm:$0xff] %v1084_v53   ;;  %v537_v59 = vadd.f32 %v536_v51, %v488_v56  ;;  %v471_v0 = vadd.f32 %v1485_v4, %v470_v57  ;;  %v552_v8 = vmax.f32 %v525_v62, 0.0 }
  0xe1   : > { %v557_v63 = vmax.f32 %v537_v59, 0.0  ;;  %v520_v7 = vadd.f32 %v519_v30, %v471_v0 }
  0xe3   : > { %v1104_v2 = vpack.c.bf16 %v557_v63, %v556_v61  ;;  %v550_v15 = vmax.f32 %v520_v7, 0.0 }
  0xe4   : > { %v526_v1 = vpop.f32.mrf.mxu1  ;;  %v490_v6 = vpop.f32.mrf.mxu2 }
  0xe5   : > { %v527_v3 = vadd.f32 %v526_v1, %v478_v60  ;;  %1116 = vst [vmem:[%s1490_s8 + $0x30] sm:$0xff] %v1104_v2   ;;  %v491_v14 = vadd.f32 %v1485_v4, %v490_v6 }
  0xe6   : > { %v472_v10 = vpop.f32.mrf.mxu0 }
  0xe7   : > { %v553_v9 = vmax.f32 %v527_v3, 0.0  ;;  %v473_v11 = vadd.f32 %v1485_v4, %v472_v10  ;;  %v540_v19 = vadd.f32 %v539_v5, %v491_v14 }
  0xe9   : > { %v1094_v12 = vpack.c.bf16 %v553_v9, %v552_v8  ;;  %v522_v13 = vadd.f32 %v521_v41, %v473_v11  ;;  %v558_v23 = vmax.f32 %v540_v19, 0.0 }
  0xeb   : > { %1114 = vst [vmem:[%s1490_s8 + $0x20] sm:$0xff] %v1094_v12   ;;  %v551_v16 = vmax.f32 %v522_v13, 0.0 }
  0xec   : > { %v492_v18 = vpop.f32.mrf.mxu2 }
  0xed   : > { %v1089_v17 = vpack.c.bf16 %v551_v16, %v550_v15  ;;  %v493_v20 = vadd.f32 %v1485_v4, %v492_v18 }
  0xef   : > { %1113 = vst [vmem:[%s1490_s8 + $0x18] sm:$0xff] %v1089_v17   ;;  %v542_v22 = vadd.f32 %v541_v21, %v493_v20 }
  0xf1   : > { %v559_v24 = vmax.f32 %v542_v22, 0.0  ;;  %598 = sbr.rel (!%p1391_p3) target bundleno = 294 (0x126), region = 36 }
  0xf3   : > { %v1109_v25 = vpack.c.bf16 %v559_v24, %v558_v23 }
  0xf5   : > { %1117 = vst [vmem:[%s1490_s8 + $0x38] sm:$0xff] %v1109_v25  }
  0xf6   : > { %s1636_s12 = smov (!%p601_p9, %s600_s12), 16 }
  0xf7   : > { %s1027_s19 = sshll.u32 %s1636_s12, 2 }
  0xf8   : > { %p1030_p10 = scmp.eq.s32.totalorder %s1027_s19, 0 }
  0xf9   : > { %s1527_s21 = sshrl.u32 (!%p1030_p10), %s1636_s12, 4 }
  0xfa   : > { %610 = sbr.rel (%p1030_p10) target bundleno = 294 (0x126), region = 40  ;;  %p1031_p11 = scmp.le.s32.totalorder (!%p1030_p10), %s1527_s21, 0 }
  0xff   : > { %836 = sbr.rel (%p1031_p11) target bundleno = 277 (0x115), region = 118  ;;  %s1624_s14 = smov (!%p1031_p11), %s1521_s17 }
 0x100   : > { %s1625_s20 = smov (!%p1031_p11), %s1490_s8  ;;  %s1536_s27 = smov (!%p1031_p11), 0  }
 0x101   : > { %s1538_s23 = smov (!%p1031_p11), 0  }
 0x104 LB: >> { %v627_v4 = vld [vmem:[%s1312_s20] sm:$0xf]  ;;  %v629_v26 = vld [vmem:[%s1312_s20 + $0x4] sm:$0xf]  ;;  %v631_v27 = vld [vmem:[%s1312_s20 + $0x8] sm:$0xf]  ;;  %s1320_s23 = sphi %s1538_s23, %s621_s23   ;;  %s1316_s27 = sphi %s1536_s27, %s1628_s27   ;;  %s1312_s20 = sphi %s1625_s20, %s1627_s20   ;;  %s1308_s14 = sphi %s1624_s14, %s1626_s14  }
 0x105   : >> { %628 = vst [vmem:[%s1308_s14] sm:$0xf] %v627_v4  ;;  %v633_v28 = vld [vmem:[%s1312_s20 + $0xc] sm:$0xf]  ;;  %s659_s24 = sadd.s32 1, %s1316_s27  ;;  %v635_v29 = vld [vmem:[%s1312_s20 + $0x10] sm:$0xf] }
 0x106   : >> { %630 = vst [vmem:[%s1308_s14 + $0x4] sm:$0xf] %v629_v26  ;;  %v637_v30 = vld [vmem:[%s1312_s20 + $0x14] sm:$0xf]  ;;  %p660_p12 = scmp.ge.s32.totalorder %s659_s24, %s1527_s21  ;;  %v639_v31 = vld [vmem:[%s1312_s20 + $0x18] sm:$0xf] }
 0x107   : >> { %632 = vst [vmem:[%s1308_s14 + $0x8] sm:$0xf] %v631_v27  ;;  %v641_v32 = vld [vmem:[%s1312_s20 + $0x1c] sm:$0xf]  ;;  %v643_v33 = vld [vmem:[%s1312_s20 + $0x20] sm:$0xf] }
 0x108   : >> { %634 = vst [vmem:[%s1308_s14 + $0xc] sm:$0xf] %v633_v28  ;;  %v645_v34 = vld [vmem:[%s1312_s20 + $0x24] sm:$0xf]  ;;  %s1638_s24 = smov (%p660_p12, %s659_s24), 0  ;;  %s621_s23 = sadd.s32 1, %s1320_s23  }
 0x109   : >> { %636 = vst [vmem:[%s1308_s14 + $0x10] sm:$0xf] %v635_v29  ;;  %v647_v35 = vld [vmem:[%s1312_s20 + $0x28] sm:$0xf]  ;;  %v649_v36 = vld [vmem:[%s1312_s20 + $0x2c] sm:$0xf]  ;;  %p620_p13 = scmp.ge.s32.totalorder %s621_s23, %s1527_s21  ;;  %s1628_s27 = smov %s1638_s24 }
 0x10a   : >> { %638 = vst [vmem:[%s1308_s14 + $0x14] sm:$0xf] %v637_v30  ;;  %s1032_s25 = sshll.u32 %s1638_s24, 6  ;;  %v651_v37 = vld [vmem:[%s1312_s20 + $0x30] sm:$0xf] }
 0x10b   : >> { %640 = vst [vmem:[%s1308_s14 + $0x18] sm:$0xf] %v639_v31  ;;  %s664_s26 = scalar_lea.vmem %s1490_s8, %s1032_s25 [#allocation2]   ;;  %s665_s28 = scalar_lea.vmem %s1521_s17, %s1032_s25   ;;  %v653_v38 = vld [vmem:[%s1312_s20 + $0x34] sm:$0xf]  ;;  %v655_v39 = vld [vmem:[%s1312_s20 + $0x38] sm:$0xf] }
 0x10c   : >> { %642 = vst [vmem:[%s1308_s14 + $0x1c] sm:$0xf] %v641_v32  ;;  %v657_v40 = vld [vmem:[%s1312_s20 + $0x3c] sm:$0xf]  ;;  %s1627_s20 = smov %s664_s26 }
 0x10d   : >> { %644 = vst [vmem:[%s1308_s14 + $0x20] sm:$0xf] %v643_v33 }
 0x10e   : >> { %646 = vst [vmem:[%s1308_s14 + $0x24] sm:$0xf] %v645_v34 }
 0x10f   : >> { %648 = vst [vmem:[%s1308_s14 + $0x28] sm:$0xf] %v647_v35 }
 0x110   : >> { %650 = vst [vmem:[%s1308_s14 + $0x2c] sm:$0xf] %v649_v36  ;;  %623 = sbr.rel (!%p620_p13) target bundleno = 260 (0x104), region = 124 }
 0x111   : >> { %652 = vst [vmem:[%s1308_s14 + $0x30] sm:$0xf] %v651_v37 }
 0x112   : >> { %654 = vst [vmem:[%s1308_s14 + $0x34] sm:$0xf] %v653_v38 }
 0x113   : >> { %656 = vst [vmem:[%s1308_s14 + $0x38] sm:$0xf] %v655_v39 }
 0x114   : >> { %658 = vst [vmem:[%s1308_s14 + $0x3c] sm:$0xf] %v657_v40  ;;  %s1626_s14 = smov %s665_s28 }
 0x115 PF: > { %s1596_s29 = sand.u32 15, %s1636_s12   ;;  %s1069_s30 = sshll.u32 %s1527_s21, 6 }
 0x116   : > { %s670_s4 = scalar_lea.vmem %s1490_s8, %s1069_s30 [#allocation2]   ;;  %s672_s5 = scalar_lea.vmem %s1521_s17, %s1069_s30  }
 0x117   : > { %p1037_p0 = scmp.le.s32.totalorder %s1596_s29, 0 }
 0x118   : > { %s1322_s6 = smov (!%p1037_p0), %s672_s5   ;;  %s1326_s7 = smov (!%p1037_p0), %s670_s4  }
 0x119   : > { %850 = sbr.rel (%p1037_p0) target bundleno = 294 (0x126), region = 129  ;;  %s1330_s9 = smov (!%p1037_p0), 0  }
 0x11a   : > { %s1334_s10 = smov (!%p1037_p0), 0  }
 0x11e LB: >> { %v682_v41 = vld [vmem:[%s1328_s7] sm:$0xf]  ;;  %s684_s12 = sadd.s32 1, %s1332_s9  ;;  %s676_s10 = sadd.s32 1, %s1336_s10   ;;  %s1336_s10 = sphi %s1334_s10, %s676_s10   ;;  %s1332_s9 = sphi %s1330_s9, %s1331_s9   ;;  %s1328_s7 = sphi %s1326_s7, %s689_s7   ;;  %s1324_s6 = sphi %s1322_s6, %s690_s6  }
 0x11f   : >> { %683 = vst [vmem:[%s1324_s6] sm:$0xf] %v682_v41  ;;  %p685_p1 = scmp.ge.s32.totalorder %s684_s12, %s1596_s29  ;;  %p675_p2 = scmp.ge.s32.totalorder %s676_s10, %s1596_s29 }
 0x121   : >> { %s1640_s12 = smov (%p685_p1, %s684_s12), 0  ;;  %678 = sbr.rel (!%p675_p2) target bundleno = 286 (0x11e), region = 135 }
 0x122   : >> { %s1038_s8 = sshll.u32 %s1640_s12, 2  ;;  %s1331_s9 = smov %s1640_s12  }
 0x123   : >> { %s689_s7 = scalar_lea.vmem %s670_s4, %s1038_s8 [#allocation2]   ;;  %s690_s6 = scalar_lea.vmem %s672_s5, %s1038_s8  }
 0x126 PF: > { %s13_s16 = sadd.s32 1, %s1304_s16   ;;  %s1629_s12 = smov %s1292_s13 }
 0x127   : > { %p10_p3 = scmp.ge.s32.totalorder %s13_s16, 5   ;;  %s1630_s13 = smov %s1400_s22 }
 0x128   : > { %s1631_s14 = smov %s1300_s15  ;;  %s1632_s15 = smov %s1634_s18 }
 0x129   :  { %12 = sbr.rel (!%p10_p3) target bundleno = 3 (0x3), region = 146 }

// kernel: squeezenet_forward.6
= control target key start
LH: loop header
LB: loop body
LE: loop exit
PB: predicated region body
PF: predicated region fallthrough
CT: control target
= control target key end

     0   :  { %s5078_s0 = inlined_call_operand.vmem [shape: bf16[2,64,96], index: 0, kind: input, shape index: {}]   ;;  %s5079_s1 = inlined_call_operand.vmem [shape: bf16[96,16], index: 1, kind: input, shape index: {}]   ;;  %s5080_s2 = inlined_call_operand.vmem [shape: f32[1,16], index: 2, kind: input, shape index: {}]   ;;  %s5081_s3 = inlined_call_operand.vmem [shape: bf16[16,64], index: 3, kind: input, shape index: {}]   ;;  %s5082_s4 = inlined_call_operand.vmem [shape: f32[1,64], index: 4, kind: input, shape index: {}]   ;;  %s5083_s5 = inlined_call_operand.vmem [shape: bf16[144,64], index: 5, kind: input, shape index: {}]   ;;  %s5084_s6 = inlined_call_operand.vmem [shape: f32[1,64], index: 6, kind: input, shape index: {}]   ;;  %s5085_s7 = inlined_call_operand.vmem [shape: bf16[128,16], index: 7, kind: input, shape index: {}]   ;;  %s5086_s8 = inlined_call_operand.vmem [shape: f32[1,16], index: 8, kind: input, shape index: {}]   ;;  %s5087_s9 = inlined_call_operand.vmem [shape: bf16[16,64], index: 9, kind: input, shape index: {}]   ;;  %s5088_s10 = inlined_call_operand.vmem [shape: f32[1,64], index: 10, kind: input, shape index: {}]   ;;  %s5089_s11 = inlined_call_operand.vmem [shape: bf16[144,64], index: 11, kind: input, shape index: {}]   ;;  %s5090_s12 = inlined_call_operand.vmem [shape: f32[1,64], index: 12, kind: input, shape index: {}]   ;;  %s5091_s13 = inlined_call_operand.vmem [shape: bf16[128,32], index: 13, kind: input, shape index: {}]   ;;  %s5092_s14 = inlined_call_operand.vmem [shape: f32[1,32], index: 14, kind: input, shape index: {}]   ;;  %s5093_s15 = inlined_call_operand.vmem [shape: bf16[32,128], index: 15, kind: input, shape index: {}]   ;;  %s5094_s16 = inlined_call_operand.vmem [shape: f32[1,128], index: 16, kind: input, shape index: {}]   ;;  %s5095_s17 = inlined_call_operand.vmem [shape: bf16[288,128], index: 17, kind: input, shape index: {}]   ;;  %s5096_s18 = inlined_call_operand.vmem [shape: f32[1,128], index: 18, kind: input, shape index: {}]   ;;  %s5097_s19 = inlined_call_operand.vmem [shape: bf16[2,64,256], index: 19, kind: output, shape index: {}]  }
   0x1   :  { %5114 = sst [smem:[#allocation3_spill]] %s5078_s0  ;;  %s3964_s0 = smov 0  }
   0x2   :  { %5115 = sst [smem:[#allocation4_spill]] %s5079_s1 }
   0x3   :  { %5116 = sst [smem:[#allocation5_spill]] %s5080_s2 }
   0x4   :  { %5117 = sst [smem:[#allocation6_spill]] %s5081_s3 }
   0x5 LB: > { %s3330_s30 = sadd.s32 4294967295, %s3854_s0   ;;  %p3334_p0 = scmp.ge.s32.totalorder %s3854_s0, 1  ;;  %s3854_s0 = sphi %s3964_s0, %s29_s0  }
   0x6   : > { %p537_p1 = scmp.lt.s32.totalorder %s3854_s0, 3 }
   0x8   : > { %p538_p2 = pnand %p3334_p0, %p537_p1 }
   0x9   : > { %s5118_s1 = sld [smem:[#allocation4_spill]] (!%p538_p2)  ;;  %p593_p3 = scmp.lt.s32.totalorder (!%p538_p2), %s3330_s30, 1 }
   0xa   : > { %541 = sbr.rel (%p538_p2) target bundleno = 1709 (0x6ad), region = 96  ;;  %s5119_s2 = sld [smem:[#allocation3_spill]] (!%p538_p2) }
   0xb   : > { %s5120_s3 = sld [smem:[#allocation6_spill]] (!%p538_p2)  ;;  %s3857_s29 = smov (!%p538_p2), 64  }
   0xc   : > { %s3858_s20 = smov (!%p538_p2), 80   ;;  %s5105_s21 = smov (!%p538_p2), 96  }
   0xd   : > { %s3860_s22 = smov (!%p538_p2), 48   ;;  %s5165_s27 = smov (!%p538_p2), 96  }
   0xf   : > { %v3644_v0 = vld [vmem:[%s5118_s1 + $0x28] sm:$0xff]  ;;  %v3643_v1 = vld [vmem:[%s5118_s1 + $0x20] sm:$0xff]  ;;  %v3642_v2 = vld [vmem:[%s5118_s1 + $0x18] sm:$0xff]  ;;  %s5253_s30 = smov (!%p593_p3, %s3330_s30), 1  ;;  %vm5100_vm0 = vcmask 785408   ;;  %v604_v10 = vlaneseq  ;;  %vm5099_vm1 = vcmask 257024  }
  0x10   : > { %817 = vmatpush.bf16.msra.mxu0 %v3644_v0  ;;  %v3641_v3 = vld [vmem:[%s5118_s1 + $0x10] sm:$0xff]  ;;  %v3640_v4 = vld [vmem:[%s5118_s1 + $0x8] sm:$0xff]  ;;  %s3633_s28 = sshll.u32 %s5253_s30, 5  ;;  %v3639_v5 = vld [vmem:[%s5118_s1] sm:$0xff]  ;;  %v3856_v21 = vmov 0   ;;  %vm5110_vm13 = vcmask 125952  }
  0x11   : > { %s597_s23 = scalar_lea.vmem %s5119_s2, %s3633_s28  ;;  %v4000_v11 = vshrl.u32 %v604_v10, 7  ;;  %v3645_v17 = vld [vmem:[%s5120_s3] sm:$0xff]  ;;  %719 = vst.msk [vmem:[#allocation2 + $0x4] sm:$0xf] %vm5099_vm1, %v3856_v21  ;;  %s5121_s28 = sld [smem:[#allocation5_spill]] }
  0x12   : > { %v3635_v6 = vld [vmem:[%s597_s23] sm:$0xff]  ;;  %v3636_v7 = vld [vmem:[%s597_s23 + $0x8] sm:$0xff]  ;;  %v3637_v8 = vld [vmem:[%s597_s23 + $0x10] sm:$0xff]  ;;  %945 = vmatpush.bf16.msra.mxu1 %v3645_v17  ;;  %720 = vst.msk [vmem:[#allocation2 + $0x28] sm:$0xf] %vm5099_vm1, %v3856_v21  ;;  %3782 = vmatpush.bf16.msra.mxu3 %v3645_v17  ;;  %s3861_s2 = smov 16  }
  0x13   : > { %v3638_v9 = vld [vmem:[%s597_s23 + $0x18] sm:$0xff]  ;;  %v613_v12 = vcvt.s32.f32 %v4000_v11  ;;  %v606_v14 = vadd.s32 8, %v4000_v11  ;;  %v607_v20 = vadd.s32 16, %v4000_v11  ;;  %721 = vst.msk [vmem:[#allocation2 + $0x2c] sm:$0xf] %vm5099_vm1, %v3856_v21  ;;  %v608_v28 = vadd.s32 24, %v4000_v11 }
  0x14   : > { %818 = vmatpush.bf16.msra.mxu0 %v3643_v1  ;;  %718 = vst.msk [vmem:[#allocation2] sm:$0xf] %vm5099_vm1, %v3856_v21  ;;  %v4019_v33 = vadd.s32 32, %v4000_v11  ;;  %v4032_v47 = vadd.s32 40, %v4000_v11  ;;  %v4047_v1 = vadd.s32 48, %v4000_v11  ;;  %s5107_s23 = smov 32  }
  0x15   : > { %v621_v13 = vadd.f32 0.5, %v613_v12  ;;  %v614_v16 = vcvt.s32.f32 %v606_v14  ;;  %v615_v24 = vcvt.s32.f32 %v607_v20  ;;  %v616_v31 = vcvt.s32.f32 %v608_v28  ;;  %s5103_s3 = smov 112  }
  0x16   : > { %v617_v41 = vcvt.s32.f32 %v4019_v33  ;;  %v618_v55 = vcvt.s32.f32 %v4032_v47  ;;  %vm5101_vm1 = vsmask.f32 3328 }
  0x17   : > { %v629_v15 = vmul.f32 0.125, %v621_v13  ;;  %v622_v19 = vadd.f32 0.5, %v614_v16  ;;  %v623_v27 = vadd.f32 0.5, %v615_v24  ;;  %v4016_v32 = vld [vmem:[%s5121_s28] ss:$0 sm:$0xff]  ;;  %v624_v37 = vadd.f32 0.5, %v616_v31 }
  0x18   : > { %819 = vmatpush.bf16.msra.mxu0 %v3642_v2  ;;  %v625_v46 = vadd.f32 0.5, %v617_v41  ;;  %v626_v60 = vadd.f32 0.5, %v618_v55  ;;  %v619_v13 = vcvt.s32.f32 %v4047_v1 }
  0x19   : > { %v637_v18 = vfloor.f32 %v629_v15  ;;  %v630_v23 = vmul.f32 0.125, %v622_v19  ;;  %v631_v30 = vmul.f32 0.125, %v623_v27  ;;  %v632_v43 = vmul.f32 0.125, %v624_v37 }
  0x1a   : > { %v633_v54 = vmul.f32 0.125, %v625_v46 }
  0x1b   : > { %v645_v22 = vmul.f32 8.0, %v637_v18  ;;  %v638_v26 = vfloor.f32 %v630_v23  ;;  %vm661_vm2 = vcmp.ge.f32.partialorder %v637_v18, 1.0  ;;  %vm669_vm3 = vcmp.le.f32.partialorder %v637_v18, 6.0 }
  0x1c   : > { %820 = vmatpush.bf16.msra.mxu0 %v3641_v3  ;;  %vm677_vm4 = vmand %vm661_vm2, %vm669_vm3  ;;  %v639_v36 = vfloor.f32 %v631_v30  ;;  %v640_v50 = vfloor.f32 %v632_v43  ;;  %v641_v59 = vfloor.f32 %v633_v54  ;;  %v3699_v3 = vld [vmem:[%s5095_s17 + $0x80] sm:$0xff] }
  0x1d   : > { %v653_v25 = vsub.f32 %v613_v12, %v645_v22  ;;  %v646_v29 = vmul.f32 8.0, %v638_v26  ;;  %vm662_vm8 = vcmp.ge.f32.partialorder %v638_v26, 1.0  ;;  %vm670_vm9 = vcmp.le.f32.partialorder %v638_v26, 6.0 }
  0x1e   : > { %vm678_vm11 = vmand %vm662_vm8, %vm670_vm9  ;;  %v647_v42 = vmul.f32 8.0, %v639_v36  ;;  %vm663_vm2 = vcmp.ge.f32.partialorder %v639_v36, 1.0  ;;  %vm671_vm3 = vcmp.le.f32.partialorder %v639_v36, 6.0  ;;  %v648_v56 = vmul.f32 8.0, %v640_v50 }
  0x1f   : > { %vm685_vm5 = vcmp.ge.f32.partialorder %v653_v25, 1.0  ;;  %vm701_vm7 = vcmp.le.f32.partialorder %v653_v25, 6.0  ;;  %v654_v35 = vsub.f32 %v614_v16, %v646_v29  ;;  %vm5102_vm9 = vcmask 130048  }
  0x20   : > { %821 = vmatpush.bf16.msra.mxu0 %v3640_v4  ;;  %vm693_vm6 = vmand %vm677_vm4, %vm685_vm5  ;;  %v655_v49 = vsub.f32 %v615_v24, %v647_v42  ;;  %v656_v0 = vsub.f32 %v616_v31, %v648_v56  ;;  %v4072_v24 = vadd.s32 56, %v4000_v11  ;;  %v627_v29 = vadd.f32 0.5, %v619_v13  ;;  %v977_v11 = vld [vmem:[#allocation2 + $0x4] sm:$0x8] }
  0x21   : > { %vm4022_vm10 = vmand %vm693_vm6, %vm701_vm7  ;;  %vm686_vm12 = vcmp.ge.f32.partialorder %v654_v35, 1.0  ;;  %vm702_vm15 = vcmp.le.f32.partialorder %v654_v35, 6.0 }
  0x22   : > { %vm694_vm14 = vmand %vm678_vm11, %vm686_vm12  ;;  %vm687_vm6 = vcmp.ge.f32.partialorder %v655_v49, 1.0  ;;  %vm703_vm8 = vcmp.le.f32.partialorder %v655_v49, 6.0  ;;  %vm664_vm11 = vcmp.ge.f32.partialorder %v640_v50, 1.0  ;;  %vm672_vm12 = vcmp.le.f32.partialorder %v640_v50, 6.0 }
  0x23   : > { %vm4036_vm4 = vmand %vm694_vm14, %vm702_vm15 }
  0x24   : > { %822 = vmatpush.bf16.msra.mxu0 %v3639_v5  ;;  %vm679_vm5 = vmand %vm663_vm2, %vm671_vm3  ;;  %v4054_v5 = vld [vmem:[#allocation2 + $0x4] sm:$0xf]  ;;  %vm688_vm2 = vcmp.ge.f32.partialorder %v656_v0, 1.0  ;;  %vm704_vm3 = vcmp.le.f32.partialorder %v656_v0, 6.0 }
  0x25   : > { %vm695_vm7 = vmand %vm679_vm5, %vm687_vm6  ;;  %v993_v15 = vunpack.c.l.b16 %v4054_v5  ;;  %vm665_vm6 = vcmp.ge.f32.partialorder %v641_v59, 1.0 }
  0x26   : > { %vm4050_vm14 = vmand %vm695_vm7, %vm703_vm8  ;;  %vm673_vm7 = vcmp.le.f32.partialorder %v641_v59, 6.0 }
  0x27   : > { %3379 = vmatmul.msk.bf16.vlgmr.msra.gmra.mxu0 %vm5100_vm0, %v3635_v6  ;;  %vm680_vm15 = vmand %vm664_vm11, %vm672_vm12 }
  0x28   : > { %vm4061_vm5 = vmand %vm680_vm15, %vm688_vm2 }
  0x29   : > { %vm4086_vm8 = vmand %vm4061_vm5, %vm704_vm3 }
  0x2a   : > { %vm681_vm11 = vmand %vm665_vm6, %vm673_vm7 }
  0x37   : > { %3380 = vmatmul.msk.bf16.gmra.mxu0 %vm5100_vm0, %v3636_v7  ;;  %v649_v7 = vmul.f32 8.0, %v641_v59 }
  0x39   : > { %v657_v22 = vsub.f32 %v617_v41, %v649_v7  ;;  %v635_v41 = vmul.f32 0.125, %v627_v29 }
  0x3b   : > { %vm689_vm12 = vcmp.ge.f32.partialorder %v657_v22, 1.0  ;;  %vm705_vm15 = vcmp.le.f32.partialorder %v657_v22, 6.0 }
  0x3c   : > { %vm4110_vm2 = vmand %vm681_vm11, %vm689_vm12 }
  0x3d   : > { %vm4127_vm6 = vmand %vm4110_vm2, %vm705_vm15  ;;  %vm5109_vm2 = vcmask 1042432  }
  0x47   : > { %3381 = vmatmul.msk.bf16.gmra.mxu0 %vm5100_vm0, %v3637_v8  ;;  %v634_v8 = vmul.f32 0.125, %v626_v60 }
  0x49   : > { %v4069_v23 = vfloor.f32 %v634_v8 }
  0x4b   : > { %v650_v37 = vmul.f32 8.0, %v4069_v23  ;;  %vm666_vm3 = vcmp.ge.f32.partialorder %v4069_v23, 1.0  ;;  %vm674_vm5 = vcmp.le.f32.partialorder %v4069_v23, 6.0 }
  0x4c   : > { %vm682_vm7 = vmand %vm666_vm3, %vm674_vm5 }
  0x4d   : > { %v658_v50 = vsub.f32 %v618_v55, %v650_v37 }
  0x4f   : > { %vm690_vm11 = vcmp.ge.f32.partialorder %v658_v50, 1.0  ;;  %vm706_vm15 = vcmp.le.f32.partialorder %v658_v50, 6.0 }
  0x50   : > { %vm4147_vm12 = vmand %vm682_vm7, %vm690_vm11 }
  0x51   : > { %vm4163_vm7 = vmand %vm4147_vm12, %vm706_vm15 }
  0x57   : > { %3382 = vmatmul.msk.bf16.gmra.mxu0 %vm5100_vm0, %v3638_v9 }
  0xa4   : > { %v824_v34 = vpop.f32.mrf.mxu0 }
  0xa5   : > { %v825_v38 = vadd.f32 %v4016_v32, %v824_v34 }
  0xa7   : > { %v844_v40 = vmax.f32 %v825_v38, 0.0  ;;  %v620_v38 = vcvt.s32.f32 %v4072_v24 }
  0xa9   : > { %v868_v44 = vsel %vm4022_vm10, %v844_v40, 0.0  ;;  %v1081_v40 = vunpack.c.l.b16 %v977_v11  ;;  %v3654_v11 = vld [vmem:[%s5083_s5 + $0x40] sm:$0xff] }
  0xaa   : > { %v876_v45 = vpack.c.bf16 %v868_v44, %v868_v44  ;;  %1494 = vmatpush.bf16.msrb.mxu3 %v3654_v11 }
  0xac   : > { %885 = vst.msk [vmem:[#allocation2 + $0x8] sm:$0xf] %vm5110_vm13, %v876_v45  ;;  %v826_v48 = vpop.f32.mrf.mxu0  ;;  %v907_v61 = vunpack.c.l.b16 %v876_v45 }
  0xad   : > { %v827_v51 = vadd.f32 %v4016_v32, %v826_v48 }
  0xaf   : > { %v845_v53 = vmax.f32 %v827_v51, 0.0  ;;  %v628_v51 = vadd.f32 0.5, %v620_v38 }
  0xb1   : > { %v869_v57 = vsel %vm4036_vm4, %v845_v53, 0.0 }
  0xb2   : > { %v877_v58 = vpack.c.bf16 %v869_v57, %v869_v57 }
  0xb3   : > { %v980_v12 = vld [vmem:[#allocation2 + $0x8] sm:$0x8] }
  0xb4   : > { %886 = vst.msk [vmem:[#allocation2 + $0xc] sm:$0xf] %vm5110_vm13, %v877_v58  ;;  %v908_v62 = vunpack.c.l.b16 %v877_v58  ;;  %v829_v63 = vpop.f32.mrf.mxu0  ;;  %v1161_v21 = vunpack.c.l.b16 %v980_v12  ;;  %v643_v58 = vfloor.f32 %v635_v41 }
  0xb5   : > { %v830_v2 = vadd.f32 %v4016_v32, %v829_v63  ;;  %v636_v63 = vmul.f32 0.125, %v628_v51 }
  0xb6   : > { %v915_v4 = vpack.c.b16 %v908_v62, %v907_v61  ;;  %vm667_vm3 = vcmp.ge.f32.partialorder %v643_v58, 1.0  ;;  %vm675_vm5 = vcmp.le.f32.partialorder %v643_v58, 6.0 }
  0xb7   : > { %v846_v6 = vmax.f32 %v830_v2, 0.0  ;;  %vm683_vm11 = vmand %vm667_vm3, %vm675_vm5 }
  0xb8   : > { %3387 = vmatmul.msk.bf16.vlgmr.msra.gmra.mxu1 %vm5102_vm9, %v915_v4  ;;  %v1095_v9 = vshrl.u32 %v915_v4, 16  ;;  %v1098_v10 = vshll.u32 %v915_v4, 16  ;;  %v651_v4 = vmul.f32 8.0, %v643_v58 }
  0xb9   : > { %v870_v14 = vsel %vm4050_vm14, %v846_v6, 0.0 }
  0xba   : > { %v878_v16 = vpack.c.bf16 %v870_v14, %v870_v14  ;;  %v1097_v17 = vrot.slane %v1095_v9, 4  ;;  %v1100_v18 = vrot.slane %v1098_v10, 5  ;;  %v644_v14 = vfloor.f32 %v636_v63 }
  0xbb   : > { %v4065_v20 = vld [vmem:[#allocation2 + $0x8] sm:$0xff]  }
  0xbc   : > { %887 = vst.msk [vmem:[#allocation2 + $0x10] sm:$0xf] %vm5110_vm13, %v878_v16  ;;  %v831_v25 = vpop.f32.mrf.mxu0  ;;  %v4075_v26 = vor.u32 %v1100_v18, %v1097_v17  ;;  %v1140_v27 = vrot.slane %v4065_v20, 5  ;;  %v3704_v28 = vunpack.c.h.b16 %v4065_v20  ;;  %v3703_v31 = vunpack.c.l.b16 %v4065_v20 }
  0xbd   : > { %v832_v30 = vadd.f32 %v4016_v32, %v831_v25  ;;  %v909_v53 = vunpack.c.l.b16 %v878_v16  ;;  %vm668_vm3 = vcmp.ge.f32.partialorder %v644_v14, 1.0  ;;  %vm676_vm5 = vcmp.le.f32.partialorder %v644_v14, 6.0 }
  0xbe   : > { %1126 = vrot.lane.b32.xlu0 %v4075_v26, %s3857_s29  ;;  %1149 = vrot.lane.b32.xlu2 %v1140_v27, %s3858_s20  ;;  %v1163_v34 = vpack.c.b16 %v3704_v28, %v1161_v21  ;;  %v4099_v36 = vpack.c.b16 %v3703_v31, %v993_v15  ;;  %v1083_v57 = vpack.c.b16 %v3703_v31, %v1081_v40  ;;  %v652_v31 = vmul.f32 8.0, %v644_v14 }
  0xbf   : > { %v847_v35 = vmax.f32 %v832_v30, 0.0  ;;  %v659_v21 = vsub.f32 %v619_v13, %v651_v4 }
  0xc0   : > { %1165 = vrot.lane.b32.xlu1 %v1163_v34, %s5105_s21  ;;  %v1012_v43 = vshrl.u32 %v4099_v36, 16  ;;  %v1015_v44 = vshll.u32 %v4099_v36, 16  ;;  %v1060_v61 = vrot.slane %v4099_v36, 5 }
  0xc1   : > { %v871_v42 = vsel %vm4086_vm8, %v847_v35, 0.0  ;;  %vm691_vm12 = vcmp.ge.f32.partialorder %v659_v21, 1.0  ;;  %vm707_vm0 = vcmp.le.f32.partialorder %v659_v21, 6.0 }
  0xc2   : > { %v879_v45 = vpack.c.bf16 %v871_v42, %v871_v42  ;;  %v1014_v48 = vrot.slane %v1012_v43, 4  ;;  %v1017_v49 = vrot.slane %v1015_v44, 5  ;;  %vm699_vm15 = vmand %vm683_vm11, %vm691_vm12 }
  0xc3   : > { %vm4194_vm11 = vmand %vm699_vm15, %vm707_vm0 }
  0xc4   : > { %888 = vst.msk [vmem:[#allocation2 + $0x14] sm:$0xf] %vm5110_vm13, %v879_v45  ;;  %v910_v54 = vunpack.c.l.b16 %v879_v45  ;;  %v834_v56 = vpop.f32.mrf.mxu0  ;;  %v4120_v60 = vor.u32 %v1017_v49, %v1014_v48  ;;  %v660_v45 = vsub.f32 %v620_v38, %v652_v31  ;;  %vm684_vm0 = vmand %vm668_vm3, %vm676_vm5 }
  0xc5   : > { %v835_v59 = vadd.f32 %v4016_v32, %v834_v56 }
  0xc6   : > { %1085 = vrot.lane.b32.xlu2 %v1083_v57, %s3860_s22  ;;  %v916_v55 = vpack.c.b16 %v910_v54, %v909_v53  ;;  %1046 = vrot.lane.b32.xlu0 %v4120_v60, %s3861_s2  ;;  %vm692_vm12 = vcmp.ge.f32.partialorder %v660_v45, 1.0 }
  0xc7   : > { %v848_v62 = vmax.f32 %v835_v59, 0.0  ;;  %vm700_vm15 = vmand %vm684_vm0, %vm692_vm12  ;;  %vm5111_vm0 = vsmask.f32 4352 }
  0xc8   : > { %3388 = vmatmul.msk.bf16.gmra.mxu1 %vm5102_vm9, %v916_v55  ;;  %v1102_v0 = vshrl.u32 %v916_v55, 16  ;;  %v1105_v2 = vshll.u32 %v916_v55, 16  ;;  %1069 = vrot.lane.b32.xlu1 %v1060_v61, %s5107_s23 }
  0xc9   : > { %v872_v6 = vsel %vm4127_vm6, %v848_v62, 0.0 }
  0xca   : > { %v880_v7 = vpack.c.bf16 %v872_v6, %v872_v6  ;;  %v1104_v8 = vrot.slane %v1102_v0, 4  ;;  %v1107_v9 = vrot.slane %v1105_v2, 5 }
  0xcb   : > { %v4145_v10 = vld [vmem:[#allocation2 + $0x10] sm:$0xff]  }
  0xcc   : > { %v3707_v16 = vunpack.c.l.b16 %v4145_v10  ;;  %889 = vst.msk [vmem:[#allocation2 + $0x18] sm:$0xf] %vm5110_vm13, %v880_v7  ;;  %v836_v17 = vpop.f32.mrf.mxu0  ;;  %v1141_v18 = vrot.slane %v4145_v10, 5  ;;  %v4154_v19 = vor.u32 %v1107_v9, %v1104_v8  ;;  %v911_v34 = vunpack.c.l.b16 %v880_v7 }
  0xcd   : > { %v837_v22 = vadd.f32 %v4016_v32, %v836_v17 }
  0xce   : > { %v1007_v23 = vpack.c.b16 %v3707_v16, %v3704_v28  ;;  %1167 = vrot.lane.b32.xlu2 %v4145_v10, %s5105_s21  ;;  %v1142_v1 = vsel %vm5109_vm2, %v1140_v27, %v1141_v18  ;;  %v1109_v13 = vsel %vm5101_vm1, %v4075_v26, %v4154_v19  ;;  %vm708_vm1 = vcmp.le.f32.partialorder %v660_v45, 6.0 }
  0xcf   : > { %v849_v28 = vmax.f32 %v837_v22, 0.0  ;;  %1151 = vrot.lane.b32.xlu0 %v1142_v1, %s3858_s20  ;;  %vm4215_vm3 = vmand %vm700_vm15, %vm708_vm1 }
  0xd0   : > { %1128 = vrot.lane.b32.xlu1 %v1109_v13, %s3857_s29  ;;  %v1020_v29 = vshrl.u32 %v1007_v23, 16  ;;  %v1023_v30 = vshll.u32 %v1007_v23, 16  ;;  %v4184_v40 = vrot.slane %v1007_v23, 5 }
  0xd1   : > { %v873_v27 = vsel %vm4163_vm7, %v849_v28, 0.0 }
  0xd2   : > { %v881_v35 = vpack.c.bf16 %v873_v27, %v873_v27  ;;  %v1022_v26 = vrot.slane %v1020_v29, 4  ;;  %v1025_v37 = vrot.slane %v1023_v30, 5  ;;  %v1062_v24 = vsel %vm5109_vm2, %v1060_v61, %v4184_v40 }
  0xd3   : > { %v4186_v41 = vld [vmem:[#allocation2 + $0x14] sm:$0xff]   ;;  %v1321_v31 = vshrl.u32 %v4184_v40, 16  ;;  %v1324_v11 = vshll.u32 %v4184_v40, 16 }
  0xd4   : > { %890 = vst.msk [vmem:[#allocation2 + $0x1c] sm:$0xf] %vm5110_vm13, %v881_v35  ;;  %v912_v42 = vunpack.c.l.b16 %v881_v35  ;;  %v839_v43 = vpop.f32.mrf.mxu0  ;;  %v1026_v44 = vor.u32 %v1025_v37, %v1022_v26  ;;  %v1029_v48 = vshrl.u32 %v4186_v41, 16  ;;  %v1032_v49 = vshll.u32 %v4186_v41, 16  ;;  %v981_v37 = vld [vmem:[#allocation2 + $0x28] sm:$0xf] }
  0xd5   : > { %v840_v46 = vadd.f32 %v4016_v32, %v839_v43  ;;  %v1063_v12 = vrot.slane %v4186_v41, 5  ;;  %v1323_v45 = vrot.slane %v1321_v31, 3 }
  0xd6   : > { %1087 = vrot.lane.b32.xlu2 %v1007_v23, %s3860_s22  ;;  %v917_v51 = vpack.c.b16 %v912_v42, %v911_v34  ;;  %v1031_v38 = vrot.slane %v1029_v48, 4  ;;  %v1034_v54 = vrot.slane %v1032_v49, 5 }
  0xd7   : > { %v850_v53 = vmax.f32 %v840_v46, 0.0  ;;  %1185 = vrot.lane.b32.xlu0 %v1026_v44, %s5103_s3  ;;  %v1064_v16 = vsel %vm5109_vm2, %v4184_v40, %v1063_v12  ;;  %v1326_v40 = vrot.slane %v1324_v11, 4  ;;  %v4255_v46 = vunpack.c.l.b16 %v981_v37 }
  0xd8   : > { %3389 = vmatmul.msk.bf16.vlgmr.msra.gmra.mxu3 %vm5102_vm9, %v917_v51  ;;  %1071 = vrot.lane.b32.xlu1 %v1062_v24, %s5107_s23  ;;  %v1110_v57 = vshrl.u32 %v917_v51, 16  ;;  %v1113_v58 = vshll.u32 %v917_v51, 16  ;;  %v4209_v59 = vor.u32 %v1034_v54, %v1031_v38  ;;  %vm5142_vm9 = vsmask.f32 3328 }
  0xd9   : > { %v874_v56 = vsel %vm4194_vm11, %v850_v53, 0.0  ;;  %vm5145_vm5 = vmmov %vm5142_vm9  ;;  %v1329_v13 = vshrl.u32 %v1064_v16, 16  ;;  %v1327_v54 = vor.u32 %v1326_v40, %v1323_v45 }
  0xda   : > { %v882_v55 = vpack.c.bf16 %v874_v56, %v874_v56  ;;  %v1036_v62 = vsel %vm5142_vm9, %v1026_v44, %v4209_v59  ;;  %v1112_v63 = vrot.slane %v1110_v57, 4  ;;  %v1115_v0 = vrot.slane %v1113_v58, 5  ;;  %vm5146_vm1 = vmmov %vm5145_vm5 }
  0xdb   : > { %v1027_v4 = vsel %vm5145_vm5, %v4120_v60, %v1026_v44  ;;  %v4235_v21 = vld [vmem:[#allocation2 + $0x18] sm:$0xff]   ;;  %vm5147_vm9 = vcmask 130048   ;;  %vm5148_vm12 = vmmov %vm5146_vm1 }
  0xdc   : > { %891 = vst.msk [vmem:[#allocation2 + $0x20] sm:$0xf] %vm5110_vm13, %v882_v55  ;;  %v841_v36 = vpop.f32.mrf.mxu0  ;;  %v1116_v7 = vor.u32 %v1115_v0, %v1112_v63  ;;  %v913_v8 = vunpack.c.l.b16 %v882_v55  ;;  %v1143_v1 = vrot.slane %v4235_v21, 5  ;;  %v3712_v29 = vunpack.c.h.b16 %v4235_v21  ;;  %vm5149_vm15 = vmmov %vm5146_vm1 }
  0xdd   : > { %v842_v61 = vadd.f32 %v4016_v32, %v841_v36  ;;  %vm5150_vm5 = vmmov %vm5147_vm9 }
  0xde   : > { %1050 = vrot.lane.b32.xlu2 %v1036_v62, %s3861_s2  ;;  %v1117_v60 = vsel %vm5146_vm1, %v4154_v19, %v1116_v7  ;;  %v1332_v19 = vshll.u32 %v1064_v16, 16  ;;  %v1144_v27 = vsel %vm5109_vm2, %v1141_v18, %v1143_v1 }
  0xdf   : > { %v851_v6 = vmax.f32 %v842_v61, 0.0  ;;  %1048 = vrot.lane.b32.xlu0 %v1027_v4, %s3861_s2 }
  0xe0   : > { %1089 = vrot.lane.b32.xlu1 %v4186_v41, %s3860_s22  ;;  %v1331_v41 = vrot.slane %v1329_v13, 3  ;;  %v1334_v42 = vrot.slane %v1332_v19, 4  ;;  %v979_v13 = vld [vmem:[#allocation2 + $0x28] sm:$0x1]  ;;  %v982_v19 = vld [vmem:[#allocation2 + $0x2c] sm:$0x1] }
  0xe1   : > { %v875_v32 = vsel %vm4215_vm3, %v851_v6, 0.0  ;;  %v1137_v31 = vunpack.c.l.b16 %v979_v13 }
  0xe2   : > { %v883_v9 = vpack.c.bf16 %v875_v32, %v875_v32  ;;  %v1335_v53 = vor.u32 %v1334_v42, %v1331_v41 }
  0xe4   : > { %892 = vst.msk [vmem:[#allocation2 + $0x24] sm:$0xf] %vm5110_vm13, %v883_v9  ;;  %v914_v14 = vunpack.c.l.b16 %v883_v9  ;;  %v1336_v55 = vsel %vm5111_vm0, %v1327_v54, %v1335_v53  ;;  %vm5154_vm13 = vmmov %vm5150_vm5 }
  0xe6   : > { %1130 = vrot.lane.b32.xlu2 %v1117_v60, %s3857_s29  ;;  %v918_v17 = vpack.c.b16 %v914_v14, %v913_v8 }
  0xe7   : > { %1073 = vrot.lane.b32.xlu0 %v1064_v16, %s5107_s23 }
  0xe8   : > { %3390 = vmatmul.msk.bf16.gmra.mxu3 %vm5147_vm9, %v918_v17  ;;  %1187 = vrot.lane.b32.xlu1 %v1036_v62, %s5103_s3  ;;  %v1118_v22 = vshrl.u32 %v918_v17, 16  ;;  %v1121_v23 = vshll.u32 %v918_v17, 16  ;;  %vm5151_vm9 = vmmov %vm5150_vm5 }
  0xea   : > { %v1120_v35 = vrot.slane %v1118_v22, 4  ;;  %v1123_v26 = vrot.slane %v1121_v23, 5 }
  0xeb   : > { %v4240_v28 = vld [vmem:[#allocation2 + $0x20] sm:$0xff]  }
  0xec   : > { %v4244_v30 = vunpack.c.l.b16 %v4240_v28  ;;  %v1124_v49 = vor.u32 %v1123_v26, %v1120_v35  ;;  %v3716_v51 = vunpack.c.h.b16 %v4240_v28  ;;  %v1145_v0 = vrot.slane %v4240_v28, 5  ;;  %v976_v9 = vld [vmem:[#allocation2 + $0x24] sm:$0x1] }
  0xed   : > { %v1057_v14 = vunpack.c.l.b16 %v976_v9  ;;  %v1139_v26 = vpack.c.b16 %v1137_v31, %v1137_v31  ;;  %v3647_v9 = vld [vmem:[%s5083_s5 + $0x8] sm:$0xff] }
  0xee   : > { %v1009_v34 = vpack.c.b16 %v4244_v30, %v3712_v29  ;;  %v1125_v57 = vsel %vm5149_vm15, %v1116_v7, %v1124_v49  ;;  %v1175_v58 = vpack.c.b16 %v4255_v46, %v3716_v51  ;;  %v1146_v8 = vsel %vm5109_vm2, %v1143_v1, %v1145_v0  ;;  %vm5153_vm15 = vmmov %vm5150_vm5 }
  0xef   : > { %1153 = vrot.lane.b32.xlu0 %v1144_v27, %s3858_s20  ;;  %v1058_v22 = vpack.c.b16 %v1057_v14, %v1057_v14  ;;  %v1084_v35 = vpack.c.b16 %v3716_v51, %v3716_v51 }
  0xf0   : > { %1169 = vrot.lane.b32.xlu1 %v4235_v21, %s5105_s21  ;;  %v1038_v43 = vshrl.u32 %v1009_v34, 16  ;;  %v1041_v44 = vshll.u32 %v1009_v34, 16  ;;  %v1065_v24 = vrot.slane %v1009_v34, 5  ;;  %v1177_v61 = vshrl.u32 %v1175_v58, 16 }
  0xf1   : > { %v1180_v62 = vshll.u32 %v1175_v58, 16  ;;  %v1198_v16 = vrot.slane %v1175_v58, 5  ;;  %v1067_v29 = vrot.slane %v1058_v22, 5 }
  0xf2   : > { %v1040_v48 = vrot.slane %v1038_v43, 4  ;;  %v1043_v18 = vrot.slane %v1041_v44, 5  ;;  %v1066_v36 = vsel %vm5109_vm2, %v1063_v12, %v1065_v24  ;;  %v1179_v4 = vrot.slane %v1177_v61, 4 }
  0xf3   : > { %v1346_v63 = vshrl.u32 %v1066_v36, 16  ;;  %v1182_v6 = vrot.slane %v1180_v62, 5  ;;  %v1199_v1 = vsel %vm5109_vm2, %v1065_v24, %v1198_v16  ;;  %v1147_v43 = vrot.slane %v1139_v26, 5 }
  0xf4   : > { %v1044_v38 = vor.u32 %v1043_v18, %v1040_v48  ;;  %v1363_v11 = vshrl.u32 %v1199_v1, 16  ;;  %v1366_v27 = vshll.u32 %v1199_v1, 16  ;;  %v1164_v44 = vpack.c.b16 %v4255_v46, %v4255_v46 }
  0xf5   : > { %v1348_v32 = vrot.slane %v1346_v63, 3  ;;  %v1183_v12 = vor.u32 %v1182_v6, %v1179_v4  ;;  %v1148_v48 = vsel %vm5109_vm2, %v1145_v0, %v1147_v43  ;;  %v3648_v0 = vld [vmem:[%s5083_s5 + $0x10] sm:$0xff] }
  0xf6   : > { %v1045_v56 = vsel %vm5148_vm12, %v4209_v59, %v1044_v38  ;;  %v1349_v59 = vshll.u32 %v1066_v36, 16  ;;  %v1365_v37 = vrot.slane %v1363_v11, 3  ;;  %v1368_v41 = vrot.slane %v1366_v27, 4  ;;  %vm5152_vm12 = vmmov %vm5150_vm5 }
  0xf7   : > { %1189 = vrot.lane.b32.xlu2 %v1045_v56, %s5103_s3  ;;  %1132 = vrot.lane.b32.xlu0 %v1125_v57, %s3857_s29  ;;  %v1184_v17 = vsel %vm5146_vm1, %v1044_v38, %v1183_v12  ;;  %v3652_v57 = vld [vmem:[%s5083_s5 + $0x30] sm:$0xff]  ;;  %vm1217_vm1 = vcmask 261120  }
  0xf8   : > { %3427 = vmatmul.msk.bf16.vlgmr.msrb.gmra.mxu3 %vm5150_vm5, %v1336_v55  ;;  %1075 = vrot.lane.b32.xlu1 %v1066_v36, %s5107_s23  ;;  %v1351_v7 = vrot.slane %v1349_v59, 4  ;;  %v1369_v45 = vor.u32 %v1368_v41, %v1365_v37  ;;  %v3651_v55 = vld [vmem:[%s5083_s5 + $0x28] sm:$0xff]  ;;  %v3650_v36 = vld [vmem:[%s5083_s5 + $0x20] sm:$0xff]  ;;  %v3649_v59 = vld [vmem:[%s5083_s5 + $0x18] sm:$0xff] }
  0xfa   : > { %v1352_v60 = vor.u32 %v1351_v7, %v1348_v32  ;;  %v967_v32 = vld [vmem:[#allocation2] sm:$0x8] }
  0xfc   : > { %v1353_v23 = vsel %vm5111_vm0, %v1335_v53, %v1352_v60  ;;  %v1370_v18 = vsel %vm5111_vm0, %v1352_v60, %v1369_v45 }
  0xff   : > { %1091 = vrot.lane.b32.xlu2 %v1009_v34, %s3860_s22  ;;  %1052 = vrot.lane.b32.xlu0 %v1045_v56, %s3861_s2  ;;  %v1196_v34 = vunpack.c.l.b16 %v982_v19 }
 0x100   : > { %1155 = vrot.lane.b32.xlu1 %v1146_v8, %s3858_s20  ;;  %v992_v8 = vunpack.c.l.b16 %v967_v32 }
 0x101   : > { %v1197_v42 = vpack.c.b16 %v1196_v34, %v1196_v34 }
 0x102   : > { %v1001_v14 = vpack.c.b16 %v993_v15, %v992_v8 }
 0x103   : > { %v1200_v40 = vrot.slane %v1197_v42, 5 }
 0x107   : > { %1171 = vrot.lane.b32.xlu2 %v4240_v28, %s5105_s21  ;;  %1191 = vrot.lane.b32.xlu0 %v1184_v17, %s5103_s3  ;;  %v1068_v28 = vsel %vm5109_vm2, %v1065_v24, %v1067_v29 }
 0x108   : > { %3428 = vmatmul.msk.bf16.gmra.mxu3 %vm5151_vm9, %v1353_v23  ;;  %1054 = vrot.lane.b32.xlu1 %v1044_v38, %s3861_s2  ;;  %v3653_v38 = vld [vmem:[%s5083_s5 + $0x38] sm:$0xff]  ;;  %vm1228_vm9 = vcmask 392192  }
 0x109   : > { %1458 = vmatpush.bf16.msra.mxu2 %v3653_v38 }
 0x10d   : > { %1459 = vmatpush.bf16.msra.mxu2 %v3652_v57 }
 0x10f   : > { %1077 = vrot.lane.b32.xlu2 %v1068_v28, %s5107_s23  ;;  %1093 = vrot.lane.b32.xlu0 %v1084_v35, %s3860_s22  ;;  %s5164_s23 = smov 32  }
 0x110   : > { %1134 = vrot.lane.b32.xlu1 %v1124_v49, %s3857_s29  ;;  %v1201_v49 = vsel %vm5109_vm2, %v1198_v16, %v1200_v40  ;;  %vm5112_vm2 = vcmask 916480  }
 0x111   : > { %v1380_v51 = vshrl.u32 %v1201_v49, 16  ;;  %v1383_v53 = vshll.u32 %v1201_v49, 16  ;;  %1460 = vmatpush.bf16.msra.mxu2 %v3651_v55 }
 0x113   : > { %v1382_v24 = vrot.slane %v1380_v51, 3  ;;  %v1385_v46 = vrot.slane %v1383_v53, 4 }
 0x115   : > { %v1386_v54 = vor.u32 %v1385_v46, %v1382_v24  ;;  %1461 = vmatpush.bf16.msra.mxu2 %v3650_v36 }
 0x117   : > { %1157 = vrot.lane.b32.xlu2 %v1148_v48, %s3858_s20  ;;  %1173 = vrot.lane.b32.xlu0 %v1164_v44, %s5105_s21  ;;  %v1387_v58 = vsel %vm5111_vm0, %v1369_v45, %v1386_v54  ;;  %vm5156_vm0 = vmmov %vm5154_vm13  ;;  %s5175_s21 = smov 112  }
 0x118   : > { %3429 = vmatmul.msk.bf16.gmra.mxu3 %vm5152_vm12, %v1370_v18  ;;  %1193 = vrot.lane.b32.xlu1 %v1183_v12, %s5103_s3  ;;  %v1150_v56 = vpop.permute.xlu2 %1149  ;;  %v3646_v12 = vld [vmem:[%s5083_s5] sm:$0xff]  ;;  %vm1239_vm12 = vcmask 523264  }
 0x119   : > { %1462 = vmatpush.bf16.msra.mxu2 %v3649_v59 }
 0x11d   : > { %1463 = vmatpush.bf16.msra.mxu2 %v3648_v0 }
 0x120   : > { %v1086_v61 = vpop.permute.xlu2 %1085 }
 0x121   : > { %1464 = vmatpush.bf16.msra.mxu2 %v3647_v9  ;;  %v4353_v9 = vld [vmem:[%s5082_s4] ss:$0 sm:$0xff] }
 0x125   : > { %1465 = vmatpush.bf16.msra.mxu2 %v3646_v12 }
 0x128   : > { %3430 = vmatmul.msk.bf16.gmra.mxu3 %vm5153_vm15, %v1387_v58  ;;  %v1168_v6 = vpop.permute.xlu2 %1167  ;;  %vm5113_vm15 = vcmask 654336  }
 0x130   : > { %v1127_v62 = vpop.permute.xlu0 %1126  ;;  %v1088_v17 = vpop.permute.xlu2 %1087 }
 0x132   : > { %v1166_v63 = vpop.permute.xlu1 %1165 }
 0x138   : > { %v1047_v4 = vpop.permute.xlu0 %1046  ;;  %v1051_v29 = vpop.permute.xlu2 %1050 }
 0x139   : > { %v1204_v22 = vsel %vm5150_vm5, %v1001_v14, %v1047_v4  ;;  %vm5155_vm5 = vcmask 785408  }
 0x13a   : > { %v1070_v7 = vpop.permute.xlu1 %1069 }
 0x13b   : > { %v1219_v23 = vsel %vm1217_vm1, %v1204_v22, %v1070_v7 }
 0x13c   : > { %v1230_v19 = vsel %vm1228_vm9, %v1219_v23, %v1086_v61 }
 0x13d   : > { %v1241_v31 = vsel %vm1239_vm12, %v1230_v19, %v1127_v62 }
 0x13e   : > { %v1252_v5 = vsel %vm5113_vm15, %v1241_v31, %v1150_v56 }
 0x13f   : > { %v1262_v35 = vsel %vm5155_vm5, %v1252_v5, %v1166_v63 }
 0x140   : > { %v1131_v42 = vpop.permute.xlu2 %1130 }
 0x141   : > { %v1152_v60 = vpop.permute.xlu0 %1151 }
 0x142   : > { %v1129_v16 = vpop.permute.xlu1 %1128 }
 0x149   : > { %v1186_v13 = vpop.permute.xlu0 %1185 }
 0x14a   : > { %v1072_v1 = vpop.permute.xlu1 %1071  ;;  %v1273_v26 = vsel %vm5112_vm2, %v1262_v35, %v1186_v13 }
 0x14b   : > { %v1305_v43 = vshrl.u32 %v1273_v26, 16  ;;  %v1308_v44 = vshll.u32 %v1273_v26, 16 }
 0x14d   : > { %v1307_v53 = vrot.slane %v1305_v43, 3  ;;  %v1310_v24 = vrot.slane %v1308_v44, 4  ;;  %v1005_v43 = vpack.c.b16 %v4244_v30, %v4244_v30 }
 0x14f   : > { %v1311_v55 = vor.u32 %v1310_v24, %v1307_v53 }
 0x151   : > { %v1049_v15 = vpop.permute.xlu0 %1048  ;;  %v1190_v58 = vpop.permute.xlu2 %1189 }
 0x152   : > { %v1207_v11 = vsel %vm5154_vm13, %v4065_v20, %v1049_v15  ;;  %v1090_v27 = vpop.permute.xlu1 %1089  ;;  %v1210_v20 = vsel %vm5156_vm0, %v4145_v10, %v1051_v29  ;;  %vm5157_vm13 = vmmov %vm5155_vm5  ;;  %vm5158_vm0 = vsmask.f32 4352 }
 0x153   : > { %v1221_v34 = vsel %vm1217_vm1, %v1207_v11, %v1072_v1 }
 0x154   : > { %v1232_v28 = vsel %vm1228_vm9, %v1221_v34, %v1088_v17 }
 0x155   : > { %v1243_v37 = vsel %vm1239_vm12, %v1232_v28, %v1129_v16 }
 0x156   : > { %v1254_v41 = vsel %vm5113_vm15, %v1243_v37, %v1152_v60 }
 0x157   : > { %v1264_v48 = vsel %vm5157_vm13, %v1254_v41, %v1168_v6  ;;  %vm5159_vm13 = vcmask 130048  }
 0x159   : > { %v1074_v45 = vpop.permute.xlu0 %1073  ;;  %v1092_v12 = vpop.permute.xlu2 %1091 }
 0x15a   : > { %v1188_v40 = vpop.permute.xlu1 %1187  ;;  %v1223_v18 = vsel %vm1217_vm1, %v1210_v20, %v1074_v45 }
 0x15b   : > { %v1275_v49 = vsel %vm5112_vm2, %v1264_v48, %v1188_v40  ;;  %v4340_v51 = vpop.f32.mrf.mxu3  ;;  %v1234_v54 = vsel %vm1228_vm9, %v1223_v18, %v1090_v27 }
 0x15c   : > { %v1312_v46 = vshrl.u32 %v1275_v49, 16  ;;  %v1315_v38 = vshll.u32 %v1275_v49, 16  ;;  %v1245_v36 = vsel %vm1239_vm12, %v1234_v54, %v1131_v42 }
 0x15e   : > { %v1314_v56 = vrot.slane %v1312_v46, 3  ;;  %v1317_v57 = vrot.slane %v1315_v38, 4 }
 0x160   : > { %v1318_v10 = vor.u32 %v1317_v57, %v1314_v56 }
 0x161   : > { %v1154_v61 = vpop.permute.xlu0 %1153  ;;  %v1172_v5 = vpop.permute.xlu2 %1171 }
 0x162   : > { %v1256_v62 = vsel %vm5113_vm15, %v1245_v36, %v1154_v61  ;;  %v1170_v63 = vpop.permute.xlu1 %1169  ;;  %v1319_v59 = vsel %vm5158_vm0, %v1311_v55, %v1318_v10 }
 0x163   : > { %v1266_v0 = vsel %vm5155_vm5, %v1256_v62, %v1170_v63  ;;  %v4347_v4 = vpop.f32.mrf.mxu3  ;;  %1466 = vmatmul.bf16.vlgmr.msra.gmra.mxu2 %v1319_v59 }
 0x164   : > { %v1277_v6 = vsel %vm5112_vm2, %v1266_v0, %v1190_v58 }
 0x165   : > { %v1337_v32 = vshrl.u32 %v1277_v6, 16  ;;  %v1340_v7 = vshll.u32 %v1277_v6, 16 }
 0x167   : > { %v1339_v14 = vrot.slane %v1337_v32, 3  ;;  %v1342_v60 = vrot.slane %v1340_v7, 4  ;;  %v3841_v32 = vld [vmem:[%s5084_s6] ss:$0 sm:$0xff] }
 0x169   : > { %v1133_v8 = vpop.permute.xlu0 %1132  ;;  %v1343_v23 = vor.u32 %v1342_v60, %v1339_v14  ;;  %v1078_v44 = vpop.permute.xlu2 %1077 }
 0x16a   : > { %v1076_v16 = vpop.permute.xlu1 %1075 }
 0x16b   : > { %v962_v17 = vpop.f32.mrf.mxu3  ;;  %v1344_v29 = vsel %vm5158_vm0, %v1318_v10, %v1343_v23 }
 0x16c   : > { %v4356_v22 = vadd.f32 %v4353_v9, %v962_v17 }
 0x171   : > { %v1053_v13 = vpop.permute.xlu0 %1052  ;;  %v1158_v46 = vpop.permute.xlu2 %1157 }
 0x172   : > { %v1213_v1 = vsel %vm5159_vm13, %v4235_v21, %v1053_v13  ;;  %v1156_v19 = vpop.permute.xlu1 %1155 }
 0x173   : > { %v1225_v31 = vsel %vm1217_vm1, %v1213_v1, %v1076_v16  ;;  %1471 = vmatmul.bf16.gmra.mxu2 %v1344_v29  ;;  %v4378_v63 = vpop.f32.mrf.mxu3 }
 0x174   : > { %v1236_v15 = vsel %vm1228_vm9, %v1225_v31, %v1092_v12 }
 0x175   : > { %v1247_v11 = vsel %vm1239_vm12, %v1236_v15, %v1133_v8 }
 0x176   : > { %v1258_v27 = vsel %vm5113_vm15, %v1247_v11, %v1156_v19 }
 0x177   : > { %v1268_v34 = vsel %vm5155_vm5, %v1258_v27, %v1172_v5  ;;  %v3662_v27 = vld [vmem:[%s5085_s7 + $0x38] sm:$0xff] }
 0x178   : > { %1636 = vmatpush.bf16.msrb.mxu1 %v3662_v27 }
 0x179   : > { %v1192_v35 = vpop.permute.xlu0 %1191 }
 0x17a   : > { %v1279_v28 = vsel %vm5112_vm2, %v1268_v34, %v1192_v35  ;;  %v1055_v26 = vpop.permute.xlu1 %1054  ;;  %v3661_v35 = vld [vmem:[%s5085_s7 + $0x30] sm:$0xff] }
 0x17b   : > { %v1354_v21 = vshrl.u32 %v1279_v28, 16  ;;  %v1357_v37 = vshll.u32 %v1279_v28, 16  ;;  %v1216_v45 = vsel %vm5159_vm13, %v1005_v43, %v1055_v26  ;;  %vm5160_vm13 = vmmov %vm5158_vm0  ;;  %v1496_v59 = vpop.f32.mrf.mxu3  ;;  %v3660_v28 = vld [vmem:[%s5085_s7 + $0x28] sm:$0xff] }
 0x17c   : > { %v1227_v18 = vsel %vm1217_vm1, %v1216_v45, %v1078_v44  ;;  %1637 = vmatpush.bf16.msrb.mxu1 %v3661_v35 }
 0x17d   : > { %v1356_v41 = vrot.slane %v1354_v21, 3  ;;  %v1359_v42 = vrot.slane %v1357_v37, 4 }
 0x17f   : > { %v1360_v20 = vor.u32 %v1359_v42, %v1356_v41  ;;  %v3659_v42 = vld [vmem:[%s5085_s7 + $0x20] sm:$0xff] }
 0x180   : > { %1638 = vmatpush.bf16.msrb.mxu1 %v3660_v28 }
 0x181   : > { %v1094_v40 = vpop.permute.xlu0 %1093  ;;  %v1361_v48 = vsel %vm5158_vm0, %v1343_v23, %v1360_v20  ;;  %vm5161_vm0 = vcmask 125952  }
 0x182   : > { %v1135_v49 = vpop.permute.xlu1 %1134  ;;  %v1238_v53 = vsel %vm1228_vm9, %v1227_v18, %v1094_v40  ;;  %v3657_v18 = vld [vmem:[%s5085_s7 + $0x10] sm:$0xff] }
 0x183   : > { %1476 = vmatmul.bf16.gmra.mxu2 %v1361_v48  ;;  %v1249_v24 = vsel %vm1239_vm12, %v1238_v53, %v1135_v49  ;;  %v1498_v0 = vpop.f32.mrf.mxu3 }
 0x184   : > { %v1260_v38 = vsel %vm5113_vm15, %v1249_v24, %v1158_v46  ;;  %1639 = vmatpush.bf16.msrb.mxu1 %v3659_v42  ;;  %v958_v42 = vadd.f32 %v4353_v9, %v4340_v51  ;;  %v4436_v51 = vld [vmem:[%s5086_s8] ss:$0 sm:$0xff]  ;;  %vm5179_vm15 = vcmask 125952  }
 0x189   : > { %v1174_v54 = vpop.permute.xlu0 %1173 }
 0x18a   : > { %v1270_v30 = vsel %vm5155_vm5, %v1260_v38, %v1174_v54  ;;  %v1194_v56 = vpop.permute.xlu1 %1193  ;;  %vm5162_vm5 = vmmov %vm5161_vm0 }
 0x18b   : > { %v1281_v57 = vsel %vm5112_vm2, %v1270_v30, %v1194_v56  ;;  %v1501_v8 = vpop.f32.mrf.mxu3  ;;  %v3656_v56 = vld [vmem:[%s5085_s7 + $0x8] sm:$0xff]  ;;  %vm5177_vm2 = vcmask 130048  }
 0x18c   : > { %v1371_v58 = vshrl.u32 %v1281_v57, 16  ;;  %v1374_v55 = vshll.u32 %v1281_v57, 16  ;;  %v3655_v57 = vld [vmem:[%s5085_s7] sm:$0xff] }
 0x18e   : > { %v1373_v10 = vrot.slane %v1371_v58, 3  ;;  %v1376_v36 = vrot.slane %v1374_v55, 4  ;;  %v947_v58 = vpop.f32.mrf.mxu1 }
 0x190   : > { %v1377_v61 = vor.u32 %v1376_v36, %v1373_v10  ;;  %v948_v36 = vadd.f32 %v4353_v9, %v947_v58 }
 0x192   : > { %v1378_v62 = vsel %vm5160_vm13, %v1360_v20, %v1377_v61  ;;  %v3658_v20 = vld [vmem:[%s5085_s7 + $0x18] sm:$0xff]  ;;  %vm5163_vm13 = vcmask 130048  }
 0x193   : > { %1481 = vmatmul.bf16.gmra.mxu2 %v1378_v62  ;;  %v1503_v13 = vpop.f32.mrf.mxu3  ;;  %1640 = vmatpush.bf16.msrb.mxu1 %v3658_v20 }
 0x196   : > { %v949_v55 = vpop.f32.mrf.mxu1 }
 0x197   : > { %1641 = vmatpush.bf16.msrb.mxu1 %v3657_v18  ;;  %v950_v61 = vadd.f32 %v4353_v9, %v949_v55  ;;  %v3663_v18 = vld [vmem:[%s5087_s9] sm:$0xff] }
 0x198   : > { %1748 = vmatpush.bf16.msra.mxu3 %v3663_v18 }
 0x19b   : > { %v1506_v15 = vpop.f32.mrf.mxu3  ;;  %1642 = vmatpush.bf16.msrb.mxu1 %v3656_v56 }
 0x19f   : > { %1643 = vmatpush.bf16.msrb.mxu1 %v3655_v57 }
 0x1a3   : > { %v1508_v26 = vpop.f32.mrf.mxu3 }
 0x1ab   : > { %v1511_v40 = vpop.f32.mrf.mxu3 }
 0x1b3   : > { %v1513_v46 = vpop.f32.mrf.mxu3 }
 0x1e6   : > { %v1467_v6 = vpop.f32.mrf.mxu2 }
 0x1e7   : > { %v1468_v7 = vadd.f32 %v3841_v32, %v1467_v6 }
 0x1e9   : > { %v1497_v60 = vadd.f32 %v1496_v59, %v1468_v7 }
 0x1ee   : > { %v1469_v12 = vpop.f32.mrf.mxu2 }
 0x1ef   : > { %v1470_v14 = vadd.f32 %v3841_v32, %v1469_v12  ;;  %v952_v12 = vpop.f32.mrf.mxu1 }
 0x1f1   : > { %v1499_v16 = vadd.f32 %v1498_v0, %v1470_v14 }
 0x1f3   : > { %v3799_v17 = vpack.i.bf16 %v1499_v16, %v1497_v60  ;;  %v953_v16 = vadd.f32 %v4353_v9, %v952_v12 }
 0x1f5   : > { %3800 = vrot.lane.b32.xlu2 %v3799_v17, %s3857_s29 }
 0x1f6   : > { %v1472_v23 = vpop.f32.mrf.mxu2 }
 0x1f7   : > { %v1473_v1 = vadd.f32 %v3841_v32, %v1472_v23  ;;  %v954_v14 = vpop.f32.mrf.mxu1 }
 0x1f8   : > { %v955_v17 = vadd.f32 %v4353_v9, %v954_v14 }
 0x1f9   : > { %v1502_v31 = vadd.f32 %v1501_v8, %v1473_v1 }
 0x1fe   : > { %v1474_v19 = vpop.f32.mrf.mxu2 }
 0x1ff   : > { %v1475_v29 = vadd.f32 %v3841_v32, %v1474_v19 }
 0x201   : > { %v1504_v5 = vadd.f32 %v1503_v13, %v1475_v29 }
 0x203   : > { %v3804_v11 = vpack.i.bf16 %v1504_v5, %v1502_v31 }
 0x205   : > { %3805 = vrot.lane.b32.xlu0 %v3804_v11, %s3857_s29  ;;  %v965_v11 = vadd.f32 %v4353_v9, %v4378_v63 }
 0x206   : > { %v1477_v34 = vpop.f32.mrf.mxu2 }
 0x207   : > { %v1478_v21 = vadd.f32 %v3841_v32, %v1477_v34 }
 0x209   : > { %v1507_v43 = vadd.f32 %v1506_v15, %v1478_v21 }
 0x20e   : > { %v1479_v37 = vpop.f32.mrf.mxu2 }
 0x20f   : > { %v1480_v41 = vadd.f32 %v3841_v32, %v1479_v37 }
 0x211   : > { %v1509_v44 = vadd.f32 %v1508_v26, %v1480_v41 }
 0x213   : > { %v3809_v45 = vpack.i.bf16 %v1509_v44, %v1507_v43  ;;  %v960_v43 = vadd.f32 %v4353_v9, %v4347_v4 }
 0x215   : > { %3810 = vrot.lane.b32.xlu1 %v3809_v45, %s3857_s29 }
 0x216   : > { %v1482_v48 = vpop.f32.mrf.mxu2 }
 0x217   : > { %v1483_v49 = vadd.f32 %v3841_v32, %v1482_v48 }
 0x219   : > { %v1512_v38 = vadd.f32 %v1511_v40, %v1483_v49 }
 0x21e   : > { %v1484_v53 = vpop.f32.mrf.mxu2 }
 0x21f   : > { %v1485_v24 = vadd.f32 %v3841_v32, %v1484_v53 }
 0x221   : > { %v1514_v54 = vadd.f32 %v1513_v46, %v1485_v24 }
 0x223   : > { %v3814_v30 = vpack.i.bf16 %v1514_v54, %v1512_v38 }
 0x225   : > { %3815 = vrot.lane.b32.xlu2 %v3814_v30, %s3857_s29 }
 0x24f   : > { %v3801_v10 = vpop.permute.xlu2 %3800 }
 0x250   : > { %v3803_v62 = vunpack.i.h.bf16 %v3801_v10  ;;  %v3802_v59 = vunpack.i.l.bf16 %v3801_v10  ;;  %v4446_v10 = vld [vmem:[#allocation2 + $0x4] sm:$0xf] }
 0x252   : > { %v1548_v0 = vsel %vm1239_vm12, %v948_v36, %v3802_v59  ;;  %v1549_v6 = vsel %vm1239_vm12, %v950_v61, %v3803_v62  ;;  %v1780_v36 = vld [vmem:[#allocation2 + $0x4] sm:$0x8] }
 0x253   : > { %v1556_v32 = vmax.f32 %v1548_v0, 0.0  ;;  %v1557_v7 = vmax.f32 %v1549_v6, 0.0  ;;  %v1796_v6 = vunpack.c.l.b16 %v4446_v10 }
 0x255   : > { %v1564_v8 = vpack.c.bf16 %v1557_v7, %v1556_v32  ;;  %v1882_v32 = vunpack.c.l.b16 %v1780_v36 }
 0x257   : > { %1644 = vmatmul.bf16.vlgmr.msrb.gmra.mxu1 %v1564_v8 }
 0x277   : > { %v3806_v60 = vpop.permute.xlu0 %3805 }
 0x278   : > { %v3808_v23 = vunpack.i.h.bf16 %v3806_v60  ;;  %v3807_v13 = vunpack.i.l.bf16 %v3806_v60 }
 0x27a   : > { %v1550_v1 = vsel %vm1239_vm12, %v953_v16, %v3807_v13  ;;  %v1551_v19 = vsel %vm1239_vm12, %v955_v17, %v3808_v23 }
 0x27b   : > { %v1558_v29 = vmax.f32 %v1550_v1, 0.0  ;;  %v1559_v31 = vmax.f32 %v1551_v19, 0.0 }
 0x27d   : > { %v1565_v5 = vpack.c.bf16 %v1559_v31, %v1558_v29 }
 0x27f   : > { %v3816_v15 = vpop.permute.xlu2 %3815  ;;  %1649 = vmatmul.bf16.gmra.mxu1 %v1565_v5 }
 0x280   : > { %v3818_v27 = vunpack.i.h.bf16 %v3816_v15  ;;  %v3817_v34 = vunpack.i.l.bf16 %v3816_v15 }
 0x282   : > { %v1554_v35 = vsel %vm1239_vm12, %v4356_v22, %v3817_v34  ;;  %v1555_v28 = vsel %vm1239_vm12, %v965_v11, %v3818_v27 }
 0x283   : > { %v1562_v26 = vmax.f32 %v1554_v35, 0.0  ;;  %v1563_v21 = vmax.f32 %v1555_v28, 0.0 }
 0x285   : > { %v1567_v37 = vpack.c.bf16 %v1563_v21, %v1562_v26 }
 0x287   : > { %v3811_v41 = vpop.permute.xlu1 %3810 }
 0x288   : > { %v3813_v44 = vunpack.i.h.bf16 %v3811_v41  ;;  %v3812_v45 = vunpack.i.l.bf16 %v3811_v41  ;;  %v3672_v41 = vld [vmem:[%s5089_s11 + $0x40] sm:$0xff] }
 0x289   : > { %2289 = vmatpush.bf16.msrb.mxu2 %v3672_v41 }
 0x28a   : > { %v1552_v63 = vsel %vm1239_vm12, %v958_v42, %v3812_v45  ;;  %v1553_v20 = vsel %vm1239_vm12, %v960_v43, %v3813_v44 }
 0x28b   : > { %v1560_v40 = vmax.f32 %v1552_v63, 0.0  ;;  %v1561_v22 = vmax.f32 %v1553_v20, 0.0 }
 0x28d   : > { %v1566_v48 = vpack.c.bf16 %v1561_v22, %v1560_v40 }
 0x28f   : > { %1654 = vmatmul.bf16.gmra.mxu1 %v1566_v48 }
 0x29f   : > { %1659 = vmatmul.bf16.gmra.mxu1 %v1567_v37 }
 0x2d4   : > { %v1645_v4 = vpop.f32.mrf.mxu1 }
 0x2d5   : > { %v1646_v9 = vadd.f32 %v4436_v51, %v1645_v4 }
 0x2d7   : > { %v1665_v49 = vmax.f32 %v1646_v9, 0.0 }
 0x2d9   : > { %v1673_v53 = vsel %vm4022_vm10, %v1665_v49, 0.0 }
 0x2da   : > { %v1681_v24 = vpack.c.bf16 %v1673_v53, %v1673_v53 }
 0x2dc   : > { %1689 = vst.msk [vmem:[#allocation2 + $0x8] sm:$0xf] %vm5161_vm0, %v1681_v24  ;;  %v1647_v46 = vpop.f32.mrf.mxu1  ;;  %v1711_v57 = vunpack.c.l.b16 %v1681_v24 }
 0x2dd   : > { %v1648_v38 = vadd.f32 %v4436_v51, %v1647_v46 }
 0x2df   : > { %v1666_v54 = vmax.f32 %v1648_v38, 0.0 }
 0x2e1   : > { %v1674_v30 = vsel %vm4036_vm4, %v1666_v54, 0.0 }
 0x2e2   : > { %v1682_v56 = vpack.c.bf16 %v1674_v30, %v1674_v30 }
 0x2e3   : > { %v1783_v13 = vld [vmem:[#allocation2 + $0x8] sm:$0x8] }
 0x2e4   : > { %1690 = vst.msk [vmem:[#allocation2 + $0xc] sm:$0xf] %vm5162_vm5, %v1682_v56  ;;  %v1712_v58 = vunpack.c.l.b16 %v1682_v56  ;;  %v1962_v15 = vunpack.c.l.b16 %v1783_v13  ;;  %vm5166_vm5 = vmmov %vm5161_vm0 }
 0x2e6   : > { %v1719_v55 = vpack.c.b16 %v1712_v58, %v1711_v57 }
 0x2e8   : > { %3467 = vmatmul.msk.bf16.vlgmr.msra.gmra.mxu3 %vm5163_vm13, %v1719_v55  ;;  %v1896_v61 = vshrl.u32 %v1719_v55, 16  ;;  %v1899_v62 = vshll.u32 %v1719_v55, 16 }
 0x2ea   : > { %v1898_v59 = vrot.slane %v1896_v61, 4  ;;  %v1901_v0 = vrot.slane %v1899_v62, 5 }
 0x2eb   : > { %v4450_v7 = vld [vmem:[#allocation2 + $0x8] sm:$0xff]  }
 0x2ec   : > { %v1902_v8 = vor.u32 %v1901_v0, %v1898_v59  ;;  %v1941_v12 = vrot.slane %v4450_v7, 5  ;;  %v3719_v14 = vunpack.c.l.b16 %v4450_v7  ;;  %v3720_v29 = vunpack.c.h.b16 %v4450_v7 }
 0x2ee   : > { %1927 = vrot.lane.b32.xlu0 %v1902_v8, %s3857_s29  ;;  %1950 = vrot.lane.b32.xlu2 %v1941_v12, %s3858_s20  ;;  %v4458_v60 = vpack.c.b16 %v3719_v14, %v1796_v6  ;;  %v1884_v16 = vpack.c.b16 %v3719_v14, %v1882_v32  ;;  %v1964_v11 = vpack.c.b16 %v3720_v29, %v1962_v15 }
 0x2f0   : > { %1886 = vrot.lane.b32.xlu1 %v1884_v16, %s3860_s22  ;;  %v1814_v17 = vshrl.u32 %v4458_v60, 16  ;;  %v1817_v23 = vshll.u32 %v4458_v60, 16  ;;  %v1861_v5 = vrot.slane %v4458_v60, 5 }
 0x2f2   : > { %v1816_v1 = vrot.slane %v1814_v17, 4  ;;  %v1819_v19 = vrot.slane %v1817_v23, 5 }
 0x2f4   : > { %v4464_v31 = vor.u32 %v1819_v19, %v1816_v1 }
 0x2f6   : > { %1848 = vrot.lane.b32.xlu0 %v4464_v31, %s3861_s2  ;;  %1870 = vrot.lane.b32.xlu2 %v1861_v5, %s5164_s23 }
 0x2f8   : > { %1966 = vrot.lane.b32.xlu1 %v1964_v11, %s5165_s27 }
 0x2fc   : > { %v1650_v27 = vpop.f32.mrf.mxu1 }
 0x2fd   : > { %v1651_v34 = vadd.f32 %v4436_v51, %v1650_v27 }
 0x2ff   : > { %v1667_v35 = vmax.f32 %v1651_v34, 0.0 }
 0x301   : > { %v1675_v28 = vsel %vm4050_vm14, %v1667_v35, 0.0 }
 0x302   : > { %v1683_v26 = vpack.c.bf16 %v1675_v28, %v1675_v28 }
 0x304   : > { %1691 = vst.msk [vmem:[#allocation2 + $0x10] sm:$0xf] %vm5161_vm0, %v1683_v26  ;;  %v1652_v21 = vpop.f32.mrf.mxu1  ;;  %v1713_v45 = vunpack.c.l.b16 %v1683_v26 }
 0x305   : > { %v1653_v37 = vadd.f32 %v4436_v51, %v1652_v21 }
 0x307   : > { %v1668_v42 = vmax.f32 %v1653_v37, 0.0 }
 0x309   : > { %v1676_v43 = vsel %vm4086_vm8, %v1668_v42, 0.0 }
 0x30a   : > { %v1684_v44 = vpack.c.bf16 %v1676_v43, %v1676_v43 }
 0x30c   : > { %1692 = vst.msk [vmem:[#allocation2 + $0x14] sm:$0xf] %vm5166_vm5, %v1684_v44  ;;  %v1714_v63 = vunpack.c.l.b16 %v1684_v44  ;;  %v1655_v20 = vpop.f32.mrf.mxu1  ;;  %vm5167_vm5 = vsmask.f32 3328 }
 0x30d   : > { %v1656_v40 = vadd.f32 %v4436_v51, %v1655_v20 }
 0x30e   : > { %v1720_v22 = vpack.c.b16 %v1714_v63, %v1713_v45 }
 0x30f   : > { %v1669_v48 = vmax.f32 %v1656_v40, 0.0 }
 0x310   : > { %3468 = vmatmul.msk.bf16.gmra.mxu3 %vm5163_vm13, %v1720_v22  ;;  %v1903_v18 = vshrl.u32 %v1720_v22, 16  ;;  %v1906_v4 = vshll.u32 %v1720_v22, 16  ;;  %vm5168_vm13 = vcmask 1042432  }
 0x311   : > { %v1677_v9 = vsel %vm4127_vm6, %v1669_v48, 0.0 }
 0x312   : > { %v1685_v49 = vpack.c.bf16 %v1677_v9, %v1677_v9  ;;  %v1905_v53 = vrot.slane %v1903_v18, 4  ;;  %v1908_v24 = vrot.slane %v1906_v4, 5 }
 0x313   : > { %v4488_v46 = vld [vmem:[#allocation2 + $0x10] sm:$0xff]  }
 0x314   : > { %1693 = vst.msk [vmem:[#allocation2 + $0x18] sm:$0xf] %vm5161_vm0, %v1685_v49  ;;  %v1657_v38 = vpop.f32.mrf.mxu1  ;;  %1968 = vrot.lane.b32.xlu2 %v4488_v46, %s5165_s27  ;;  %v4493_v54 = vor.u32 %v1908_v24, %v1905_v53  ;;  %v1942_v30 = vrot.slane %v4488_v46, 5  ;;  %v3723_v56 = vunpack.c.l.b16 %v4488_v46  ;;  %v1715_v23 = vunpack.c.l.b16 %v1685_v49 }
 0x315   : > { %v1658_v57 = vadd.f32 %v4436_v51, %v1657_v38 }
 0x316   : > { %v1910_v58 = vsel %vm5167_vm5, %v1902_v8, %v4493_v54  ;;  %v1943_v55 = vsel %vm5168_vm13, %v1941_v12, %v1942_v30  ;;  %v1810_v36 = vpack.c.b16 %v3723_v56, %v3720_v29  ;;  %vm5169_vm5 = vmmov %vm5168_vm13 }
 0x317   : > { %v1670_v61 = vmax.f32 %v1658_v57, 0.0  ;;  %1929 = vrot.lane.b32.xlu1 %v1910_v58, %s3857_s29  ;;  %1952 = vrot.lane.b32.xlu0 %v1943_v55, %s3858_s20  ;;  %vm5170_vm13 = vmmov %vm5169_vm5 }
 0x318   : > { %v1862_v62 = vrot.slane %v1810_v36, 5  ;;  %v1822_v59 = vshrl.u32 %v1810_v36, 16  ;;  %v1825_v0 = vshll.u32 %v1810_v36, 16 }
 0x319   : > { %v1678_v32 = vsel %vm4163_vm7, %v1670_v61, 0.0 }
 0x31a   : > { %v1686_v14 = vpack.c.bf16 %v1678_v32, %v1678_v32  ;;  %v1824_v16 = vrot.slane %v1822_v59, 4  ;;  %v1827_v17 = vrot.slane %v1825_v0, 5  ;;  %v2116_v1 = vshrl.u32 %v1862_v62, 16 }
 0x31b   : > { %v4507_v8 = vld [vmem:[#allocation2 + $0x14] sm:$0xff]   ;;  %v2119_v19 = vshll.u32 %v1862_v62, 16  ;;  %v1863_v34 = vsel %vm5169_vm5, %v1861_v5, %v1862_v62  ;;  %vm5172_vm5 = vsmask.f32 3328 }
 0x31c   : > { %1694 = vst.msk [vmem:[#allocation2 + $0x1c] sm:$0xf] %vm5161_vm0, %v1686_v14  ;;  %v1716_v12 = vunpack.c.l.b16 %v1686_v14  ;;  %v1660_v13 = vpop.f32.mrf.mxu1  ;;  %1888 = vrot.lane.b32.xlu2 %v1810_v36, %s3860_s22  ;;  %v1864_v15 = vrot.slane %v4507_v8, 5  ;;  %v1831_v11 = vshrl.u32 %v4507_v8, 16  ;;  %v1834_v27 = vshll.u32 %v4507_v8, 16 }
 0x31d   : > { %v1661_v29 = vadd.f32 %v4436_v51, %v1660_v13  ;;  %v1828_v28 = vor.u32 %v1827_v17, %v1824_v16  ;;  %vm5171_vm0 = vcmask 130048   ;;  %v2118_v43 = vrot.slane %v2116_v1, 3  ;;  %v1784_v17 = vld [vmem:[#allocation2 + $0x28] sm:$0xf] }
 0x31e   : > { %v1721_v35 = vpack.c.b16 %v1716_v12, %v1715_v23  ;;  %v1833_v21 = vrot.slane %v1831_v11, 4  ;;  %v1836_v37 = vrot.slane %v1834_v27, 5  ;;  %v1865_v41 = vsel %vm5170_vm13, %v1862_v62, %v1864_v15 }
 0x31f   : > { %v1671_v26 = vmax.f32 %v1661_v29, 0.0  ;;  %1890 = vrot.lane.b32.xlu1 %v4507_v8, %s3860_s22  ;;  %1872 = vrot.lane.b32.xlu0 %v1863_v34, %s5164_s23  ;;  %v2124_v5 = vshrl.u32 %v1865_v41, 16  ;;  %v2121_v63 = vrot.slane %v2119_v19, 4  ;;  %v2127_v20 = vshll.u32 %v1865_v41, 16 }
 0x320   : > { %3469 = vmatmul.msk.bf16.gmra.mxu3 %vm5171_vm0, %v1721_v35  ;;  %v1911_v42 = vshrl.u32 %v1721_v35, 16  ;;  %v1914_v60 = vshll.u32 %v1721_v35, 16  ;;  %v4527_v45 = vor.u32 %v1836_v37, %v1833_v21  ;;  %vm5173_vm13 = vcmask 125952   ;;  %vm5174_vm0 = vmmov %vm5172_vm5 }
 0x321   : > { %v1679_v44 = vsel %vm4194_vm11, %v1671_v26, 0.0  ;;  %v2126_v22 = vrot.slane %v2124_v5, 3  ;;  %v2129_v18 = vrot.slane %v2127_v20, 4  ;;  %v2122_v24 = vor.u32 %v2121_v63, %v2118_v43 }
 0x322   : > { %v1687_v40 = vpack.c.bf16 %v1679_v44, %v1679_v44  ;;  %v1838_v48 = vsel %vm5172_vm5, %v1828_v28, %v4527_v45  ;;  %v1913_v4 = vrot.slane %v1911_v42, 4  ;;  %v1916_v9 = vrot.slane %v1914_v60, 5 }
 0x323   : > { %v2130_v38 = vor.u32 %v2129_v18, %v2126_v22  ;;  %v1829_v56 = vsel %vm5174_vm0, %v4464_v31, %v1828_v28  ;;  %vm5176_vm5 = vsmask.f32 4352  ;;  %v4548_v0 = vld [vmem:[#allocation2 + $0x18] sm:$0xff]   ;;  %v4565_v27 = vunpack.c.l.b16 %v1784_v17  ;;  %v1782_v17 = vld [vmem:[#allocation2 + $0x28] sm:$0x1] }
 0x324   : > { %1695 = vst.msk [vmem:[#allocation2 + $0x20] sm:$0xf] %vm5173_vm13, %v1687_v40  ;;  %v1662_v49 = vpop.f32.mrf.mxu1  ;;  %1852 = vrot.lane.b32.xlu2 %v1838_v48, %s3861_s2  ;;  %v1917_v55 = vor.u32 %v1916_v9, %v1913_v4  ;;  %vm5178_vm13 = vmmov %vm5174_vm0  ;;  %v1717_v62 = vunpack.c.l.b16 %v1687_v40  ;;  %v1944_v16 = vrot.slane %v4548_v0, 5  ;;  %v3728_v23 = vunpack.c.h.b16 %v4548_v0  ;;  %v1785_v9 = vld [vmem:[#allocation2 + $0x2c] sm:$0x1] }
 0x325   : > { %v1663_v53 = vadd.f32 %v4436_v51, %v1662_v49  ;;  %v2131_v58 = vsel %vm5176_vm5, %v2122_v24, %v2130_v38  ;;  %vm5182_vm5 = vmmov %vm5178_vm13 }
 0x326   : > { %3507 = vmatmul.msk.bf16.vlgmr.msrb.gmra.mxu2 %vm5177_vm2, %v2131_v58  ;;  %v1918_v51 = vsel %vm5178_vm13, %v4493_v54, %v1917_v55  ;;  %vm5183_vm13 = vmmov %vm5182_vm5 }
 0x327   : > { %v1672_v57 = vmax.f32 %v1663_v53, 0.0  ;;  %1986 = vrot.lane.b32.xlu0 %v1828_v28, %s5175_s21  ;;  %1850 = vrot.lane.b32.xlu1 %v1829_v56, %s3861_s2  ;;  %v1997_v56 = vunpack.c.l.b16 %v1785_v9  ;;  %v3664_v9 = vld [vmem:[%s5089_s11] sm:$0xff] }
 0x329   : > { %v1680_v36 = vsel %vm4215_vm3, %v1672_v57, 0.0 }
 0x32a   : > { %v1688_v61 = vpack.c.bf16 %v1680_v36, %v1680_v36 }
 0x32c   : > { %1696 = vst.msk [vmem:[#allocation2 + $0x24] sm:$0xf] %vm5179_vm15, %v1688_v61  ;;  %v1718_v31 = vunpack.c.l.b16 %v1688_v61  ;;  %1931 = vrot.lane.b32.xlu2 %v1918_v51, %s3857_s29  ;;  %vm5180_vm15 = vcmask 1042432   ;;  %v1998_v51 = vpack.c.b16 %v1997_v56, %v1997_v56 }
 0x32d   : > { %v1945_v19 = vsel %vm5180_vm15, %v1942_v30, %v1944_v16  ;;  %vm5181_vm0 = vmmov %vm5180_vm15  ;;  %vm5185_vm15 = vcmask 130048  }
 0x32e   : > { %v1722_v59 = vpack.c.b16 %v1718_v31, %v1717_v62  ;;  %v3671_v62 = vld [vmem:[%s5089_s11 + $0x38] sm:$0xff] }
 0x32f   : > { %1874 = vrot.lane.b32.xlu0 %v1865_v41, %s5164_s23  ;;  %1988 = vrot.lane.b32.xlu1 %v1838_v48, %s5175_s21 }
 0x330   : > { %3470 = vmatmul.msk.bf16.gmra.mxu3 %vm5177_vm2, %v1722_v59  ;;  %v1919_v32 = vshrl.u32 %v1722_v59, 16  ;;  %v1922_v14 = vshll.u32 %v1722_v59, 16  ;;  %vm5184_vm2 = vsmask.f32 4352  ;;  %2253 = vmatpush.bf16.msrb.mxu0 %v3671_v62 }
 0x332   : > { %v1921_v13 = vrot.slane %v1919_v32, 4  ;;  %v1924_v1 = vrot.slane %v1922_v14, 5  ;;  %v2001_v14 = vrot.slane %v1998_v51, 5 }
 0x333   : > { %v4552_v54 = vld [vmem:[#allocation2 + $0x20] sm:$0xff]  }
 0x334   : > { %v4556_v12 = vunpack.c.l.b16 %v4552_v54  ;;  %v4563_v11 = vunpack.c.h.b16 %v4552_v54  ;;  %v4570_v26 = vor.u32 %v1924_v1, %v1921_v13  ;;  %v1946_v4 = vrot.slane %v4552_v54, 5  ;;  %v1779_v57 = vld [vmem:[#allocation2 + $0x24] sm:$0x1] }
 0x335   : > { %v1859_v61 = vunpack.c.l.b16 %v1779_v57  ;;  %v1938_v1 = vunpack.c.l.b16 %v1782_v17 }
 0x336   : > { %v1812_v29 = vpack.c.b16 %v4556_v12, %v3728_v23  ;;  %v1976_v41 = vpack.c.b16 %v4565_v27, %v4563_v11  ;;  %v1926_v63 = vsel %vm5182_vm5, %v1917_v55, %v4570_v26  ;;  %vm5186_vm5 = vmmov %vm5181_vm0 }
 0x337   : > { %1954 = vrot.lane.b32.xlu0 %v1945_v19, %s3858_s20  ;;  %1970 = vrot.lane.b32.xlu1 %v4548_v0, %s5165_s27  ;;  %v1860_v32 = vpack.c.b16 %v1859_v61, %v1859_v61 }
 0x338   : > { %v1840_v34 = vshrl.u32 %v1812_v29, 16  ;;  %v1843_v35 = vshll.u32 %v1812_v29, 16  ;;  %v1866_v28 = vrot.slane %v1812_v29, 5  ;;  %v1999_v40 = vrot.slane %v1976_v41, 5 }
 0x339   : > { %v1978_v22 = vshrl.u32 %v1976_v41, 16  ;;  %v1981_v48 = vshll.u32 %v1976_v41, 16  ;;  %v1868_v13 = vrot.slane %v1860_v32, 5 }
 0x33a   : > { %v1842_v21 = vrot.slane %v1840_v34, 4  ;;  %v1845_v37 = vrot.slane %v1843_v35, 5  ;;  %v1867_v30 = vsel %vm5181_vm0, %v1864_v15, %v1866_v28  ;;  %v2000_v18 = vsel %vm5181_vm0, %v1866_v28, %v1999_v40 }
 0x33b   : > { %v2141_v42 = vshrl.u32 %v1867_v30, 16  ;;  %v2144_v60 = vshll.u32 %v1867_v30, 16  ;;  %v2161_v49 = vshll.u32 %v2000_v18, 16  ;;  %v1980_v53 = vrot.slane %v1978_v22, 4 }
 0x33c   : > { %v1846_v43 = vor.u32 %v1845_v37, %v1842_v21  ;;  %v1983_v24 = vrot.slane %v1981_v48, 5  ;;  %v2002_v19 = vsel %vm5181_vm0, %v1999_v40, %v2001_v14  ;;  %v3669_v37 = vld [vmem:[%s5089_s11 + $0x28] sm:$0xff]  ;;  %v1770_v48 = vld [vmem:[#allocation2] sm:$0x8] }
 0x33d   : > { %v2143_v5 = vrot.slane %v2141_v42, 3  ;;  %v2146_v44 = vrot.slane %v2144_v60, 4  ;;  %v2163_v55 = vrot.slane %v2161_v49, 4  ;;  %v2175_v34 = vshrl.u32 %v2002_v19, 16 }
 0x33e   : > { %v1847_v20 = vsel %vm5183_vm13, %v4527_v45, %v1846_v43  ;;  %v2158_v45 = vshrl.u32 %v2000_v18, 16  ;;  %v1984_v36 = vor.u32 %v1983_v24, %v1980_v53  ;;  %v2178_v35 = vshll.u32 %v2002_v19, 16 }
 0x33f   : > { %1933 = vrot.lane.b32.xlu0 %v1926_v63, %s3857_s29  ;;  %1990 = vrot.lane.b32.xlu2 %v1847_v20, %s5175_s21  ;;  %v2147_v8 = vor.u32 %v2146_v44, %v2143_v5  ;;  %v1965_v42 = vpack.c.b16 %v4565_v27, %v4565_v27  ;;  %v3667_v27 = vld [vmem:[%s5089_s11 + $0x18] sm:$0xff]  ;;  %v3666_v44 = vld [vmem:[%s5089_s11 + $0x10] sm:$0xff] }
 0x340   : > { %1876 = vrot.lane.b32.xlu1 %v1867_v30, %s5164_s23  ;;  %v2160_v58 = vrot.slane %v2158_v45, 3  ;;  %v1985_v59 = vsel %vm5183_vm13, %v1846_v43, %v1984_v36  ;;  %v2177_v30 = vrot.slane %v2175_v34, 3  ;;  %v2180_v41 = vrot.slane %v2178_v35, 4  ;;  %vm5188_vm13 = vmmov %vm5181_vm0 }
 0x341   : > { %v2148_v15 = vsel %vm5184_vm2, %v2130_v38, %v2147_v8  ;;  %v1947_v38 = vsel %vm5186_vm5, %v1944_v16, %v1946_v4  ;;  %v3670_v16 = vld [vmem:[%s5089_s11 + $0x30] sm:$0xff]  ;;  %vm5187_vm5 = vmmov %vm5181_vm0 }
 0x342   : > { %3508 = vmatmul.msk.bf16.gmra.mxu2 %vm5185_vm15, %v2148_v15  ;;  %v2164_v31 = vor.u32 %v2163_v55, %v2160_v58  ;;  %2254 = vmatpush.bf16.msrb.mxu0 %v3670_v16  ;;  %v1869_v21 = vsel %vm5187_vm5, %v1866_v28, %v1868_v13  ;;  %v2181_v28 = vor.u32 %v2180_v41, %v2177_v30  ;;  %vm5189_vm0 = vmmov %vm5185_vm15  ;;  %vm5190_vm5 = vcmask 654336  }
 0x344   : > { %v2165_v23 = vsel %vm5184_vm2, %v2147_v8, %v2164_v31  ;;  %v3665_v8 = vld [vmem:[%s5089_s11 + $0x8] sm:$0xff] }
 0x346   : > { %2255 = vmatpush.bf16.msrb.mxu0 %v3669_v37 }
 0x347   : > { %1854 = vrot.lane.b32.xlu0 %v1847_v20, %s3861_s2  ;;  %1892 = vrot.lane.b32.xlu2 %v1812_v29, %s3860_s22  ;;  %v1885_v29 = vpack.c.b16 %v4563_v11, %v4563_v11 }
 0x348   : > { %1956 = vrot.lane.b32.xlu1 %v1947_v38, %s3858_s20  ;;  %v1951_v5 = vpop.permute.xlu2 %1950 }
 0x34f   : > { %1992 = vrot.lane.b32.xlu0 %v1985_v59, %s5175_s21  ;;  %1972 = vrot.lane.b32.xlu2 %v4552_v54, %s5165_s27  ;;  %v1940_v54 = vpack.c.b16 %v1938_v1, %v1938_v1 }
 0x350   : > { %1856 = vrot.lane.b32.xlu1 %v1846_v43, %s3861_s2  ;;  %v3668_v43 = vld [vmem:[%s5089_s11 + $0x20] sm:$0xff]  ;;  %v1871_v40 = vpop.permute.xlu2 %1870 }
 0x351   : > { %v1948_v11 = vrot.slane %v1940_v54, 5  ;;  %2256 = vmatpush.bf16.msrb.mxu0 %v3668_v43 }
 0x352   : > { %3509 = vmatmul.msk.bf16.gmra.mxu2 %vm5185_vm15, %v2165_v23 }
 0x353   : > { %v1949_v60 = vsel %vm5188_vm13, %v1946_v4, %v1948_v11  ;;  %v1795_v4 = vunpack.c.l.b16 %v1770_v48  ;;  %vm5191_vm13 = vmmov %vm5189_vm0 }
 0x355   : > { %2257 = vmatpush.bf16.msrb.mxu0 %v3667_v27  ;;  %v1804_v45 = vpack.c.b16 %v1796_v6, %v1795_v4 }
 0x357   : > { %1894 = vrot.lane.b32.xlu0 %v1885_v29, %s3860_s22  ;;  %1878 = vrot.lane.b32.xlu2 %v1869_v21, %s5164_s23 }
 0x358   : > { %1935 = vrot.lane.b32.xlu1 %v4570_v26, %s3857_s29  ;;  %v2182_v26 = vsel %vm5184_vm2, %v2164_v31, %v2181_v28  ;;  %vm5192_vm2 = vcmask 785408  }
 0x359   : > { %2258 = vmatpush.bf16.msrb.mxu0 %v3666_v44 }
 0x35d   : > { %2259 = vmatpush.bf16.msrb.mxu0 %v3665_v8 }
 0x35f   : > { %1974 = vrot.lane.b32.xlu0 %v1965_v42, %s5165_s27  ;;  %1958 = vrot.lane.b32.xlu2 %v1949_v60, %s3858_s20 }
 0x360   : > { %1994 = vrot.lane.b32.xlu1 %v1984_v36, %s5175_s21  ;;  %v1928_v63 = vpop.permute.xlu0 %1927  ;;  %s3634_s21 = sshll.u32 %s5253_s30, 6 }
 0x361   : > { %2260 = vmatpush.bf16.msrb.mxu0 %v3664_v9  ;;  %s5051_s22 = scalar_lea.vmem %s5097_s19, %s3634_s21 }
 0x362   : > { %3510 = vmatmul.msk.bf16.gmra.mxu2 %vm5185_vm15, %v2182_v26  ;;  %v1887_v20 = vpop.permute.xlu1 %1886  ;;  %vm5193_vm15 = vcmask 916480  }
 0x368   : > { %v1849_v15 = vpop.permute.xlu0 %1848 }
 0x369   : > { %v2005_v56 = vsel %vm5189_vm0, %v1804_v45, %v1849_v15  ;;  %vm5194_vm0 = vmmov %vm5190_vm5 }
 0x36a   : > { %v1967_v22 = vpop.permute.xlu1 %1966  ;;  %v2019_v38 = vsel %vm1217_vm1, %v2005_v56, %v1871_v40 }
 0x36b   : > { %v2029_v55 = vsel %vm1228_vm9, %v2019_v38, %v1887_v20 }
 0x36c   : > { %v2039_v36 = vsel %vm1239_vm12, %v2029_v55, %v1928_v63 }
 0x36d   : > { %v2049_v51 = vsel %vm5190_vm5, %v2039_v36, %v1951_v5  ;;  %vm5195_vm5 = vmmov %vm5191_vm13 }
 0x36e   : > { %v1969_v18 = vpop.permute.xlu2 %1968  ;;  %v2059_v31 = vsel %vm5192_vm2, %v2049_v51, %v1967_v22 }
 0x376   : > { %v1889_v24 = vpop.permute.xlu2 %1888 }
 0x37e   : > { %v1853_v61 = vpop.permute.xlu2 %1852 }
 0x37f   : > { %v2011_v29 = vsel %vm5195_vm5, %v4488_v46, %v1853_v61 }
 0x386   : > { %v1932_v23 = vpop.permute.xlu2 %1931 }
 0x389   : > { %v1930_v49 = vpop.permute.xlu1 %1929  ;;  %v1953_v53 = vpop.permute.xlu0 %1952 }
 0x391   : > { %v1891_v57 = vpop.permute.xlu1 %1890  ;;  %v1873_v58 = vpop.permute.xlu0 %1872 }
 0x399   : > { %v1987_v62 = vpop.permute.xlu0 %1986  ;;  %v1851_v10 = vpop.permute.xlu1 %1850 }
 0x39a   : > { %v2008_v6 = vsel %vm5191_vm13, %v4450_v7, %v1851_v10  ;;  %v2069_v32 = vsel %vm5193_vm15, %v2059_v31, %v1987_v62  ;;  %vm5196_vm13 = vmmov %vm5192_vm2  ;;  %v1991_v43 = vpop.permute.xlu2 %1990 }
 0x39b   : > { %v2021_v59 = vsel %vm1217_vm1, %v2008_v6, %v1873_v58  ;;  %v2100_v13 = vshrl.u32 %v2069_v32, 16  ;;  %v2103_v1 = vshll.u32 %v2069_v32, 16  ;;  %vm5197_vm2 = vmmov %vm5193_vm15  ;;  %v1808_v32 = vpack.c.b16 %v4556_v12, %v4556_v12 }
 0x39c   : > { %v2031_v14 = vsel %vm1228_vm9, %v2021_v59, %v1889_v24  ;;  %vm5198_vm15 = vmmov %vm5194_vm0 }
 0x39d   : > { %v2041_v16 = vsel %vm1239_vm12, %v2031_v14, %v1930_v49  ;;  %v2102_v54 = vrot.slane %v2100_v13, 3  ;;  %v2105_v37 = vrot.slane %v2103_v1, 4  ;;  %vm5200_vm5 = vmmov %vm5196_vm13 }
 0x39e   : > { %v2051_v17 = vsel %vm5194_vm0, %v2041_v16, %v1953_v53  ;;  %vm5199_vm0 = vsmask.f32 4352 }
 0x39f   : > { %v2061_v7 = vsel %vm5196_vm13, %v2051_v17, %v1969_v18  ;;  %v2106_v60 = vor.u32 %v2105_v37, %v2102_v54  ;;  %vm5201_vm13 = vmmov %vm5197_vm2 }
 0x3a1   : > { %v1875_v19 = vpop.permute.xlu0 %1874  ;;  %v1989_v34 = vpop.permute.xlu1 %1988 }
 0x3a2   : > { %v2023_v35 = vsel %vm1217_vm1, %v2011_v29, %v1875_v19  ;;  %v2071_v21 = vsel %vm5197_vm2, %v2061_v7, %v1989_v34  ;;  %v1893_v48 = vpop.permute.xlu2 %1892  ;;  %vm5202_vm2 = vcmask 130048  }
 0x3a3   : > { %v2107_v30 = vshrl.u32 %v2071_v21, 16  ;;  %v2110_v41 = vshll.u32 %v2071_v21, 16  ;;  %v2033_v11 = vsel %vm1228_vm9, %v2023_v35, %v1891_v57 }
 0x3a4   : > { %v2043_v46 = vsel %vm1239_vm12, %v2033_v11, %v1932_v23 }
 0x3a5   : > { %v2109_v42 = vrot.slane %v2107_v30, 3  ;;  %v2112_v28 = vrot.slane %v2110_v41, 4 }
 0x3a7   : > { %v2113_v26 = vor.u32 %v2112_v28, %v2109_v42 }
 0x3a9   : > { %v1955_v27 = vpop.permute.xlu0 %1954  ;;  %v1971_v44 = vpop.permute.xlu1 %1970  ;;  %v2114_v63 = vsel %vm5199_vm0, %v2106_v60, %v2113_v26 }
 0x3aa   : > { %v2053_v5 = vsel %vm5198_vm15, %v2043_v46, %v1955_v27  ;;  %2261 = vmatmul.bf16.vlgmr.msrb.gmra.mxu0 %v2114_v63  ;;  %vm5203_vm15 = vmmov %vm5199_vm0  ;;  %v1973_v57 = vpop.permute.xlu2 %1972  ;;  %vm5204_vm0 = vcmask 654336   ;;  %v3844_v46 = vld [vmem:[%s5090_s12] ss:$0 sm:$0xff] }
 0x3ab   : > { %v2063_v20 = vsel %vm5200_vm5, %v2053_v5, %v1971_v44 }
 0x3ac   : > { %v2073_v40 = vsel %vm5201_vm13, %v2063_v20, %v1991_v43  ;;  %v2291_v43 = vpop.f32.mrf.mxu2 }
 0x3ad   : > { %v2132_v8 = vshrl.u32 %v2073_v40, 16  ;;  %v2135_v15 = vshll.u32 %v2073_v40, 16 }
 0x3af   : > { %v2134_v18 = vrot.slane %v2132_v8, 3  ;;  %v2137_v4 = vrot.slane %v2135_v15, 4 }
 0x3b1   : > { %v1934_v22 = vpop.permute.xlu0 %1933  ;;  %v2138_v45 = vor.u32 %v2137_v4, %v2134_v18 }
 0x3b2   : > { %v1877_v9 = vpop.permute.xlu1 %1876  ;;  %v1879_v14 = vpop.permute.xlu2 %1878 }
 0x3b3   : > { %v2139_v56 = vsel %vm5203_vm15, %v2113_v26, %v2138_v45 }
 0x3b4   : > { %v2293_v26 = vpop.f32.mrf.mxu2 }
 0x3b9   : > { %v1855_v49 = vpop.permute.xlu0 %1854 }
 0x3ba   : > { %v2014_v53 = vsel %vm5202_vm2, %v4548_v0, %v1855_v49  ;;  %v1957_v24 = vpop.permute.xlu1 %1956  ;;  %2266 = vmatmul.bf16.gmra.mxu0 %v2139_v56  ;;  %v1959_v34 = vpop.permute.xlu2 %1958  ;;  %v3680_v56 = vld [vmem:[%s5091_s13 + $0x38] sm:$0xff] }
 0x3bb   : > { %v2025_v38 = vsel %vm1217_vm1, %v2014_v53, %v1877_v9  ;;  %2431 = vmatpush.bf16.msra.mxu1 %v3680_v56 }
 0x3bc   : > { %v2035_v58 = vsel %vm1228_vm9, %v2025_v38, %v1893_v48 }
 0x3bd   : > { %v2045_v55 = vsel %vm1239_vm12, %v2035_v58, %v1934_v22  ;;  %v3678_v58 = vld [vmem:[%s5091_s13 + $0x28] sm:$0xff] }
 0x3be   : > { %v2055_v36 = vsel %vm5204_vm0, %v2045_v55, %v1957_v24 }
 0x3bf   : > { %v2065_v51 = vsel %vm5200_vm5, %v2055_v36, %v1973_v57  ;;  %v3679_v57 = vld [vmem:[%s5091_s13 + $0x30] sm:$0xff] }
 0x3c0   : > { %2432 = vmatpush.bf16.msra.mxu1 %v3679_v57 }
 0x3c1   : > { %v1993_v61 = vpop.permute.xlu0 %1992 }
 0x3c2   : > { %v2075_v62 = vsel %vm5201_vm13, %v2065_v51, %v1993_v61  ;;  %v1857_v10 = vpop.permute.xlu1 %1856 }
 0x3c3   : > { %v2149_v0 = vshrl.u32 %v2075_v62, 16  ;;  %v2152_v6 = vshll.u32 %v2075_v62, 16  ;;  %v2017_v16 = vsel %vm5202_vm2, %v1808_v32, %v1857_v10  ;;  %vm5205_vm2 = vmmov %vm5203_vm15  ;;  %v3677_v62 = vld [vmem:[%s5091_s13 + $0x20] sm:$0xff] }
 0x3c4   : > { %v2027_v1 = vsel %vm1217_vm1, %v2017_v16, %v1879_v14  ;;  %2433 = vmatpush.bf16.msra.mxu1 %v3678_v58  ;;  %v3675_v14 = vld [vmem:[%s5091_s13 + $0x10] sm:$0xff] }
 0x3c5   : > { %v2151_v31 = vrot.slane %v2149_v0, 3  ;;  %v2154_v59 = vrot.slane %v2152_v6, 4  ;;  %v2296_v44 = vpop.f32.mrf.mxu2 }
 0x3c7   : > { %v2155_v17 = vor.u32 %v2154_v59, %v2151_v31  ;;  %v3676_v31 = vld [vmem:[%s5091_s13 + $0x18] sm:$0xff] }
 0x3c8   : > { %2434 = vmatpush.bf16.msra.mxu1 %v3677_v62 }
 0x3c9   : > { %v1895_v23 = vpop.permute.xlu0 %1894  ;;  %v2156_v13 = vsel %vm5203_vm15, %v2138_v45, %v2155_v17 }
 0x3ca   : > { %v1936_v19 = vpop.permute.xlu1 %1935  ;;  %v2037_v29 = vsel %vm1228_vm9, %v2027_v1, %v1895_v23  ;;  %2271 = vmatmul.bf16.gmra.mxu0 %v2156_v13  ;;  %vm5206_vm9 = vcmask 257024  }
 0x3cb   : > { %v2047_v7 = vsel %vm1239_vm12, %v2037_v29, %v1936_v19  ;;  %vm5207_vm15 = vmmov %vm5206_vm9 }
 0x3cc   : > { %v2057_v21 = vsel %vm5204_vm0, %v2047_v7, %v1959_v34  ;;  %2435 = vmatpush.bf16.msra.mxu1 %v3676_v31  ;;  %v3674_v7 = vld [vmem:[%s5091_s13 + $0x8] sm:$0xff]  ;;  %v3673_v34 = vld [vmem:[%s5091_s13] sm:$0xff] }
 0x3cd   : > { %v2298_v48 = vpop.f32.mrf.mxu2 }
 0x3d0   : > { %2436 = vmatpush.bf16.msra.mxu1 %v3675_v14 }
 0x3d1   : > { %v1975_v35 = vpop.permute.xlu0 %1974 }
 0x3d2   : > { %v2067_v12 = vsel %vm5200_vm5, %v2057_v21, %v1975_v35  ;;  %v1995_v54 = vpop.permute.xlu1 %1994  ;;  %v1750_v35 = vpop.f32.mrf.mxu3  ;;  %v3843_v21 = vld [vmem:[%s5088_s10] ss:$0 sm:$0xff] }
 0x3d3   : > { %v2077_v37 = vsel %vm5201_vm13, %v2067_v12, %v1995_v54 }
 0x3d4   : > { %v2166_v30 = vshrl.u32 %v2077_v37, 16  ;;  %v2169_v41 = vshll.u32 %v2077_v37, 16  ;;  %2437 = vmatpush.bf16.msra.mxu1 %v3674_v7  ;;  %v1751_v37 = vadd.f32 %v3843_v21, %v1750_v35 }
 0x3d5   : > { %v2301_v53 = vpop.f32.mrf.mxu2 }
 0x3d6   : > { %v2168_v11 = vrot.slane %v2166_v30, 3  ;;  %v2171_v42 = vrot.slane %v2169_v41, 4 }
 0x3d8   : > { %v2172_v28 = vor.u32 %v2171_v42, %v2168_v11  ;;  %2438 = vmatpush.bf16.msra.mxu1 %v3673_v34 }
 0x3da   : > { %v2173_v60 = vsel %vm5205_vm2, %v2155_v17, %v2172_v28  ;;  %v1752_v12 = vpop.f32.mrf.mxu3 }
 0x3db   : > { %2276 = vmatmul.bf16.gmra.mxu0 %v2173_v60  ;;  %v1753_v30 = vadd.f32 %v3843_v21, %v1752_v12 }
 0x3dd   : > { %v2303_v55 = vpop.f32.mrf.mxu2 }
 0x3e5   : > { %v2306_v59 = vpop.f32.mrf.mxu2 }
 0x3ed   : > { %v2308_v13 = vpop.f32.mrf.mxu2 }
 0x427   : > { %v2262_v27 = vpop.f32.mrf.mxu0 }
 0x428   : > { %v2263_v5 = vadd.f32 %v3844_v46, %v2262_v27  ;;  %v1755_v27 = vpop.f32.mrf.mxu3 }
 0x42a   : > { %v2292_v40 = vadd.f32 %v2291_v43, %v2263_v5 }
 0x42f   : > { %v2264_v63 = vpop.f32.mrf.mxu0 }
 0x430   : > { %v2265_v20 = vadd.f32 %v3844_v46, %v2264_v63  ;;  %v1756_v63 = vadd.f32 %v3843_v21, %v1755_v27 }
 0x432   : > { %v2294_v8 = vadd.f32 %v2293_v26, %v2265_v20 }
 0x434   : > { %v3819_v15 = vpack.i.bf16 %v2294_v8, %v2292_v40 }
 0x436   : > { %3820 = vrot.lane.b32.xlu2 %v3819_v15, %s3857_s29 }
 0x437   : > { %v2267_v22 = vpop.f32.mrf.mxu0 }
 0x438   : > { %v2268_v18 = vadd.f32 %v3844_v46, %v2267_v22 }
 0x43a   : > { %v2297_v45 = vadd.f32 %v2296_v44, %v2268_v18 }
 0x43f   : > { %v2269_v4 = vpop.f32.mrf.mxu0 }
 0x440   : > { %v2270_v9 = vadd.f32 %v3844_v46, %v2269_v4 }
 0x442   : > { %v2299_v49 = vadd.f32 %v2298_v48, %v2270_v9 }
 0x444   : > { %v3824_v24 = vpack.i.bf16 %v2299_v49, %v2297_v45 }
 0x446   : > { %3825 = vrot.lane.b32.xlu0 %v3824_v24, %s3857_s29 }
 0x447   : > { %v2272_v38 = vpop.f32.mrf.mxu0 }
 0x448   : > { %v2273_v36 = vadd.f32 %v3844_v46, %v2272_v38 }
 0x44a   : > { %v2302_v10 = vadd.f32 %v2301_v53, %v2273_v36 }
 0x44f   : > { %v2274_v61 = vpop.f32.mrf.mxu0 }
 0x450   : > { %v2275_v51 = vadd.f32 %v3844_v46, %v2274_v61 }
 0x452   : > { %v2304_v0 = vadd.f32 %v2303_v55, %v2275_v51 }
 0x454   : > { %v3829_v6 = vpack.i.bf16 %v2304_v0, %v2302_v10 }
 0x456   : > { %3830 = vrot.lane.b32.xlu1 %v3829_v6, %s3857_s29 }
 0x458   : > { %v2277_v32 = vpop.f32.mrf.mxu0 }
 0x459   : > { %v2278_v16 = vadd.f32 %v3844_v46, %v2277_v32 }
 0x45b   : > { %v2307_v1 = vadd.f32 %v2306_v59, %v2278_v16 }
 0x460   : > { %v2279_v17 = vpop.f32.mrf.mxu0 }
 0x461   : > { %v2280_v23 = vadd.f32 %v3844_v46, %v2279_v17  ;;  %v1757_v46 = vpop.f32.mrf.mxu3 }
 0x462   : > { %v1758_v20 = vadd.f32 %v3843_v21, %v1757_v46 }
 0x463   : > { %v2309_v19 = vadd.f32 %v2308_v13, %v2280_v23  ;;  %v3682_v23 = vld [vmem:[%s5093_s15 + $0x8] sm:$0xff]  ;;  %v3681_v13 = vld [vmem:[%s5093_s15] sm:$0xff] }
 0x464   : > { %2550 = vmatpush.bf16.msrb.mxu3 %v3682_v23 }
 0x465   : > { %v3834_v29 = vpack.i.bf16 %v2309_v19, %v2307_v1  ;;  %v4736_v1 = vld [vmem:[%s5092_s14] ss:$0 sm:$0xff] }
 0x467   : > { %3835 = vrot.lane.b32.xlu2 %v3834_v29, %s3857_s29 }
 0x468   : > { %2551 = vmatpush.bf16.msrb.mxu3 %v3681_v13 }
 0x469   : > { %v1760_v5 = vpop.f32.mrf.mxu3 }
 0x46a   : > { %v1761_v53 = vadd.f32 %v3843_v21, %v1760_v5 }
 0x471   : > { %v1762_v4 = vpop.f32.mrf.mxu3 }
 0x472   : > { %v1763_v24 = vadd.f32 %v3843_v21, %v1762_v4 }
 0x479   : > { %v1765_v45 = vpop.f32.mrf.mxu3 }
 0x47a   : > { %v1766_v6 = vadd.f32 %v3843_v21, %v1765_v45 }
 0x481   : > { %v1767_v62 = vpop.f32.mrf.mxu3 }
 0x482   : > { %v1768_v31 = vadd.f32 %v3843_v21, %v1767_v62 }
 0x490   : > { %v3821_v54 = vpop.permute.xlu2 %3820 }
 0x491   : > { %v3823_v41 = vunpack.i.h.bf16 %v3821_v54  ;;  %v3822_v11 = vunpack.i.l.bf16 %v3821_v54 }
 0x493   : > { %v2344_v42 = vsel %vm1239_vm12, %v1753_v30, %v3823_v41  ;;  %v2343_v28 = vsel %vm1239_vm12, %v1751_v37, %v3822_v11 }
 0x494   : > { %v2352_v60 = vmax.f32 %v2344_v42, 0.0  ;;  %v2351_v43 = vmax.f32 %v2343_v28, 0.0  ;;  %v4746_v28 = vld [vmem:[#allocation2 + $0x4] sm:$0xf] }
 0x496   : > { %v2359_v26 = vpack.c.bf16 %v2352_v60, %v2351_v43  ;;  %v2599_v60 = vunpack.c.l.b16 %v4746_v28 }
 0x498   : > { %2439 = vmatmul.bf16.vlgmr.msra.gmra.mxu1 %v2359_v26 }
 0x4b8   : > { %v3826_v44 = vpop.permute.xlu0 %3825 }
 0x4b9   : > { %v3828_v40 = vunpack.i.h.bf16 %v3826_v44  ;;  %v3827_v8 = vunpack.i.l.bf16 %v3826_v44 }
 0x4bb   : > { %v2345_v15 = vsel %vm1239_vm12, %v1756_v63, %v3827_v8  ;;  %v2346_v22 = vsel %vm1239_vm12, %v1758_v20, %v3828_v40 }
 0x4bc   : > { %v2353_v48 = vmax.f32 %v2345_v15, 0.0  ;;  %v2354_v18 = vmax.f32 %v2346_v22, 0.0 }
 0x4be   : > { %v2360_v9 = vpack.c.bf16 %v2354_v18, %v2353_v48 }
 0x4c0   : > { %2444 = vmatmul.bf16.gmra.mxu1 %v2360_v9 }
 0x4c1   : > { %v3836_v51 = vpop.permute.xlu2 %3835 }
 0x4c2   : > { %v3838_v10 = vunpack.i.h.bf16 %v3836_v51  ;;  %v3837_v0 = vunpack.i.l.bf16 %v3836_v51 }
 0x4c4   : > { %v2349_v59 = vsel %vm1239_vm12, %v1766_v6, %v3837_v0  ;;  %v2350_v32 = vsel %vm1239_vm12, %v1768_v31, %v3838_v10 }
 0x4c5   : > { %v2357_v14 = vmax.f32 %v2349_v59, 0.0  ;;  %v2358_v16 = vmax.f32 %v2350_v32, 0.0 }
 0x4c7   : > { %v2362_v17 = vpack.c.bf16 %v2358_v16, %v2357_v14 }
 0x4c8   : > { %v3831_v49 = vpop.permute.xlu1 %3830 }
 0x4c9   : > { %v3833_v56 = vunpack.i.h.bf16 %v3831_v49  ;;  %v3832_v38 = vunpack.i.l.bf16 %v3831_v49 }
 0x4cb   : > { %v2347_v57 = vsel %vm1239_vm12, %v1761_v53, %v3832_v38  ;;  %v2348_v58 = vsel %vm1239_vm12, %v1763_v24, %v3833_v56  ;;  %v3700_v53 = vld [vmem:[%s5095_s17 + $0x88] sm:$0xff] }
 0x4cc   : > { %v2355_v55 = vmax.f32 %v2347_v57, 0.0  ;;  %v2356_v36 = vmax.f32 %v2348_v58, 0.0  ;;  %3220 = vmatpush.bf16.msrb.mxu1 %v3700_v53 }
 0x4ce   : > { %v2361_v61 = vpack.c.bf16 %v2356_v36, %v2355_v55 }
 0x4d0   : > { %2449 = vmatmul.bf16.gmra.mxu1 %v2361_v61 }
 0x4d1   : > { %3221 = vmatpush.bf16.msrb.mxu1 %v3699_v3 }
 0x4e0   : > { %2454 = vmatmul.bf16.gmra.mxu1 %v2362_v17 }
 0x515   : > { %v2440_v19 = vpop.f32.mrf.mxu1 }
 0x516   : > { %v2441_v29 = vadd.f32 %v4736_v1, %v2440_v19 }
 0x518   : > { %v2460_v7 = vmax.f32 %v2441_v29, 0.0 }
 0x51a   : > { %v2468_v34 = vsel %vm4022_vm10, %v2460_v7, 0.0  ;;  %vm5208_vm10 = vmmov %vm5206_vm9 }
 0x51b   : > { %v2476_v35 = vpack.c.bf16 %v2468_v34, %v2468_v34 }
 0x51d   : > { %2484 = vst.msk [vmem:[#allocation2 + $0x8] sm:$0xf] %vm5206_vm9, %v2476_v35  ;;  %v2442_v21 = vpop.f32.mrf.mxu1  ;;  %v2508_v41 = vunpack.c.l.b16 %v2476_v35 }
 0x51e   : > { %v2443_v12 = vadd.f32 %v4736_v1, %v2442_v21 }
 0x520   : > { %v2461_v54 = vmax.f32 %v2443_v12, 0.0 }
 0x522   : > { %v2469_v37 = vsel %vm4036_vm4, %v2461_v54, 0.0  ;;  %vm5209_vm4 = vmmov %vm5206_vm9 }
 0x523   : > { %v2477_v30 = vpack.c.bf16 %v2469_v37, %v2469_v37  ;;  %vm5214_vm5 = vmmov %vm5209_vm4 }
 0x524   : > { %v2586_v39 = vld [vmem:[#allocation2 + $0x8] sm:$0x8]  ;;  %vm5217_vm2 = vmmov %vm5209_vm4 }
 0x525   : > { %2485 = vst.msk [vmem:[#allocation2 + $0xc] sm:$0xf] %vm5207_vm15, %v2477_v30  ;;  %v2509_v11 = vunpack.c.l.b16 %v2477_v30  ;;  %v2755_v46 = vunpack.c.l.b16 %v2586_v39  ;;  %vm5220_vm15 = vsmask.f32 4352 }
 0x527   : > { %v2516_v42 = vpack.c.b16 %v2509_v11, %v2508_v41 }
 0x529   : > { %3551 = vmatmul.msk.bf16.vlgmr.msrb.gmra.mxu3 %vm1217_vm1, %v2516_v42  ;;  %v2699_v61 = vshrl.u32 %v2516_v42, 16  ;;  %v2702_v51 = vshll.u32 %v2516_v42, 16 }
 0x52b   : > { %v2701_v31 = vrot.slane %v2699_v61, 4  ;;  %v2704_v59 = vrot.slane %v2702_v51, 5 }
 0x52c   : > { %v4750_v43 = vld [vmem:[#allocation2 + $0x8] sm:$0xff]  }
 0x52d   : > { %v3735_v26 = vunpack.c.l.b16 %v4750_v43  ;;  %v2734_v52 = vrot.slane %v4750_v43, 5  ;;  %v3736_v27 = vunpack.c.h.b16 %v4750_v43  ;;  %v4796_v7 = vor.u32 %v2704_v59, %v2701_v31 }
 0x52f   : > { %2743 = vrot.lane.b32.xlu0 %v2734_v52, %s5164_s23  ;;  %v2757_v5 = vpack.c.b16 %v3736_v27, %v2755_v46  ;;  %v4760_v44 = vpack.c.b16 %v3735_v26, %v2599_v60 }
 0x531   : > { %2759 = vrot.lane.b32.xlu2 %v2757_v5, %s3857_s29  ;;  %v2617_v63 = vshrl.u32 %v4760_v44, 16  ;;  %v2620_v20 = vshll.u32 %v4760_v44, 16  ;;  %v2664_v22 = vrot.slane %v4760_v44, 5 }
 0x533   : > { %v2619_v40 = vrot.slane %v2617_v63, 4  ;;  %v2622_v8 = vrot.slane %v2620_v20, 5 }
 0x535   : > { %v4765_v15 = vor.u32 %v2622_v8, %v2619_v40 }
 0x537   : > { %2651 = vrot.lane.b32.xlu0 %v4765_v15, %s5164_s23 }
 0x539   : > { %2673 = vrot.lane.b32.xlu2 %v2664_v22, %s3857_s29 }
 0x53d   : > { %v2445_v48 = vpop.f32.mrf.mxu1 }
 0x53e   : > { %v2446_v18 = vadd.f32 %v4736_v1, %v2445_v48 }
 0x540   : > { %v2462_v4 = vmax.f32 %v2446_v18, 0.0 }
 0x542   : > { %v2470_v9 = vsel %vm4050_vm14, %v2462_v4, 0.0  ;;  %vm5210_vm14 = vmmov %vm5209_vm4 }
 0x543   : > { %v2478_v45 = vpack.c.bf16 %v2470_v9, %v2470_v9 }
 0x545   : > { %2486 = vst.msk [vmem:[#allocation2 + $0x10] sm:$0xf] %vm5208_vm10, %v2478_v45  ;;  %v2447_v49 = vpop.f32.mrf.mxu1  ;;  %v2510_v58 = vunpack.c.l.b16 %v2478_v45 }
 0x546   : > { %v2448_v24 = vadd.f32 %v4736_v1, %v2447_v49 }
 0x548   : > { %v2463_v56 = vmax.f32 %v2448_v24, 0.0 }
 0x54a   : > { %v2471_v38 = vsel %vm4086_vm8, %v2463_v56, 0.0  ;;  %vm5211_vm8 = vcmask 1042432  }
 0x54b   : > { %v2479_v57 = vpack.c.bf16 %v2471_v38, %v2471_v38  ;;  %vm5213_vm0 = vmmov %vm5211_vm8 }
 0x54c   : > { %vm5219_vm9 = vmmov %vm5213_vm0 }
 0x54d   : > { %2487 = vst.msk [vmem:[#allocation2 + $0x14] sm:$0xf] %vm5209_vm4, %v2479_v57  ;;  %v2511_v55 = vunpack.c.l.b16 %v2479_v57  ;;  %v2450_v36 = vpop.f32.mrf.mxu1  ;;  %vm5222_vm4 = vmmov %vm5217_vm2 }
 0x54e   : > { %v2451_v62 = vadd.f32 %v4736_v1, %v2450_v36 }
 0x54f   : > { %v2517_v10 = vpack.c.b16 %v2511_v55, %v2510_v58 }
 0x550   : > { %v2464_v0 = vmax.f32 %v2451_v62, 0.0 }
 0x551   : > { %3552 = vmatmul.msk.bf16.gmra.mxu3 %vm1217_vm1, %v2517_v10  ;;  %v2706_v33 = vshrl.u32 %v2517_v10, 16  ;;  %v2709_v6 = vshll.u32 %v2517_v10, 16 }
 0x552   : > { %v2472_v32 = vsel %vm4127_vm6, %v2464_v0, 0.0  ;;  %vm5212_vm6 = vsmask.f32 3328 }
 0x553   : > { %v2480_v14 = vpack.c.bf16 %v2472_v32, %v2472_v32  ;;  %v2708_v16 = vrot.slane %v2706_v33, 4  ;;  %v2711_v17 = vrot.slane %v2709_v6, 5  ;;  %vm5216_vm13 = vmmov %vm5212_vm6 }
 0x554   : > { %v4789_v23 = vld [vmem:[#allocation2 + $0x10] sm:$0xff]   ;;  %vm5221_vm10 = vmmov %vm5212_vm6 }
 0x555   : > { %2488 = vst.msk [vmem:[#allocation2 + $0x18] sm:$0xf] %vm5210_vm14, %v2480_v14  ;;  %2761 = vrot.lane.b32.xlu0 %v4789_v23, %s3857_s29  ;;  %v3739_v13 = vunpack.c.l.b16 %v4789_v23  ;;  %v2452_v19 = vpop.f32.mrf.mxu1  ;;  %v2735_v29 = vrot.slane %v4789_v23, 5  ;;  %v4798_v34 = vor.u32 %v2711_v17, %v2708_v16  ;;  %v2512_v46 = vunpack.c.l.b16 %v2480_v14  ;;  %vm5224_vm14 = vmmov %vm5212_vm6 }
 0x556   : > { %v2453_v47 = vadd.f32 %v4736_v1, %v2452_v19  ;;  %v2583_v19 = vld [vmem:[#allocation2 + $0x4] sm:$0x8] }
 0x557   : > { %v4801_v35 = vpack.c.b16 %v3739_v13, %v3736_v27  ;;  %v2736_v21 = vsel %vm5211_vm8, %v2734_v52, %v2735_v29  ;;  %v4807_v12 = vsel %vm5212_vm6, %v4796_v7, %v4798_v34  ;;  %vm5225_vm8 = vmmov %vm5213_vm0 }
 0x558   : > { %v2465_v54 = vmax.f32 %v2453_v47, 0.0  ;;  %2745 = vrot.lane.b32.xlu1 %v2736_v21, %s5164_s23 }
 0x559   : > { %v2665_v37 = vrot.slane %v4801_v35, 5  ;;  %v2625_v30 = vshrl.u32 %v4801_v35, 16  ;;  %v2628_v41 = vshll.u32 %v4801_v35, 16 }
 0x55a   : > { %v2473_v11 = vsel %vm4163_vm7, %v2465_v54, 0.0  ;;  %vm5215_vm7 = vmmov %vm5213_vm0  ;;  %v2685_v54 = vunpack.c.l.b16 %v2583_v19 }
 0x55b   : > { %v2481_v42 = vpack.c.bf16 %v2473_v11, %v2473_v11  ;;  %v2666_v39 = vsel %vm5213_vm0, %v2664_v22, %v2665_v37  ;;  %v2627_v52 = vrot.slane %v2625_v30, 4  ;;  %v2630_v27 = vrot.slane %v2628_v41, 5 }
 0x55c   : > { %v4816_v5 = vld [vmem:[#allocation2 + $0x14] sm:$0xff]   ;;  %v2937_v40 = vshrl.u32 %v2665_v37, 16  ;;  %v2940_v8 = vshll.u32 %v2665_v37, 16  ;;  %v2687_v41 = vpack.c.b16 %v3735_v26, %v2685_v54 }
 0x55d   : > { %2489 = vst.msk [vmem:[#allocation2 + $0x1c] sm:$0xf] %vm5214_vm5, %v2481_v42  ;;  %v2513_v44 = vunpack.c.l.b16 %v2481_v42  ;;  %2675 = vrot.lane.b32.xlu0 %v2666_v39, %s3857_s29  ;;  %v2455_v63 = vpop.f32.mrf.mxu1  ;;  %v2631_v20 = vor.u32 %v2630_v27, %v2627_v52  ;;  %v2634_v48 = vshrl.u32 %v4816_v5, 16  ;;  %v2637_v22 = vshll.u32 %v4816_v5, 16  ;;  %v2587_v27 = vld [vmem:[#allocation2 + $0x28] sm:$0xf] }
 0x55e   : > { %v2456_v25 = vadd.f32 %v4736_v1, %v2455_v63  ;;  %v2667_v18 = vrot.slane %v4816_v5, 5  ;;  %v2939_v24 = vrot.slane %v2937_v40, 3  ;;  %v2942_v56 = vrot.slane %v2940_v8, 4  ;;  %v2585_v8 = vld [vmem:[#allocation2 + $0x28] sm:$0x1] }
 0x55f   : > { %v2518_v4 = vpack.c.b16 %v2513_v44, %v2512_v46  ;;  %v2636_v45 = vrot.slane %v2634_v48, 4  ;;  %v2639_v49 = vrot.slane %v2637_v22, 5 }
 0x560   : > { %v2466_v9 = vmax.f32 %v2456_v25, 0.0  ;;  %2779 = vrot.lane.b32.xlu1 %v2631_v20, %s5165_s27  ;;  %v4828_v53 = vsel %vm5215_vm7, %v2665_v37, %v2667_v18  ;;  %v2943_v31 = vor.u32 %v2942_v56, %v2939_v24  ;;  %v4880_v25 = vunpack.c.l.b16 %v2587_v27 }
 0x561   : > { %3553 = vmatmul.msk.bf16.gmra.mxu3 %vm1217_vm1, %v2518_v4  ;;  %v2945_v38 = vshrl.u32 %v4828_v53, 16  ;;  %v2948_v57 = vshll.u32 %v4828_v53, 16  ;;  %v4835_v58 = vor.u32 %v2639_v49, %v2636_v45  ;;  %v2714_v55 = vshrl.u32 %v2518_v4, 16 }
 0x562   : > { %v2474_v3 = vsel %vm4194_vm11, %v2466_v9, 0.0  ;;  %v2717_v62 = vshll.u32 %v2518_v4, 16  ;;  %vm5218_vm11 = vmmov %vm5212_vm6  ;;  %v2731_v45 = vunpack.c.l.b16 %v2585_v8  ;;  %v3688_v8 = vld [vmem:[%s5095_s17 + $0x28] sm:$0xff] }
 0x563   : > { %v2482_v36 = vpack.c.bf16 %v2474_v3, %v2474_v3  ;;  %v2947_v61 = vrot.slane %v2945_v38, 3  ;;  %v2950_v51 = vrot.slane %v2948_v57, 4  ;;  %v2641_v10 = vsel %vm5216_vm13, %v2631_v20, %v4835_v58  ;;  %vm5229_vm13 = vmmov %vm5212_vm6 }
 0x564   : > { %v4839_v0 = vld [vmem:[#allocation2 + $0x18] sm:$0xff]   ;;  %v2716_v33 = vrot.slane %v2714_v55, 4  ;;  %2781 = vrot.lane.b32.xlu2 %v2641_v10, %s5165_s27  ;;  %v2719_v14 = vrot.slane %v2717_v62, 5  ;;  %v2632_v16 = vsel %vm5218_vm11, %v4765_v15, %v2631_v20  ;;  %v2733_v62 = vpack.c.b16 %v2731_v45, %v2731_v45 }
 0x565   : > { %2490 = vst.msk [vmem:[#allocation2 + $0x20] sm:$0xf] %vm5217_vm2, %v2482_v36  ;;  %v2457_v6 = vpop.f32.mrf.mxu1  ;;  %v2737_v50 = vrot.slane %v4839_v0, 5  ;;  %v4844_v59 = vor.u32 %v2950_v51, %v2947_v61  ;;  %v2514_v37 = vunpack.c.l.b16 %v2482_v36  ;;  %v3744_v46 = vunpack.c.h.b16 %v4839_v0 }
 0x566   : > { %v2458_v32 = vadd.f32 %v4736_v1, %v2457_v6  ;;  %v2720_v21 = vor.u32 %v2719_v14, %v2716_v33  ;;  %v2741_v6 = vrot.slane %v2733_v62, 5  ;;  %v3684_v62 = vld [vmem:[%s5095_s17 + $0x8] sm:$0xff] }
 0x567   : > { %v2738_v17 = vsel %vm5219_vm9, %v2735_v29, %v2737_v50  ;;  %v2952_v13 = vsel %vm5220_vm15, %v2943_v31, %v4844_v59 }
 0x568   : > { %v2467_v47 = vmax.f32 %v2458_v32, 0.0  ;;  %2653 = vrot.lane.b32.xlu1 %v2632_v16, %s5164_s23  ;;  %2747 = vrot.lane.b32.xlu0 %v2738_v17, %s5164_s23  ;;  %v4859_v15 = vsel %vm5221_vm10, %v4798_v34, %v2720_v21  ;;  %v2588_v32 = vld [vmem:[#allocation2 + $0x2c] sm:$0x1]  ;;  %vm5234_vm10 = vcmask 785408  }
 0x569   : > { %3627 = vmatmul.msk.bf16.vlgmr.msrb.gmra.mxu1 %vm1217_vm1, %v2952_v13  ;;  %v2790_v13 = vunpack.c.l.b16 %v2588_v32 }
 0x56a   : > { %v2475_v1 = vsel %vm4215_vm3, %v2467_v47, 0.0  ;;  %vm5223_vm3 = vmmov %vm5213_vm0 }
 0x56b   : > { %v2483_v29 = vpack.c.bf16 %v2475_v1, %v2475_v1  ;;  %vm5226_vm0 = vmmov %vm5220_vm15  ;;  %v2791_v1 = vpack.c.b16 %v2790_v13, %v2790_v13 }
 0x56c   : > { %2691 = vrot.lane.b32.xlu2 %v4801_v35, %s5165_s27  ;;  %vm5227_vm5 = vmmov %vm5223_vm3 }
 0x56d   : > { %2491 = vst.msk [vmem:[#allocation2 + $0x24] sm:$0xf] %vm5222_vm4, %v2483_v29  ;;  %v2515_v30 = vunpack.c.l.b16 %v2483_v29  ;;  %vm5228_vm7 = vmmov %vm5223_vm3 }
 0x56e   : > { %vm5230_vm2 = vmmov %vm5226_vm0 }
 0x56f   : > { %v2519_v11 = vpack.c.b16 %v2515_v30, %v2514_v37  ;;  %v2794_v37 = vrot.slane %v2791_v1, 5  ;;  %v3690_v30 = vld [vmem:[%s5095_s17 + $0x38] sm:$0xff]  ;;  %vm5231_vm11 = vmmov %vm5223_vm3 }
 0x570   : > { %2689 = vrot.lane.b32.xlu1 %v2687_v41, %s5165_s27  ;;  %2655 = vrot.lane.b32.xlu0 %v2641_v10, %s5164_s23  ;;  %v3697_v41 = vld [vmem:[%s5095_s17 + $0x70] sm:$0xff]  ;;  %vm5232_vm9 = vmmov %vm5223_vm3 }
 0x571   : > { %3554 = vmatmul.msk.bf16.gmra.mxu3 %vm1217_vm1, %v2519_v11  ;;  %v2722_v2 = vshrl.u32 %v2519_v11, 16  ;;  %v2725_v34 = vshll.u32 %v2519_v11, 16  ;;  %3156 = vmatpush.bf16.msra.mxu0 %v3690_v30  ;;  %vm5233_vm15 = vmmov %vm5226_vm0 }
 0x572   : > { %vm5235_vm4 = vmmov %vm5234_vm10 }
 0x573   : > { %v2724_v42 = vrot.slane %v2722_v2, 4  ;;  %v2727_v39 = vrot.slane %v2725_v34, 5 }
 0x574   : > { %v3770_v52 = vld [vmem:[#allocation2 + $0x20] sm:$0xff]  }
 0x575   : > { %v4870_v44 = vunpack.c.l.b16 %v3770_v52  ;;  %v2739_v35 = vrot.slane %v3770_v52, 5  ;;  %v4872_v63 = vor.u32 %v2727_v39, %v2724_v42  ;;  %v4874_v26 = vunpack.c.h.b16 %v3770_v52  ;;  %v2582_v11 = vld [vmem:[#allocation2 + $0x24] sm:$0x1] }
 0x576   : > { %v2662_v34 = vunpack.c.l.b16 %v2582_v11  ;;  %v2758_v39 = vpack.c.b16 %v4880_v25, %v4880_v25 }
 0x577   : > { %v2740_v20 = vsel %vm5223_vm3, %v2737_v50, %v2739_v35  ;;  %v4878_v40 = vpack.c.b16 %v4870_v44, %v3744_v46  ;;  %v4887_v48 = vsel %vm5224_vm14, %v2720_v21, %v4872_v63  ;;  %v2769_v38 = vpack.c.b16 %v4880_v25, %v4874_v26  ;;  %vm5236_vm3 = vmmov %vm5226_vm0 }
 0x578   : > { %2763 = vrot.lane.b32.xlu1 %v4839_v0, %s3857_s29  ;;  %2749 = vrot.lane.b32.xlu0 %v2740_v20, %s5164_s23  ;;  %v2742_v17 = vsel %vm5228_vm7, %v2739_v35, %v2741_v6  ;;  %v2663_v46 = vpack.c.b16 %v2662_v34, %v2662_v34  ;;  %v3689_v35 = vld [vmem:[%s5095_s17 + $0x30] sm:$0xff]  ;;  %v3696_v20 = vld [vmem:[%s5095_s17 + $0x68] sm:$0xff]  ;;  %vm5237_vm14 = vmmov %vm5235_vm4 }
 0x579   : > { %v2643_v22 = vshrl.u32 %v4878_v40, 16  ;;  %v2646_v4 = vshll.u32 %v4878_v40, 16  ;;  %v4892_v9 = vrot.slane %v4878_v40, 5  ;;  %v2792_v10 = vrot.slane %v2769_v38, 5  ;;  %3157 = vmatpush.bf16.msra.mxu0 %v3689_v35 }
 0x57a   : > { %v2771_v31 = vshrl.u32 %v2769_v38, 16  ;;  %v2671_v45 = vrot.slane %v2663_v46, 5 }
 0x57b   : > { %v2645_v49 = vrot.slane %v2643_v22, 4  ;;  %v2648_v24 = vrot.slane %v2646_v4, 5  ;;  %v2670_v56 = vsel %vm5225_vm8, %v2667_v18, %v4892_v9  ;;  %v2793_v50 = vsel %vm5227_vm5, %v4892_v9, %v2792_v10  ;;  %v3695_v4 = vld [vmem:[%s5095_s17 + $0x60] sm:$0xff]  ;;  %vm5238_vm8 = vmmov %vm5235_vm4 }
 0x57c   : > { %v2970_v57 = vshrl.u32 %v2670_v56, 16  ;;  %v2973_v3 = vshll.u32 %v2670_v56, 16  ;;  %v2995_v14 = vshrl.u32 %v2793_v50, 16  ;;  %v2998_v16 = vshll.u32 %v2793_v50, 16  ;;  %vm5241_vm5 = vmmov %vm5230_vm2 }
 0x57d   : > { %v2649_v55 = vor.u32 %v2648_v24, %v2645_v49  ;;  %v2795_v42 = vsel %vm5231_vm11, %v2792_v10, %v2794_v37  ;;  %3158 = vmatpush.bf16.msra.mxu0 %v3688_v8  ;;  %v2672_v24 = vsel %vm5232_vm9, %v4892_v9, %v2671_v45  ;;  %v3694_v9 = vld [vmem:[%s5095_s17 + $0x58] sm:$0xff]  ;;  %vm5245_vm11 = vmmov %vm5236_vm3 }
 0x57e   : > { %v2972_v36 = vrot.slane %v2970_v57, 3  ;;  %v2975_v61 = vrot.slane %v2973_v3, 4  ;;  %v2997_v47 = vrot.slane %v2995_v14, 3  ;;  %v3000_v21 = vrot.slane %v2998_v16, 4  ;;  %v3686_v57 = vld [vmem:[%s5095_s17 + $0x18] sm:$0xff]  ;;  %v3693_v3 = vld [vmem:[%s5095_s17 + $0x50] sm:$0xff] }
 0x57f   : > { %v2650_v51 = vsel %vm5212_vm6, %v4835_v58, %v2649_v55  ;;  %v3698_v58 = vld [vmem:[%s5095_s17 + $0x78] sm:$0xff]  ;;  %v3023_v27 = vshll.u32 %v2795_v42, 16  ;;  %vm5239_vm6 = vmmov %vm5226_vm0 }
 0x580   : > { %2677 = vrot.lane.b32.xlu1 %v4828_v53, %s3857_s29  ;;  %2657 = vrot.lane.b32.xlu0 %v2650_v51, %s5164_s23  ;;  %v2976_v33 = vor.u32 %v2975_v61, %v2972_v36  ;;  %v2774_v53 = vshll.u32 %v2769_v38, 16  ;;  %v3001_v29 = vor.u32 %v3000_v21, %v2997_v47  ;;  %v2688_v38 = vpack.c.b16 %v4874_v26, %v4874_v26  ;;  %v3685_v26 = vld [vmem:[%s5095_s17 + $0x10] sm:$0xff]  ;;  %v2573_v47 = vld [vmem:[#allocation2] sm:$0x8] }
 0x581   : > { %2783 = vrot.lane.b32.xlu2 %v2650_v51, %s5165_s27  ;;  %3185 = vmatpush.bf16.msra.mxu2 %v3698_v58  ;;  %v3025_v22 = vrot.slane %v3023_v27, 4  ;;  %v3691_v51 = vld [vmem:[%s5095_s17 + $0x40] sm:$0xff] }
 0x582   : > { %v2977_v18 = vsel %vm5226_vm0, %v4844_v59, %v2976_v33  ;;  %v2773_v59 = vrot.slane %v2771_v31, 4  ;;  %v2776_v19 = vrot.slane %v2774_v53, 5  ;;  %v3002_v2 = vsel %vm5230_vm2, %v2976_v33, %v3001_v29  ;;  %vm5240_vm0 = vmmov %vm5235_vm4 }
 0x583   : > { %3628 = vmatmul.msk.bf16.gmra.mxu1 %vm1217_vm1, %v2977_v18  ;;  %v3683_v18 = vld [vmem:[%s5095_s17] sm:$0xff]  ;;  %vm5242_vm7 = vmmov %vm5240_vm0 }
 0x584   : > { %v2777_v54 = vor.u32 %v2776_v19, %v2773_v59  ;;  %vm5246_vm9 = vmmov %vm5240_vm0 }
 0x585   : > { %3186 = vmatpush.bf16.msra.mxu2 %v3697_v41  ;;  %v2598_v41 = vunpack.c.l.b16 %v2573_v47 }
 0x588   : > { %2765 = vrot.lane.b32.xlu1 %v3770_v52, %s3857_s29  ;;  %2751 = vrot.lane.b32.xlu0 %v2742_v17, %s5164_s23  ;;  %v3020_v52 = vshrl.u32 %v2795_v42, 16  ;;  %v2607_v42 = vpack.c.b16 %v2599_v60, %v2598_v41 }
 0x589   : > { %2693 = vrot.lane.b32.xlu2 %v4816_v5, %s5165_s27  ;;  %v2778_v5 = vsel %vm5229_vm13, %v2649_v55, %v2777_v54  ;;  %3187 = vmatpush.bf16.msra.mxu2 %v3696_v20  ;;  %vm5243_vm13 = vmmov %vm5230_vm2 }
 0x58a   : > { %v3022_v25 = vrot.slane %v3020_v52, 3  ;;  %vm5244_vm2 = vmmov %vm5240_vm0 }
 0x58b   : > { %v2760_v61 = vpop.permute.xlu2 %2759 }
 0x58c   : > { %v3026_v49 = vor.u32 %v3025_v22, %v3022_v25 }
 0x58d   : > { %3188 = vmatpush.bf16.msra.mxu2 %v3695_v4 }
 0x590   : > { %2679 = vrot.lane.b32.xlu1 %v2670_v56, %s3857_s29  ;;  %2659 = vrot.lane.b32.xlu0 %v2649_v55, %s5164_s23  ;;  %v3027_v56 = vsel %vm5233_vm15, %v3001_v29, %v3026_v49  ;;  %v3692_v55 = vld [vmem:[%s5095_s17 + $0x48] sm:$0xff]  ;;  %vm5247_vm15 = vmmov %vm5236_vm3 }
 0x591   : > { %2785 = vrot.lane.b32.xlu2 %v2778_v5, %s5165_s27  ;;  %3189 = vmatpush.bf16.msra.mxu2 %v3694_v9 }
 0x593   : > { %3629 = vmatmul.msk.bf16.gmra.mxu1 %vm1217_vm1, %v3002_v2  ;;  %v2674_v33 = vpop.permute.xlu2 %2673 }
 0x595   : > { %3190 = vmatpush.bf16.msra.mxu2 %v3693_v3 }
 0x598   : > { %2767 = vrot.lane.b32.xlu1 %v2758_v39, %s3857_s29 }
 0x599   : > { %2695 = vrot.lane.b32.xlu2 %v4878_v40, %s5165_s27  ;;  %v3687_v40 = vld [vmem:[%s5095_s17 + $0x20] sm:$0xff]  ;;  %3191 = vmatpush.bf16.msra.mxu2 %v3692_v55 }
 0x59a   : > { %3159 = vmatpush.bf16.msra.mxu0 %v3687_v40 }
 0x59d   : > { %3192 = vmatpush.bf16.msra.mxu2 %v3691_v51 }
 0x59e   : > { %3160 = vmatpush.bf16.msra.mxu0 %v3686_v57 }
 0x5a0   : > { %2681 = vrot.lane.b32.xlu1 %v2672_v24, %s3857_s29 }
 0x5a1   : > { %2787 = vrot.lane.b32.xlu2 %v2777_v54, %s5165_s27  ;;  %v2744_v36 = vpop.permute.xlu0 %2743 }
 0x5a2   : > { %3161 = vmatpush.bf16.msra.mxu0 %v3685_v26  ;;  %v2833_v14 = vsel %vm1217_vm1, %v4796_v7, %v2744_v36 }
 0x5a3   : > { %3630 = vmatmul.msk.bf16.gmra.mxu1 %vm1217_vm1, %v3027_v56  ;;  %v2847_v13 = vsel %vm1239_vm12, %v2833_v14, %v2760_v61 }
 0x5a6   : > { %3162 = vmatpush.bf16.msra.mxu0 %v3684_v62 }
 0x5a9   : > { %2697 = vrot.lane.b32.xlu2 %v2688_v38, %s5165_s27  ;;  %v2652_v10 = vpop.permute.xlu0 %2651 }
 0x5aa   : > { %3163 = vmatpush.bf16.msra.mxu0 %v3683_v18  ;;  %v2798_v35 = vsel %vm1217_vm1, %v2607_v42, %v2652_v10 }
 0x5ab   : > { %v2812_v22 = vsel %vm1239_vm12, %v2798_v35, %v2674_v33 }
 0x5be   : > { %v2782_v31 = vpop.permute.xlu2 %2781 }
 0x5c6   : > { %v2692_v2 = vpop.permute.xlu2 %2691 }
 0x5c7   : > { %v2762_v50 = vpop.permute.xlu0 %2761 }
 0x5ca   : > { %v2746_v6 = vpop.permute.xlu1 %2745 }
 0x5cb   : > { %v2836_v58 = vsel %vm1217_vm1, %v4807_v12, %v2746_v6 }
 0x5cc   : > { %v2849_v53 = vsel %vm1239_vm12, %v2836_v58, %v2762_v50 }
 0x5cd   : > { %v2859_v32 = vsel %vm5234_vm10, %v2849_v53, %v2782_v31  ;;  %vm5248_vm10 = vmmov %vm5240_vm0 }
 0x5ce   : > { %v2928_v16 = vshrl.u32 %v2859_v32, 16  ;;  %v2931_v17 = vshll.u32 %v2859_v32, 16 }
 0x5cf   : > { %v2676_v29 = vpop.permute.xlu0 %2675 }
 0x5d0   : > { %v2930_v21 = vrot.slane %v2928_v16, 3  ;;  %v2933_v1 = vrot.slane %v2931_v17, 4 }
 0x5d2   : > { %v2780_v59 = vpop.permute.xlu1 %2779  ;;  %v2934_v11 = vor.u32 %v2933_v1, %v2930_v21 }
 0x5d3   : > { %v2857_v19 = vsel %vm5235_vm4, %v2847_v13, %v2780_v59  ;;  %vm5249_vm4 = vmmov %vm5236_vm3 }
 0x5d4   : > { %v2921_v54 = vshrl.u32 %v2857_v19, 16  ;;  %v2924_v12 = vshll.u32 %v2857_v19, 16 }
 0x5d6   : > { %v2923_v37 = vrot.slane %v2921_v54, 3  ;;  %v2926_v30 = vrot.slane %v2924_v12, 4 }
 0x5d8   : > { %v2927_v5 = vor.u32 %v2926_v30, %v2923_v37 }
 0x5da   : > { %v2654_v7 = vpop.permute.xlu1 %2653  ;;  %v2935_v34 = vsel %vm5236_vm3, %v2927_v5, %v2934_v11  ;;  %v2748_v46 = vpop.permute.xlu0 %2747  ;;  %vm5250_vm3 = vmmov %vm5240_vm0 }
 0x5db   : > { %v2801_v39 = vsel %vm1217_vm1, %v4750_v43, %v2654_v7  ;;  %3193 = vmatmul.bf16.vlgmr.msra.gmra.mxu2 %v2935_v34  ;;  %v2784_v25 = vpop.permute.xlu2 %2783  ;;  %v2839_v57 = vsel %vm1217_vm1, %v4859_v15, %v2748_v46 }
 0x5dc   : > { %v2814_v52 = vsel %vm1239_vm12, %v2801_v39, %v2676_v29 }
 0x5dd   : > { %v2824_v27 = vsel %vm5237_vm14, %v2814_v52, %v2692_v2  ;;  %vm5251_vm14 = vmmov %vm5249_vm4 }
 0x5de   : > { %v2913_v20 = vshrl.u32 %v2824_v27, 16  ;;  %v2916_v8 = vshll.u32 %v2824_v27, 16 }
 0x5e0   : > { %v2915_v60 = vrot.slane %v2913_v20, 3  ;;  %v2918_v45 = vrot.slane %v2916_v8, 4 }
 0x5e2   : > { %v2690_v4 = vpop.permute.xlu1 %2689  ;;  %v2656_v56 = vpop.permute.xlu0 %2655  ;;  %v2919_v9 = vor.u32 %v2918_v45, %v2915_v60 }
 0x5e3   : > { %v2822_v28 = vsel %vm5238_vm8, %v2812_v22, %v2690_v4  ;;  %v2694_v55 = vpop.permute.xlu2 %2693  ;;  %v2804_v50 = vsel %vm1217_vm1, %v4789_v23, %v2656_v56 }
 0x5e4   : > { %v2906_v49 = vshrl.u32 %v2822_v28, 16  ;;  %v2909_v43 = vshll.u32 %v2822_v28, 16 }
 0x5e6   : > { %v2908_v24 = vrot.slane %v2906_v49, 3  ;;  %v2911_v40 = vrot.slane %v2909_v43, 4 }
 0x5e8   : > { %v2912_v38 = vor.u32 %v2911_v40, %v2908_v24  ;;  %v2611_v24 = vpack.c.b16 %v4870_v44, %v4870_v44 }
 0x5ea   : > { %v2764_v3 = vpop.permute.xlu1 %2763  ;;  %v2920_v26 = vsel %vm5239_vm6, %v2912_v38, %v2919_v9  ;;  %v2750_v18 = vpop.permute.xlu0 %2749 }
 0x5eb   : > { %v2851_v36 = vsel %vm1239_vm12, %v2839_v57, %v2764_v3  ;;  %3164 = vmatmul.bf16.vlgmr.msra.gmra.mxu0 %v2920_v26  ;;  %v2786_v32 = vpop.permute.xlu2 %2785  ;;  %v2842_v19 = vsel %vm1217_vm1, %v4887_v48, %v2750_v18  ;;  %v5038_v18 = vld [vmem:[%s5096_s18] ss:$0 sm:$0xff] }
 0x5ec   : > { %v2861_v61 = vsel %vm5240_vm0, %v2851_v36, %v2784_v25 }
 0x5ed   : > { %v2961_v51 = vshrl.u32 %v2861_v61, 16  ;;  %v2964_v62 = vshll.u32 %v2861_v61, 16 }
 0x5ef   : > { %v2963_v10 = vrot.slane %v2961_v51, 3  ;;  %v2966_v33 = vrot.slane %v2964_v62, 4  ;;  %v2553_v62 = vpop.f32.mrf.mxu3 }
 0x5f1   : > { %v2967_v6 = vor.u32 %v2966_v33, %v2963_v10  ;;  %v3223_v10 = vpop.f32.mrf.mxu1 }
 0x5f2   : > { %v2678_v58 = vpop.permute.xlu1 %2677  ;;  %v2658_v21 = vpop.permute.xlu0 %2657 }
 0x5f3   : > { %v2816_v15 = vsel %vm1239_vm12, %v2804_v50, %v2678_v58  ;;  %v2968_v31 = vsel %vm5241_vm5, %v2934_v11, %v2967_v6  ;;  %v2696_v37 = vpop.permute.xlu2 %2695  ;;  %v2807_v11 = vsel %vm1217_vm1, %v4839_v0, %v2658_v21 }
 0x5f4   : > { %v2826_v53 = vsel %vm5242_vm7, %v2816_v15, %v2694_v55  ;;  %3198 = vmatmul.bf16.gmra.mxu2 %v2968_v31 }
 0x5f5   : > { %v2953_v14 = vshrl.u32 %v2826_v53, 16  ;;  %v2956_v16 = vshll.u32 %v2826_v53, 16 }
 0x5f7   : > { %v2955_v17 = vrot.slane %v2953_v14, 3  ;;  %v2958_v13 = vrot.slane %v2956_v16, 4  ;;  %v2555_v50 = vpop.f32.mrf.mxu3 }
 0x5f9   : > { %v2959_v59 = vor.u32 %v2958_v13, %v2955_v17  ;;  %v3225_v53 = vpop.f32.mrf.mxu1 }
 0x5fa   : > { %v2766_v47 = vpop.permute.xlu1 %2765  ;;  %v2752_v42 = vpop.permute.xlu0 %2751 }
 0x5fb   : > { %v2853_v23 = vsel %vm1239_vm12, %v2842_v19, %v2766_v47  ;;  %v2960_v1 = vsel %vm5243_vm13, %v2919_v9, %v2959_v59  ;;  %v2788_v35 = vpop.permute.xlu2 %2787  ;;  %v2845_v8 = vsel %vm1217_vm1, %v4872_v63, %v2752_v42 }
 0x5fc   : > { %v2863_v54 = vsel %vm5244_vm2, %v2853_v23, %v2786_v32  ;;  %3169 = vmatmul.bf16.gmra.mxu0 %v2960_v1 }
 0x5fd   : > { %v2986_v12 = vshrl.u32 %v2863_v54, 16  ;;  %v2989_v29 = vshll.u32 %v2863_v54, 16 }
 0x5ff   : > { %v2988_v30 = vrot.slane %v2986_v12, 3  ;;  %v2991_v41 = vrot.slane %v2989_v29, 4  ;;  %v2558_v17 = vpop.f32.mrf.mxu3 }
 0x601   : > { %v2992_v5 = vor.u32 %v2991_v41, %v2988_v30  ;;  %v3228_v1 = vpop.f32.mrf.mxu1 }
 0x602   : > { %v2680_v2 = vpop.permute.xlu1 %2679  ;;  %v2660_v45 = vpop.permute.xlu0 %2659 }
 0x603   : > { %v2818_v48 = vsel %vm1239_vm12, %v2807_v11, %v2680_v2  ;;  %v2993_v7 = vsel %vm5245_vm11, %v2967_v6, %v2992_v5  ;;  %v2810_v56 = vsel %vm1217_vm1, %v2611_v24, %v2660_v45  ;;  %v2698_v38 = vpop.permute.xlu2 %2697  ;;  %v5043_v6 = vld [vmem:[%s5094_s16] ss:$0 sm:$0xff] }
 0x604   : > { %v2828_v34 = vsel %vm5246_vm9, %v2818_v48, %v2696_v37  ;;  %3203 = vmatmul.bf16.gmra.mxu2 %v2993_v7  ;;  %v2554_v31 = vadd.f32 %v5043_v6, %v2553_v62  ;;  %v2556_v23 = vadd.f32 %v5043_v6, %v2555_v50  ;;  %v2559_v48 = vadd.f32 %v5043_v6, %v2558_v17 }
 0x605   : > { %v2978_v39 = vshrl.u32 %v2828_v34, 16  ;;  %v2981_v52 = vshll.u32 %v2828_v34, 16 }
 0x606   : > { %v3243_v16 = vmax.f32 %v2554_v31, 0.0  ;;  %v3245_v29 = vmax.f32 %v2556_v23, 0.0 }
 0x607   : > { %v2980_v27 = vrot.slane %v2978_v39, 3  ;;  %v2983_v46 = vrot.slane %v2981_v52, 4  ;;  %v2560_v41 = vpop.f32.mrf.mxu3  ;;  %v3247_v52 = vmax.f32 %v2559_v48, 0.0 }
 0x609   : > { %v2984_v20 = vor.u32 %v2983_v46, %v2980_v27  ;;  %v3230_v34 = vpop.f32.mrf.mxu1 }
 0x60a   : > { %v2768_v25 = vpop.permute.xlu1 %2767 }
 0x60b   : > { %v2855_v0 = vsel %vm1239_vm12, %v2845_v8, %v2768_v25  ;;  %v2985_v22 = vsel %vm5247_vm15, %v2959_v59, %v2984_v20  ;;  %v2561_v25 = vadd.f32 %v5043_v6, %v2560_v41 }
 0x60c   : > { %v2865_v4 = vsel %vm5248_vm10, %v2855_v0, %v2788_v35  ;;  %3174 = vmatmul.bf16.gmra.mxu0 %v2985_v22 }
 0x60d   : > { %v3011_v28 = vshrl.u32 %v2865_v4, 16  ;;  %v3014_v60 = vshll.u32 %v2865_v4, 16 }
 0x60f   : > { %v3013_v49 = vrot.slane %v3011_v28, 3  ;;  %v3016_v43 = vrot.slane %v3014_v60, 4  ;;  %v2563_v8 = vpop.f32.mrf.mxu3  ;;  %v3249_v60 = vmax.f32 %v2561_v25, 0.0 }
 0x611   : > { %v3017_v40 = vor.u32 %v3016_v43, %v3013_v49  ;;  %v3233_v4 = vpop.f32.mrf.mxu1 }
 0x612   : > { %v2682_v63 = vpop.permute.xlu1 %2681 }
 0x613   : > { %v2820_v9 = vsel %vm1239_vm12, %v2810_v56, %v2682_v63  ;;  %v3018_v57 = vsel %vm5249_vm4, %v2992_v5, %v3017_v40  ;;  %v2564_v40 = vadd.f32 %v5043_v6, %v2563_v8 }
 0x614   : > { %v2830_v3 = vsel %vm5250_vm3, %v2820_v9, %v2698_v38  ;;  %3208 = vmatmul.bf16.gmra.mxu2 %v3018_v57 }
 0x615   : > { %v3003_v26 = vshrl.u32 %v2830_v3, 16  ;;  %v3006_v55 = vshll.u32 %v2830_v3, 16  ;;  %v3251_v57 = vmax.f32 %v2564_v40, 0.0 }
 0x617   : > { %v3005_v36 = vrot.slane %v3003_v26, 3  ;;  %v3008_v61 = vrot.slane %v3006_v55, 4  ;;  %v2565_v63 = vpop.f32.mrf.mxu3 }
 0x619   : > { %v3009_v51 = vor.u32 %v3008_v61, %v3005_v36  ;;  %v3235_v26 = vpop.f32.mrf.mxu1 }
 0x61b   : > { %v3010_v44 = vsel %vm5251_vm14, %v2984_v20, %v3009_v51  ;;  %v2566_v51 = vadd.f32 %v5043_v6, %v2565_v63 }
 0x61c   : > { %3179 = vmatmul.bf16.gmra.mxu0 %v3010_v44 }
 0x65e   : > { %v3194_v33 = vpop.f32.mrf.mxu2 }
 0x666   : > { %v3196_v13 = vpop.f32.mrf.mxu2 }
 0x668   : > { %v3165_v58 = vpop.f32.mrf.mxu0 }
 0x669   : > { %v3166_v15 = vadd.f32 %v5038_v18, %v3165_v58 }
 0x66b   : > { %v3195_v32 = vadd.f32 %v3194_v33, %v3166_v15  ;;  %v3253_v33 = vmax.f32 %v2566_v51, 0.0 }
 0x66d   : > { %v3224_v14 = vadd.f32 %v3223_v10, %v3195_v32  ;;  %v2568_v10 = vpop.f32.mrf.mxu3  ;;  %v3238_v32 = vpop.f32.mrf.mxu1 }
 0x66f   : > { %v3244_v59 = vmax.f32 %v3224_v14, 0.0  ;;  %v2569_v14 = vadd.f32 %v5043_v6, %v2568_v10 }
 0x670   : > { %v3167_v19 = vpop.f32.mrf.mxu0 }
 0x671   : > { %v3259_v47 = vpack.c.bf16 %v3244_v59, %v3243_v16  ;;  %v3168_v21 = vadd.f32 %v5038_v18, %v3167_v19 }
 0x673   : > { %3267 = vst [vmem:[%s5051_s22] sm:$0xff] %v3259_v47  ;;  %v3197_v54 = vadd.f32 %v3196_v13, %v3168_v21  ;;  %v3255_v13 = vmax.f32 %v2569_v14, 0.0 }
 0x675   : > { %v3226_v12 = vadd.f32 %v3225_v53, %v3197_v54  ;;  %v2570_v19 = vpop.f32.mrf.mxu3 }
 0x676   : > { %v2571_v54 = vadd.f32 %v5043_v6, %v2570_v19 }
 0x677   : > { %v3246_v37 = vmax.f32 %v3226_v12, 0.0  ;;  %v3199_v30 = vpop.f32.mrf.mxu2 }
 0x679   : > { %v3260_v5 = vpack.c.bf16 %v3246_v37, %v3245_v29  ;;  %v3170_v11 = vpop.f32.mrf.mxu0  ;;  %v3240_v29 = vpop.f32.mrf.mxu1 }
 0x67a   : > { %v3171_v2 = vadd.f32 %v5038_v18, %v3170_v11 }
 0x67b   : > { %3268 = vst [vmem:[%s5051_s22 + $0x8] sm:$0xff] %v3260_v5 }
 0x67c   : > { %v3200_v7 = vadd.f32 %v3199_v30, %v3171_v2  ;;  %v3257_v30 = vmax.f32 %v2571_v54, 0.0 }
 0x67e   : > { %v3229_v42 = vadd.f32 %v3228_v1, %v3200_v7 }
 0x67f   : > { %v3201_v39 = vpop.f32.mrf.mxu2 }
 0x680   : > { %v3248_v27 = vmax.f32 %v3229_v42, 0.0 }
 0x681   : > { %v3172_v46 = vpop.f32.mrf.mxu0 }
 0x682   : > { %v3261_v35 = vpack.c.bf16 %v3248_v27, %v3247_v52  ;;  %v3173_v20 = vadd.f32 %v5038_v18, %v3172_v46 }
 0x684   : > { %3269 = vst [vmem:[%s5051_s22 + $0x10] sm:$0xff] %v3261_v35  ;;  %v3202_v0 = vadd.f32 %v3201_v39, %v3173_v20 }
 0x686   : > { %v3231_v22 = vadd.f32 %v3230_v34, %v3202_v0 }
 0x687   : > { %v3204_v28 = vpop.f32.mrf.mxu2 }
 0x688   : > { %v3250_v45 = vmax.f32 %v3231_v22, 0.0 }
 0x689   : > { %v3175_v49 = vpop.f32.mrf.mxu0 }
 0x68a   : > { %v3262_v43 = vpack.c.bf16 %v3250_v45, %v3249_v60  ;;  %v3176_v24 = vadd.f32 %v5038_v18, %v3175_v49 }
 0x68c   : > { %3270 = vst [vmem:[%s5051_s22 + $0x18] sm:$0xff] %v3262_v43  ;;  %v3205_v56 = vadd.f32 %v3204_v28, %v3176_v24 }
 0x68e   : > { %v3234_v38 = vadd.f32 %v3233_v4, %v3205_v56 }
 0x68f   : > { %v3206_v9 = vpop.f32.mrf.mxu2 }
 0x690   : > { %v3252_v3 = vmax.f32 %v3234_v38, 0.0 }
 0x691   : > { %v3177_v55 = vpop.f32.mrf.mxu0 }
 0x692   : > { %v3263_v36 = vpack.c.bf16 %v3252_v3, %v3251_v57  ;;  %v3178_v61 = vadd.f32 %v5038_v18, %v3177_v55 }
 0x694   : > { %3271 = vst [vmem:[%s5051_s22 + $0x20] sm:$0xff] %v3263_v36  ;;  %v3207_v44 = vadd.f32 %v3206_v9, %v3178_v61 }
 0x696   : > { %v3236_v62 = vadd.f32 %v3235_v26, %v3207_v44 }
 0x697   : > { %v3209_v58 = vpop.f32.mrf.mxu2 }
 0x698   : > { %v3254_v50 = vmax.f32 %v3236_v62, 0.0 }
 0x699   : > { %v3180_v15 = vpop.f32.mrf.mxu0 }
 0x69a   : > { %v3264_v31 = vpack.c.bf16 %v3254_v50, %v3253_v33  ;;  %v3181_v53 = vadd.f32 %v5038_v18, %v3180_v15 }
 0x69c   : > { %3272 = vst [vmem:[%s5051_s22 + $0x28] sm:$0xff] %v3264_v31  ;;  %v3210_v16 = vadd.f32 %v3209_v58, %v3181_v53 }
 0x69e   : > { %v3239_v17 = vadd.f32 %v3238_v32, %v3210_v16 }
 0x69f   : > { %v3211_v1 = vpop.f32.mrf.mxu2 }
 0x6a0   : > { %v3256_v59 = vmax.f32 %v3239_v17, 0.0 }
 0x6a1   : > { %v3182_v47 = vpop.f32.mrf.mxu0 }
 0x6a2   : > { %v3265_v21 = vpack.c.bf16 %v3256_v59, %v3255_v13  ;;  %v3183_v23 = vadd.f32 %v5038_v18, %v3182_v47 }
 0x6a4   : > { %3273 = vst [vmem:[%s5051_s22 + $0x30] sm:$0xff] %v3265_v21  ;;  %v3212_v12 = vadd.f32 %v3211_v1, %v3183_v23 }
 0x6a6   : > { %v3241_v37 = vadd.f32 %v3240_v29, %v3212_v12 }
 0x6a8   : > { %v3258_v41 = vmax.f32 %v3241_v37, 0.0 }
 0x6aa   : > { %v3266_v5 = vpack.c.bf16 %v3258_v41, %v3257_v30 }
 0x6ac   : > { %3274 = vst [vmem:[%s5051_s22 + $0x38] sm:$0xff] %v3266_v5 }
 0x6ad PF: > { %s29_s0 = sadd.s32 1, %s3854_s0  }
 0x6ae   : > { %p26_p4 = scmp.ge.s32.totalorder %s29_s0, 4  }
 0x6b0   :  { %28 = sbr.rel (!%p26_p4) target bundleno = 5 (0x5), region = 126 }

// kernel: squeezenet_forward.8
= control target key start
LH: loop header
LB: loop body
LE: loop exit
PB: predicated region body
PF: predicated region fallthrough
CT: control target
= control target key end

     0   :  { %s2198_s24 = smov 0   ;;  %s2912_s0 = inlined_call_operand.vmem [shape: bf16[2,9,512], index: 0, kind: input, shape index: {}]   ;;  %s2913_s1 = inlined_call_operand.vmem [shape: bf16[512,64], index: 1, kind: input, shape index: {}]   ;;  %s2914_s2 = inlined_call_operand.vmem [shape: f32[1,64], index: 2, kind: input, shape index: {}]   ;;  %s2915_s3 = inlined_call_operand.vmem [shape: bf16[64,256], index: 3, kind: input, shape index: {}]   ;;  %s2916_s4 = inlined_call_operand.vmem [shape: f32[1,256], index: 4, kind: input, shape index: {}]   ;;  %s2917_s5 = inlined_call_operand.vmem [shape: bf16[576,256], index: 5, kind: input, shape index: {}]   ;;  %s2918_s6 = inlined_call_operand.vmem [shape: f32[1,256], index: 6, kind: input, shape index: {}]   ;;  %s2919_s7 = inlined_call_operand.vmem [shape: bf16[2,9,512], index: 7, kind: output, shape index: {}]  }
   0x1 LB: > { %s1525_s25 = sadd.s32 4294967295, %s2154_s24   ;;  %p1529_p0 = scmp.ge.s32.totalorder %s2154_s24, 1  ;;  %s2154_s24 = sphi %s2198_s24, %s17_s24  }
   0x2   : > { %p237_p1 = scmp.lt.s32.totalorder %s2154_s24, 3 }
   0x4   : > { %p238_p2 = pnand %p1529_p0, %p237_p1 }
   0x5   : > { %p269_p3 = scmp.lt.s32.totalorder (!%p238_p2), %s1525_s25, 1  ;;  %s2157_s17 = smov (!%p238_p2), 64  }
   0x6   : > { %241 = sbr.rel (%p238_p2) target bundleno = 508 (0x1fc), region = 48 }
   0xb   : > { %v2029_v0 = vld [vmem:[%s2913_s1 + $0x38] sm:$0xff]  ;;  %v2028_v4 = vld [vmem:[%s2913_s1 + $0x30] sm:$0xff]  ;;  %v2027_v8 = vld [vmem:[%s2913_s1 + $0x28] sm:$0xff]  ;;  %s2927_s25 = smov (!%p269_p3, %s1525_s25), 1  ;;  %v280_v44 = vlaneseq  ;;  %vm309_vm0 = vcmask 519168   ;;  %v2156_v47 = vmov 0  }
   0xc   : > { %v2037_v1 = vld [vmem:[%s2913_s1 + $0x78] sm:$0xff]  ;;  %602 = vmatpush.bf16.msra.mxu0 %v2029_v0  ;;  %v2036_v5 = vld [vmem:[%s2913_s1 + $0x70] sm:$0xff]  ;;  %v2035_v9 = vld [vmem:[%s2913_s1 + $0x68] sm:$0xff]  ;;  %s2016_s9 = sshll.u32 %s2927_s25, 5  ;;  %vm313_vm1 = vsmask.f32 7938 }
   0xd   : > { %v2045_v2 = vld [vmem:[%s2913_s1 + $0xb8] sm:$0xff]  ;;  %616 = vmatpush.bf16.msra.mxu1 %v2037_v1  ;;  %v2044_v6 = vld [vmem:[%s2913_s1 + $0xb0] sm:$0xff]  ;;  %v2043_v10 = vld [vmem:[%s2913_s1 + $0xa8] sm:$0xff]  ;;  %s273_s16 = scalar_lea.vmem %s2912_s0, %s2016_s9  ;;  %v281_v46 = vshrl.u32 %v280_v44, 7  ;;  %311 = vst.msk [vmem:[#allocation2 + $0x4] sm:$0xf] %vm309_vm0, %v2156_v47  ;;  %s2825_s15 = scalar_lea.vmem %s2919_s7, %s2016_s9 }
   0xe   : > { %v2053_v3 = vld [vmem:[%s2913_s1 + $0xf8] sm:$0xff]  ;;  %630 = vmatpush.bf16.msra.mxu2 %v2045_v2  ;;  %v2052_v7 = vld [vmem:[%s2913_s1 + $0xf0] sm:$0xff]  ;;  %v2051_v11 = vld [vmem:[%s2913_s1 + $0xe8] sm:$0xff] }
   0xf   : > { %644 = vmatpush.bf16.msra.mxu3 %v2053_v3  ;;  %v2026_v12 = vld [vmem:[%s2913_s1 + $0x20] sm:$0xff]  ;;  %v2025_v16 = vld [vmem:[%s2913_s1 + $0x18] sm:$0xff]  ;;  %v2024_v20 = vld [vmem:[%s2913_s1 + $0x10] sm:$0xff]  ;;  %v283_v52 = vcvt.s32.f32 %v281_v46  ;;  %v282_v62 = vadd.s32 8, %v281_v46 }
  0x10   : > { %603 = vmatpush.bf16.msra.mxu0 %v2028_v4  ;;  %v2034_v13 = vld [vmem:[%s2913_s1 + $0x60] sm:$0xff]  ;;  %v2033_v17 = vld [vmem:[%s2913_s1 + $0x58] sm:$0xff]  ;;  %v2032_v21 = vld [vmem:[%s2913_s1 + $0x50] sm:$0xff] }
  0x11   : > { %617 = vmatpush.bf16.msra.mxu1 %v2036_v5  ;;  %v2042_v14 = vld [vmem:[%s2913_s1 + $0xa0] sm:$0xff]  ;;  %v2041_v18 = vld [vmem:[%s2913_s1 + $0x98] sm:$0xff]  ;;  %v2040_v22 = vld [vmem:[%s2913_s1 + $0x90] sm:$0xff]  ;;  %v285_v61 = vadd.f32 0.5, %v283_v52 }
  0x12   : > { %631 = vmatpush.bf16.msra.mxu2 %v2044_v6  ;;  %v2050_v15 = vld [vmem:[%s2913_s1 + $0xe0] sm:$0xff]  ;;  %v2049_v19 = vld [vmem:[%s2913_s1 + $0xd8] sm:$0xff]  ;;  %v2048_v23 = vld [vmem:[%s2913_s1 + $0xd0] sm:$0xff]  ;;  %v284_v6 = vcvt.s32.f32 %v282_v62 }
  0x13   : > { %645 = vmatpush.bf16.msra.mxu3 %v2052_v7  ;;  %v2023_v24 = vld [vmem:[%s2913_s1 + $0x8] sm:$0xff]  ;;  %v2022_v28 = vld [vmem:[%s2913_s1] sm:$0xff]  ;;  %v2020_v33 = vld [vmem:[%s273_s16 + $0xc] sm:$0x10]  ;;  %v287_v5 = vmul.f32 0.33333334, %v285_v61 }
  0x14   : > { %604 = vmatpush.bf16.msra.mxu0 %v2027_v8  ;;  %v2031_v25 = vld [vmem:[%s2913_s1 + $0x48] sm:$0xff]  ;;  %v2030_v29 = vld [vmem:[%s2913_s1 + $0x40] sm:$0xff]  ;;  %v1538_v35 = vld [vmem:[%s273_s16 + $0x10] sm:$0x10] }
  0x15   : > { %618 = vmatpush.bf16.msra.mxu1 %v2035_v9  ;;  %v2039_v26 = vld [vmem:[%s2913_s1 + $0x88] sm:$0xff]  ;;  %v2038_v30 = vld [vmem:[%s2913_s1 + $0x80] sm:$0xff]  ;;  %v2021_v37 = vld [vmem:[%s273_s16 + $0x14] sm:$0x10] }
  0x16   : > { %632 = vmatpush.bf16.msra.mxu2 %v2043_v10  ;;  %v2047_v27 = vld [vmem:[%s2913_s1 + $0xc8] sm:$0xff]  ;;  %v2046_v31 = vld [vmem:[%s2913_s1 + $0xc0] sm:$0xff]  ;;  %v1546_v39 = vld [vmem:[%s273_s16 + $0x18] sm:$0x10]  ;;  %v289_v10 = vfloor.f32 %v287_v5 }
  0x17   : > { %646 = vmatpush.bf16.msra.mxu3 %v2051_v11  ;;  %v1536_v32 = vld [vmem:[%s273_s16] sm:$0xf]  ;;  %v2018_v34 = vld [vmem:[%s273_s16 + $0x4] sm:$0xf]  ;;  %v1544_v36 = vld [vmem:[%s273_s16 + $0x8] sm:$0xf] }
  0x18   : > { %605 = vmatpush.bf16.msra.mxu0 %v2026_v12  ;;  %v2019_v38 = vld [vmem:[%s273_s16 + $0xc] sm:$0xf]  ;;  %v1537_v40 = vor.u32 %v2020_v33, %v1536_v32  ;;  %v1541_v41 = vor.u32 %v2018_v34, %v1538_v35  ;;  %v1545_v42 = vor.u32 %v2021_v37, %v1544_v36  ;;  %vm314_vm2 = vmand %vm309_vm0, %vm313_vm1  ;;  %v1704_v49 = vld [vmem:[%s2915_s3 + $0x30] sm:$0xf]  ;;  %v286_v11 = vadd.f32 0.5, %v284_v6 }
  0x19   : > { %619 = vmatpush.bf16.msra.mxu1 %v2034_v13  ;;  %v1549_v43 = vor.u32 %v2019_v38, %v1546_v39  ;;  %v315_v45 = vld [vmem:[#allocation2 + $0xc] sm:$0xf]  ;;  %v2061_v50 = vld [vmem:[%s2915_s3 + $0x34] sm:$0xf0]  ;;  %v2060_v51 = vld [vmem:[%s2915_s3 + $0x34] sm:$0xf] }
  0x1a   : > { %633 = vmatpush.bf16.msra.mxu2 %v2042_v14  ;;  %v316_v48 = vsel %vm314_vm2, 0, %v315_v45  ;;  %v1705_v53 = vor.u32 %v2061_v50, %v1704_v49  ;;  %v1706_v54 = vld [vmem:[%s2915_s3 + $0x38] sm:$0xf0]  ;;  %v1696_v56 = vld [vmem:[%s2915_s3 + $0x20] sm:$0xf]  ;;  %vm295_vm3 = vcmp.ge.f32.partialorder %v289_v10, 1.0 }
  0x1b   : > { %647 = vmatpush.bf16.msra.mxu3 %v2050_v15  ;;  %317 = vst [vmem:[#allocation2 + $0xc] sm:$0xf] %v316_v48  ;;  %v1709_v55 = vor.u32 %v2060_v51, %v1706_v54  ;;  %v2059_v57 = vld [vmem:[%s2915_s3 + $0x24] sm:$0xf0]  ;;  %v2058_v58 = vld [vmem:[%s2915_s3 + $0x24] sm:$0xf] }
  0x1c   : > { %606 = vmatpush.bf16.msra.mxu0 %v2025_v16  ;;  %v1697_v59 = vor.u32 %v2059_v57, %v1696_v56  ;;  %v1698_v60 = vld [vmem:[%s2915_s3 + $0x28] sm:$0xf0]  ;;  %v1688_v0 = vld [vmem:[%s2915_s3 + $0x10] sm:$0xf]  ;;  %v2057_v1 = vld [vmem:[%s2915_s3 + $0x14] sm:$0xf0] }
  0x1d   : > { %620 = vmatpush.bf16.msra.mxu1 %v2033_v17  ;;  %v1701_v63 = vor.u32 %v2058_v58, %v1698_v60  ;;  %v2056_v2 = vld [vmem:[%s2915_s3 + $0x14] sm:$0xf]  ;;  %v1689_v3 = vor.u32 %v2057_v1, %v1688_v0  ;;  %v1690_v4 = vld [vmem:[%s2915_s3 + $0x18] sm:$0xf0]  ;;  %v1680_v8 = vld [vmem:[%s2915_s3] sm:$0xf] }
  0x1e   : > { %634 = vmatpush.bf16.msra.mxu2 %v2041_v18  ;;  %v1693_v7 = vor.u32 %v2056_v2, %v1690_v4  ;;  %v2055_v9 = vld [vmem:[%s2915_s3 + $0x4] sm:$0xf0]  ;;  %v2054_v13 = vld [vmem:[%s2915_s3 + $0x4] sm:$0xf]  ;;  %v1682_v14 = vld [vmem:[%s2915_s3 + $0x8] sm:$0xf0] }
  0x1f   : > { %648 = vmatpush.bf16.msra.mxu3 %v2049_v19  ;;  %v1681_v12 = vor.u32 %v2055_v9, %v1680_v8  ;;  %v1685_v15 = vor.u32 %v2054_v13, %v1682_v14  ;;  %v2147_v16 = vld [vmem:[%s2914_s2] ss:$0 sm:$0xff]  ;;  %v291_v17 = vmul.f32 3.0, %v289_v10  ;;  %v288_v18 = vmul.f32 0.33333334, %v286_v11 }
  0x20   : > { %607 = vmatpush.bf16.msra.mxu0 %v2024_v20  ;;  %vm297_vm4 = vcmp.le.f32.partialorder %v289_v10, 1.0  ;;  %vm669_vm2 = vcmask 516096   ;;  %v1782_v45 = vld [vmem:[%s2917_s5 + $0x70] sm:$0xf]  ;;  %v2080_v46 = vld [vmem:[%s2917_s5 + $0x74] sm:$0xf0] }
  0x21   : > { %621 = vmatpush.bf16.msra.mxu1 %v2032_v21  ;;  %v293_v21 = vsub.f32 %v283_v52, %v291_v17  ;;  %vm299_vm5 = vmand %vm295_vm3, %vm297_vm4  ;;  %vm670_vm3 = vsmask.f32 256  ;;  %v1783_v47 = vor.u32 %v2080_v46, %v1782_v45  ;;  %v1774_v48 = vld [vmem:[%s2917_s5 + $0x60] sm:$0xf]  ;;  %v2078_v49 = vld [vmem:[%s2917_s5 + $0x64] sm:$0xf0] }
  0x22   : > { %635 = vmatpush.bf16.msra.mxu2 %v2040_v22  ;;  %v290_v22 = vfloor.f32 %v288_v18  ;;  %v672_v44 = vld [vmem:[#allocation2 + $0xc] sm:$0x1]  ;;  %v1846_v50 = vld [vmem:[%s2917_s5 + $0xf0] sm:$0xf]  ;;  %v2096_v54 = vld [vmem:[%s2917_s5 + $0xf4] sm:$0xf0]  ;;  %v1775_v57 = vor.u32 %v2078_v49, %v1774_v48 }
  0x23   : > { %649 = vmatpush.bf16.msra.mxu3 %v2048_v23  ;;  %vm301_vm6 = vcmp.ge.f32.partialorder %v293_v21, 1.0  ;;  %vm305_vm8 = vcmp.le.f32.partialorder %v293_v21, 1.0  ;;  %v1847_v58 = vor.u32 %v2096_v54, %v1846_v50  ;;  %v1910_v60 = vld [vmem:[%s2917_s5 + $0x170] sm:$0xf]  ;;  %v2112_v61 = vld [vmem:[%s2917_s5 + $0x174] sm:$0xf0] }
  0x24   : > { %608 = vmatpush.bf16.msra.mxu0 %v2023_v24  ;;  %vm303_vm7 = vmand %vm299_vm5, %vm301_vm6  ;;  %vm296_vm9 = vcmp.ge.f32.partialorder %v290_v22, 1.0  ;;  %vm298_vm10 = vcmp.le.f32.partialorder %v290_v22, 1.0  ;;  %v2076_v1 = vld [vmem:[%s2917_s5 + $0x54] sm:$0xf0]  ;;  %v1911_v2 = vor.u32 %v2112_v61, %v1910_v60  ;;  %v2094_v8 = vld [vmem:[%s2917_s5 + $0xe4] sm:$0xf0] }
  0x25   : > { %622 = vmatpush.bf16.msra.mxu1 %v2031_v25  ;;  %v292_v25 = vmul.f32 3.0, %v290_v22  ;;  %vm307_vm11 = vmand %vm303_vm7, %vm305_vm8  ;;  %vm734_vm4 = vcmask 523264   ;;  %v1902_v10 = vld [vmem:[%s2917_s5 + $0x160] sm:$0xf]  ;;  %v2074_v18 = vld [vmem:[%s2917_s5 + $0x44] sm:$0xf0] }
  0x26   : > { %636 = vmatpush.bf16.msra.mxu2 %v2039_v26  ;;  %vm300_vm12 = vmand %vm296_vm9, %vm298_vm10  ;;  %v1758_v17 = vld [vmem:[%s2917_s5 + $0x40] sm:$0xf]  ;;  %v2126_v49 = vld [vmem:[%s2917_s5 + $0x1e4] sm:$0xf0]  ;;  %vm1458_vm5 = vcmask 1040384   ;;  %vm1460_vm6 = vcmask 1044484  }
  0x27   : > { %650 = vmatpush.bf16.msra.mxu3 %v2047_v27  ;;  %v1966_v48 = vld [vmem:[%s2917_s5 + $0x1e0] sm:$0xf]  ;;  %v2088_v54 = vld [vmem:[%s2917_s5 + $0xb4] sm:$0xf0]  ;;  %v1958_v60 = vld [vmem:[%s2917_s5 + $0x1d0] sm:$0xf] }
  0x28   : > { %609 = vmatpush.bf16.msra.mxu0 %v2022_v28  ;;  %v1967_v52 = vor.u32 %v2126_v49, %v1966_v48  ;;  %v2124_v61 = vld [vmem:[%s2917_s5 + $0x1d4] sm:$0xf0]  ;;  %v1934_v48 = vld [vmem:[%s2917_s5 + $0x1a0] sm:$0xf]  ;;  %v2118_v49 = vld [vmem:[%s2917_s5 + $0x1a4] sm:$0xf0] }
  0x29   : > { %623 = vmatpush.bf16.msra.mxu1 %v2030_v29  ;;  %vm1461_vm7 = vsmask.f32 4352  ;;  %vm2845_vm8 = vmand %vm1458_vm5, %vm670_vm3 }
  0x2a   : > { %637 = vmatpush.bf16.msra.mxu2 %v2038_v30  ;;  %v294_v30 = vsub.f32 %v284_v6, %v292_v25  ;;  %v1894_v25 = vld [vmem:[%s2917_s5 + $0x150] sm:$0xf]  ;;  %vm2851_vm9 = vmand %vm1460_vm6, %vm1461_vm7 }
  0x2b   : > { %651 = vmatpush.bf16.msra.mxu3 %v2046_v31  ;;  %610 = vmatmul.bf16.vlgmr.msra.gmra.mxu0 %v1537_v40  ;;  %vm1463_vm10 = vmor %vm2851_vm9, %vm2845_vm8 }
  0x2c   : > { %624 = vmatmul.bf16.vlgmr.msra.gmra.mxu1 %v1541_v41  ;;  %742 = vmatpush.bf16.msrb.mxu0 %v1705_v53  ;;  %vm302_vm13 = vcmp.ge.f32.partialorder %v294_v30, 1.0  ;;  %vm306_vm15 = vcmp.le.f32.partialorder %v294_v30, 1.0  ;;  %v1714_v53 = vld [vmem:[#allocation2 + $0x4] sm:$0xc] }
  0x2d   : > { %638 = vmatmul.bf16.vlgmr.msra.gmra.mxu2 %v1545_v42  ;;  %756 = vmatpush.bf16.msrb.mxu1 %v1709_v55  ;;  %vm304_vm14 = vmand %vm300_vm12, %vm302_vm13  ;;  %v768_v42 = vld [vmem:[#allocation2 + $0x4] sm:$0x8] }
  0x2e   : > { %652 = vmatmul.bf16.vlgmr.msra.gmra.mxu3 %v1549_v43  ;;  %vm308_vm1 = vmand %vm304_vm14, %vm306_vm15  ;;  %v791_v56 = vunpack.c.l.b16 %v768_v42  ;;  %1304 = vmatpush.bf16.msrb.mxu2 %v1783_v47  ;;  %v2106_v42 = vld [vmem:[%s2917_s5 + $0x144] sm:$0xf0] }
  0x2f   : > { %1318 = vmatpush.bf16.msrb.mxu3 %v1847_v58  ;;  %v2104_v58 = vld [vmem:[%s2917_s5 + $0x134] sm:$0xf0] }
  0x30   : > { %743 = vmatpush.bf16.msrb.mxu0 %v1697_v59  ;;  %v1766_v59 = vld [vmem:[%s2917_s5 + $0x50] sm:$0xf] }
  0x31   : > { %757 = vmatpush.bf16.msrb.mxu1 %v1701_v63  ;;  %v1767_v14 = vor.u32 %v2076_v1, %v1766_v59  ;;  %v1734_v1 = vld [vmem:[%s2917_s5 + $0x10] sm:$0xf] }
  0x32   : > { %1305 = vmatpush.bf16.msrb.mxu2 %v1775_v57  ;;  %v1878_v57 = vld [vmem:[%s2917_s5 + $0x130] sm:$0xf] }
  0x34   : > { %744 = vmatpush.bf16.msrb.mxu0 %v1689_v3 }
  0x35   : > { %758 = vmatpush.bf16.msrb.mxu1 %v1693_v7  ;;  %v1838_v7 = vld [vmem:[%s2917_s5 + $0xe0] sm:$0xf] }
  0x36   : > { %v1839_v9 = vor.u32 %v2094_v8, %v1838_v7  ;;  %1306 = vmatpush.bf16.msrb.mxu2 %v1767_v14  ;;  %v1959_v7 = vor.u32 %v2124_v61, %v1958_v60  ;;  %v1806_v8 = vld [vmem:[%s2917_s5 + $0xa0] sm:$0xf]  ;;  %v1990_v61 = vld [vmem:[%s2917_s5 + $0x210] sm:$0xf] }
  0x38   : > { %745 = vmatpush.bf16.msrb.mxu0 %v1681_v12  ;;  %1319 = vmatpush.bf16.msrb.mxu3 %v1839_v9  ;;  %v2086_v9 = vld [vmem:[%s2917_s5 + $0xa4] sm:$0xf0] }
  0x39   : > { %759 = vmatpush.bf16.msrb.mxu1 %v1685_v15  ;;  %v2110_v15 = vld [vmem:[%s2917_s5 + $0x164] sm:$0xf0] }
  0x3c   : > { %1332 = vmatpush.bf16.msra.mxu0 %v1911_v2  ;;  %v2068_v2 = vld [vmem:[%s2917_s5 + $0x14] sm:$0xf0] }
  0xa8   : > { %v611_v19 = vpop.f32.mrf.mxu0 }
  0xa9   : > { %v612_v20 = vadd.f32 %v2147_v16, %v611_v19  ;;  %v625_v23 = vpop.f32.mrf.mxu1  ;;  %v1903_v19 = vor.u32 %v2110_v15, %v1902_v10  ;;  %v1870_v10 = vld [vmem:[%s2917_s5 + $0x120] sm:$0xf]  ;;  %v2102_v15 = vld [vmem:[%s2917_s5 + $0x124] sm:$0xf0] }
  0xab   : > { %v626_v24 = vadd.f32 %v625_v23, %v612_v20  ;;  %v2092_v20 = vld [vmem:[%s2917_s5 + $0xd4] sm:$0xf0]  ;;  %1333 = vmatpush.bf16.msra.mxu0 %v1903_v19 }
  0xb0   : > { %v639_v26 = vpop.f32.mrf.mxu2  ;;  %v613_v29 = vpop.f32.mrf.mxu0 }
  0xb1   : > { %v653_v27 = vpop.f32.mrf.mxu3  ;;  %v640_v28 = vadd.f32 %v639_v26, %v626_v24  ;;  %v614_v32 = vadd.f32 %v2147_v16, %v613_v29  ;;  %v627_v34 = vpop.f32.mrf.mxu1  ;;  %v1830_v16 = vld [vmem:[%s2917_s5 + $0xd0] sm:$0xf]  ;;  %v2128_v29 = vld [vmem:[%s2917_s5 + $0x1f4] sm:$0xf0] }
  0xb2   : > { %v1831_v26 = vor.u32 %v2092_v20, %v1830_v16  ;;  %v1950_v16 = vld [vmem:[%s2917_s5 + $0x1c0] sm:$0xf]  ;;  %v1807_v20 = vor.u32 %v2086_v9, %v1806_v8  ;;  %v2130_v8 = vld [vmem:[%s2917_s5 + $0x204] sm:$0xf0]  ;;  %v2093_v9 = vld [vmem:[%s2917_s5 + $0xe4] sm:$0xf] }
  0xb3   : > { %v654_v31 = vadd.f32 %v653_v27, %v640_v28  ;;  %v628_v36 = vadd.f32 %v627_v34, %v614_v32  ;;  %v2108_v27 = vld [vmem:[%s2917_s5 + $0x154] sm:$0xf0]  ;;  %v1974_v28 = vld [vmem:[%s2917_s5 + $0x1f0] sm:$0xf]  ;;  %v2090_v34 = vld [vmem:[%s2917_s5 + $0xc4] sm:$0xf0] }
  0xb4   : > { %v1895_v32 = vor.u32 %v2108_v27, %v1894_v25  ;;  %1320 = vmatpush.bf16.msrb.mxu3 %v1831_v26  ;;  %v2084_v26 = vld [vmem:[%s2917_s5 + $0x94] sm:$0xf0]  ;;  %v1862_v27 = vld [vmem:[%s2917_s5 + $0x110] sm:$0xf] }
  0xb5   : > { %v658_v33 = vmax.f32 %v654_v31, 0.0  ;;  %v1759_v31 = vor.u32 %v2074_v18, %v1758_v17  ;;  %v2122_v17 = vld [vmem:[%s2917_s5 + $0x1c4] sm:$0xf0] }
  0xb6   : > { %1334 = vmatpush.bf16.msra.mxu0 %v1895_v32  ;;  %v1951_v25 = vor.u32 %v2122_v17, %v1950_v16  ;;  %v2006_v32 = vld [vmem:[%s2917_s5 + $0x230] sm:$0xf] }
  0xb7   : > { %v664_v35 = vsel %vm307_vm11, %v658_v33, 0.0  ;;  %v1822_v33 = vld [vmem:[%s2917_s5 + $0xc0] sm:$0xf]  ;;  %1307 = vmatpush.bf16.msrb.mxu2 %v1759_v31  ;;  %v2120_v31 = vld [vmem:[%s2917_s5 + $0x1b4] sm:$0xf0] }
  0xb8   : > { %v666_v37 = vpack.c.bf16 %v664_v35, %v664_v35  ;;  %v641_v38 = vpop.f32.mrf.mxu2  ;;  %v1750_v35 = vld [vmem:[%s2917_s5 + $0x30] sm:$0xf]  ;;  %v1823_v46 = vor.u32 %v2090_v34, %v1822_v33  ;;  %v2136_v33 = vld [vmem:[%s2917_s5 + $0x234] sm:$0xf0] }
  0xb9   : > { %v642_v39 = vadd.f32 %v641_v38, %v628_v36  ;;  %v655_v40 = vpop.f32.mrf.mxu3  ;;  %v2072_v36 = vld [vmem:[%s2917_s5 + $0x34] sm:$0xf0]  ;;  %v1886_v38 = vld [vmem:[%s2917_s5 + $0x140] sm:$0xf] }
  0xba   : > { %668 = vst.msk [vmem:[#allocation2 + $0x8] sm:$0xf] %vm309_vm0, %v666_v37  ;;  %vm2384_vm0 = vmand %vm669_vm2, %vm670_vm3  ;;  %v691_v62 = vunpack.c.l.b16 %v666_v37  ;;  %v1975_v37 = vor.u32 %v2128_v29, %v1974_v28  ;;  %v1887_v47 = vor.u32 %v2106_v42, %v1886_v38  ;;  %v1751_v50 = vor.u32 %v2072_v36, %v1750_v35  ;;  %1321 = vmatpush.bf16.msrb.mxu3 %v1823_v46  ;;  %v2100_v28 = vld [vmem:[%s2917_s5 + $0x114] sm:$0xf0]  ;;  %v2066_v29 = vld [vmem:[%s2917_s5 + $0x4] sm:$0xf0] }
  0xbb   : > { %v656_v41 = vadd.f32 %v655_v40, %v642_v39  ;;  %v1790_v38 = vld [vmem:[%s2917_s5 + $0x80] sm:$0xf]  ;;  %v2007_v46 = vor.u32 %v2136_v33, %v2006_v32  ;;  %v2109_v33 = vld [vmem:[%s2917_s5 + $0x164] sm:$0xf] }
  0xbc   : > { %1346 = vmatpush.bf16.msra.mxu1 %v1975_v37  ;;  %1335 = vmatpush.bf16.msra.mxu0 %v1887_v47  ;;  %v1863_v37 = vor.u32 %v2100_v28, %v1862_v27  ;;  %v1998_v42 = vld [vmem:[%s2917_s5 + $0x220] sm:$0xf]  ;;  %v1784_v47 = vld [vmem:[%s2917_s5 + $0x78] sm:$0xf0]  ;;  %v2073_v27 = vld [vmem:[%s2917_s5 + $0x44] sm:$0xf] }
  0xbd   : > { %v659_v43 = vmax.f32 %v656_v41, 0.0  ;;  %1308 = vmatpush.bf16.msrb.mxu2 %v1751_v50  ;;  %v2134_v50 = vld [vmem:[%s2917_s5 + $0x224] sm:$0xf0]  ;;  %v1760_v28 = vld [vmem:[%s2917_s5 + $0x48] sm:$0xf0] }
  0xbf   : > { %v665_v51 = vsel %vm308_vm1, %v659_v43, 0.0 }
  0xc0   : > { %v667_v55 = vpack.c.bf16 %v665_v51, %v665_v51  ;;  %v1742_v51 = vld [vmem:[%s2917_s5 + $0x20] sm:$0xf]  ;;  %1347 = vmatpush.bf16.msra.mxu1 %v1967_v52  ;;  %v1848_v52 = vld [vmem:[%s2917_s5 + $0xf8] sm:$0xf0] }
  0xc1   : > { %v2062_v63 = vld [vmem:[#allocation2 + $0x4] sm:$0x70] }
  0xc2   : > { %v2400_v0 = vld [vmem:[#allocation2 + $0x8] sm:$0xf]  ;;  %v673_v3 = vsel %vm2384_vm0, %v667_v55, %v672_v44  ;;  %v692_v4 = vunpack.c.l.b16 %v667_v55  ;;  %v2407_v5 = vor.u32 %v2062_v63, %v1714_v53  ;;  %v1814_v53 = vld [vmem:[%s2917_s5 + $0xb0] sm:$0xf] }
  0xc3   : > { %v792_v6 = vunpack.c.l.b16 %v2400_v0  ;;  %674 = vst [vmem:[#allocation2 + $0xc] sm:$0x1] %v673_v3  ;;  %v1718_v44 = vld [vmem:[#allocation2 + $0x8] sm:$0xe]  ;;  %v1815_v0 = vor.u32 %v2088_v54, %v1814_v53  ;;  %v1879_v3 = vor.u32 %v2104_v58, %v1878_v57  ;;  %v1935_v57 = vor.u32 %v2118_v49, %v1934_v48  ;;  %v2085_v48 = vld [vmem:[%s2917_s5 + $0xa4] sm:$0xf] }
  0xc4   : > { %v2419_v11 = vpack.c.b16 %v692_v4, %v691_v62  ;;  %v783_v12 = vshll.u32 %v2407_v5, 16  ;;  %v781_v21 = vshrl.u32 %v2407_v5, 16  ;;  %1348 = vmatpush.bf16.msra.mxu1 %v1959_v7  ;;  %v1999_v58 = vor.u32 %v2134_v50, %v1998_v42  ;;  %v1982_v7 = vld [vmem:[%s2917_s5 + $0x200] sm:$0xf]  ;;  %v2107_v42 = vld [vmem:[%s2917_s5 + $0x154] sm:$0xf] }
  0xc5   : > { %v2424_v13 = vpack.c.b16 %v792_v6, %v791_v56  ;;  %v2070_v56 = vld [vmem:[%s2917_s5 + $0x24] sm:$0xf0]  ;;  %1322 = vmatpush.bf16.msrb.mxu3 %v1815_v0  ;;  %1336 = vmatpush.bf16.msra.mxu0 %v1879_v3  ;;  %v2077_v0 = vld [vmem:[%s2917_s5 + $0x64] sm:$0xf]  ;;  %v1926_v3 = vld [vmem:[%s2917_s5 + $0x190] sm:$0xf] }
  0xc6   : > { %1710 = vmatmul.msk.bf16.vlgmr.msrb.gmra.mxu0 %vm734_vm4, %v2419_v11  ;;  %1711 = vmatmul.msk.bf16.vlgmr.msrb.gmra.mxu1 %vm734_vm4, %v2419_v11  ;;  %v785_v22 = vrot.slane %v783_v12, 1  ;;  %v1808_v49 = vld [vmem:[%s2917_s5 + $0xa8] sm:$0xf0]  ;;  %v2105_v50 = vld [vmem:[%s2917_s5 + $0x144] sm:$0xf] }
  0xc7   : > { %v796_v23 = vshrl.u32 %v2424_v13, 16  ;;  %v799_v24 = vshll.u32 %v2424_v13, 16 }
  0xc8   : > { %v786_v30 = vor.u32 %v785_v22, %v781_v21  ;;  %v1726_v21 = vld [vmem:[%s2917_s5] sm:$0xf]  ;;  %v1871_v22 = vor.u32 %v2102_v15, %v1870_v10  ;;  %1349 = vmatpush.bf16.msra.mxu1 %v1951_v25  ;;  %v1983_v10 = vor.u32 %v2130_v8, %v1982_v7  ;;  %v1768_v15 = vld [vmem:[%s2917_s5 + $0x58] sm:$0xf0] }
  0xc9   : > { %v798_v39 = vrot.slane %v796_v23, 1  ;;  %v801_v40 = vrot.slane %v799_v24, 2  ;;  %v1798_v23 = vld [vmem:[%s2917_s5 + $0x90] sm:$0xf]  ;;  %v1735_v24 = vor.u32 %v2068_v2, %v1734_v1  ;;  %1323 = vmatpush.bf16.msrb.mxu3 %v1807_v20  ;;  %v1776_v1 = vld [vmem:[%s2917_s5 + $0x68] sm:$0xf0] }
  0xca   : > { %787 = vrot.lane.b32.xlu0 %v786_v30, %s2157_s17  ;;  %v770_v41 = vld [vmem:[#allocation2 + $0xc] sm:$0x1]  ;;  %v1942_v30 = vld [vmem:[%s2917_s5 + $0x1b0] sm:$0xf]  ;;  %1337 = vmatpush.bf16.msra.mxu0 %v1871_v22  ;;  %v1799_v36 = vor.u32 %v2084_v26, %v1798_v23  ;;  %v1779_v2 = vor.u32 %v2077_v0, %v1776_v1  ;;  %v1832_v22 = vld [vmem:[%s2917_s5 + $0xd8] sm:$0xf0] }
  0xcb   : > { %v807_v43 = vunpack.c.l.b16 %v770_v41  ;;  %v2063_v45 = vld [vmem:[#allocation2 + $0x8] sm:$0x30]  ;;  %v802_v4 = vor.u32 %v801_v40, %v798_v39  ;;  %v2082_v39 = vld [vmem:[%s2917_s5 + $0x84] sm:$0xf0]  ;;  %v1727_v40 = vor.u32 %v2066_v29, %v1726_v21  ;;  %v1943_v41 = vor.u32 %v2120_v31, %v1942_v30  ;;  %v2091_v21 = vld [vmem:[%s2917_s5 + $0xd4] sm:$0xf] }
  0xcc   : > { %v2505_v59 = vor.u32 %v2063_v45, %v1718_v44  ;;  %v1854_v44 = vld [vmem:[%s2917_s5 + $0x100] sm:$0xf]  ;;  %v2098_v45 = vld [vmem:[%s2917_s5 + $0x104] sm:$0xf0]  ;;  %v1791_v54 = vor.u32 %v2082_v39, %v1790_v38  ;;  %v1835_v23 = vor.u32 %v2091_v21, %v1832_v22  ;;  %v1912_v25 = vld [vmem:[%s2917_s5 + $0x178] sm:$0xf0]  ;;  %v1763_v29 = vor.u32 %v2073_v27, %v1760_v28 }
  0xcd   : > { %v808_v55 = vpack.c.b16 %v807_v43, %v792_v6  ;;  %v1743_v6 = vor.u32 %v2070_v56, %v1742_v51  ;;  %v2079_v43 = vld [vmem:[%s2917_s5 + $0x74] sm:$0xf]  ;;  %1324 = vmatpush.bf16.msrb.mxu3 %v1799_v36  ;;  %1350 = vmatpush.bf16.msra.mxu1 %v1943_v41  ;;  %v2089_v30 = vld [vmem:[%s2917_s5 + $0xc4] sm:$0xf]  ;;  %v1824_v31 = vld [vmem:[%s2917_s5 + $0xc8] sm:$0xf0] }
  0xce   : > { %v826_v19 = vshrl.u32 %v2505_v59, 16  ;;  %v829_v35 = vshll.u32 %v2505_v59, 16  ;;  %v2095_v51 = vld [vmem:[%s2917_s5 + $0xf4] sm:$0xf]  ;;  %1338 = vmatpush.bf16.msra.mxu0 %v1863_v37  ;;  %v1787_v56 = vor.u32 %v2079_v43, %v1784_v47  ;;  %v1827_v32 = vor.u32 %v2089_v30, %v1824_v31  ;;  %v1752_v37 = vld [vmem:[%s2917_s5 + $0x38] sm:$0xf0] }
  0xcf   : > { %v810_v62 = vshrl.u32 %v808_v55, 16  ;;  %v813_v63 = vshll.u32 %v808_v55, 16  ;;  %1309 = vmatpush.bf16.msrb.mxu2 %v1743_v6  ;;  %v1855_v55 = vor.u32 %v2098_v45, %v1854_v44  ;;  %v1851_v60 = vor.u32 %v2095_v51, %v1848_v52  ;;  %v2087_v39 = vld [vmem:[%s2917_s5 + $0xb4] sm:$0xf]  ;;  %v1896_v43 = vld [vmem:[%s2917_s5 + $0x158] sm:$0xf0] }
  0xd0   : > { %v828_v34 = vrot.slane %v826_v19, 7  ;;  %v2114_v19 = vld [vmem:[%s2917_s5 + $0x184] sm:$0xf0]  ;;  %v2069_v44 = vld [vmem:[%s2917_s5 + $0x24] sm:$0xf]  ;;  %v1899_v45 = vor.u32 %v2107_v42, %v1896_v43  ;;  %v1811_v51 = vor.u32 %v2085_v48, %v1808_v49  ;;  %v794_v31 = vrot.slane %v2424_v13, 1 }
  0xd1   : > { %v812_v12 = vrot.slane %v810_v62, 6  ;;  %v815_v14 = vrot.slane %v813_v63, 7  ;;  %v2132_v62 = vld [vmem:[%s2917_s5 + $0x214] sm:$0xf0]  ;;  %1325 = vmatpush.bf16.msrb.mxu3 %v1791_v54  ;;  %1351 = vmatpush.bf16.msra.mxu1 %v1935_v57  ;;  %v1888_v52 = vld [vmem:[%s2917_s5 + $0x148] sm:$0xf0] }
  0xd2   : > { %803 = vrot.lane.b32.xlu0 %v802_v4, %s2157_s17  ;;  %v831_v53 = vor.u32 %v829_v35, %v828_v34  ;;  %1339 = vmatpush.bf16.msra.mxu0 %v1855_v55  ;;  %v1991_v63 = vor.u32 %v2132_v62, %v1990_v61  ;;  %v2116_v4 = vld [vmem:[%s2917_s5 + $0x194] sm:$0xf0]  ;;  %v1904_v34 = vld [vmem:[%s2917_s5 + $0x168] sm:$0xf0]  ;;  %v2071_v35 = vld [vmem:[%s2917_s5 + $0x34] sm:$0xf] }
  0xd3   : > { %v816_v18 = vor.u32 %v815_v14, %v812_v12  ;;  %1310 = vmatpush.bf16.msrb.mxu2 %v1735_v24  ;;  %v1927_v6 = vor.u32 %v2116_v4, %v1926_v3  ;;  %v1840_v12 = vld [vmem:[%s2917_s5 + $0xe8] sm:$0xf0]  ;;  %v2075_v14 = vld [vmem:[%s2917_s5 + $0x54] sm:$0xf]  ;;  %v1907_v36 = vor.u32 %v2109_v33, %v1904_v34  ;;  %v1755_v38 = vor.u32 %v2071_v35, %v1752_v37  ;;  %v1736_v54 = vld [vmem:[%s2917_s5 + $0x18] sm:$0xf0] }
  0xd4   : > { %v1843_v16 = vor.u32 %v2093_v9, %v1840_v12  ;;  %v1771_v17 = vor.u32 %v2075_v14, %v1768_v15  ;;  %v2111_v24 = vld [vmem:[%s2917_s5 + $0x174] sm:$0xf]  ;;  %v1880_v62 = vld [vmem:[%s2917_s5 + $0x138] sm:$0xf0]  ;;  %v2065_v1 = vld [vmem:[%s2917_s5 + $0x4] sm:$0xf] }
  0xd5   : > { %817 = vrot.lane.b32.xlu1 %v816_v18, %s2157_s17  ;;  %1374 = vmatpush.bf16.msra.mxu3 %v1787_v56  ;;  %v1918_v18 = vld [vmem:[%s2917_s5 + $0x180] sm:$0xf]  ;;  %v1915_v26 = vor.u32 %v2111_v24, %v1912_v25  ;;  %v2127_v55 = vld [vmem:[%s2917_s5 + $0x1f4] sm:$0xf]  ;;  %v1891_v56 = vor.u32 %v2105_v50, %v1888_v52  ;;  %v2081_v4 = vld [vmem:[%s2917_s5 + $0x84] sm:$0xf] }
  0xd6   : > { %1388 = vmatpush.bf16.msrb.mxu0 %v1851_v60  ;;  %1352 = vmatpush.bf16.msra.mxu1 %v1927_v6  ;;  %v1919_v20 = vor.u32 %v2114_v19, %v1918_v18  ;;  %v1800_v60 = vld [vmem:[%s2917_s5 + $0x98] sm:$0xf0]  ;;  %v2103_v61 = vld [vmem:[%s2917_s5 + $0x134] sm:$0xf]  ;;  %v1792_v6 = vld [vmem:[%s2917_s5 + $0x88] sm:$0xf0] }
  0xd7   : > { %1311 = vmatpush.bf16.msrb.mxu2 %v1727_v40  ;;  %v1816_v40 = vld [vmem:[%s2917_s5 + $0xb8] sm:$0xf0]  ;;  %v1883_v3 = vor.u32 %v2103_v61, %v1880_v62  ;;  %v2101_v9 = vld [vmem:[%s2917_s5 + $0x124] sm:$0xf]  ;;  %v2765_v15 = vld [vmem:[%s2916_s4] sm:$0x3]  ;;  %v1795_v19 = vor.u32 %v2081_v4, %v1792_v6 }
  0xd8   : > { %v1819_v41 = vor.u32 %v2087_v39, %v1816_v40  ;;  %v1968_v18 = vld [vmem:[%s2917_s5 + $0x1e8] sm:$0xf0]  ;;  %v686_v21 = vperm.slane %v2765_v15, 1  ;;  %v2099_v22 = vld [vmem:[%s2917_s5 + $0x114] sm:$0xf]  ;;  %v805_v48 = vrot.slane %v2419_v11, 6 }
  0xd9   : > { %1375 = vmatpush.bf16.msra.mxu3 %v1779_v2  ;;  %v1728_v2 = vld [vmem:[%s2917_s5 + $0x8] sm:$0xf0]  ;;  %v2123_v25 = vld [vmem:[%s2917_s5 + $0x1d4] sm:$0xf]  ;;  %v2008_v28 = vld [vmem:[%s2917_s5 + $0x238] sm:$0xf0] }
  0xda   : > { %1389 = vmatpush.bf16.msrb.mxu0 %v1843_v16  ;;  %1353 = vmatpush.bf16.msra.mxu1 %v1919_v20  ;;  %v1731_v8 = vor.u32 %v2065_v1, %v1728_v2  ;;  %v685_v20 = vperm.slane %v2765_v15, 0  ;;  %v2135_v27 = vld [vmem:[%s2917_s5 + $0x234] sm:$0xf]  ;;  %v2064_v37 = vld [vmem:[#allocation2 + $0x8] sm:$0x70]  ;;  %v824_v4 = vrot.slane %v2505_v59, 7 }
  0xdb   : > { %1364 = vmatpush.bf16.msra.mxu2 %v2007_v46  ;;  %v1744_v46 = vld [vmem:[%s2917_s5 + $0x28] sm:$0xf0]  ;;  %v2011_v43 = vor.u32 %v2135_v27, %v2008_v28  ;;  %v1992_v61 = vld [vmem:[%s2917_s5 + $0x218] sm:$0xf0]  ;;  %v2113_v28 = vld [vmem:[%s2917_s5 + $0x184] sm:$0xf] }
  0xdc   : > { %v1747_v47 = vor.u32 %v2069_v44, %v1744_v46  ;;  %v1856_v39 = vld [vmem:[%s2917_s5 + $0x108] sm:$0xf0]  ;;  %v2133_v44 = vld [vmem:[%s2917_s5 + $0x224] sm:$0xf] }
  0xdd   : > { %832 = vrot.lane.b32.xlu1 %v831_v53, %s2157_s17  ;;  %1376 = vmatpush.bf16.msra.mxu3 %v1771_v17  ;;  %v2067_v53 = vld [vmem:[%s2917_s5 + $0x14] sm:$0xf]  ;;  %v2125_v17 = vld [vmem:[%s2917_s5 + $0x1e4] sm:$0xf]  ;;  %v1952_v42 = vld [vmem:[%s2917_s5 + $0x1c8] sm:$0xf0] }
  0xde   : > { %1390 = vmatpush.bf16.msrb.mxu0 %v1835_v23  ;;  %1402 = vmatpush.bf16.msrb.mxu1 %v1915_v26  ;;  %v1739_v57 = vor.u32 %v2067_v53, %v1736_v54  ;;  %v1864_v23 = vld [vmem:[%s2917_s5 + $0x118] sm:$0xf0]  ;;  %v1971_v24 = vor.u32 %v2125_v17, %v1968_v18  ;;  %v2000_v49 = vld [vmem:[%s2917_s5 + $0x228] sm:$0xf0]  ;;  %v2129_v17 = vld [vmem:[%s2917_s5 + $0x204] sm:$0xf] }
  0xdf   : > { %1365 = vmatpush.bf16.msra.mxu2 %v1999_v58  ;;  %v2083_v58 = vld [vmem:[%s2917_s5 + $0x94] sm:$0xf]  ;;  %v1960_v26 = vld [vmem:[%s2917_s5 + $0x1d8] sm:$0xf0]  ;;  %v1984_v59 = vld [vmem:[%s2917_s5 + $0x208] sm:$0xf0] }
  0xe0   : > { %v1803_v0 = vor.u32 %v2083_v58, %v1800_v60  ;;  %v1963_v13 = vor.u32 %v2123_v25, %v1960_v26  ;;  %v1944_v58 = vld [vmem:[%s2917_s5 + $0x1b8] sm:$0xf0]  ;;  %v2131_v60 = vld [vmem:[%s2917_s5 + $0x214] sm:$0xf] }
  0xe1   : > { %1377 = vmatpush.bf16.msra.mxu3 %v1763_v29  ;;  %v1464_v18 = vld [vmem:[%s2825_s15 + $0x10] sm:$0x11]  ;;  %v1928_v26 = vld [vmem:[%s2917_s5 + $0x198] sm:$0xf0] }
  0xe2   : > { %1391 = vmatpush.bf16.msrb.mxu0 %v1827_v32  ;;  %1403 = vmatpush.bf16.msrb.mxu1 %v1907_v36  ;;  %v1867_v32 = vor.u32 %v2099_v22, %v1864_v23  ;;  %v1722_v36 = vld [vmem:[#allocation2 + $0x8] sm:$0xc]  ;;  %v1987_v23 = vor.u32 %v2129_v17, %v1984_v59  ;;  %v2115_v25 = vld [vmem:[%s2917_s5 + $0x194] sm:$0xf] }
  0xe3   : > { %1366 = vmatpush.bf16.msra.mxu2 %v1991_v63  ;;  %v1976_v63 = vld [vmem:[%s2917_s5 + $0x1f8] sm:$0xf0]  ;;  %v1931_v27 = vor.u32 %v2115_v25, %v1928_v26 }
  0xe4   : > { %v1979_v14 = vor.u32 %v2127_v55, %v1976_v63 }
  0xe5   : > { %1378 = vmatpush.bf16.msra.mxu3 %v1755_v38  ;;  %v2097_v38 = vld [vmem:[%s2917_s5 + $0x104] sm:$0xf] }
  0xe6   : > { %1392 = vmatpush.bf16.msrb.mxu0 %v1819_v41  ;;  %1404 = vmatpush.bf16.msrb.mxu1 %v1899_v45  ;;  %v2121_v41 = vld [vmem:[%s2917_s5 + $0x1c4] sm:$0xf]  ;;  %v1859_v52 = vor.u32 %v2097_v38, %v1856_v39 }
  0xe7   : > { %1367 = vmatpush.bf16.msra.mxu2 %v1983_v10  ;;  %v1872_v10 = vld [vmem:[%s2917_s5 + $0x128] sm:$0xf0]  ;;  %v1955_v55 = vor.u32 %v2121_v41, %v1952_v42 }
  0xe9   : > { %1379 = vmatpush.bf16.msra.mxu3 %v1747_v47 }
  0xea   : > { %1393 = vmatpush.bf16.msrb.mxu0 %v1811_v51  ;;  %1405 = vmatpush.bf16.msrb.mxu1 %v1891_v56  ;;  %v1723_v51 = vor.u32 %v2064_v37, %v1722_v36  ;;  %v2119_v56 = vld [vmem:[%s2917_s5 + $0x1b4] sm:$0xf] }
  0xec   : > { %v936_v6 = vrot.slane %v1723_v51, 2 }
  0xed   : > { %1380 = vmatpush.bf16.msra.mxu3 %v1739_v57  ;;  %v2003_v57 = vor.u32 %v2133_v44, %v2000_v49 }
  0xee   : > { %1394 = vmatpush.bf16.msrb.mxu0 %v1803_v0  ;;  %1406 = vmatpush.bf16.msrb.mxu1 %v1883_v3 }
  0xf1   : > { %1381 = vmatpush.bf16.msra.mxu3 %v1731_v8  ;;  %v2117_v8 = vld [vmem:[%s2917_s5 + $0x1a4] sm:$0xf] }
  0xf2   : > { %1395 = vmatpush.bf16.msrb.mxu0 %v1795_v19 }
 0x13c   : > { %v788_v7 = vpop.permute.xlu0 %787 }
 0x13d   : > { %v2760_v12 = vsel %vm734_vm4, %v2407_v5, %v788_v7  ;;  %v1875_v5 = vor.u32 %v2101_v9, %v1872_v10  ;;  %v1947_v7 = vor.u32 %v2119_v56, %v1944_v58  ;;  %v1936_v9 = vld [vmem:[%s2917_s5 + $0x1a8] sm:$0xf0]  ;;  %v1995_v10 = vor.u32 %v2131_v60, %v1992_v61 }
 0x13e   : > { %v932_v16 = vrot.slane %v2760_v12, 2  ;;  %v1939_v22 = vor.u32 %v2117_v8, %v1936_v9  ;;  %v922_v12 = vld [vmem:[%s2918_s6] sm:$0x3] }
 0x13f   : > { %1407 = vmatpush.bf16.msrb.mxu1 %v1875_v5  ;;  %v924_v38 = vperm.slane %v922_v12, 0 }
 0x140   : > { %1312 = vmatmul.bf16.vlgmr.msrb.gmra.mxu2 %v932_v16 }
 0x141   : > { %1416 = vmatpush.bf16.msrb.mxu2 %v1979_v14 }
 0x143   : > { %v747_v29 = vpop.f32.mrf.mxu0  ;;  %v761_v30 = vpop.f32.mrf.mxu1  ;;  %1408 = vmatpush.bf16.msrb.mxu1 %v1867_v32 }
 0x144   : > { %v748_v33 = vadd.f32 %v747_v29, %v685_v20  ;;  %v762_v34 = vadd.f32 %v761_v30, %v686_v21  ;;  %v804_v35 = vpop.permute.xlu0 %803  ;;  %v1920_v29 = vld [vmem:[%s2917_s5 + $0x188] sm:$0xf0] }
 0x145   : > { %v2804_v40 = vsel %vm734_vm4, %v794_v31, %v804_v35  ;;  %1417 = vmatpush.bf16.msrb.mxu2 %v1971_v24  ;;  %v1923_v30 = vor.u32 %v2113_v28, %v1920_v29 }
 0x146   : > { %v1444_v45 = vmax.f32 %v748_v33, 0.0  ;;  %v1445_v46 = vmax.f32 %v762_v34, 0.0  ;;  %v933_v47 = vrot.slane %v2804_v40, 2  ;;  %v925_v40 = vperm.slane %v922_v12, 1 }
 0x147   : > { %v818_v50 = vpop.permute.xlu1 %817  ;;  %1409 = vmatpush.bf16.msrb.mxu1 %v1859_v52 }
 0x148   : > { %v1452_v53 = vpack.c.bf16 %v1445_v46, %v1444_v45  ;;  %v846_v54 = vsel %vm734_vm4, %v805_v48, %v818_v50  ;;  %1326 = vmatmul.bf16.vlgmr.msrb.gmra.mxu3 %v933_v47 }
 0x149   : > { %v934_v11 = vrot.slane %v846_v54, 2  ;;  %1418 = vmatpush.bf16.msrb.mxu2 %v1963_v13  ;;  %1434 = vmatpush.bf16.msrb.mxu3 %v2011_v43 }
 0x14a   : > { %1456 = vst [vmem:[%s2825_s15] sm:$0xff] %v1452_v53 }
 0x14b   : > { %v749_v62 = vpop.f32.mrf.mxu0  ;;  %v763_v63 = vpop.f32.mrf.mxu1  ;;  %1340 = vmatmul.bf16.vlgmr.msra.gmra.mxu0 %v934_v11 }
 0x14c   : > { %v750_v1 = vadd.f32 %v749_v62, %v685_v20  ;;  %v764_v2 = vadd.f32 %v763_v63, %v686_v21 }
 0x14d   : > { %1419 = vmatpush.bf16.msrb.mxu2 %v1955_v55  ;;  %1435 = vmatpush.bf16.msrb.mxu3 %v2003_v57 }
 0x14e   : > { %v1448_v14 = vmax.f32 %v750_v1, 0.0  ;;  %v1449_v15 = vmax.f32 %v764_v2, 0.0 }
 0x14f   : > { %v833_v19 = vpop.permute.xlu1 %832 }
 0x150   : > { %v1454_v5 = vpack.c.bf16 %v1449_v15, %v1448_v14  ;;  %v849_v20 = vsel %vm734_vm4, %v824_v4, %v833_v19  ;;  %2012 = vmatmul.msk.bf16.vlgmr.msra.gmra.mxu2 %vm734_vm4, %v936_v6 }
 0x151   : > { %v935_v21 = vrot.slane %v849_v20, 2  ;;  %1420 = vmatpush.bf16.msrb.mxu2 %v1947_v7  ;;  %1436 = vmatpush.bf16.msrb.mxu3 %v1995_v10 }
 0x152   : > { %v1465_v24 = vsel %vm1463_vm10, %v1454_v5, %v1464_v18  ;;  %v1467_v18 = vld [vmem:[%s2825_s15 + $0x18] sm:$0x11] }
 0x153   : > { %1466 = vst [vmem:[%s2825_s15 + $0x10] sm:$0x11] %v1465_v24  ;;  %1354 = vmatmul.bf16.vlgmr.msra.gmra.mxu1 %v935_v21 }
 0x155   : > { %1421 = vmatpush.bf16.msrb.mxu2 %v1939_v22  ;;  %1437 = vmatpush.bf16.msrb.mxu3 %v1987_v23 }
 0x158   : > { %1382 = vmatmul.bf16.vlgmr.msra.gmra.mxu3 %v932_v16 }
 0x159   : > { %1422 = vmatpush.bf16.msrb.mxu2 %v1931_v27 }
 0x15b   : > { %1396 = vmatmul.bf16.vlgmr.msrb.gmra.mxu0 %v933_v47 }
 0x15d   : > { %1423 = vmatpush.bf16.msrb.mxu2 %v1923_v30 }
 0x160   : > { %1424 = vmatmul.bf16.vlgmr.msrb.gmra.mxu2 %v935_v21 }
 0x163   : > { %1410 = vmatmul.bf16.vlgmr.msrb.gmra.mxu1 %v934_v11 }
 0x168   : > { %2013 = vmatmul.msk.bf16.vlgmr.msrb.gmra.mxu3 %vm734_vm4, %v936_v6 }
 0x1c3   : > { %v1313_v31 = vpop.f32.mrf.mxu2 }
 0x1c4   : > { %v1314_v42 = vadd.f32 %v1313_v31, %v924_v38 }
 0x1c8   : > { %v1341_v32 = vpop.f32.mrf.mxu0 }
 0x1cb   : > { %v1315_v33 = vpop.f32.mrf.mxu2  ;;  %v1327_v34 = vpop.f32.mrf.mxu3 }
 0x1cc   : > { %v1328_v43 = vadd.f32 %v1327_v34, %v1314_v42  ;;  %v1316_v50 = vadd.f32 %v1315_v33, %v924_v38 }
 0x1ce   : > { %v1342_v47 = vadd.f32 %v1341_v32, %v1328_v43 }
 0x1d0   : > { %v1355_v35 = vpop.f32.mrf.mxu1  ;;  %v1343_v16 = vpop.f32.mrf.mxu0 }
 0x1d1   : > { %v1356_v52 = vadd.f32 %v1355_v35, %v1342_v47 }
 0x1d3   : > { %v1329_v36 = vpop.f32.mrf.mxu3  ;;  %v1369_v37 = vpop.f32.mrf.mxu2 }
 0x1d4   : > { %v1330_v53 = vadd.f32 %v1329_v36, %v1316_v50  ;;  %v1370_v56 = vadd.f32 %v1369_v37, %v1356_v52 }
 0x1d6   : > { %v1344_v57 = vadd.f32 %v1343_v16, %v1330_v53  ;;  %v1446_v1 = vmax.f32 %v1370_v56, 0.0 }
 0x1d8   : > { %v1357_v39 = vpop.f32.mrf.mxu1  ;;  %v1397_v45 = vpop.f32.mrf.mxu0 }
 0x1d9   : > { %v1358_v2 = vadd.f32 %v1357_v39, %v1344_v57 }
 0x1db   : > { %v1371_v13 = vpop.f32.mrf.mxu2  ;;  %v1383_v41 = vpop.f32.mrf.mxu3 }
 0x1dc   : > { %v1384_v44 = vadd.f32 %v1383_v41, %v925_v40  ;;  %v1372_v9 = vadd.f32 %v1371_v13, %v1358_v2 }
 0x1de   : > { %v1398_v48 = vadd.f32 %v1397_v45, %v1384_v44  ;;  %v1450_v17 = vmax.f32 %v1372_v9, 0.0 }
 0x1e0   : > { %v1411_v46 = vpop.f32.mrf.mxu1  ;;  %v1399_v55 = vpop.f32.mrf.mxu0 }
 0x1e1   : > { %v1412_v54 = vadd.f32 %v1411_v46, %v1398_v48 }
 0x1e3   : > { %v1385_v49 = vpop.f32.mrf.mxu3  ;;  %v1425_v51 = vpop.f32.mrf.mxu2 }
 0x1e4   : > { %v1386_v11 = vadd.f32 %v1385_v49, %v925_v40  ;;  %v1426_v58 = vadd.f32 %v1425_v51, %v1412_v54 }
 0x1e6   : > { %v1400_v60 = vadd.f32 %v1399_v55, %v1386_v11 }
 0x1e8   : > { %v1413_v61 = vpop.f32.mrf.mxu1 }
 0x1e9   : > { %v1414_v4 = vadd.f32 %v1413_v61, %v1400_v60 }
 0x1eb   : > { %v1439_v62 = vpop.f32.mrf.mxu3  ;;  %v1427_v7 = vpop.f32.mrf.mxu2 }
 0x1ec   : > { %v1440_v63 = vadd.f32 %v1439_v62, %v1426_v58  ;;  %v1428_v10 = vadd.f32 %v1427_v7, %v1414_v4 }
 0x1ee   : > { %v1447_v6 = vmax.f32 %v1440_v63, 0.0 }
 0x1f0   : > { %v1453_v8 = vpack.c.bf16 %v1447_v6, %v1446_v1 }
 0x1f2   : > { %1457 = vst [vmem:[%s2825_s15 + $0x8] sm:$0xff] %v1453_v8 }
 0x1f3   : > { %v1441_v14 = vpop.f32.mrf.mxu3 }
 0x1f4   : > { %v1442_v15 = vadd.f32 %v1441_v14, %v1428_v10 }
 0x1f6   : > { %v1451_v59 = vmax.f32 %v1442_v15, 0.0 }
 0x1f8   : > { %v1455_v19 = vpack.c.bf16 %v1451_v59, %v1450_v17 }
 0x1fa   : > { %v1468_v5 = vsel %vm1463_vm10, %v1455_v19, %v1467_v18 }
 0x1fb   : > { %1469 = vst [vmem:[%s2825_s15 + $0x18] sm:$0x11] %v1468_v5 }
 0x1fc PF: > { %s17_s24 = sadd.s32 1, %s2154_s24  }
 0x1fd   : > { %p14_p4 = scmp.ge.s32.totalorder %s17_s24, 4  }
 0x1ff   :  { %16 = sbr.rel (!%p14_p4) target bundleno = 1 (0x1), region = 78 }

// kernel: squeezenet_forward.7
= control target key start
LH: loop header
LB: loop body
LE: loop exit
PB: predicated region body
PF: predicated region fallthrough
CT: control target
= control target key end

     0   :  { %s6801_s29 = smov 0   ;;  %s8947_s0 = inlined_call_operand.vmem [shape: bf16[2,25,256], index: 0, kind: input, shape index: {}]   ;;  %s8948_s1 = inlined_call_operand.vmem [shape: bf16[256,32], index: 1, kind: input, shape index: {}]   ;;  %s8949_s2 = inlined_call_operand.vmem [shape: f32[1,32], index: 2, kind: input, shape index: {}]   ;;  %s8950_s3 = inlined_call_operand.vmem [shape: bf16[32,128], index: 3, kind: input, shape index: {}]   ;;  %s8951_s4 = inlined_call_operand.vmem [shape: f32[1,128], index: 4, kind: input, shape index: {}]   ;;  %s8952_s5 = inlined_call_operand.vmem [shape: bf16[288,128], index: 5, kind: input, shape index: {}]   ;;  %s8953_s6 = inlined_call_operand.vmem [shape: f32[1,128], index: 6, kind: input, shape index: {}]   ;;  %s8954_s7 = inlined_call_operand.vmem [shape: bf16[256,48], index: 7, kind: input, shape index: {}]   ;;  %s8955_s8 = inlined_call_operand.vmem [shape: f32[1,48], index: 8, kind: input, shape index: {}]   ;;  %s8956_s9 = inlined_call_operand.vmem [shape: bf16[48,192], index: 9, kind: input, shape index: {}]   ;;  %s8957_s10 = inlined_call_operand.vmem [shape: f32[1,192], index: 10, kind: input, shape index: {}]   ;;  %s8958_s11 = inlined_call_operand.vmem [shape: bf16[432,192], index: 11, kind: input, shape index: {}]   ;;  %s8959_s12 = inlined_call_operand.vmem [shape: f32[1,192], index: 12, kind: input, shape index: {}]   ;;  %s8960_s13 = inlined_call_operand.vmem [shape: bf16[384,48], index: 13, kind: input, shape index: {}]   ;;  %s8961_s14 = inlined_call_operand.vmem [shape: f32[1,48], index: 14, kind: input, shape index: {}]   ;;  %s8962_s15 = inlined_call_operand.vmem [shape: bf16[48,192], index: 15, kind: input, shape index: {}]   ;;  %s8963_s16 = inlined_call_operand.vmem [shape: f32[1,192], index: 16, kind: input, shape index: {}]   ;;  %s8964_s17 = inlined_call_operand.vmem [shape: bf16[432,192], index: 17, kind: input, shape index: {}]   ;;  %s8965_s18 = inlined_call_operand.vmem [shape: f32[1,192], index: 18, kind: input, shape index: {}]   ;;  %s8966_s19 = inlined_call_operand.vmem [shape: bf16[384,64], index: 19, kind: input, shape index: {}]   ;;  %s8967_s20 = inlined_call_operand.vmem [shape: f32[1,64], index: 20, kind: input, shape index: {}]   ;;  %s8968_s21 = inlined_call_operand.vmem [shape: bf16[64,256], index: 21, kind: input, shape index: {}]   ;;  %s8969_s22 = inlined_call_operand.vmem [shape: f32[1,256], index: 22, kind: input, shape index: {}]   ;;  %s8970_s23 = inlined_call_operand.vmem [shape: bf16[576,256], index: 23, kind: input, shape index: {}]   ;;  %s8971_s24 = inlined_call_operand.vmem [shape: f32[1,256], index: 24, kind: input, shape index: {}]   ;;  %s8972_s25 = inlined_call_operand.vmem [shape: bf16[2,25,512], index: 25, kind: output, shape index: {}]  }
   0x1   :  { %9005 = sst [smem:[#allocation4_spill]] %s8947_s0 }
   0x2   :  { %9006 = sst [smem:[#allocation5_spill]] %s8948_s1 }
   0x3   :  { %9007 = sst [smem:[#allocation6_spill]] %s8949_s2 }
   0x4   :  { %9008 = sst [smem:[#allocation7_spill]] %s8950_s3 }
   0x5   :  { %9009 = sst [smem:[#allocation8_spill]] %s8951_s4 }
   0x6   :  { %9010 = sst [smem:[#allocation9_spill]] %s8952_s5 }
   0x7   :  { %9011 = sst [smem:[#allocation10_spill]] %s8953_s6 }
   0x8   :  { %9012 = sst [smem:[#allocation11_spill]] %s8954_s7 }
   0x9   :  { %9013 = sst [smem:[#allocation12_spill]] %s8955_s8 }
   0xa   :  { %9014 = sst [smem:[#allocation13_spill]] %s8956_s9 }
   0xb LB: > { %9015 = sst [smem:[#allocation3_spill]] %s6661_s29  ;;  %s5008_s2 = sadd.s32 4294967295, %s6661_s29   ;;  %s6661_s29 = sphi %s6801_s29, %s35_s29  }
   0xc   : > { %p5012_p0 = scmp.ge.s32.totalorder %s6661_s29, 1  ;;  %p687_p1 = scmp.lt.s32.totalorder %s6661_s29, 3 }
   0xe   : > { %p688_p2 = pnand %p5012_p0, %p687_p1 }
   0xf   : > { %s9016_s7 = sld [smem:[#allocation5_spill]] (!%p688_p2)  ;;  %p755_p3 = scmp.lt.s32.totalorder (!%p688_p2), %s5008_s2, 1 }
  0x10   : > { %691 = sbr.rel (%p688_p2) target bundleno = 2258 (0x8d2), region = 120  ;;  %s9017_s4 = sld [smem:[#allocation4_spill]] (!%p688_p2) }
  0x11   : > { %s9018_s30 = sld [smem:[#allocation7_spill]] (!%p688_p2)  ;;  %s8979_s29 = smov (!%p688_p2), 32  }
  0x12   : > { %s9019_s27 = sld [smem:[#allocation6_spill]] (!%p688_p2)  ;;  %s8981_s3 = smov (!%p688_p2), 96  }
  0x13   : > { %s9024_s9 = sld [smem:[#allocation9_spill]] (!%p688_p2)  ;;  %s8991_s5 = smov (!%p688_p2), 16  }
  0x14   : > { %s9029_s8 = sld [smem:[#allocation11_spill]] (!%p688_p2)  ;;  %s8998_s1 = smov (!%p688_p2), 48  }
  0x15   : > { %v6276_v0 = vld [vmem:[%s9016_s7 + $0x38] sm:$0xff]  ;;  %v6275_v2 = vld [vmem:[%s9016_s7 + $0x30] sm:$0xff]  ;;  %v6274_v4 = vld [vmem:[%s9016_s7 + $0x28] sm:$0xff]  ;;  %s9067_s2 = smov (!%p755_p3, %s5008_s2), 1  ;;  %v766_v28 = vlaneseq  ;;  %vm8986_vm0 = vcmask 519168   ;;  %v6663_v40 = vmov 0  }
  0x16   : > { %v6284_v1 = vld [vmem:[%s9016_s7 + $0x78] sm:$0xff]  ;;  %988 = vmatpush.bf16.msra.mxu0 %v6276_v0  ;;  %v6283_v3 = vld [vmem:[%s9016_s7 + $0x70] sm:$0xff]  ;;  %v6282_v5 = vld [vmem:[%s9016_s7 + $0x68] sm:$0xff]  ;;  %s6263_s6 = sshll.u32 %s9067_s2, 5  ;;  %825 = vst.msk [vmem:[#allocation2 + $0x4] sm:$0xf] %vm8986_vm0, %v6663_v40 }
  0x17   : > { %1007 = vmatpush.bf16.msra.mxu1 %v6284_v1  ;;  %v6273_v6 = vld [vmem:[%s9016_s7 + $0x20] sm:$0xff]  ;;  %v6272_v8 = vld [vmem:[%s9016_s7 + $0x18] sm:$0xff]  ;;  %v6271_v10 = vld [vmem:[%s9016_s7 + $0x10] sm:$0xff]  ;;  %s759_s28 = scalar_lea.vmem %s9017_s4, %s6263_s6  ;;  %v767_v29 = vshrl.u32 %v766_v28, 7  ;;  %vm827_vm1 = vsmask.f32 7938 }
  0x18   : > { %v6281_v7 = vld [vmem:[%s9016_s7 + $0x60] sm:$0xff]  ;;  %v6280_v9 = vld [vmem:[%s9016_s7 + $0x58] sm:$0xff]  ;;  %v6279_v11 = vld [vmem:[%s9016_s7 + $0x50] sm:$0xff]  ;;  %vm1046_vm14 = vcmask 257024   ;;  %s8983_s6 = smov 64   ;;  %s9030_s26 = sld [smem:[#allocation8_spill]] }
  0x19   : > { %v6270_v12 = vld [vmem:[%s9016_s7 + $0x8] sm:$0xff]  ;;  %v6269_v14 = vld [vmem:[%s9016_s7] sm:$0xff]  ;;  %v5027_v22 = vld [vmem:[%s759_s28 + $0x10] sm:$0xf]  ;;  %v771_v30 = vcvt.s32.f32 %v767_v29  ;;  %v768_v32 = vadd.s32 8, %v767_v29  ;;  %v769_v39 = vadd.s32 16, %v767_v29 }
  0x1a   : > { %989 = vmatpush.bf16.msra.mxu0 %v6275_v2  ;;  %v6278_v13 = vld [vmem:[%s9016_s7 + $0x48] sm:$0xff]  ;;  %v6277_v15 = vld [vmem:[%s9016_s7 + $0x40] sm:$0xff]  ;;  %v6268_v23 = vld [vmem:[%s759_s28 + $0x14] sm:$0x10]  ;;  %v770_v49 = vadd.s32 24, %v767_v29  ;;  %s9033_s0 = sld [smem:[#allocation12_spill]] }
  0x1b   : > { %1008 = vmatpush.bf16.msra.mxu1 %v6283_v3  ;;  %v5019_v16 = vld [vmem:[%s759_s28] sm:$0xf]  ;;  %v6266_v17 = vld [vmem:[%s759_s28 + $0x4] sm:$0xf0]  ;;  %v6265_v18 = vld [vmem:[%s759_s28 + $0x4] sm:$0xf]  ;;  %v5028_v26 = vor.u32 %v6268_v23, %v5027_v22  ;;  %v772_v35 = vcvt.s32.f32 %v768_v32  ;;  %v773_v43 = vcvt.s32.f32 %v769_v39 }
  0x1c   : > { %v5021_v19 = vld [vmem:[%s759_s28 + $0x8] sm:$0xf0]  ;;  %v5020_v20 = vor.u32 %v6266_v17, %v5019_v16  ;;  %v6267_v24 = vld [vmem:[%s759_s28 + $0x14] sm:$0xf]  ;;  %v5029_v25 = vld [vmem:[%s759_s28 + $0x18] sm:$0x10]  ;;  %v774_v53 = vcvt.s32.f32 %v770_v49 }
  0x1d   : > { %v5024_v21 = vor.u32 %v6265_v18, %v5021_v19  ;;  %v5032_v27 = vor.u32 %v6267_v24, %v5029_v25  ;;  %v775_v31 = vadd.f32 0.5, %v771_v30  ;;  %v6286_v33 = vld [vmem:[%s9018_s30 + $0x8] sm:$0xff]  ;;  %v6285_v36 = vld [vmem:[%s9018_s30] sm:$0xff]  ;;  %v776_v38 = vadd.f32 0.5, %v772_v35  ;;  %vm828_vm2 = vmand %vm8986_vm0, %vm827_vm1  ;;  %s8995_s7 = smov 80   ;;  %s9045_s28 = smov 48  }
  0x1e   : > { %990 = vmatpush.bf16.msra.mxu0 %v6274_v4  ;;  %1099 = vmatpush.bf16.msra.mxu2 %v6286_v33  ;;  %v829_v44 = vld [vmem:[#allocation2 + $0x14] sm:$0xf]  ;;  %v777_v48 = vadd.f32 0.5, %v773_v43  ;;  %v6874_v50 = vld [vmem:[%s9019_s27] ss:$0 sm:$0xff]  ;;  %v778_v59 = vadd.f32 0.5, %v774_v53 }
  0x1f   : > { %1009 = vmatpush.bf16.msra.mxu1 %v6282_v5  ;;  %v779_v34 = vmul.f32 0.2, %v775_v31  ;;  %v780_v42 = vmul.f32 0.2, %v776_v38  ;;  %v830_v45 = vsel %vm828_vm2, 0, %v829_v44  ;;  %v6303_v18 = vld [vmem:[%s9024_s9 + $0x80] sm:$0xff] }
  0x20   : > { %831 = vst [vmem:[#allocation2 + $0x14] sm:$0xf] %v830_v45  ;;  %v781_v52 = vmul.f32 0.2, %v777_v48  ;;  %v782_v0 = vmul.f32 0.2, %v778_v59 }
  0x21   : > { %v783_v37 = vfloor.f32 %v779_v34  ;;  %v784_v47 = vfloor.f32 %v780_v42  ;;  %s9032_s27 = sld [smem:[#allocation13_spill]]  ;;  %vm1780_vm0 = vcmask 392192   ;;  %v4086_v23 = vld [vmem:[#allocation2 + $0x4] sm:$0xc] }
  0x22   : > { %991 = vmatpush.bf16.msra.mxu0 %v6273_v6  ;;  %1100 = vmatpush.bf16.msra.mxu2 %v6285_v36  ;;  %v785_v58 = vfloor.f32 %v781_v52 }
  0x23   : > { %1010 = vmatpush.bf16.msra.mxu1 %v6281_v7  ;;  %v787_v41 = vmul.f32 5.0, %v783_v37  ;;  %vm795_vm3 = vcmp.ge.f32.partialorder %v783_v37, 1.0  ;;  %vm799_vm4 = vcmp.le.f32.partialorder %v783_v37, 3.0  ;;  %v788_v51 = vmul.f32 5.0, %v784_v47 }
  0x24   : > { %vm803_vm5 = vmand %vm795_vm3, %vm799_vm4  ;;  %vm796_vm9 = vcmp.ge.f32.partialorder %v784_v47, 1.0  ;;  %vm800_vm10 = vcmp.le.f32.partialorder %v784_v47, 3.0  ;;  %v789_v63 = vmul.f32 5.0, %v785_v58  ;;  %v786_v7 = vfloor.f32 %v782_v0  ;;  %v1116_v47 = vld [vmem:[#allocation2 + $0x4] sm:$0xc] }
  0x25   : > { %v791_v46 = vsub.f32 %v771_v30, %v787_v41  ;;  %v792_v57 = vsub.f32 %v772_v35, %v788_v51  ;;  %vm804_vm12 = vmand %vm796_vm9, %vm800_vm10  ;;  %vm797_vm2 = vcmp.ge.f32.partialorder %v785_v58, 1.0  ;;  %vm801_vm3 = vcmp.le.f32.partialorder %v785_v58, 3.0 }
  0x26   : > { %992 = vmatpush.bf16.msra.mxu0 %v6272_v8  ;;  %v793_v6 = vsub.f32 %v773_v43, %v789_v63  ;;  %vm9004_vm9 = vcmask 261120   ;;  %vm798_vm10 = vcmp.ge.f32.partialorder %v786_v7, 1.0 }
  0x27   : > { %1011 = vmatpush.bf16.msra.mxu1 %v6280_v9  ;;  %vm807_vm6 = vcmp.ge.f32.partialorder %v791_v46, 1.0  ;;  %vm815_vm8 = vcmp.le.f32.partialorder %v791_v46, 3.0  ;;  %vm808_vm13 = vcmp.ge.f32.partialorder %v792_v57, 1.0  ;;  %vm816_vm1 = vcmp.le.f32.partialorder %v792_v57, 3.0  ;;  %v1053_v44 = vld [vmem:[#allocation2 + $0x14] sm:$0x1] }
  0x28   : > { %vm811_vm7 = vmand %vm803_vm5, %vm807_vm6  ;;  %vm809_vm6 = vcmp.ge.f32.partialorder %v793_v6, 1.0 }
  0x29   : > { %vm6877_vm11 = vmand %vm811_vm7, %vm815_vm8  ;;  %vm817_vm8 = vcmp.le.f32.partialorder %v793_v6, 3.0 }
  0x2a   : > { %993 = vmatpush.bf16.msra.mxu0 %v6271_v10  ;;  %vm812_vm15 = vmand %vm804_vm12, %vm808_vm13  ;;  %vm802_vm12 = vcmp.le.f32.partialorder %v786_v7, 3.0 }
  0x2b   : > { %1012 = vmatpush.bf16.msra.mxu1 %v6279_v11  ;;  %vm6885_vm4 = vmand %vm812_vm15, %vm816_vm1  ;;  %v6304_v11 = vld [vmem:[%s9024_s9 + $0x88] sm:$0xff] }
  0x2c   : > { %vm805_vm5 = vmand %vm797_vm2, %vm801_vm3 }
  0x2d   : > { %vm813_vm7 = vmand %vm805_vm5, %vm809_vm6  ;;  %vm1050_vm6 = vcmask 253952  }
  0x2e   : > { %994 = vmatpush.bf16.msra.mxu0 %v6270_v12  ;;  %v790_v12 = vmul.f32 5.0, %v786_v7  ;;  %vm6899_vm13 = vmand %vm813_vm7, %vm817_vm8  ;;  %vm1051_vm7 = vsmask.f32 256  ;;  %vm1197_vm8 = vcmask 1040384  }
  0x2f   : > { %1013 = vmatpush.bf16.msra.mxu1 %v6278_v13  ;;  %vm806_vm15 = vmand %vm798_vm10, %vm802_vm12  ;;  %vm1135_vm10 = vsmask.f32 7424  ;;  %vm1161_vm12 = vcmask 1046528  }
  0x32   : > { %995 = vmatpush.bf16.msra.mxu0 %v6269_v14 }
  0x33   : > { %1014 = vmatpush.bf16.msra.mxu1 %v6277_v15 }
  0x35   : > { %996 = vmatmul.bf16.vlgmr.msra.gmra.mxu0 %v5020_v20 }
  0x36   : > { %1015 = vmatmul.bf16.vlgmr.msra.gmra.mxu1 %v5024_v21  ;;  %1512 = vmatpush.bf16.msrb.mxu0 %v6304_v11  ;;  %v794_v21 = vsub.f32 %v774_v53, %v790_v12 }
  0x38   : > { %vm810_vm1 = vcmp.ge.f32.partialorder %v794_v21, 1.0  ;;  %vm818_vm3 = vcmp.le.f32.partialorder %v794_v21, 3.0 }
  0x39   : > { %vm814_vm2 = vmand %vm806_vm15, %vm810_vm1  ;;  %vm1265_vm15 = vcmask 1045504   ;;  %vm1175_vm1 = vsmask.f32 5376 }
  0x3a   : > { %1513 = vmatpush.bf16.msrb.mxu0 %v6303_v18  ;;  %vm6911_vm5 = vmand %vm814_vm2, %vm818_vm3  ;;  %vm9001_vm2 = vsmask.f32 6400  ;;  %vm1273_vm3 = vcmask 523264  }
  0x45   : > { %1001 = vmatmul.bf16.gmra.mxu0 %v5028_v26  ;;  %v1112_v26 = vld [vmem:[#allocation2 + $0x4] sm:$0xe] }
  0x46   : > { %1020 = vmatmul.bf16.gmra.mxu1 %v5032_v27  ;;  %v1129_v32 = vunpack.c.l.b16 %v1112_v26 }
  0xb2   : > { %v997_v54 = vpop.f32.mrf.mxu0 }
  0xb3   : > { %v1016_v55 = vpop.f32.mrf.mxu1  ;;  %v998_v56 = vadd.f32 %v6874_v50, %v997_v54 }
  0xb5   : > { %v1017_v60 = vadd.f32 %v1016_v55, %v998_v56  ;;  %v1157_v56 = vunpack.c.l.b16 %v1116_v47 }
  0xb7   : > { %v1026_v62 = vmax.f32 %v1017_v60, 0.0 }
  0xb9   : > { %v1038_v1 = vsel %vm6877_vm11, %v1026_v62, 0.0  ;;  %v1118_v62 = vld [vmem:[#allocation2 + $0x4] sm:$0x8] }
  0xba   : > { %v1042_v2 = vpack.c.bf16 %v1038_v1, %v1038_v1  ;;  %v999_v3 = vpop.f32.mrf.mxu0 }
  0xbb   : > { %v1018_v4 = vpop.f32.mrf.mxu1  ;;  %v1000_v5 = vadd.f32 %v6874_v50, %v999_v3 }
  0xbc   : > { %1047 = vst.msk [vmem:[#allocation2 + $0x8] sm:$0xf] %vm1046_vm14, %v1042_v2  ;;  %v1068_v19 = vunpack.c.l.b16 %v1042_v2 }
  0xbd   : > { %v1019_v8 = vadd.f32 %v1018_v4, %v1000_v5  ;;  %v1171_v5 = vunpack.c.l.b16 %v1118_v62 }
  0xbf   : > { %v1027_v10 = vmax.f32 %v1019_v8, 0.0 }
  0xc1   : > { %v1039_v13 = vsel %vm6885_vm4, %v1027_v10, 0.0 }
  0xc2   : > { %v1043_v14 = vpack.c.bf16 %v1039_v13, %v1039_v13  ;;  %v1002_v15 = vpop.f32.mrf.mxu0 }
  0xc3   : > { %v1021_v16 = vpop.f32.mrf.mxu1  ;;  %v1003_v17 = vadd.f32 %v6874_v50, %v1002_v15  ;;  %v1123_v63 = vld [vmem:[#allocation2 + $0x8] sm:$0x8] }
  0xc4   : > { %1048 = vst.msk [vmem:[#allocation2 + $0xc] sm:$0xf] %vm1046_vm14, %v1043_v14  ;;  %v1069_v20 = vunpack.c.l.b16 %v1043_v14  ;;  %v1261_v6 = vunpack.c.l.b16 %v1123_v63  ;;  %v1121_v12 = vld [vmem:[#allocation2 + $0x8] sm:$0xc] }
  0xc5   : > { %v1022_v22 = vadd.f32 %v1021_v16, %v1003_v17 }
  0xc6   : > { %v6903_v24 = vpack.c.b16 %v1069_v20, %v1068_v19 }
  0xc7   : > { %v1028_v25 = vmax.f32 %v1022_v22, 0.0 }
  0xc8   : > { %5105 = vmatmul.msk.bf16.vlgmr.msra.gmra.mxu2 %vm9004_vm9, %v6903_v24  ;;  %v1198_v0 = vrot.slane %v6903_v24, 7  ;;  %v6320_v24 = vld [vmem:[%s9029_s8 + $0x78] sm:$0xff] }
  0xc9   : > { %v1040_v27 = vsel %vm6899_vm13, %v1028_v25, 0.0  ;;  %v1226_v25 = vunpack.c.l.b16 %v1121_v12  ;;  %v6312_v12 = vld [vmem:[%s9029_s8 + $0x38] sm:$0xff] }
  0xca   : > { %v1044_v28 = vpack.c.bf16 %v1040_v27, %v1040_v27  ;;  %v1004_v29 = vpop.f32.mrf.mxu0  ;;  %1669 = vmatpush.bf16.msrb.mxu1 %v6312_v12 }
  0xcb   : > { %v1005_v30 = vadd.f32 %v6874_v50, %v1004_v29  ;;  %v6585_v31 = vld [vmem:[#allocation2 + $0x8] sm:$0xff]   ;;  %v1023_v33 = vpop.f32.mrf.mxu1 }
  0xcc   : > { %1049 = vst.msk [vmem:[#allocation2 + $0x10] sm:$0xf] %vm1046_vm14, %v1044_v28  ;;  %v1206_v34 = vshrl.u32 %v6585_v31, 16  ;;  %v6571_v36 = vunpack.c.l.b16 %v6585_v31  ;;  %v1209_v39 = vshll.u32 %v6585_v31, 16  ;;  %vm1052_vm14 = vmand %vm1050_vm6, %vm1051_vm7  ;;  %v1070_v48 = vunpack.c.l.b16 %v1044_v28 }
  0xcd   : > { %v1024_v35 = vadd.f32 %v1023_v33, %v1005_v30  ;;  %v6572_v49 = vunpack.c.h.b16 %v6585_v31  ;;  %vm8987_vm6 = vcmask 785408  }
  0xce   : > { %v6915_v38 = vrot.slane %v1206_v34, 7  ;;  %v6917_v41 = vpack.c.b16 %v6571_v36, %v1129_v32  ;;  %v1159_v10 = vpack.c.b16 %v6571_v36, %v1157_v56  ;;  %v1173_v22 = vpack.c.b16 %v6571_v36, %v1171_v5 }
  0xcf   : > { %v1029_v40 = vmax.f32 %v1024_v35, 0.0  ;;  %v1263_v15 = vpack.c.b16 %v6572_v49, %v1261_v6 }
  0xd0   : > { %v1211_v42 = vor.u32 %v1209_v39, %v6915_v38  ;;  %v1139_v46 = vshll.u32 %v6917_v41, 16  ;;  %v1137_v3 = vshrl.u32 %v6917_v41, 16  ;;  %v1162_v21 = vrot.slane %v1159_v10, 1 }
  0xd1   : > { %v1041_v43 = vsel %vm6911_vm5, %v1029_v40, 0.0  ;;  %v1266_v30 = vrot.slane %v1263_v15, 2  ;;  %v1177_v40 = vshrl.u32 %v1173_v22, 16  ;;  %v6293_v15 = vld [vmem:[%s9024_s9 + $0x30] sm:$0xff] }
  0xd2   : > { %v1045_v45 = vpack.c.bf16 %v1041_v43, %v1041_v43  ;;  %1220 = vrot.lane.b32.xlu0 %v1211_v42, %s8979_s29  ;;  %v1141_v60 = vrot.slane %v1139_v46, 1  ;;  %v1228_v42 = vpack.c.b16 %v6572_v49, %v1226_v25  ;;  %v1180_v46 = vshll.u32 %v1173_v22, 16  ;;  %v6301_v22 = vld [vmem:[%s9024_s9 + $0x70] sm:$0xff]  ;;  %v6290_v25 = vld [vmem:[%s9024_s9 + $0x18] sm:$0xff] }
  0xd3   : > { %v1117_v50 = vld [vmem:[#allocation2 + $0x10] sm:$0x7] }
  0xd4   : > { %v1115_v51 = vld [vmem:[#allocation2 + $0x10] sm:$0x3]  ;;  %v1054_v52 = vsel %vm1052_vm14, %v1045_v45, %v1053_v44  ;;  %v1071_v53 = vunpack.c.l.b16 %v1045_v45  ;;  %v1158_v54 = vunpack.c.l.b16 %v1117_v50  ;;  %v1142_v7 = vor.u32 %v1141_v60, %v1137_v3 }
  0xd5   : > { %v1132_v55 = vunpack.c.l.b16 %v1115_v51  ;;  %1055 = vst [vmem:[#allocation2 + $0x14] sm:$0x1] %v1054_v52  ;;  %v1242_v56 = vshll.u32 %v1228_v42, 16  ;;  %vm8988_vm14 = vcmask 388096  }
  0xd6   : > { %v1073_v57 = vpack.c.b16 %v1071_v53, %v1070_v48  ;;  %v1160_v58 = vpack.c.b16 %v1158_v54, %v6572_v49 }
  0xd7   : > { %v6925_v59 = vpack.c.b16 %v1132_v55, %v6572_v49  ;;  %v1244_v3 = vrot.slane %v1242_v56, 2 }
  0xd8   : > { %5106 = vmatmul.msk.bf16.gmra.mxu2 %vm9004_vm9, %v1073_v57  ;;  %v1199_v1 = vrot.slane %v1073_v57, 7  ;;  %v1163_v2 = vrot.slane %v1160_v58, 1  ;;  %v1179_v57 = vrot.slane %v1177_v40, 2  ;;  %v1182_v58 = vrot.slane %v1180_v46, 3  ;;  %v6650_v46 = vld [vmem:[%s9030_s26] ss:$0 sm:$0xff] }
  0xd9   : > { %v1144_v4 = vshll.u32 %v6925_v59, 16  ;;  %v1148_v29 = vshrl.u32 %v6925_v59, 16  ;;  %s8989_s26 = smov 112  }
  0xda   : > { %1167 = vrot.lane.b32.xlu1 %v1163_v2, %s8983_s6  ;;  %v6935_v11 = vsel %vm1197_vm8, %v1198_v0, %v1199_v1  ;;  %v1164_v28 = vsel %vm1161_vm12, %v1162_v21, %v1163_v2  ;;  %v6308_v21 = vld [vmem:[%s9029_s8 + $0x18] sm:$0xff] }
  0xdb   : > { %v1146_v8 = vrot.slane %v1144_v4, 1  ;;  %v1183_v4 = vor.u32 %v1182_v58, %v1179_v57 }
  0xdc   : > { %v1119_v14 = vld [vmem:[#allocation2 + $0x10] sm:$0xff]  }
  0xdd   : > { %v1147_v13 = vsel %vm1135_vm10, %v1142_v7, %v1146_v8  ;;  %v1120_v16 = vld [vmem:[#allocation2 + $0x14] sm:$0x1]  ;;  %v1172_v18 = vunpack.c.l.b16 %v1119_v14  ;;  %v1267_v34 = vrot.slane %v1119_v14, 2  ;;  %v1150_v39 = vor.u32 %v1148_v29, %v1146_v8  ;;  %v6306_v29 = vld [vmem:[%s9029_s8 + $0x8] sm:$0xff] }
  0xde   : > { %v1122_v17 = vld [vmem:[#allocation2 + $0x14] sm:$0x7]  ;;  %1151 = vrot.lane.b32.xlu0 %v1147_v13, %s8979_s29  ;;  %v1202_v19 = vunpack.c.l.b16 %v1120_v16  ;;  %v1230_v8 = vrot.slane %v1228_v42, 1  ;;  %v6294_v13 = vld [vmem:[%s9024_s9 + $0x38] sm:$0xff]  ;;  %v6310_v16 = vld [vmem:[%s9029_s8 + $0x28] sm:$0xff] }
  0xdf   : > { %v1227_v20 = vunpack.c.l.b16 %v1122_v17  ;;  %v1174_v26 = vpack.c.b16 %v1172_v18, %v6572_v49  ;;  %v1268_v44 = vsel %vm1265_vm15, %v1266_v30, %v1267_v34  ;;  %v1348_v45 = vrot.slane %v1267_v34, 1  ;;  %v6311_v14 = vld [vmem:[%s9029_s8 + $0x30] sm:$0xff]  ;;  %1468 = vmatpush.bf16.msra.mxu3 %v6294_v13  ;;  %v6292_v17 = vld [vmem:[%s9024_s9 + $0x28] sm:$0xff]  ;;  %v6299_v30 = vld [vmem:[%s9024_s9 + $0x60] sm:$0xff] }
  0xe0   : > { %v1204_v27 = vpack.c.b16 %v1202_v19, %v1172_v18  ;;  %v1347_v47 = vrot.slane %v1268_v44, 1  ;;  %v1239_v49 = vshrl.u32 %v1228_v42, 16  ;;  %1670 = vmatpush.bf16.msrb.mxu1 %v6311_v14  ;;  %v6302_v19 = vld [vmem:[%s9024_s9 + $0x78] sm:$0xff]  ;;  %v6287_v34 = vld [vmem:[%s9024_s9] sm:$0xff] }
  0xe1   : > { %v1229_v31 = vpack.c.b16 %v1227_v20, %v1172_v18  ;;  %v1185_v32 = vshrl.u32 %v1174_v26, 16  ;;  %v1188_v33 = vshll.u32 %v1174_v26, 16  ;;  %v6309_v18 = vld [vmem:[%s9029_s8 + $0x20] sm:$0xff]  ;;  %1487 = vmatpush.bf16.msrb.mxu2 %v6302_v19  ;;  %v6307_v26 = vld [vmem:[%s9029_s8 + $0x10] sm:$0xff] }
  0xe2   : > { %v1213_v35 = vshrl.u32 %v1204_v27, 16  ;;  %1165 = vrot.lane.b32.xlu1 %v1164_v28, %s8983_s6  ;;  %v1216_v50 = vshll.u32 %v1204_v27, 16  ;;  %v1349_v54 = vsel %vm1161_vm12, %v1347_v47, %v1348_v45  ;;  %v1241_v2 = vrot.slane %v1239_v49, 1  ;;  %v6291_v20 = vld [vmem:[%s9024_s9 + $0x20] sm:$0xff]  ;;  %v6300_v27 = vld [vmem:[%s9024_s9 + $0x68] sm:$0xff]  ;;  %v6289_v28 = vld [vmem:[%s9024_s9 + $0x10] sm:$0xff] }
  0xe3   : > { %v1187_v36 = vrot.slane %v1185_v32, 2  ;;  %v1190_v43 = vrot.slane %v1188_v33, 3  ;;  %v1247_v52 = vshrl.u32 %v1229_v31, 16  ;;  %v1250_v53 = vshll.u32 %v1229_v31, 16  ;;  %5179 = vmatmul.msk.bf16.vlgmr.msrb.gmra.mxu0 %vm9004_vm9, %v1349_v54  ;;  %1469 = vmatpush.bf16.msra.mxu3 %v6293_v15  ;;  %v6305_v32 = vld [vmem:[%s9029_s8] sm:$0xff]  ;;  %v6298_v33 = vld [vmem:[%s9024_s9 + $0x58] sm:$0xff] }
  0xe4   : > { %v1215_v48 = vrot.slane %v1213_v35, 7  ;;  %v1231_v1 = vrot.slane %v1229_v31, 1  ;;  %v1245_v7 = vor.u32 %v1244_v3, %v1241_v2  ;;  %1671 = vmatpush.bf16.msrb.mxu1 %v6310_v16  ;;  %v6288_v31 = vld [vmem:[%s9024_s9 + $0x8] sm:$0xff]  ;;  %v6297_v35 = vld [vmem:[%s9024_s9 + $0x50] sm:$0xff]  ;;  %v6295_v42 = vld [vmem:[%s9024_s9 + $0x40] sm:$0xff] }
  0xe5   : > { %v1191_v51 = vor.u32 %v1190_v43, %v1187_v36  ;;  %v1249_v62 = vrot.slane %v1247_v52, 1  ;;  %v1252_v63 = vrot.slane %v1250_v53, 2  ;;  %1488 = vmatpush.bf16.msrb.mxu2 %v6301_v22 }
  0xe6   : > { %1153 = vrot.lane.b32.xlu0 %v1150_v39, %s8979_s29  ;;  %v1218_v55 = vor.u32 %v1216_v50, %v1215_v48  ;;  %v1232_v10 = vsel %vm1161_vm12, %v1230_v8, %v1231_v1  ;;  %v6296_v39 = vld [vmem:[%s9024_s9 + $0x48] sm:$0xff]  ;;  %s9046_s9 = smov 16  }
  0xe7   : > { %1195 = vrot.lane.b32.xlu2 %v1191_v51, %s8981_s3  ;;  %v1253_v5 = vor.u32 %v1252_v63, %v1249_v62  ;;  %v1192_v6 = vsel %vm1175_vm1, %v1183_v4, %v1191_v51  ;;  %1470 = vmatpush.bf16.msra.mxu3 %v6292_v17 }
  0xe8   : > { %v1219_v60 = vsel %vm1051_vm7, %v6915_v38, %v1218_v55  ;;  %1672 = vmatpush.bf16.msrb.mxu1 %v6309_v18 }
  0xe9   : > { %v1254_v38 = vsel %vm9001_vm2, %v1245_v7, %v1253_v5  ;;  %1489 = vmatpush.bf16.msrb.mxu2 %v6300_v27  ;;  %v6316_v27 = vld [vmem:[%s9029_s8 + $0x58] sm:$0xff] }
  0xea   : > { %1222 = vrot.lane.b32.xlu1 %v1219_v60, %s8979_s29  ;;  %s9037_s29 = smov 96  }
  0xeb   : > { %1471 = vmatpush.bf16.msra.mxu3 %v6291_v20 }
  0xec   : > { %1673 = vmatpush.bf16.msrb.mxu1 %v6308_v21 }
  0xed   : > { %1490 = vmatpush.bf16.msrb.mxu2 %v6299_v30  ;;  %v6313_v30 = vld [vmem:[%s9029_s8 + $0x40] sm:$0xff] }
  0xee   : > { %1235 = vrot.lane.b32.xlu0 %v1231_v1, %s8983_s6 }
  0xef   : > { %1193 = vrot.lane.b32.xlu2 %v1192_v6, %s8981_s3  ;;  %1472 = vmatpush.bf16.msra.mxu3 %v6290_v25  ;;  %v6318_v25 = vld [vmem:[%s9029_s8 + $0x68] sm:$0xff] }
  0xf0   : > { %1674 = vmatpush.bf16.msrb.mxu1 %v6307_v26  ;;  %v6317_v26 = vld [vmem:[%s9029_s8 + $0x60] sm:$0xff] }
  0xf1   : > { %1491 = vmatpush.bf16.msrb.mxu2 %v6298_v33 }
  0xf2   : > { %1255 = vrot.lane.b32.xlu1 %v1254_v38, %s8981_s3 }
  0xf3   : > { %5180 = vmatmul.msk.bf16.gmra.mxu0 %vm9004_vm9, %v1348_v45  ;;  %1473 = vmatpush.bf16.msra.mxu3 %v6289_v28  ;;  %v6315_v28 = vld [vmem:[%s9029_s8 + $0x50] sm:$0xff] }
  0xf4   : > { %1675 = vmatpush.bf16.msrb.mxu1 %v6306_v29  ;;  %v6314_v29 = vld [vmem:[%s9029_s8 + $0x48] sm:$0xff] }
  0xf5   : > { %1492 = vmatpush.bf16.msrb.mxu2 %v6297_v35 }
  0xf7   : > { %1233 = vrot.lane.b32.xlu2 %v1232_v10, %s8983_s6  ;;  %1474 = vmatpush.bf16.msra.mxu3 %v6288_v31  ;;  %s9039_s6 = smov 32  }
  0xf8   : > { %1676 = vmatpush.bf16.msrb.mxu1 %v6305_v32 }
  0xf9   : > { %1493 = vmatpush.bf16.msrb.mxu2 %v6296_v39 }
  0xfb   : > { %1475 = vmatpush.bf16.msra.mxu3 %v6287_v34 }
  0xfd   : > { %1494 = vmatpush.bf16.msrb.mxu2 %v6295_v42 }
  0xff   : > { %1257 = vrot.lane.b32.xlu2 %v1253_v5, %s8981_s3  ;;  %1688 = vmatpush.bf16.msrb.mxu3 %v6320_v24  ;;  %s9031_s3 = sld [smem:[#allocation10_spill]] }
 0x105   : > { %v6652_v33 = vld [vmem:[%s9031_s3] ss:$0 sm:$0xff]  ;;  %s9034_s3 = smov 64  }
 0x141   : > { %v1196_v40 = vpop.permute.xlu2 %1195 }
 0x144   : > { %v1221_v36 = vpop.permute.xlu0 %1220 }
 0x145   : > { %v1285_v10 = vsel %vm9004_vm9, %v1198_v0, %v1221_v36  ;;  %v6319_v0 = vld [vmem:[%s9029_s8 + $0x70] sm:$0xff]  ;;  %s9048_s8 = smov 80  }
 0x146   : > { %1689 = vmatpush.bf16.msrb.mxu3 %v6319_v0 }
 0x149   : > { %v1194_v45 = vpop.permute.xlu2 %1193 }
 0x14a   : > { %1690 = vmatpush.bf16.msrb.mxu3 %v6318_v25 }
 0x14b   : > { %v1102_v43 = vpop.f32.mrf.mxu2 }
 0x14c   : > { %v1168_v44 = vpop.permute.xlu1 %1167  ;;  %v1103_v48 = vadd.f32 %v6650_v46, %v1102_v43 }
 0x14e   : > { %v1525_v55 = vmax.f32 %v1103_v48, 0.0  ;;  %1691 = vmatpush.bf16.msrb.mxu3 %v6317_v26 }
 0x150   : > { %v1152_v47 = vpop.permute.xlu0 %1151 }
 0x151   : > { %v1270_v51 = vsel %vm9004_vm9, %v6917_v41, %v1152_v47  ;;  %v1234_v57 = vpop.permute.xlu2 %1233 }
 0x152   : > { %v1290_v14 = vsel %vm1273_vm3, %v1285_v10, %v1234_v57  ;;  %1692 = vmatpush.bf16.msrb.mxu3 %v6316_v27  ;;  %v6323_v10 = vld [vmem:[%s9032_s27 + $0x14] sm:$0xf] }
 0x153   : > { %v1104_v50 = vpop.f32.mrf.mxu2 }
 0x154   : > { %v1105_v52 = vadd.f32 %v6650_v46, %v1104_v50  ;;  %v1166_v53 = vpop.permute.xlu1 %1165 }
 0x155   : > { %v1275_v54 = vsel %vm1273_vm3, %v1270_v51, %v1166_v53 }
 0x156   : > { %v1527_v49 = vmax.f32 %v1105_v52, 0.0  ;;  %v1280_v58 = vsel %vm8987_vm6, %v1275_v54, %v1194_v45  ;;  %1693 = vmatpush.bf16.msrb.mxu3 %v6315_v28 }
 0x157   : > { %v1341_v1 = vrot.slane %v1280_v58, 1 }
 0x158   : > { %v1154_v56 = vpop.permute.xlu0 %1153  ;;  %v1533_v62 = vpack.c.bf16 %v1527_v49, %v1525_v55 }
 0x159   : > { %v1272_v60 = vsel %vm9004_vm9, %v6925_v59, %v1154_v56  ;;  %v1258_v59 = vpop.permute.xlu2 %1257 }
 0x15a   : > { %v1277_v63 = vsel %vm1273_vm3, %v1272_v60, %v1168_v44  ;;  %1677 = vmatmul.bf16.vlgmr.msrb.gmra.mxu1 %v1533_v62  ;;  %1694 = vmatpush.bf16.msrb.mxu3 %v6314_v29 }
 0x15b   : > { %v1282_v41 = vsel %vm8987_vm6, %v1277_v63, %v1196_v40  ;;  %v1107_v2 = vpop.f32.mrf.mxu2 }
 0x15c   : > { %v1342_v3 = vrot.slane %v1282_v41, 1  ;;  %v1223_v4 = vpop.permute.xlu1 %1222  ;;  %v1108_v8 = vadd.f32 %v6650_v46, %v1107_v2 }
 0x15d   : > { %v1288_v6 = vsel %vm9004_vm9, %v6935_v11, %v1223_v4  ;;  %v6326_v4 = vld [vmem:[%s9032_s27 + $0x24] sm:$0xf0] }
 0x15e   : > { %v1343_v5 = vsel %vm1161_vm12, %v1341_v1, %v1342_v3  ;;  %v1529_v18 = vmax.f32 %v1108_v8, 0.0  ;;  %1695 = vmatpush.bf16.msrb.mxu3 %v6313_v30  ;;  %v6324_v8 = vld [vmem:[%s9032_s27 + $0x14] sm:$0xf0]  ;;  %v5483_v30 = vld [vmem:[%s8958_s11 + $0x1a0] sm:$0xf] }
 0x15f   : > { %1476 = vmatmul.bf16.vlgmr.msra.gmra.mxu3 %v1343_v5  ;;  %v6325_v5 = vld [vmem:[%s9032_s27 + $0x24] sm:$0xf] }
 0x160   : > { %v1236_v7 = vpop.permute.xlu0 %1235  ;;  %v1515_v32 = vpop.f32.mrf.mxu0 }
 0x161   : > { %v1292_v38 = vsel %vm1273_vm3, %v1288_v6, %v1236_v7  ;;  %v5265_v7 = vld [vmem:[%s9032_s27 + $0x28] sm:$0xf0] }
 0x162   : > { %v1296_v12 = vsel %vm8987_vm6, %v1292_v38, %v1258_v59  ;;  %v5268_v38 = vor.u32 %v6325_v5, %v5265_v7  ;;  %v5255_v59 = vld [vmem:[%s9032_s27 + $0x10] sm:$0xf] }
 0x163   : > { %v1109_v13 = vpop.f32.mrf.mxu2  ;;  %v1345_v11 = vrot.slane %v1296_v12, 1  ;;  %v5256_v12 = vor.u32 %v6324_v8, %v5255_v59  ;;  %v1831_v59 = vld [vmem:[#allocation2 + $0x4] sm:$0x8] }
 0x164   : > { %v1110_v15 = vadd.f32 %v6650_v46, %v1109_v13  ;;  %v1256_v16 = vpop.permute.xlu1 %1255  ;;  %1811 = vmatpush.bf16.msra.mxu0 %v5268_v38  ;;  %v5257_v13 = vld [vmem:[%s9032_s27 + $0x18] sm:$0xf0] }
 0x165   : > { %v1294_v17 = vsel %vm8987_vm6, %v1290_v14, %v1256_v16  ;;  %v5260_v14 = vor.u32 %v6323_v10, %v5257_v13  ;;  %v6322_v16 = vld [vmem:[%s9032_s27 + $0x4] sm:$0xf0]  ;;  %vm1723_vm6 = vcmask 385024  }
 0x166   : > { %v1531_v19 = vmax.f32 %v1110_v15, 0.0  ;;  %v1344_v20 = vrot.slane %v1294_v17, 1  ;;  %v5247_v15 = vld [vmem:[%s9032_s27] sm:$0xf]  ;;  %v6321_v17 = vld [vmem:[%s9032_s27 + $0x4] sm:$0xf] }
 0x168   : > { %v1346_v21 = vsel %vm1161_vm12, %v1344_v20, %v1345_v11  ;;  %v1535_v22 = vpack.c.bf16 %v1531_v19, %v1529_v18  ;;  %v1517_v42 = vpop.f32.mrf.mxu0  ;;  %1812 = vmatpush.bf16.msra.mxu0 %v5260_v14  ;;  %v5248_v18 = vor.u32 %v6322_v16, %v5247_v15  ;;  %v1725_v14 = vld [vmem:[#allocation2 + $0x14] sm:$0x1] }
 0x169   : > { %1495 = vmatmul.bf16.vlgmr.msrb.gmra.mxu2 %v1346_v21  ;;  %v6651_v21 = vld [vmem:[%s9033_s0] ss:$0 sm:$0xff]  ;;  %s9038_s0 = smov 112  }
 0x16a   : > { %1682 = vmatmul.bf16.gmra.mxu1 %v1535_v22 }
 0x16f   : > { %1481 = vmatmul.bf16.gmra.mxu3 %v1342_v3  ;;  %v5263_v3 = vld [vmem:[%s9032_s27 + $0x20] sm:$0xf] }
 0x170   : > { %v1520_v52 = vpop.f32.mrf.mxu0  ;;  %v5264_v6 = vor.u32 %v6326_v4, %v5263_v3 }
 0x172   : > { %1792 = vmatpush.bf16.msra.mxu2 %v5264_v6 }
 0x176   : > { %1793 = vmatpush.bf16.msra.mxu2 %v5256_v12 }
 0x178   : > { %v1522_v62 = vpop.f32.mrf.mxu0 }
 0x179   : > { %1500 = vmatmul.bf16.gmra.mxu2 %v1345_v11  ;;  %v5249_v11 = vld [vmem:[%s9032_s27 + $0x8] sm:$0xf0] }
 0x17a   : > { %v5252_v19 = vor.u32 %v6321_v17, %v5249_v11  ;;  %1794 = vmatpush.bf16.msra.mxu2 %v5248_v18  ;;  %v1882_v17 = vunpack.c.l.b16 %v1831_v59 }
 0x17c   : > { %1813 = vmatpush.bf16.msra.mxu0 %v5252_v19 }
 0x1d7   : > { %v1678_v20 = vpop.f32.mrf.mxu1 }
 0x1d8   : > { %v1679_v22 = vadd.f32 %v6651_v21, %v1678_v20 }
 0x1df   : > { %v1680_v24 = vpop.f32.mrf.mxu1 }
 0x1e0   : > { %v1681_v29 = vadd.f32 %v6651_v21, %v1680_v24 }
 0x1e2   : > { %v1477_v31 = vpop.f32.mrf.mxu3 }
 0x1e3   : > { %v1478_v39 = vadd.f32 %v6652_v33, %v1477_v31  ;;  %v6380_v31 = vld [vmem:[%s8958_s11 + $0x1a4] sm:$0xf0] }
 0x1ea   : > { %v1479_v34 = vpop.f32.mrf.mxu3 }
 0x1eb   : > { %v1480_v36 = vadd.f32 %v6652_v33, %v1479_v34  ;;  %v5484_v34 = vor.u32 %v6380_v31, %v5483_v30  ;;  %v6379_v30 = vld [vmem:[%s8958_s11 + $0x1a4] sm:$0xf]  ;;  %v5485_v31 = vld [vmem:[%s8958_s11 + $0x1a8] sm:$0xf0] }
 0x1ec   : > { %v1496_v35 = vpop.f32.mrf.mxu2 }
 0x1ed   : > { %v1497_v40 = vadd.f32 %v1496_v35, %v1478_v39  ;;  %v6378_v35 = vld [vmem:[%s8958_s11 + $0x194] sm:$0xf0]  ;;  %2433 = vmatpush.bf16.msrb.mxu0 %v5484_v34  ;;  %v5488_v34 = vor.u32 %v6379_v30, %v5485_v31 }
 0x1ef   : > { %v1516_v44 = vadd.f32 %v1515_v32, %v1497_v40  ;;  %v5475_v32 = vld [vmem:[%s8958_s11 + $0x190] sm:$0xf]  ;;  %v1683_v40 = vpop.f32.mrf.mxu1 }
 0x1f1   : > { %v1526_v48 = vmax.f32 %v1516_v44, 0.0 }
 0x1f2   : > { %v1482_v46 = vpop.f32.mrf.mxu3 }
 0x1f3   : > { %v1483_v54 = vadd.f32 %v6652_v33, %v1482_v46 }
 0x1f4   : > { %v1498_v43 = vpop.f32.mrf.mxu2 }
 0x1f5   : > { %v1499_v45 = vadd.f32 %v1498_v43, %v1480_v36 }
 0x1f7   : > { %v1518_v47 = vadd.f32 %v1517_v42, %v1499_v45  ;;  %v5476_v42 = vor.u32 %v6378_v35, %v5475_v32  ;;  %v1684_v45 = vadd.f32 %v6651_v21, %v1683_v40  ;;  %v6377_v35 = vld [vmem:[%s8958_s11 + $0x194] sm:$0xf] }
 0x1f9   : > { %v1528_v50 = vmax.f32 %v1518_v47, 0.0  ;;  %2434 = vmatpush.bf16.msrb.mxu0 %v5476_v42 }
 0x1fa   : > { %v1484_v55 = vpop.f32.mrf.mxu3 }
 0x1fb   : > { %v1534_v51 = vpack.c.bf16 %v1528_v50, %v1526_v48  ;;  %v1485_v56 = vadd.f32 %v6652_v33, %v1484_v55 }
 0x1fc   : > { %v1501_v53 = vpop.f32.mrf.mxu2 }
 0x1fd   : > { %1696 = vmatmul.bf16.vlgmr.msrb.gmra.mxu3 %v1534_v51  ;;  %v1502_v49 = vadd.f32 %v1501_v53, %v1483_v54  ;;  %v5467_v51 = vld [vmem:[%s8958_s11 + $0x180] sm:$0xf] }
 0x1ff   : > { %v1521_v58 = vadd.f32 %v1520_v52, %v1502_v49  ;;  %v6376_v52 = vld [vmem:[%s8958_s11 + $0x184] sm:$0xf0]  ;;  %v1685_v49 = vpop.f32.mrf.mxu1 }
 0x200   : > { %v5468_v54 = vor.u32 %v6376_v52, %v5467_v51  ;;  %v6375_v52 = vld [vmem:[%s8958_s11 + $0x184] sm:$0xf] }
 0x201   : > { %v1530_v41 = vmax.f32 %v1521_v58, 0.0 }
 0x202   : > { %2435 = vmatpush.bf16.msrb.mxu0 %v5468_v54 }
 0x204   : > { %v1503_v57 = vpop.f32.mrf.mxu2 }
 0x205   : > { %v1504_v60 = vadd.f32 %v1503_v57, %v1485_v56 }
 0x207   : > { %v1523_v63 = vadd.f32 %v1522_v62, %v1504_v60  ;;  %v1686_v60 = vadd.f32 %v6651_v21, %v1685_v49 }
 0x209   : > { %v1532_v1 = vmax.f32 %v1523_v63, 0.0 }
 0x20b   : > { %v1536_v2 = vpack.c.bf16 %v1532_v1, %v1530_v41 }
 0x20d   : > { %1701 = vmatmul.bf16.gmra.mxu3 %v1536_v2  ;;  %v1829_v2 = vld [vmem:[#allocation2 + $0x4] sm:$0xc] }
 0x20e   : > { %v1869_v38 = vunpack.c.l.b16 %v1829_v2 }
 0x280   : > { %v1697_v0 = vpop.f32.mrf.mxu3 }
 0x281   : > { %v1698_v25 = vadd.f32 %v1697_v0, %v1679_v22 }
 0x283   : > { %v1707_v26 = vmax.f32 %v1698_v25, 0.0 }
 0x285   : > { %v1711_v27 = vsel %vm6877_vm11, %v1707_v26, 0.0 }
 0x286   : > { %v1715_v28 = vpack.c.bf16 %v1711_v27, %v1711_v27 }
 0x288   : > { %1720 = vst.msk [vmem:[#allocation2 + $0x8] sm:$0xf] %vm8988_vm14, %v1715_v28  ;;  %v1699_v33 = vpop.f32.mrf.mxu3  ;;  %v1744_v46 = vunpack.c.l.b16 %v1715_v28 }
 0x289   : > { %v1700_v39 = vadd.f32 %v1699_v33, %v1681_v29 }
 0x28b   : > { %v1708_v36 = vmax.f32 %v1700_v39, 0.0  ;;  %v5477_v39 = vld [vmem:[%s8958_s11 + $0x198] sm:$0xf0] }
 0x28d   : > { %v1712_v43 = vsel %vm6885_vm4, %v1708_v36, 0.0 }
 0x28e   : > { %v1716_v44 = vpack.c.bf16 %v1712_v43, %v1712_v43 }
 0x28f   : > { %v1836_v24 = vld [vmem:[#allocation2 + $0x8] sm:$0x8] }
 0x290   : > { %1721 = vst.msk [vmem:[#allocation2 + $0xc] sm:$0xf] %vm8988_vm14, %v1716_v44  ;;  %v1745_v47 = vunpack.c.l.b16 %v1716_v44  ;;  %v1702_v48 = vpop.f32.mrf.mxu3  ;;  %v1973_v28 = vunpack.c.l.b16 %v1836_v24  ;;  %v1834_v29 = vld [vmem:[#allocation2 + $0x8] sm:$0xc] }
 0x291   : > { %v1703_v50 = vadd.f32 %v1702_v48, %v1684_v45 }
 0x292   : > { %v1748_v53 = vpack.c.b16 %v1745_v47, %v1744_v46  ;;  %v1939_v46 = vunpack.c.l.b16 %v1834_v29  ;;  %v5480_v47 = vor.u32 %v6377_v35, %v5477_v39 }
 0x293   : > { %v1709_v55 = vmax.f32 %v1703_v50, 0.0 }
 0x294   : > { %5269 = vmatmul.msk.bf16.vlgmr.msra.gmra.mxu2 %vm1780_vm0, %v1748_v53  ;;  %5271 = vmatmul.msk.bf16.vlgmr.msra.gmra.mxu0 %vm1780_vm0, %v1748_v53  ;;  %v1907_v56 = vrot.slane %v1748_v53, 7  ;;  %v5469_v53 = vld [vmem:[%s8958_s11 + $0x188] sm:$0xf0] }
 0x295   : > { %v1713_v57 = vsel %vm6899_vm13, %v1709_v55, 0.0  ;;  %2509 = vmatpush.bf16.msra.mxu0 %v5488_v34 }
 0x296   : > { %v1717_v58 = vpack.c.bf16 %v1713_v57, %v1713_v57  ;;  %1910 = vrot.lane.b32.xlu1 %v1907_v56, %s9034_s3  ;;  %v1825_v57 = vld [vmem:[#allocation2 + $0x4] sm:$0xe] }
 0x297   : > { %v6586_v62 = vld [vmem:[#allocation2 + $0x8] sm:$0xff]  }
 0x298   : > { %1722 = vst.msk [vmem:[#allocation2 + $0x10] sm:$0xf] %vm8988_vm14, %v1717_v58  ;;  %v1704_v63 = vpop.f32.mrf.mxu3  ;;  %v1919_v41 = vshrl.u32 %v6586_v62, 16  ;;  %v1922_v4 = vshll.u32 %v6586_v62, 16  ;;  %v7152_v7 = vunpack.c.l.b16 %v6586_v62  ;;  %vm7157_vm14 = vmand %vm1723_vm6, %vm1051_vm7  ;;  %v1746_v13 = vunpack.c.l.b16 %v1717_v58 }
 0x299   : > { %v1705_v1 = vadd.f32 %v1704_v63, %v1686_v60  ;;  %v7162_v15 = vunpack.c.h.b16 %v6586_v62  ;;  %2510 = vmatpush.bf16.msra.mxu0 %v5480_v47  ;;  %v5472_v63 = vor.u32 %v6375_v52, %v5469_v53  ;;  %v6356_v53 = vld [vmem:[%s8958_s11 + $0xe4] sm:$0xf0]  ;;  %vm1988_vm6 = vcmask 130048  }
 0x29a   : > { %v7149_v3 = vrot.slane %v1919_v41, 7  ;;  %v1871_v20 = vpack.c.b16 %v7152_v7, %v1869_v38  ;;  %v1884_v0 = vpack.c.b16 %v7152_v7, %v1882_v17 }
 0x29b   : > { %v1710_v5 = vmax.f32 %v1705_v1, 0.0  ;;  %v1975_v42 = vpack.c.b16 %v7162_v15, %v1973_v28  ;;  %v1941_v54 = vpack.c.b16 %v7162_v15, %v1939_v46 }
 0x29c   : > { %v1924_v6 = vor.u32 %v1922_v4, %v7149_v3  ;;  %v1873_v27 = vrot.slane %v1871_v20, 1  ;;  %v1887_v40 = vshrl.u32 %v1884_v0, 16  ;;  %v1890_v43 = vshll.u32 %v1884_v0, 16 }
 0x29d   : > { %v1714_v8 = vsel %vm6911_vm5, %v1710_v5, 0.0  ;;  %v1977_v49 = vrot.slane %v1975_v42, 2  ;;  %2511 = vmatpush.bf16.msra.mxu0 %v5472_v63  ;;  %v1951_v20 = vshrl.u32 %v1941_v54, 16  ;;  %v1954_v24 = vshll.u32 %v1941_v54, 16  ;;  %v6352_v63 = vld [vmem:[%s8958_s11 + $0xc4] sm:$0xf0] }
 0x29e   : > { %v1718_v12 = vpack.c.bf16 %v1714_v8, %v1714_v8  ;;  %1933 = vrot.lane.b32.xlu0 %v1924_v6, %s8989_s26  ;;  %v1889_v58 = vrot.slane %v1887_v40, 2  ;;  %v1892_v60 = vrot.slane %v1890_v43, 3  ;;  %v1842_v6 = vunpack.c.l.b16 %v1825_v57  ;;  %v6354_v57 = vld [vmem:[%s8958_s11 + $0xd4] sm:$0xf0]  ;;  %s6264_s26 = sshll.u32 %s9067_s2, 6 }
 0x29f   : > { %v1830_v16 = vld [vmem:[#allocation2 + $0x10] sm:$0x7]  ;;  %v1953_v30 = vrot.slane %v1951_v20, 1  ;;  %v1956_v31 = vrot.slane %v1954_v24, 2  ;;  %v1943_v39 = vrot.slane %v1941_v54, 1  ;;  %s8657_s4 = scalar_lea.vmem %s8972_s25, %s6264_s26 }
 0x2a0   : > { %v1726_v18 = vsel %vm7157_vm14, %v1718_v12, %v1725_v14  ;;  %v1747_v11 = vunpack.c.l.b16 %v1718_v12  ;;  %v1870_v19 = vunpack.c.l.b16 %v1830_v16  ;;  %v7206_v29 = vpack.c.b16 %v7152_v7, %v1842_v6  ;;  %v6342_v6 = vld [vmem:[%s8958_s11 + $0x74] sm:$0xf0]  ;;  %v5355_v20 = vld [vmem:[%s8958_s11 + $0xa0] sm:$0xf]  ;;  %v6348_v24 = vld [vmem:[%s8958_s11 + $0xa4] sm:$0xf0] }
 0x2a1   : > { %1727 = vst [vmem:[#allocation2 + $0x14] sm:$0x1] %v1726_v18  ;;  %v1957_v40 = vor.u32 %v1956_v31, %v1953_v30  ;;  %v6346_v30 = vld [vmem:[%s8958_s11 + $0x94] sm:$0xf0]  ;;  %v5427_v31 = vld [vmem:[%s8958_s11 + $0x130] sm:$0xf] }
 0x2a2   : > { %v1749_v21 = vpack.c.b16 %v1747_v11, %v1746_v13  ;;  %v1872_v22 = vpack.c.b16 %v1870_v19, %v7162_v15  ;;  %v1828_v13 = vld [vmem:[#allocation2 + $0x10] sm:$0x3]  ;;  %v1893_v11 = vor.u32 %v1892_v60, %v1889_v58  ;;  %v1851_v35 = vshll.u32 %v7206_v29, 16 }
 0x2a3   : > { %v1845_v0 = vunpack.c.l.b16 %v1828_v13 }
 0x2a4   : > { %5270 = vmatmul.msk.bf16.gmra.mxu2 %vm1780_vm0, %v1749_v21  ;;  %5272 = vmatmul.msk.bf16.gmra.mxu0 %vm1780_vm0, %v1749_v21  ;;  %v1874_v25 = vrot.slane %v1872_v22, 1  ;;  %v1908_v26 = vrot.slane %v1749_v21, 7 }
 0x2a6   : > { %1878 = vrot.lane.b32.xlu1 %v1874_v25, %s9037_s29  ;;  %v1909_v32 = vsel %vm1197_vm8, %v1907_v56, %v1908_v26  ;;  %v1875_v33 = vsel %vm1161_vm12, %v1873_v27, %v1874_v25 }
 0x2a7   : > { %1912 = vrot.lane.b32.xlu2 %v1909_v32, %s9034_s3  ;;  %1876 = vrot.lane.b32.xlu0 %v1875_v33, %s9037_s29  ;;  %v7210_v32 = vpack.c.b16 %v1845_v0, %v7162_v15  ;;  %v5356_v0 = vor.u32 %v6348_v24, %v5355_v20  ;;  %v6328_v24 = vld [vmem:[%s8958_s11 + $0x4] sm:$0xf0] }
 0x2a8   : > { %v1832_v36 = vld [vmem:[#allocation2 + $0x10] sm:$0xff]  }
 0x2a9   : > { %v1833_v44 = vld [vmem:[#allocation2 + $0x14] sm:$0x1]  ;;  %v1883_v48 = vunpack.c.l.b16 %v1832_v36  ;;  %v1978_v2 = vrot.slane %v1832_v36, 2  ;;  %v1853_v36 = vrot.slane %v1851_v35, 1 }
 0x2aa   : > { %v1835_v45 = vld [vmem:[#allocation2 + $0x14] sm:$0x7]  ;;  %v1915_v50 = vunpack.c.l.b16 %v1833_v44 }
 0x2ab   : > { %v1940_v51 = vunpack.c.l.b16 %v1835_v45  ;;  %v1885_v55 = vpack.c.b16 %v1883_v48, %v7162_v15  ;;  %v1979_v8 = vsel %vm1265_vm15, %v1977_v49, %v1978_v2  ;;  %v2087_v12 = vrot.slane %v1978_v2, 1  ;;  %v6374_v49 = vld [vmem:[%s8958_s11 + $0x174] sm:$0xf0]  ;;  %v6372_v2 = vld [vmem:[%s8958_s11 + $0x164] sm:$0xf0] }
 0x2ac   : > { %v1917_v56 = vpack.c.b16 %v1915_v50, %v1883_v48  ;;  %v2086_v14 = vrot.slane %v1979_v8, 1  ;;  %v1849_v15 = vshrl.u32 %v7206_v29, 16  ;;  %v1860_v45 = vshrl.u32 %v7210_v32, 16  ;;  %v6358_v50 = vld [vmem:[%s8958_s11 + $0xf4] sm:$0xf0] }
 0x2ad   : > { %v1942_v62 = vpack.c.b16 %v1940_v51, %v1883_v48  ;;  %v1895_v41 = vshrl.u32 %v1885_v55, 16  ;;  %v1898_v1 = vshll.u32 %v1885_v55, 16  ;;  %v5395_v48 = vld [vmem:[%s8958_s11 + $0xf0] sm:$0xf]  ;;  %v5387_v51 = vld [vmem:[%s8958_s11 + $0xe0] sm:$0xf] }
 0x2ae   : > { %v1926_v4 = vshrl.u32 %v1917_v56, 16  ;;  %v1929_v5 = vshll.u32 %v1917_v56, 16  ;;  %v2088_v21 = vsel %vm1161_vm12, %v2086_v14, %v2087_v12  ;;  %v1854_v44 = vor.u32 %v1853_v36, %v1849_v15  ;;  %v5459_v55 = vld [vmem:[%s8958_s11 + $0x170] sm:$0xf]  ;;  %v6350_v8 = vld [vmem:[%s8958_s11 + $0xb4] sm:$0xf0] }
 0x2af   : > { %v1897_v38 = vrot.slane %v1895_v41, 2  ;;  %v1900_v59 = vrot.slane %v1898_v1, 3  ;;  %v1959_v17 = vshrl.u32 %v1942_v62, 16  ;;  %v1962_v18 = vshll.u32 %v1942_v62, 16  ;;  %v5379_v56 = vld [vmem:[%s8958_s11 + $0xd0] sm:$0xf] }
 0x2b0   : > { %v1928_v16 = vrot.slane %v1926_v4, 7  ;;  %v1944_v33 = vrot.slane %v1942_v62, 1  ;;  %v5396_v52 = vor.u32 %v6358_v50, %v5395_v48  ;;  %v5388_v54 = vor.u32 %v6356_v53, %v5387_v51  ;;  %v5371_v62 = vld [vmem:[%s8958_s11 + $0xc0] sm:$0xf]  ;;  %v6370_v14 = vld [vmem:[%s8958_s11 + $0x154] sm:$0xf0] }
 0x2b1   : > { %v1901_v19 = vor.u32 %v1900_v59, %v1897_v38  ;;  %v1961_v27 = vrot.slane %v1959_v17, 1  ;;  %v1964_v28 = vrot.slane %v1962_v18, 2  ;;  %v5460_v58 = vor.u32 %v6374_v49, %v5459_v55  ;;  %v5451_v41 = vld [vmem:[%s8958_s11 + $0x160] sm:$0xf]  ;;  %v5363_v59 = vld [vmem:[%s8958_s11 + $0xb0] sm:$0xf] }
 0x2b2   : > { %v1931_v22 = vor.u32 %v1929_v5, %v1928_v16  ;;  %v1945_v42 = vsel %vm1161_vm12, %v1943_v39, %v1944_v33  ;;  %2390 = vmatpush.bf16.msra.mxu3 %v5396_v52  ;;  %v5380_v60 = vor.u32 %v6354_v57, %v5379_v56  ;;  %v5372_v1 = vor.u32 %v6352_v63, %v5371_v62  ;;  %v5331_v5 = vld [vmem:[%s8958_s11 + $0x70] sm:$0xf]  ;;  %v5435_v17 = vld [vmem:[%s8958_s11 + $0x140] sm:$0xf]  ;;  %v6368_v18 = vld [vmem:[%s8958_s11 + $0x144] sm:$0xf0] }
 0x2b3   : > { %v1902_v25 = vsel %vm1175_vm1, %v1893_v11, %v1901_v19  ;;  %1905 = vrot.lane.b32.xlu0 %v1901_v19, %s8991_s5  ;;  %v1965_v34 = vor.u32 %v1964_v28, %v1961_v27  ;;  %2409 = vmatpush.bf16.msrb.mxu2 %v5460_v58  ;;  %v5452_v4 = vor.u32 %v6372_v2, %v5451_v41  ;;  %v5323_v11 = vld [vmem:[%s8958_s11 + $0x60] sm:$0xf]  ;;  %v6340_v19 = vld [vmem:[%s8958_s11 + $0x64] sm:$0xf0]  ;;  %v5347_v27 = vld [vmem:[%s8958_s11 + $0x90] sm:$0xf] }
 0x2b4   : > { %1903 = vrot.lane.b32.xlu2 %v1902_v25, %s8991_s5  ;;  %5489 = vmatmul.msk.bf16.vlgmr.msrb.gmra.mxu0 %vm1780_vm0, %v2088_v21  ;;  %v1932_v26 = vsel %vm1051_vm7, %v7149_v3, %v1931_v22  ;;  %v1856_v3 = vshll.u32 %v7210_v32, 16  ;;  %v5332_v38 = vor.u32 %v6342_v6, %v5331_v5  ;;  %v5364_v13 = vor.u32 %v6350_v8, %v5363_v59  ;;  %v5315_v25 = vld [vmem:[%s8958_s11 + $0x50] sm:$0xf]  ;;  %v7321_v39 = vld [vmem:[%s8957_s10] sm:$0x3] }
 0x2b5   : > { %1935 = vrot.lane.b32.xlu1 %v1932_v26, %s9038_s0  ;;  %v1966_v7 = vsel %vm9001_vm2, %v1957_v40, %v1965_v34  ;;  %v5324_v22 = vor.u32 %v6340_v19, %v5323_v11  ;;  %v6338_v26 = vld [vmem:[%s8958_s11 + $0x54] sm:$0xf0]  ;;  %v5307_v40 = vld [vmem:[%s8958_s11 + $0x40] sm:$0xf]  ;;  %v6344_v36 = vld [vmem:[%s8958_s11 + $0x84] sm:$0xf0] }
 0x2b6   : > { %v1858_v43 = vrot.slane %v1856_v3, 1  ;;  %2391 = vmatpush.bf16.msra.mxu3 %v5388_v54  ;;  %2371 = vmatpush.bf16.msra.mxu1 %v5332_v38  ;;  %v5316_v28 = vor.u32 %v6338_v26, %v5315_v25  ;;  %v6336_v3 = vld [vmem:[%s8958_s11 + $0x44] sm:$0xf0]  ;;  %v5419_v15 = vld [vmem:[%s8958_s11 + $0x120] sm:$0xf]  ;;  %vm9002_vm2 = vcmask 916480  }
 0x2b7   : > { %2410 = vmatpush.bf16.msrb.mxu2 %v5452_v4  ;;  %v6362_v48 = vld [vmem:[%s8958_s11 + $0x114] sm:$0xf0]  ;;  %v5299_v50 = vld [vmem:[%s8958_s11 + $0x30] sm:$0xf]  ;;  %v6357_v53 = vld [vmem:[%s8958_s11 + $0xf4] sm:$0xf] }
 0x2b8   : > { %v1859_v46 = vsel %vm1135_vm10, %v1854_v44, %v1858_v43  ;;  %v1862_v47 = vor.u32 %v1860_v45, %v1858_v43  ;;  %v6364_v43 = vld [vmem:[%s8958_s11 + $0x124] sm:$0xf0]  ;;  %v6334_v51 = vld [vmem:[%s8958_s11 + $0x34] sm:$0xf0]  ;;  %v5397_v55 = vld [vmem:[%s8958_s11 + $0xf8] sm:$0xf0] }
 0x2b9   : > { %v5420_v45 = vor.u32 %v6364_v43, %v5419_v15  ;;  %v5300_v54 = vor.u32 %v6334_v51, %v5299_v50  ;;  %v5400_v56 = vor.u32 %v6357_v53, %v5397_v55  ;;  %v6332_v62 = vld [vmem:[%s8958_s11 + $0x24] sm:$0xf0]  ;;  %v5403_v63 = vld [vmem:[%s8958_s11 + $0x100] sm:$0xf]  ;;  %v6355_v4 = vld [vmem:[%s8958_s11 + $0xe4] sm:$0xf] }
 0x2ba   : > { %2392 = vmatpush.bf16.msra.mxu3 %v5380_v60  ;;  %2372 = vmatpush.bf16.msra.mxu1 %v5324_v22  ;;  %v5291_v60 = vld [vmem:[%s8958_s11 + $0x20] sm:$0xf]  ;;  %v6360_v2 = vld [vmem:[%s8958_s11 + $0x104] sm:$0xf0]  ;;  %v5389_v5 = vld [vmem:[%s8958_s11 + $0xe8] sm:$0xf0] }
 0x2bb   : > { %1948 = vrot.lane.b32.xlu0 %v1944_v33, %s9039_s6  ;;  %v6366_v33 = vld [vmem:[%s8958_s11 + $0x134] sm:$0xf0]  ;;  %v5404_v6 = vor.u32 %v6360_v2, %v5403_v63  ;;  %v5392_v38 = vor.u32 %v6355_v4, %v5389_v5  ;;  %v6373_v59 = vld [vmem:[%s8958_s11 + $0x174] sm:$0xf]  ;;  %v5461_v8 = vld [vmem:[%s8958_s11 + $0x178] sm:$0xf0] }
 0x2bc   : > { %1946 = vrot.lane.b32.xlu2 %v1945_v42, %s9039_s6  ;;  %v5428_v35 = vor.u32 %v6366_v33, %v5427_v31  ;;  %v5339_v42 = vld [vmem:[%s8958_s11 + $0x80] sm:$0xf]  ;;  %v5381_v11 = vld [vmem:[%s8958_s11 + $0xd8] sm:$0xf0]  ;;  %v6351_v25 = vld [vmem:[%s8958_s11 + $0xc4] sm:$0xf] }
 0x2bd   : > { %1967 = vrot.lane.b32.xlu1 %v1966_v7, %s8995_s7  ;;  %v5308_v7 = vor.u32 %v6336_v3, %v5307_v40  ;;  %v5340_v44 = vor.u32 %v6344_v36, %v5339_v42  ;;  %v5275_v22 = vld [vmem:[%s8958_s11] sm:$0xf]  ;;  %v5373_v26 = vld [vmem:[%s8958_s11 + $0xc8] sm:$0xf0]  ;;  %v6349_v3 = vld [vmem:[%s8958_s11 + $0xb4] sm:$0xf] }
 0x2be   : > { %2393 = vmatpush.bf16.msra.mxu3 %v5372_v1  ;;  %2373 = vmatpush.bf16.msra.mxu1 %v5316_v28  ;;  %v5292_v1 = vor.u32 %v6332_v62, %v5291_v60  ;;  %v5376_v28 = vor.u32 %v6351_v25, %v5373_v26  ;;  %v5365_v42 = vld [vmem:[%s8958_s11 + $0xb8] sm:$0xf0]  ;;  %v6347_v51 = vld [vmem:[%s8958_s11 + $0xa4] sm:$0xf]  ;;  %v5437_v55 = vld [vmem:[%s8958_s11 + $0x148] sm:$0xf0] }
 0x2bf   : > { %v5368_v15 = vor.u32 %v6349_v3, %v5365_v42  ;;  %v5445_v43 = vld [vmem:[%s8958_s11 + $0x158] sm:$0xf0]  ;;  %v6367_v53 = vld [vmem:[%s8958_s11 + $0x144] sm:$0xf]  ;;  %v6345_v4 = vld [vmem:[%s8958_s11 + $0x94] sm:$0xf] }
 0x2c0   : > { %v5440_v62 = vor.u32 %v6367_v53, %v5437_v55  ;;  %v5317_v2 = vld [vmem:[%s8958_s11 + $0x58] sm:$0xf0]  ;;  %v5421_v25 = vld [vmem:[%s8958_s11 + $0x128] sm:$0xf0]  ;;  %v6361_v3 = vld [vmem:[%s8958_s11 + $0x114] sm:$0xf] }
 0x2c1   : > { %v6359_v55 = vld [vmem:[%s8958_s11 + $0x104] sm:$0xf] }
 0x2c2   : > { %2394 = vmatpush.bf16.msra.mxu3 %v5364_v13  ;;  %2374 = vmatpush.bf16.msra.mxu1 %v5308_v7  ;;  %v5283_v13 = vld [vmem:[%s8958_s11 + $0x10] sm:$0xf]  ;;  %v6369_v7 = vld [vmem:[%s8958_s11 + $0x154] sm:$0xf] }
 0x2c3   : > { %1863 = vrot.lane.b32.xlu0 %v1859_v46, %s8998_s1  ;;  %v7342_v46 = vperm.slane %v7321_v39, 1 }
 0x2c4   : > { %1969 = vrot.lane.b32.xlu2 %v1965_v34, %s8995_s7  ;;  %5490 = vmatmul.msk.bf16.gmra.mxu0 %vm1780_vm0, %v2087_v12  ;;  %v5348_v34 = vor.u32 %v6346_v30, %v5347_v27  ;;  %v6371_v27 = vld [vmem:[%s8958_s11 + $0x164] sm:$0xf]  ;;  %v5453_v30 = vld [vmem:[%s8958_s11 + $0x168] sm:$0xf0] }
 0x2c5   : > { %1865 = vrot.lane.b32.xlu1 %v1862_v47, %s8998_s1  ;;  %v5411_v47 = vld [vmem:[%s8958_s11 + $0x110] sm:$0xf]  ;;  %v5456_v33 = vor.u32 %v6371_v27, %v5453_v30 }
 0x2c6   : > { %2395 = vmatpush.bf16.msra.mxu3 %v5356_v0  ;;  %v5412_v52 = vor.u32 %v6362_v48, %v5411_v47  ;;  %2375 = vmatpush.bf16.msra.mxu1 %v5300_v54  ;;  %v5276_v0 = vor.u32 %v6328_v24, %v5275_v22  ;;  %v5448_v48 = vor.u32 %v6369_v7, %v5445_v43  ;;  %v5413_v43 = vld [vmem:[%s8958_s11 + $0x118] sm:$0xf0] }
 0x2ca   : > { %2396 = vmatpush.bf16.msra.mxu3 %v5348_v34  ;;  %2376 = vmatpush.bf16.msra.mxu1 %v5292_v1  ;;  %v6341_v34 = vld [vmem:[%s8958_s11 + $0x74] sm:$0xf] }
 0x2cb   : > { %v6337_v1 = vld [vmem:[%s8958_s11 + $0x54] sm:$0xf] }
 0x2ce   : > { %2397 = vmatpush.bf16.msra.mxu3 %v5340_v44  ;;  %v6339_v44 = vld [vmem:[%s8958_s11 + $0x64] sm:$0xf] }
 0x2d2   : > { %2466 = vmatpush.bf16.msrb.mxu3 %v5400_v56 }
 0x2d4   : > { %5491 = vmatmul.msk.bf16.vlgmr.msra.gmra.mxu0 %vm1780_vm0, %v2088_v21  ;;  %v5436_v21 = vor.u32 %v6368_v18, %v5435_v17  ;;  %v5464_v17 = vor.u32 %v6373_v59, %v5461_v8  ;;  %v6365_v59 = vld [vmem:[%s8958_s11 + $0x134] sm:$0xf]  ;;  %v5429_v8 = vld [vmem:[%s8958_s11 + $0x138] sm:$0xf0] }
 0x2d6   : > { %2467 = vmatpush.bf16.msrb.mxu3 %v5392_v38  ;;  %v5349_v38 = vld [vmem:[%s8958_s11 + $0x98] sm:$0xf0] }
 0x2e4   : > { %5492 = vmatmul.msk.bf16.gmra.mxu0 %vm1780_vm0, %v2087_v12  ;;  %v5443_v12 = vld [vmem:[%s8958_s11 + $0x150] sm:$0xf] }
 0x2e5   : > { %v5444_v16 = vor.u32 %v6370_v14, %v5443_v12  ;;  %v6330_v14 = vld [vmem:[%s8958_s11 + $0x14] sm:$0xf0] }
 0x2e6   : > { %v5284_v18 = vor.u32 %v6330_v14, %v5283_v13  ;;  %v6335_v14 = vld [vmem:[%s8958_s11 + $0x44] sm:$0xf] }
 0x2e7   : > { %2411 = vmatpush.bf16.msrb.mxu2 %v5444_v16  ;;  %v6353_v16 = vld [vmem:[%s8958_s11 + $0xd4] sm:$0xf] }
 0x2e8   : > { %v5384_v20 = vor.u32 %v6353_v16, %v5381_v11  ;;  %2377 = vmatpush.bf16.msra.mxu1 %v5284_v18  ;;  %v5309_v16 = vld [vmem:[%s8958_s11 + $0x48] sm:$0xf0]  ;;  %v5352_v11 = vor.u32 %v6345_v4, %v5349_v38 }
 0x2e9   : > { %v5312_v24 = vor.u32 %v6335_v14, %v5309_v16 }
 0x2ea   : > { %2468 = vmatpush.bf16.msrb.mxu3 %v5384_v20  ;;  %v5432_v20 = vor.u32 %v6365_v59, %v5429_v8 }
 0x2eb   : > { %2412 = vmatpush.bf16.msrb.mxu2 %v5436_v21 }
 0x2ec   : > { %2378 = vmatpush.bf16.msra.mxu1 %v5276_v0  ;;  %v5341_v0 = vld [vmem:[%s8958_s11 + $0x88] sm:$0xf0] }
 0x2ee   : > { %2469 = vmatpush.bf16.msrb.mxu3 %v5376_v28 }
 0x2ef   : > { %2413 = vmatpush.bf16.msrb.mxu2 %v5428_v35  ;;  %v5333_v35 = vld [vmem:[%s8958_s11 + $0x78] sm:$0xf0] }
 0x2f0   : > { %v5336_v40 = vor.u32 %v6341_v34, %v5333_v35  ;;  %v6333_v35 = vld [vmem:[%s8958_s11 + $0x34] sm:$0xf] }
 0x2f2   : > { %2447 = vmatpush.bf16.msrb.mxu1 %v5336_v40  ;;  %2470 = vmatpush.bf16.msrb.mxu3 %v5368_v15  ;;  %v5301_v40 = vld [vmem:[%s8958_s11 + $0x38] sm:$0xf0] }
 0x2f3   : > { %2414 = vmatpush.bf16.msrb.mxu2 %v5420_v45  ;;  %v5325_v45 = vld [vmem:[%s8958_s11 + $0x68] sm:$0xf0]  ;;  %v5304_v15 = vor.u32 %v6333_v35, %v5301_v40 }
 0x2f4   : > { %v5328_v50 = vor.u32 %v6339_v44, %v5325_v45  ;;  %v6331_v44 = vld [vmem:[%s8958_s11 + $0x24] sm:$0xf]  ;;  %v5293_v45 = vld [vmem:[%s8958_s11 + $0x28] sm:$0xf0] }
 0x2f6   : > { %2448 = vmatpush.bf16.msrb.mxu1 %v5328_v50 }
 0x2f7   : > { %2415 = vmatpush.bf16.msrb.mxu2 %v5412_v52  ;;  %v5357_v52 = vld [vmem:[%s8958_s11 + $0xa8] sm:$0xf0] }
 0x2f8   : > { %v5360_v60 = vor.u32 %v6347_v51, %v5357_v52  ;;  %v5416_v51 = vor.u32 %v6361_v3, %v5413_v43 }
 0x2fa   : > { %2471 = vmatpush.bf16.msrb.mxu3 %v5360_v60 }
 0x2fb   : > { %2416 = vmatpush.bf16.msrb.mxu2 %v5404_v6  ;;  %v5320_v6 = vor.u32 %v6337_v1, %v5317_v2  ;;  %v5285_v1 = vld [vmem:[%s8958_s11 + $0x18] sm:$0xf0] }
 0x2fd   : > { %2449 = vmatpush.bf16.msrb.mxu1 %v5320_v6  ;;  %v5277_v6 = vld [vmem:[%s8958_s11 + $0x8] sm:$0xf0] }
 0x2fe   : > { %2472 = vmatpush.bf16.msrb.mxu3 %v5352_v11  ;;  %v6384_v11 = vld [vmem:[%s8960_s13 + $0x18] sm:$0xff] }
 0x2ff   : > { %2485 = vmatpush.bf16.msra.mxu2 %v5464_v17 }
 0x301   : > { %v7362_v57 = vpop.permute.xlu2 %1912  ;;  %2450 = vmatpush.bf16.msrb.mxu1 %v5312_v24 }
 0x303   : > { %2486 = vmatpush.bf16.msra.mxu2 %v5456_v33 }
 0x305   : > { %2451 = vmatpush.bf16.msrb.mxu1 %v5304_v15 }
 0x307   : > { %2487 = vmatpush.bf16.msra.mxu2 %v5448_v48 }
 0x308   : > { %v1911_v12 = vpop.permute.xlu1 %1910 }
 0x30b   : > { %2488 = vmatpush.bf16.msra.mxu2 %v5440_v62 }
 0x30e   : > { %v1904_v21 = vpop.permute.xlu2 %1903 }
 0x30f   : > { %2489 = vmatpush.bf16.msra.mxu2 %v5432_v20  ;;  %v6383_v20 = vld [vmem:[%s8960_s13 + $0x10] sm:$0xff] }
 0x310   : > { %v7376_v41 = vpop.permute.xlu0 %1933 }
 0x311   : > { %v1815_v49 = vpop.f32.mrf.mxu0 }
 0x312   : > { %v7365_v58 = vadd.f32 %v1815_v49, %v7342_v46 }
 0x316   : > { %v1947_v63 = vpop.permute.xlu2 %1946 }
 0x317   : > { %v1796_v24 = vpop.f32.mrf.mxu2 }
 0x318   : > { %v7442_v36 = vpop.permute.xlu1 %1878 }
 0x319   : > { %v7405_v19 = vpop.f32.mrf.mxu0  ;;  %v7425_v31 = vpop.permute.xlu0 %1876 }
 0x31a   : > { %v1990_v47 = vsel %vm1988_vm6, %v7425_v31, %v1904_v21  ;;  %v6343_v21 = vld [vmem:[%s8958_s11 + $0x84] sm:$0xf] }
 0x31b   : > { %v1994_v56 = vsel %vm1273_vm3, %v1990_v47, %v1911_v12  ;;  %v5344_v30 = vor.u32 %v6343_v21, %v5341_v0  ;;  %v2003_v47 = vsel %vm9004_vm9, %v7376_v41, %v1947_v63  ;;  %v6329_v63 = vld [vmem:[%s8958_s11 + $0x14] sm:$0xf]  ;;  %v6382_v21 = vld [vmem:[%s8960_s13 + $0x8] sm:$0xff] }
 0x31c   : > { %v1999_v13 = vsel %vm9002_vm2, %v1994_v56, %v7376_v41  ;;  %v5405_v56 = vld [vmem:[%s8958_s11 + $0x108] sm:$0xf0]  ;;  %v5288_v4 = vor.u32 %v6329_v63, %v5285_v1 }
 0x31d   : > { %v2080_v27 = vrot.slane %v1999_v13, 1  ;;  %2473 = vmatpush.bf16.msrb.mxu3 %v5344_v30  ;;  %v5408_v62 = vor.u32 %v6359_v55, %v5405_v56 }
 0x31e   : > { %v1970_v42 = vpop.permute.xlu2 %1969 }
 0x31f   : > { %v1798_v0 = vpop.f32.mrf.mxu2 }
 0x321   : > { %v1820_v54 = vpop.f32.mrf.mxu0 }
 0x322   : > { %v7468_v49 = vadd.f32 %v1820_v54, %v7342_v46  ;;  %v5296_v54 = vor.u32 %v6331_v44, %v5293_v45 }
 0x324   : > { %2452 = vmatpush.bf16.msrb.mxu1 %v5296_v54 }
 0x325   : > { %v1906_v5 = vpop.permute.xlu0 %1905 }
 0x326   : > { %v1992_v12 = vsel %vm1988_vm6, %v7442_v36, %v1906_v5  ;;  %v6327_v5 = vld [vmem:[%s8958_s11 + $0x4] sm:$0xf] }
 0x327   : > { %v1936_v17 = vpop.permute.xlu1 %1935  ;;  %v1996_v18 = vsel %vm1273_vm3, %v1992_v12, %v7362_v57  ;;  %v6363_v57 = vld [vmem:[%s8958_s11 + $0x124] sm:$0xf]  ;;  %v5280_v14 = vor.u32 %v6327_v5, %v5277_v6 }
 0x328   : > { %v2001_v22 = vsel %vm9002_vm2, %v1996_v18, %v1936_v17  ;;  %v5424_v33 = vor.u32 %v6363_v57, %v5421_v25  ;;  %vm9003_vm2 = vcmask 654336   ;;  %2453 = vmatpush.bf16.msrb.mxu1 %v5288_v4  ;;  %v1736_v57 = vperm.slane %v7321_v39, 0  ;;  %v2065_v39 = vld [vmem:[%s8959_s12] sm:$0x3] }
 0x329   : > { %v7514_v26 = vrot.slane %v2001_v22, 1  ;;  %v6381_v22 = vld [vmem:[%s8960_s13] sm:$0xff]  ;;  %v7600_v15 = vpop.f32.mrf.mxu0 }
 0x32a   : > { %2490 = vmatpush.bf16.msra.mxu2 %v5424_v33  ;;  %v1799_v25 = vadd.f32 %v1798_v0, %v1736_v57 }
 0x32b   : > { %v7518_v28 = vsel %vm1161_vm12, %v2080_v27, %v7514_v26  ;;  %v1797_v27 = vadd.f32 %v1796_v24, %v1736_v57 }
 0x32c   : > { %2398 = vmatmul.bf16.vlgmr.msra.gmra.mxu3 %v7518_v28  ;;  %2454 = vmatpush.bf16.msrb.mxu1 %v5280_v14  ;;  %v2566_v30 = vmax.f32 %v1799_v25, 0.0 }
 0x32d   : > { %v1949_v34 = vpop.permute.xlu0 %1948  ;;  %v2563_v33 = vmax.f32 %v1797_v27, 0.0 }
 0x32e   : > { %v2005_v7 = vsel %vm9004_vm9, %v1936_v17, %v1949_v34  ;;  %2491 = vmatpush.bf16.msra.mxu2 %v5416_v51 }
 0x32f   : > { %v2010_v48 = vsel %vm9003_vm2, %v2005_v7, %v1970_v42  ;;  %v1968_v50 = vpop.permute.xlu1 %1967  ;;  %v2575_v34 = vpack.c.bf16 %v2566_v30, %v2563_v33 }
 0x330   : > { %v2084_v52 = vrot.slane %v2010_v48, 1  ;;  %v2008_v53 = vsel %vm9003_vm2, %v2003_v47, %v1968_v50  ;;  %vm9040_vm2 = vcmask 785408   ;;  %v2067_v48 = vperm.slane %v2065_v39, 0 }
 0x331   : > { %v2083_v41 = vrot.slane %v2008_v53, 1  ;;  %vm9041_vm9 = vmmov %vm9040_vm2  ;;  %v2437_v44 = vpop.f32.mrf.mxu0 }
 0x332   : > { %2492 = vmatpush.bf16.msra.mxu2 %v5408_v62 }
 0x333   : > { %v2085_v60 = vsel %vm1161_vm12, %v2083_v41, %v2084_v52 }
 0x334   : > { %2417 = vmatmul.bf16.vlgmr.msrb.gmra.mxu2 %v2085_v60 }
 0x335   : > { %v1864_v2 = vpop.permute.xlu0 %1863 }
 0x336   : > { %v1981_v38 = vsel %vm1780_vm0, %v7206_v29, %v1864_v2  ;;  %v6388_v29 = vld [vmem:[%s8960_s13 + $0x38] sm:$0xff] }
 0x337   : > { %v1985_v59 = vsel %vm9040_vm2, %v1981_v38, %v7425_v31  ;;  %v1866_v8 = vpop.permute.xlu1 %1865  ;;  %v6386_v31 = vld [vmem:[%s8960_s13 + $0x28] sm:$0xff] }
 0x338   : > { %v2077_v12 = vrot.slane %v1985_v59, 1  ;;  %v1983_v13 = vsel %vm1780_vm0, %v7210_v32, %v1866_v8  ;;  %v6387_v32 = vld [vmem:[%s8960_s13 + $0x30] sm:$0xff] }
 0x339   : > { %v1987_v16 = vsel %vm9041_vm9, %v1983_v13, %v7442_v36  ;;  %v6385_v36 = vld [vmem:[%s8960_s13 + $0x20] sm:$0xff]  ;;  %v2439_v51 = vpop.f32.mrf.mxu0  ;;  %vm9042_vm9 = vcmask 388096  }
 0x33a   : > { %v2078_v17 = vrot.slane %v1987_v16, 1  ;;  %vm9043_vm2 = vmmov %vm9042_vm9 }
 0x33c   : > { %2403 = vmatmul.bf16.gmra.mxu3 %v7514_v26  ;;  %v2079_v18 = vsel %vm1161_vm12, %v2077_v12, %v2078_v17 }
 0x33d   : > { %2379 = vmatmul.bf16.vlgmr.msra.gmra.mxu1 %v2079_v18 }
 0x33e   : > { %2777 = vmatpush.bf16.msra.mxu1 %v6388_v29 }
 0x341   : > { %v2442_v63 = vpop.f32.mrf.mxu0 }
 0x342   : > { %2778 = vmatpush.bf16.msra.mxu1 %v6387_v32 }
 0x344   : > { %2422 = vmatmul.bf16.gmra.mxu2 %v2084_v52 }
 0x346   : > { %2779 = vmatpush.bf16.msra.mxu1 %v6386_v31 }
 0x349   : > { %v2444_v13 = vpop.f32.mrf.mxu0 }
 0x34a   : > { %2780 = vmatpush.bf16.msra.mxu1 %v6385_v36 }
 0x34c   : > { %2474 = vmatmul.bf16.vlgmr.msrb.gmra.mxu3 %v7518_v28  ;;  %v1801_v28 = vpop.f32.mrf.mxu2 }
 0x34d   : > { %2384 = vmatmul.bf16.gmra.mxu1 %v2078_v17  ;;  %v1802_v3 = vadd.f32 %v1801_v28, %v1736_v57 }
 0x34e   : > { %2781 = vmatpush.bf16.msra.mxu1 %v6384_v11  ;;  %v2068_v11 = vperm.slane %v2065_v39, 1  ;;  %v6396_v39 = vld [vmem:[%s8960_s13 + $0x78] sm:$0xff] }
 0x34f   : > { %v2569_v7 = vmax.f32 %v1802_v3, 0.0  ;;  %2796 = vmatpush.bf16.msra.mxu3 %v6396_v39 }
 0x352   : > { %2782 = vmatpush.bf16.msra.mxu1 %v6383_v20 }
 0x354   : > { %2493 = vmatmul.bf16.vlgmr.msra.gmra.mxu2 %v2085_v60  ;;  %v1803_v35 = vpop.f32.mrf.mxu2 }
 0x355   : > { %v1804_v40 = vadd.f32 %v1803_v35, %v1736_v57 }
 0x356   : > { %2783 = vmatpush.bf16.msra.mxu1 %v6382_v21 }
 0x357   : > { %v2572_v42 = vmax.f32 %v1804_v40, 0.0 }
 0x35a   : > { %2784 = vmatpush.bf16.msra.mxu1 %v6381_v22  ;;  %v2513_v22 = vpop.f32.mrf.mxu0 }
 0x35c   : > { %2479 = vmatmul.bf16.gmra.mxu3 %v7514_v26  ;;  %v2578_v26 = vpack.c.bf16 %v2572_v42, %v2569_v7 }
 0x35d   : > { %2455 = vmatmul.bf16.vlgmr.msrb.gmra.mxu1 %v2079_v18 }
 0x364   : > { %2498 = vmatmul.bf16.gmra.mxu2 %v2084_v52 }
 0x36d   : > { %2460 = vmatmul.bf16.gmra.mxu1 %v2078_v17 }
 0x37d   : > { %2785 = vmatmul.bf16.vlgmr.msra.gmra.mxu1 %v2575_v34  ;;  %v2515_v34 = vpop.f32.mrf.mxu0 }
 0x38d   : > { %2790 = vmatmul.bf16.gmra.mxu1 %v2578_v26 }
 0x3af   : > { %v2399_v43 = vpop.f32.mrf.mxu3 }
 0x3b7   : > { %v2418_v45 = vpop.f32.mrf.mxu2  ;;  %v2401_v47 = vpop.f32.mrf.mxu3 }
 0x3ba   : > { %v2380_v50 = vpop.f32.mrf.mxu1 }
 0x3bb   : > { %v2381_v52 = vadd.f32 %v2380_v50, %v2067_v48 }
 0x3bd   : > { %v2400_v54 = vadd.f32 %v2399_v43, %v2381_v52 }
 0x3bf   : > { %v2420_v53 = vpop.f32.mrf.mxu2  ;;  %v2404_v55 = vpop.f32.mrf.mxu3  ;;  %v2419_v60 = vadd.f32 %v2418_v45, %v2400_v54 }
 0x3c1   : > { %v2438_v4 = vadd.f32 %v2437_v44, %v2419_v60 }
 0x3c2   : > { %v2382_v56 = vpop.f32.mrf.mxu1 }
 0x3c3   : > { %v2383_v41 = vadd.f32 %v2382_v56, %v2067_v48 }
 0x3c5   : > { %v2402_v62 = vadd.f32 %v2401_v47, %v2383_v41  ;;  %v6394_v41 = vld [vmem:[%s8960_s13 + $0x68] sm:$0xff] }
 0x3c7   : > { %v2421_v1 = vadd.f32 %v2420_v53, %v2402_v62  ;;  %v2423_v2 = vpop.f32.mrf.mxu2  ;;  %v2406_v59 = vpop.f32.mrf.mxu3  ;;  %v6395_v53 = vld [vmem:[%s8960_s13 + $0x70] sm:$0xff] }
 0x3c8   : > { %2797 = vmatpush.bf16.msra.mxu3 %v6395_v53  ;;  %v6410_v53 = vld [vmem:[%s8962_s15 + $0x24] sm:$0xf0] }
 0x3c9   : > { %v2440_v5 = vadd.f32 %v2439_v51, %v2421_v1 }
 0x3ca   : > { %v2385_v6 = vpop.f32.mrf.mxu1 }
 0x3cb   : > { %v6609_v38 = vpack.i.bf16 %v2440_v5, %v2438_v4  ;;  %v2386_v8 = vadd.f32 %v2385_v6, %v2067_v48  ;;  %v6393_v4 = vld [vmem:[%s8960_s13 + $0x60] sm:$0xff]  ;;  %v6392_v6 = vld [vmem:[%s8960_s13 + $0x58] sm:$0xff] }
 0x3cc   : > { %2798 = vmatpush.bf16.msra.mxu3 %v6394_v41 }
 0x3cd   : > { %6610 = vrot.lane.b32.xlu2 %v6609_v38, %s9034_s3  ;;  %v2405_v14 = vadd.f32 %v2404_v55, %v2386_v8  ;;  %v6391_v38 = vld [vmem:[%s8960_s13 + $0x50] sm:$0xff]  ;;  %v6389_v8 = vld [vmem:[%s8960_s13 + $0x40] sm:$0xff] }
 0x3cf   : > { %v2425_v12 = vpop.f32.mrf.mxu2  ;;  %v2424_v18 = vadd.f32 %v2423_v2, %v2405_v14  ;;  %v2475_v32 = vpop.f32.mrf.mxu3  ;;  %v6402_v14 = vld [vmem:[%s8960_s13 + $0xa8] sm:$0xff] }
 0x3d0   : > { %2799 = vmatpush.bf16.msra.mxu3 %v6393_v4 }
 0x3d1   : > { %v2443_v20 = vadd.f32 %v2442_v63, %v2424_v18 }
 0x3d2   : > { %v2387_v16 = vpop.f32.mrf.mxu1 }
 0x3d3   : > { %v2388_v17 = vadd.f32 %v2387_v16, %v2067_v48  ;;  %v2518_v48 = vpop.f32.mrf.mxu0 }
 0x3d4   : > { %2800 = vmatpush.bf16.msra.mxu3 %v6392_v6  ;;  %v6406_v6 = vld [vmem:[%s8962_s15 + $0x4] sm:$0xf0] }
 0x3d5   : > { %v2407_v29 = vadd.f32 %v2406_v59, %v2388_v17  ;;  %v6390_v59 = vld [vmem:[%s8960_s13 + $0x48] sm:$0xff]  ;;  %v1818_v17 = vadd.f32 %v7405_v19, %v7342_v46  ;;  %v6400_v19 = vld [vmem:[%s8960_s13 + $0x98] sm:$0xff] }
 0x3d7   : > { %v2426_v31 = vadd.f32 %v2425_v12, %v2407_v29  ;;  %v2494_v36 = vpop.f32.mrf.mxu2  ;;  %v2477_v25 = vpop.f32.mrf.mxu3  ;;  %v6404_v12 = vld [vmem:[%s8960_s13 + $0xb8] sm:$0xff] }
 0x3d8   : > { %2801 = vmatpush.bf16.msra.mxu3 %v6391_v38  ;;  %2815 = vmatpush.bf16.msrb.mxu2 %v6404_v12  ;;  %v6405_v38 = vld [vmem:[%s8962_s15 + $0x4] sm:$0xf] }
 0x3d9   : > { %v2445_v21 = vadd.f32 %v2444_v13, %v2426_v31  ;;  %v6403_v13 = vld [vmem:[%s8960_s13 + $0xb0] sm:$0xff] }
 0x3da   : > { %v2456_v24 = vpop.f32.mrf.mxu1 }
 0x3db   : > { %v6619_v0 = vpack.i.bf16 %v2445_v21, %v2443_v20  ;;  %v2457_v57 = vadd.f32 %v2456_v24, %v2068_v11  ;;  %v2520_v63 = vpop.f32.mrf.mxu0  ;;  %v6401_v21 = vld [vmem:[%s8960_s13 + $0xa0] sm:$0xff] }
 0x3dc   : > { %2802 = vmatpush.bf16.msra.mxu3 %v6390_v59  ;;  %2816 = vmatpush.bf16.msrb.mxu2 %v6403_v13  ;;  %v6397_v24 = vld [vmem:[%s8960_s13 + $0x80] sm:$0xff] }
 0x3dd   : > { %6620 = vrot.lane.b32.xlu1 %v6619_v0, %s9034_s3  ;;  %v2476_v27 = vadd.f32 %v2475_v32, %v2457_v57  ;;  %v1823_v57 = vadd.f32 %v7600_v15, %v7342_v46 }
 0x3df   : > { %v2496_v28 = vpop.f32.mrf.mxu2  ;;  %v2495_v35 = vadd.f32 %v2494_v36, %v2476_v27  ;;  %v2480_v26 = vpop.f32.mrf.mxu3 }
 0x3e0   : > { %2803 = vmatpush.bf16.msra.mxu3 %v6389_v8  ;;  %2817 = vmatpush.bf16.msrb.mxu2 %v6402_v14  ;;  %v5593_v8 = vld [vmem:[%s8962_s15 + $0x8] sm:$0xf0] }
 0x3e1   : > { %v2514_v42 = vadd.f32 %v2513_v22, %v2495_v35  ;;  %v6399_v22 = vld [vmem:[%s8960_s13 + $0x90] sm:$0xff]  ;;  %v5596_v13 = vor.u32 %v6405_v38, %v5593_v8  ;;  %v2954_v8 = vld [vmem:[#allocation2 + $0x4] sm:$0x8] }
 0x3e2   : > { %v2458_v30 = vpop.f32.mrf.mxu1 }
 0x3e3   : > { %v2459_v33 = vadd.f32 %v2458_v30, %v2068_v11 }
 0x3e4   : > { %2818 = vmatpush.bf16.msrb.mxu2 %v6401_v21 }
 0x3e5   : > { %v2478_v40 = vadd.f32 %v2477_v25, %v2459_v33 }
 0x3e7   : > { %v2497_v3 = vadd.f32 %v2496_v28, %v2478_v40  ;;  %v2499_v45 = vpop.f32.mrf.mxu2  ;;  %v2482_v54 = vpop.f32.mrf.mxu3 }
 0x3e8   : > { %2819 = vmatpush.bf16.msrb.mxu2 %v6400_v19 }
 0x3e9   : > { %v2516_v7 = vadd.f32 %v2515_v34, %v2497_v3 }
 0x3ea   : > { %v2461_v43 = vpop.f32.mrf.mxu1 }
 0x3eb   : > { %v6614_v44 = vpack.i.bf16 %v2516_v7, %v2514_v42  ;;  %v2462_v47 = vadd.f32 %v2461_v43, %v2068_v11 }
 0x3ec   : > { %2820 = vmatpush.bf16.msrb.mxu2 %v6399_v22 }
 0x3ed   : > { %6615 = vrot.lane.b32.xlu0 %v6614_v44, %s9034_s3  ;;  %v2481_v50 = vadd.f32 %v2480_v26, %v2462_v47 }
 0x3ef   : > { %v2500_v55 = vadd.f32 %v2499_v45, %v2481_v50  ;;  %v2501_v60 = vpop.f32.mrf.mxu2 }
 0x3f1   : > { %v2519_v1 = vadd.f32 %v2518_v48, %v2500_v55 }
 0x3f2   : > { %v2463_v51 = vpop.f32.mrf.mxu1 }
 0x3f3   : > { %v2464_v52 = vadd.f32 %v2463_v51, %v2068_v11 }
 0x3f5   : > { %v2483_v56 = vadd.f32 %v2482_v54, %v2464_v52  ;;  %v5607_v52 = vld [vmem:[%s8962_s15 + $0x20] sm:$0xf]  ;;  %v6409_v54 = vld [vmem:[%s8962_s15 + $0x24] sm:$0xf] }
 0x3f6   : > { %v5608_v55 = vor.u32 %v6410_v53, %v5607_v52 }
 0x3f7   : > { %v2502_v62 = vadd.f32 %v2501_v60, %v2483_v56  ;;  %v5609_v56 = vld [vmem:[%s8962_s15 + $0x28] sm:$0xf0]  ;;  %v5599_v60 = vld [vmem:[%s8962_s15 + $0x10] sm:$0xf] }
 0x3f8   : > { %v5612_v41 = vor.u32 %v6409_v54, %v5609_v56  ;;  %2915 = vmatpush.bf16.msrb.mxu0 %v5608_v55 }
 0x3f9   : > { %v2521_v2 = vadd.f32 %v2520_v63, %v2502_v62  ;;  %v6408_v62 = vld [vmem:[%s8962_s15 + $0x14] sm:$0xf0]  ;;  %v6407_v63 = vld [vmem:[%s8962_s15 + $0x14] sm:$0xf] }
 0x3fa   : > { %2934 = vmatpush.bf16.msrb.mxu1 %v5612_v41  ;;  %v2786_v12 = vpop.f32.mrf.mxu1  ;;  %v2948_v41 = vld [vmem:[#allocation2 + $0x4] sm:$0xe] }
 0x3fb   : > { %v6624_v5 = vpack.i.bf16 %v2521_v2, %v2519_v1  ;;  %v5600_v1 = vor.u32 %v6408_v62, %v5599_v60  ;;  %v5601_v2 = vld [vmem:[%s8962_s15 + $0x18] sm:$0xf0]  ;;  %v2952_v62 = vld [vmem:[#allocation2 + $0x4] sm:$0xc] }
 0x3fc   : > { %v5604_v4 = vor.u32 %v6407_v63, %v5601_v2  ;;  %v2965_v2 = vunpack.c.l.b16 %v2948_v41 }
 0x3fd   : > { %6625 = vrot.lane.b32.xlu2 %v6624_v5, %s9034_s3  ;;  %2916 = vmatpush.bf16.msrb.mxu0 %v5600_v1  ;;  %v5591_v5 = vld [vmem:[%s8962_s15] sm:$0xf] }
 0x3fe   : > { %2935 = vmatpush.bf16.msrb.mxu1 %v5604_v4  ;;  %v5592_v59 = vor.u32 %v6406_v6, %v5591_v5  ;;  %v2992_v5 = vunpack.c.l.b16 %v2952_v62  ;;  %v5813_v62 = vld [vmem:[%s8964_s17 + $0x188] sm:$0xf0] }
 0x401   : > { %2917 = vmatpush.bf16.msrb.mxu0 %v5592_v59 }
 0x402   : > { %2936 = vmatpush.bf16.msrb.mxu1 %v5596_v13  ;;  %v2849_v13 = vld [vmem:[#allocation2 + $0x14] sm:$0x1] }
 0x427   : > { %v6611_v16 = vpop.permute.xlu2 %6610 }
 0x428   : > { %v6613_v18 = vunpack.i.h.bf16 %v6611_v16  ;;  %v6612_v29 = vunpack.i.l.bf16 %v6611_v16  ;;  %v6653_v16 = vld [vmem:[%s8961_s14] ss:$0 sm:$0xff] }
 0x42a   : > { %v2560_v32 = vsel %vm1273_vm3, %v1818_v17, %v6613_v18  ;;  %v2559_v31 = vsel %vm1273_vm3, %v7365_v58, %v6612_v29  ;;  %v6398_v58 = vld [vmem:[%s8960_s13 + $0x88] sm:$0xff]  ;;  %v2787_v17 = vadd.f32 %v6653_v16, %v2786_v12 }
 0x42b   : > { %v2567_v36 = vmax.f32 %v2560_v32, 0.0  ;;  %v2564_v11 = vmax.f32 %v2559_v31, 0.0  ;;  %2821 = vmatpush.bf16.msrb.mxu2 %v6398_v58  ;;  %v5827_v58 = vld [vmem:[%s8964_s17 + $0x1a0] sm:$0xf] }
 0x42d   : > { %v2576_v20 = vpack.c.bf16 %v2567_v36, %v2564_v11 }
 0x42f   : > { %2804 = vmatmul.bf16.vlgmr.msra.gmra.mxu3 %v2576_v20  ;;  %2822 = vmatpush.bf16.msrb.mxu2 %v6397_v24  ;;  %v6464_v24 = vld [vmem:[%s8964_s17 + $0x1a4] sm:$0xf0] }
 0x44f   : > { %v6621_v0 = vpop.permute.xlu1 %6620 }
 0x450   : > { %v6623_v25 = vunpack.i.h.bf16 %v6621_v0  ;;  %v6622_v27 = vunpack.i.l.bf16 %v6621_v0  ;;  %v5819_v0 = vld [vmem:[%s8964_s17 + $0x190] sm:$0xf] }
 0x452   : > { %v2561_v28 = vsel %vm1273_vm3, %v7468_v49, %v6622_v27  ;;  %v2562_v30 = vsel %vm1273_vm3, %v1823_v57, %v6623_v25 }
 0x453   : > { %v2570_v33 = vmax.f32 %v2561_v28, 0.0  ;;  %v2573_v34 = vmax.f32 %v2562_v30, 0.0  ;;  %v6462_v28 = vld [vmem:[%s8964_s17 + $0x194] sm:$0xf0] }
 0x455   : > { %v2579_v35 = vpack.c.bf16 %v2573_v34, %v2570_v33  ;;  %v5820_v34 = vor.u32 %v6462_v28, %v5819_v0 }
 0x457   : > { %2809 = vmatmul.bf16.gmra.mxu3 %v2579_v35  ;;  %v6626_v44 = vpop.permute.xlu2 %6625 }
 0x458   : > { %v6628_v39 = vunpack.i.h.bf16 %v6626_v44  ;;  %v6627_v49 = vunpack.i.l.bf16 %v6626_v44 }
 0x45a   : > { %v2549_v45 = vsel %vm1273_vm3, %v6622_v27, %v6627_v49  ;;  %v2550_v47 = vsel %vm1273_vm3, %v6623_v25, %v6628_v39  ;;  %v5828_v27 = vor.u32 %v6464_v24, %v5827_v58  ;;  %v5811_v49 = vld [vmem:[%s8964_s17 + $0x180] sm:$0xf] }
 0x45b   : > { %v2571_v48 = vmax.f32 %v2549_v45, 0.0  ;;  %v2574_v50 = vmax.f32 %v2550_v47, 0.0  ;;  %v6460_v45 = vld [vmem:[%s8964_s17 + $0x184] sm:$0xf0] }
 0x45c   : > { %3553 = vmatpush.bf16.msra.mxu1 %v5828_v27 }
 0x45d   : > { %v2580_v51 = vpack.c.bf16 %v2574_v50, %v2571_v48  ;;  %v5812_v48 = vor.u32 %v6460_v45, %v5811_v49 }
 0x45f   : > { %v6616_v40 = vpop.permute.xlu0 %6615 }
 0x460   : > { %v6618_v3 = vunpack.i.h.bf16 %v6616_v40  ;;  %v6617_v42 = vunpack.i.l.bf16 %v6616_v40  ;;  %3554 = vmatpush.bf16.msra.mxu1 %v5820_v34 }
 0x462   : > { %v2547_v7 = vsel %vm1273_vm3, %v6612_v29, %v6617_v42  ;;  %v2548_v26 = vsel %vm1273_vm3, %v6613_v18, %v6618_v3  ;;  %v2788_v18 = vpop.f32.mrf.mxu1 }
 0x463   : > { %v2565_v43 = vmax.f32 %v2547_v7, 0.0  ;;  %v2568_v46 = vmax.f32 %v2548_v26, 0.0  ;;  %v2789_v20 = vadd.f32 %v6653_v16, %v2788_v18 }
 0x464   : > { %3555 = vmatpush.bf16.msra.mxu1 %v5812_v48  ;;  %v5821_v48 = vld [vmem:[%s8964_s17 + $0x198] sm:$0xf0] }
 0x465   : > { %v2577_v15 = vpack.c.bf16 %v2568_v46, %v2565_v43 }
 0x467   : > { %2823 = vmatmul.bf16.vlgmr.msrb.gmra.mxu2 %v2577_v15 }
 0x46a   : > { %v2791_v57 = vpop.f32.mrf.mxu1 }
 0x46b   : > { %v2792_v40 = vadd.f32 %v6653_v16, %v2791_v57 }
 0x472   : > { %v2793_v44 = vpop.f32.mrf.mxu1 }
 0x473   : > { %v2794_v52 = vadd.f32 %v6653_v16, %v2793_v44 }
 0x477   : > { %2828 = vmatmul.bf16.gmra.mxu2 %v2580_v51 }
 0x4b2   : > { %v2805_v14 = vpop.f32.mrf.mxu3 }
 0x4b3   : > { %v2806_v29 = vadd.f32 %v2805_v14, %v2787_v17 }
 0x4ba   : > { %v2807_v36 = vpop.f32.mrf.mxu3 }
 0x4bb   : > { %v2808_v22 = vadd.f32 %v2807_v36, %v2789_v20 }
 0x4da   : > { %v2810_v33 = vpop.f32.mrf.mxu3 }
 0x4db   : > { %v2811_v7 = vadd.f32 %v2810_v33, %v2792_v40 }
 0x4e2   : > { %v2812_v50 = vpop.f32.mrf.mxu3 }
 0x4e3   : > { %v2813_v55 = vadd.f32 %v2812_v50, %v2794_v52 }
 0x4ea   : > { %v2824_v32 = vpop.f32.mrf.mxu2 }
 0x4eb   : > { %v2825_v31 = vadd.f32 %v2824_v32, %v2806_v29 }
 0x4ed   : > { %v2834_v11 = vmax.f32 %v2825_v31, 0.0 }
 0x4ef   : > { %v2838_v21 = vsel %vm6877_vm11, %v2834_v11, 0.0  ;;  %v3005_v11 = vunpack.c.l.b16 %v2954_v8 }
 0x4f0   : > { %v2842_v19 = vpack.c.bf16 %v2838_v21, %v2838_v21 }
 0x4f2   : > { %2846 = vst.msk [vmem:[#allocation2 + $0x8] sm:$0xf] %vm9042_vm9, %v2842_v19  ;;  %v2826_v25 = vpop.f32.mrf.mxu2  ;;  %v2868_v26 = vunpack.c.l.b16 %v2842_v19  ;;  %vm9044_vm9 = vmmov %vm9043_vm2 }
 0x4f3   : > { %v2827_v30 = vadd.f32 %v2826_v25, %v2808_v22 }
 0x4f5   : > { %v2835_v35 = vmax.f32 %v2827_v30, 0.0 }
 0x4f7   : > { %v2839_v3 = vsel %vm6885_vm4, %v2835_v35, 0.0 }
 0x4f8   : > { %v2843_v42 = vpack.c.bf16 %v2839_v3, %v2839_v3  ;;  %v6463_v3 = vld [vmem:[%s8964_s17 + $0x1a4] sm:$0xf] }
 0x4f9   : > { %v2959_v58 = vld [vmem:[#allocation2 + $0x8] sm:$0x8] }
 0x4fa   : > { %2847 = vst.msk [vmem:[#allocation2 + $0xc] sm:$0xf] %vm9043_vm2, %v2843_v42  ;;  %v2869_v43 = vunpack.c.l.b16 %v2843_v42  ;;  %v2829_v46 = vpop.f32.mrf.mxu2  ;;  %v3096_v25 = vunpack.c.l.b16 %v2959_v58  ;;  %v2957_v27 = vld [vmem:[#allocation2 + $0x8] sm:$0xc]  ;;  %v5829_v42 = vld [vmem:[%s8964_s17 + $0x1a8] sm:$0xf0] }
 0x4fb   : > { %v2830_v15 = vadd.f32 %v2829_v46, %v2811_v7  ;;  %v5832_v44 = vor.u32 %v6463_v3, %v5829_v42  ;;  %vm9049_vm2 = vcmask 785408  }
 0x4fc   : > { %v2872_v39 = vpack.c.b16 %v2869_v43, %v2868_v26 }
 0x4fd   : > { %v2836_v47 = vmax.f32 %v2830_v15, 0.0  ;;  %v3062_v15 = vunpack.c.l.b16 %v2957_v27 }
 0x4fe   : > { %5613 = vmatmul.msk.bf16.vlgmr.msrb.gmra.mxu0 %vm1780_vm0, %v2872_v39  ;;  %5615 = vmatmul.msk.bf16.vlgmr.msrb.gmra.mxu1 %vm1780_vm0, %v2872_v39  ;;  %v3030_v51 = vrot.slane %v2872_v39, 7 }
 0x4ff   : > { %v2840_v53 = vsel %vm6899_vm13, %v2836_v47, 0.0  ;;  %v6461_v47 = vld [vmem:[%s8964_s17 + $0x194] sm:$0xf]  ;;  %3629 = vmatpush.bf16.msrb.mxu1 %v5832_v44 }
 0x500   : > { %v2844_v54 = vpack.c.bf16 %v2840_v53, %v2840_v53  ;;  %3033 = vrot.lane.b32.xlu0 %v3030_v51, %s9034_s3  ;;  %v5824_v53 = vor.u32 %v6461_v47, %v5821_v48  ;;  %v6424_v47 = vld [vmem:[%s8964_s17 + $0x64] sm:$0xf0]  ;;  %v5659_v48 = vld [vmem:[%s8964_s17 + $0x50] sm:$0xf] }
 0x501   : > { %v7739_v56 = vld [vmem:[#allocation2 + $0x8] sm:$0xff]  }
 0x502   : > { %2848 = vst.msk [vmem:[#allocation2 + $0x10] sm:$0xf] %vm9044_vm9, %v2844_v54  ;;  %v2831_v60 = vpop.f32.mrf.mxu2  ;;  %v6579_v1 = vunpack.c.l.b16 %v7739_v56  ;;  %v2870_v12 = vunpack.c.l.b16 %v2844_v54  ;;  %v7748_v14 = vunpack.c.h.b16 %v7739_v56  ;;  %vm9051_vm9 = vcmask 916480  }
 0x503   : > { %v2832_v63 = vadd.f32 %v2831_v60, %v2813_v55  ;;  %v6459_v60 = vld [vmem:[%s8964_s17 + $0x184] sm:$0xf]  ;;  %3630 = vmatpush.bf16.msrb.mxu1 %v5824_v53  ;;  %v5739_v53 = vld [vmem:[%s8964_s17 + $0xf0] sm:$0xf] }
 0x504   : > { %v7745_v59 = vpack.c.b16 %v6579_v1, %v2965_v2  ;;  %v2994_v17 = vpack.c.b16 %v6579_v1, %v2992_v5  ;;  %v3007_v34 = vpack.c.b16 %v6579_v1, %v3005_v11  ;;  %v3098_v40 = vpack.c.b16 %v7748_v14, %v3096_v25 }
 0x505   : > { %v2837_v4 = vmax.f32 %v2832_v63, 0.0 }
 0x506   : > { %v2974_v22 = vshll.u32 %v7745_v59, 16  ;;  %v2996_v0 = vrot.slane %v2994_v17, 1  ;;  %v2972_v35 = vshrl.u32 %v7745_v59, 16  ;;  %v3010_v52 = vshrl.u32 %v3007_v34, 16 }
 0x507   : > { %v2841_v6 = vsel %vm6911_vm5, %v2837_v4, 0.0  ;;  %v3100_v55 = vrot.slane %v3098_v40, 2  ;;  %v3013_v2 = vshll.u32 %v3007_v34, 16  ;;  %v5816_v17 = vor.u32 %v6459_v60, %v5813_v62  ;;  %v6420_v60 = vld [vmem:[%s8964_s17 + $0x44] sm:$0xf0] }
 0x508   : > { %v2845_v38 = vpack.c.bf16 %v2841_v6, %v2841_v6  ;;  %v2976_v33 = vrot.slane %v2974_v22, 1  ;;  %v5731_v62 = vld [vmem:[%s8964_s17 + $0xe0] sm:$0xf] }
 0x509   : > { %v2953_v16 = vld [vmem:[#allocation2 + $0x10] sm:$0x7]  ;;  %3631 = vmatpush.bf16.msrb.mxu1 %v5816_v17  ;;  %v5715_v17 = vld [vmem:[%s8964_s17 + $0xc0] sm:$0xf] }
 0x50a   : > { %v2951_v18 = vld [vmem:[#allocation2 + $0x10] sm:$0x3]  ;;  %v2850_v29 = vsel %vm7157_vm14, %v2845_v38, %v2849_v13  ;;  %v2871_v32 = vunpack.c.l.b16 %v2845_v38  ;;  %v2993_v31 = vunpack.c.l.b16 %v2953_v16  ;;  %v2977_v50 = vor.u32 %v2976_v33, %v2972_v35 }
 0x50b   : > { %v2968_v36 = vunpack.c.l.b16 %v2951_v18  ;;  %2851 = vst [vmem:[#allocation2 + $0x14] sm:$0x1] %v2850_v29  ;;  %v3012_v13 = vrot.slane %v3010_v52, 2  ;;  %v3064_v16 = vpack.c.b16 %v7748_v14, %v3062_v15  ;;  %v3045_v35 = vshll.u32 %v7739_v56, 16 }
 0x50c   : > { %v2873_v20 = vpack.c.b16 %v2871_v32, %v2870_v12  ;;  %v2995_v21 = vpack.c.b16 %v2993_v31, %v7748_v14  ;;  %v3042_v12 = vshrl.u32 %v7739_v56, 16  ;;  %vm9047_vm14 = vsmask.f32 6400  ;;  %v5675_v56 = vld [vmem:[%s8964_s17 + $0x70] sm:$0xf] }
 0x50d   : > { %v7754_v19 = vpack.c.b16 %v2968_v36, %v7748_v14  ;;  %v3077_v25 = vshll.u32 %v3064_v16, 16 }
 0x50e   : > { %5614 = vmatmul.msk.bf16.gmra.mxu0 %vm1780_vm0, %v2873_v20  ;;  %5616 = vmatmul.msk.bf16.gmra.mxu1 %vm1780_vm0, %v2873_v20  ;;  %v2997_v10 = vrot.slane %v2995_v21, 1  ;;  %v3031_v24 = vrot.slane %v2873_v20, 7  ;;  %v3015_v21 = vrot.slane %v3013_v2, 3  ;;  %v5643_v2 = vld [vmem:[%s8964_s17 + $0x30] sm:$0xf] }
 0x50f   : > { %v2979_v57 = vshll.u32 %v7754_v19, 16  ;;  %v3079_v3 = vrot.slane %v3077_v25, 2  ;;  %v6412_v25 = vld [vmem:[%s8964_s17 + $0x4] sm:$0xf0] }
 0x510   : > { %3001 = vrot.lane.b32.xlu0 %v2997_v10, %s9037_s29  ;;  %v3032_v28 = vsel %vm1197_vm8, %v3030_v51, %v3031_v24  ;;  %v2998_v30 = vsel %vm1161_vm12, %v2996_v0, %v2997_v10  ;;  %v2983_v51 = vshrl.u32 %v7754_v19, 16  ;;  %v3016_v27 = vor.u32 %v3015_v21, %v3012_v13  ;;  %v5635_v13 = vld [vmem:[%s8964_s17 + $0x20] sm:$0xf]  ;;  %v6414_v21 = vld [vmem:[%s8964_s17 + $0x14] sm:$0xf0] }
 0x511   : > { %3035 = vrot.lane.b32.xlu1 %v3032_v28, %s9034_s3  ;;  %2999 = vrot.lane.b32.xlu2 %v2998_v30, %s9037_s29  ;;  %v2981_v7 = vrot.slane %v2979_v57, 1  ;;  %v3074_v57 = vshrl.u32 %v3064_v16, 16 }
 0x512   : > { %v2955_v26 = vld [vmem:[#allocation2 + $0x10] sm:$0xff]  }
 0x513   : > { %v2956_v43 = vld [vmem:[#allocation2 + $0x14] sm:$0x1]  ;;  %v3006_v39 = vunpack.c.l.b16 %v2955_v26  ;;  %v2982_v63 = vsel %vm1135_vm10, %v2977_v50, %v2981_v7  ;;  %v2985_v1 = vor.u32 %v2983_v51, %v2981_v7  ;;  %v3101_v38 = vrot.slane %v2955_v26, 2  ;;  %v6422_v51 = vld [vmem:[%s8964_s17 + $0x54] sm:$0xf0] }
 0x514   : > { %v2958_v46 = vld [vmem:[#allocation2 + $0x14] sm:$0x7]  ;;  %v3038_v49 = vunpack.c.l.b16 %v2956_v43  ;;  %v3076_v40 = vrot.slane %v3074_v57, 1  ;;  %v5660_v52 = vor.u32 %v6422_v51, %v5659_v48  ;;  %v5619_v57 = vld [vmem:[%s8964_s17] sm:$0xf] }
 0x515   : > { %v3063_v45 = vunpack.c.l.b16 %v2958_v46  ;;  %v3008_v54 = vpack.c.b16 %v3006_v39, %v7748_v14  ;;  %v3102_v32 = vsel %vm1265_vm15, %v3100_v55, %v3101_v38  ;;  %v3207_v31 = vrot.slane %v3101_v38, 1  ;;  %v5723_v38 = vld [vmem:[%s8964_s17 + $0xd0] sm:$0xf]  ;;  %v5669_v48 = vld [vmem:[%s8964_s17 + $0x68] sm:$0xf0] }
 0x516   : > { %v3040_v41 = vpack.c.b16 %v3038_v49, %v3006_v39  ;;  %v3206_v36 = vrot.slane %v3102_v32, 1  ;;  %v3044_v14 = vrot.slane %v3042_v12, 7  ;;  %v3080_v43 = vor.u32 %v3079_v3, %v3076_v40  ;;  %v5803_v32 = vld [vmem:[%s8964_s17 + $0x170] sm:$0xf]  ;;  %v6454_v40 = vld [vmem:[%s8964_s17 + $0x154] sm:$0xf0] }
 0x517   : > { %v3065_v4 = vpack.c.b16 %v3063_v45, %v3006_v39  ;;  %v3018_v5 = vshrl.u32 %v3008_v54, 16  ;;  %v3021_v6 = vshll.u32 %v3008_v54, 16  ;;  %v3066_v46 = vrot.slane %v3064_v16, 1  ;;  %v6426_v39 = vld [vmem:[%s8964_s17 + $0x74] sm:$0xf0] }
 0x518   : > { %v3049_v8 = vshrl.u32 %v3040_v41, 16  ;;  %2986 = vrot.lane.b32.xlu0 %v2982_v63, %s9045_s28  ;;  %v3052_v20 = vshll.u32 %v3040_v41, 16  ;;  %v3208_v24 = vsel %vm1161_vm12, %v3206_v36, %v3207_v31  ;;  %v3047_v42 = vor.u32 %v3045_v35, %v3044_v14  ;;  %v5667_v45 = vld [vmem:[%s8964_s17 + $0x60] sm:$0xf]  ;;  %v6442_v54 = vld [vmem:[%s8964_s17 + $0xf4] sm:$0xf0] }
 0x519   : > { %2988 = vrot.lane.b32.xlu1 %v2985_v1, %s9045_s28  ;;  %v3020_v18 = vrot.slane %v3018_v5, 2  ;;  %v3023_v29 = vrot.slane %v3021_v6, 3  ;;  %v3082_v58 = vshrl.u32 %v3065_v4, 16  ;;  %v3085_v10 = vshll.u32 %v3065_v4, 16  ;;  %v5651_v41 = vld [vmem:[%s8964_s17 + $0x40] sm:$0xf] }
 0x51a   : > { %v3051_v11 = vrot.slane %v3049_v8, 7  ;;  %v3067_v26 = vrot.slane %v3065_v4, 1  ;;  %v5676_v49 = vor.u32 %v6426_v39, %v5675_v56  ;;  %v5668_v50 = vor.u32 %v6424_v47, %v5667_v45  ;;  %v6440_v1 = vld [vmem:[%s8964_s17 + $0xe4] sm:$0xf0]  ;;  %v6418_v4 = vld [vmem:[%s8964_s17 + $0x34] sm:$0xf0] }
 0x51b   : > { %v3024_v22 = vor.u32 %v3023_v29, %v3020_v18  ;;  %v3084_v30 = vrot.slane %v3082_v58, 1  ;;  %v3087_v33 = vrot.slane %v3085_v10, 2  ;;  %v5740_v55 = vor.u32 %v6442_v54, %v5739_v53  ;;  %v6438_v8 = vld [vmem:[%s8964_s17 + $0xd4] sm:$0xf0]  ;;  %v6416_v16 = vld [vmem:[%s8964_s17 + $0x24] sm:$0xf0] }
 0x51c   : > { %v3054_v0 = vor.u32 %v3052_v20, %v3051_v11  ;;  %v3068_v44 = vsel %vm1161_vm12, %v3066_v46, %v3067_v26  ;;  %3491 = vmatpush.bf16.msrb.mxu3 %v5676_v49  ;;  %v5652_v63 = vor.u32 %v6420_v60, %v5651_v41  ;;  %v5732_v5 = vor.u32 %v6440_v1, %v5731_v62  ;;  %v6436_v29 = vld [vmem:[%s8964_s17 + $0xc4] sm:$0xf0]  ;;  %v5627_v20 = vld [vmem:[%s8964_s17 + $0x10] sm:$0xf]  ;;  %v6434_v10 = vld [vmem:[%s8964_s17 + $0xb4] sm:$0xf0] }
 0x51d   : > { %3028 = vrot.lane.b32.xlu2 %v3024_v22, %s9046_s9  ;;  %v3025_v34 = vsel %vm1175_vm1, %v3016_v27, %v3024_v22  ;;  %v3088_v7 = vor.u32 %v3087_v33, %v3084_v30  ;;  %3510 = vmatpush.bf16.msra.mxu2 %v5740_v55  ;;  %v5644_v6 = vor.u32 %v6418_v4, %v5643_v2  ;;  %v5707_v58 = vld [vmem:[%s8964_s17 + $0xb0] sm:$0xf]  ;;  %v5699_v30 = vld [vmem:[%s8964_s17 + $0xa0] sm:$0xf]  ;;  %v6432_v33 = vld [vmem:[%s8964_s17 + $0xa4] sm:$0xf0] }
 0x51e   : > { %5833 = vmatmul.msk.bf16.vlgmr.msra.gmra.mxu1 %vm1780_vm0, %v3208_v24  ;;  %v3055_v28 = vsel %vm1051_vm7, %v3044_v14, %v3054_v0  ;;  %v5724_v12 = vor.u32 %v6438_v8, %v5723_v38  ;;  %v5636_v18 = vor.u32 %v6416_v16, %v5635_v13  ;;  %v5716_v36 = vor.u32 %v6436_v29, %v5715_v17  ;;  %v6456_v14 = vld [vmem:[%s8964_s17 + $0x164] sm:$0xf0]  ;;  %v6425_v3 = vld [vmem:[%s8964_s17 + $0x74] sm:$0xf]  ;;  %v5691_v46 = vld [vmem:[%s8964_s17 + $0x90] sm:$0xf] }
 0x51f   : > { %v3089_v15 = vsel %vm9047_vm14, %v3080_v43, %v3088_v7  ;;  %v5628_v22 = vor.u32 %v6414_v21, %v5627_v20  ;;  %v5708_v0 = vor.u32 %v6434_v10, %v5707_v58  ;;  %v5700_v35 = vor.u32 %v6432_v33, %v5699_v30  ;;  %v7922_v43 = vld [vmem:[%s8963_s16] sm:$0x3]  ;;  %v6452_v49 = vld [vmem:[%s8964_s17 + $0x144] sm:$0xf0]  ;;  %v6423_v45 = vld [vmem:[%s8964_s17 + $0x64] sm:$0xf] }
 0x520   : > { %3058 = vrot.lane.b32.xlu0 %v3055_v28, %s9038_s0  ;;  %3492 = vmatpush.bf16.msrb.mxu3 %v5668_v50  ;;  %v5620_v28 = vor.u32 %v6412_v25, %v5619_v57  ;;  %v5779_v39 = vld [vmem:[%s8964_s17 + $0x140] sm:$0xf]  ;;  %v6428_v51 = vld [vmem:[%s8964_s17 + $0x84] sm:$0xf0]  ;;  %v5672_v53 = vor.u32 %v6423_v45, %v5669_v48  ;;  %v5771_v55 = vld [vmem:[%s8964_s17 + $0x130] sm:$0xf] }
 0x521   : > { %3026 = vrot.lane.b32.xlu1 %v3025_v34, %s9046_s9  ;;  %3511 = vmatpush.bf16.msra.mxu2 %v5732_v5  ;;  %v5787_v34 = vld [vmem:[%s8964_s17 + $0x150] sm:$0xf]  ;;  %v5780_v47 = vor.u32 %v6452_v49, %v5779_v39  ;;  %v5683_v50 = vld [vmem:[%s8964_s17 + $0x80] sm:$0xf]  ;;  %v6450_v41 = vld [vmem:[%s8964_s17 + $0x134] sm:$0xf0] }
 0x522   : > { %v5684_v54 = vor.u32 %v6428_v51, %v5683_v50  ;;  %v6421_v60 = vld [vmem:[%s8964_s17 + $0x54] sm:$0xf]  ;;  %v5661_v1 = vld [vmem:[%s8964_s17 + $0x58] sm:$0xf0]  ;;  %v5763_v8 = vld [vmem:[%s8964_s17 + $0x120] sm:$0xf] }
 0x523   : > { %v5664_v4 = vor.u32 %v6421_v60, %v5661_v1  ;;  %v6441_v5 = vld [vmem:[%s8964_s17 + $0xf4] sm:$0xf]  ;;  %v6419_v16 = vld [vmem:[%s8964_s17 + $0x44] sm:$0xf]  ;;  %v5653_v17 = vld [vmem:[%s8964_s17 + $0x48] sm:$0xf0] }
 0x524   : > { %3493 = vmatpush.bf16.msrb.mxu3 %v5660_v52  ;;  %v5656_v29 = vor.u32 %v6419_v16, %v5653_v17  ;;  %v6417_v20 = vld [vmem:[%s8964_s17 + $0x34] sm:$0xf]  ;;  %v5645_v21 = vld [vmem:[%s8964_s17 + $0x38] sm:$0xf0]  ;;  %v6444_v30 = vld [vmem:[%s8964_s17 + $0x104] sm:$0xf0] }
 0x525   : > { %3056 = vrot.lane.b32.xlu2 %v3047_v42, %s9038_s0  ;;  %3512 = vmatpush.bf16.msra.mxu2 %v5724_v12  ;;  %v5677_v42 = vld [vmem:[%s8964_s17 + $0x78] sm:$0xf0]  ;;  %v6448_v12 = vld [vmem:[%s8964_s17 + $0x124] sm:$0xf0]  ;;  %v6437_v57 = vld [vmem:[%s8964_s17 + $0xd4] sm:$0xf] }
 0x526   : > { %v5764_v13 = vor.u32 %v6448_v12, %v5763_v8  ;;  %v5725_v25 = vld [vmem:[%s8964_s17 + $0xd8] sm:$0xf0]  ;;  %v6415_v33 = vld [vmem:[%s8964_s17 + $0x24] sm:$0xf]  ;;  %v6413_v39 = vld [vmem:[%s8964_s17 + $0x14] sm:$0xf] }
 0x527   : > { %v5629_v49 = vld [vmem:[%s8964_s17 + $0x18] sm:$0xf0]  ;;  %v5797_v1 = vld [vmem:[%s8964_s17 + $0x168] sm:$0xf0]  ;;  %v6431_v8 = vld [vmem:[%s8964_s17 + $0xa4] sm:$0xf] }
 0x528   : > { %3090 = vrot.lane.b32.xlu0 %v3089_v15, %s9048_s8  ;;  %3494 = vmatpush.bf16.msrb.mxu3 %v5652_v63  ;;  %v6430_v15 = vld [vmem:[%s8964_s17 + $0x94] sm:$0xf0]  ;;  %v5772_v63 = vor.u32 %v6450_v41, %v5771_v55  ;;  %v6433_v55 = vld [vmem:[%s8964_s17 + $0xb4] sm:$0xf]  ;;  %v6455_v41 = vld [vmem:[%s8964_s17 + $0x164] sm:$0xf] }
 0x529   : > { %3069 = vrot.lane.b32.xlu1 %v3068_v44, %s9039_s6  ;;  %3513 = vmatpush.bf16.msra.mxu2 %v5716_v36  ;;  %v7931_v44 = vperm.slane %v7922_v43, 1  ;;  %v5692_v56 = vor.u32 %v6430_v15, %v5691_v46  ;;  %v6446_v36 = vld [vmem:[%s8964_s17 + $0x114] sm:$0xf0]  ;;  %v5805_v46 = vld [vmem:[%s8964_s17 + $0x178] sm:$0xf0]  ;;  %vm9053_vm14 = vcmask 261120  }
 0x52a   : > { %v5701_v16 = vld [vmem:[%s8964_s17 + $0xa8] sm:$0xf0]  ;;  %v6453_v17 = vld [vmem:[%s8964_s17 + $0x154] sm:$0xf] }
 0x52c   : > { %3495 = vmatpush.bf16.msrb.mxu3 %v5644_v6  ;;  %v5741_v6 = vld [vmem:[%s8964_s17 + $0xf8] sm:$0xf0] }
 0x52d   : > { %3071 = vrot.lane.b32.xlu2 %v3067_v26, %s9039_s6  ;;  %3514 = vmatpush.bf16.msra.mxu2 %v5708_v0  ;;  %v5680_v26 = vor.u32 %v6425_v3, %v5677_v42  ;;  %v5744_v38 = vor.u32 %v6441_v5, %v5741_v6  ;;  %v5717_v3 = vld [vmem:[%s8964_s17 + $0xc8] sm:$0xf0]  ;;  %v5800_v6 = vor.u32 %v6455_v41, %v5797_v1 }
 0x52e   : > { %5834 = vmatmul.msk.bf16.gmra.mxu1 %vm1780_vm0, %v3207_v31 }
 0x530   : > { %3496 = vmatpush.bf16.msrb.mxu3 %v5636_v18  ;;  %v6439_v18 = vld [vmem:[%s8964_s17 + $0xe4] sm:$0xf] }
 0x531   : > { %3092 = vrot.lane.b32.xlu1 %v3088_v7, %s9048_s8  ;;  %v5788_v7 = vor.u32 %v6454_v40, %v5787_v34  ;;  %3515 = vmatpush.bf16.msra.mxu2 %v5700_v35  ;;  %v5637_v34 = vld [vmem:[%s8964_s17 + $0x28] sm:$0xf0]  ;;  %v6435_v35 = vld [vmem:[%s8964_s17 + $0xc4] sm:$0xf] }
 0x532   : > { %v5640_v42 = vor.u32 %v6415_v33, %v5637_v34  ;;  %v6451_v33 = vld [vmem:[%s8964_s17 + $0x144] sm:$0xf]  ;;  %v5781_v34 = vld [vmem:[%s8964_s17 + $0x148] sm:$0xf0] }
 0x534   : > { %3497 = vmatpush.bf16.msrb.mxu3 %v5628_v22 }
 0x535   : > { %3516 = vmatpush.bf16.msra.mxu2 %v5692_v56 }
 0x538   : > { %3498 = vmatpush.bf16.msrb.mxu3 %v5620_v28  ;;  %v5747_v28 = vld [vmem:[%s8964_s17 + $0x100] sm:$0xf] }
 0x539   : > { %3517 = vmatpush.bf16.msra.mxu2 %v5684_v54  ;;  %v5748_v40 = vor.u32 %v6444_v30, %v5747_v28  ;;  %v5632_v54 = vor.u32 %v6413_v39, %v5629_v49  ;;  %v6470_v49 = vld [vmem:[%s8966_s19 + $0x28] sm:$0xff] }
 0x53c   : > { %3567 = vmatpush.bf16.msra.mxu3 %v5680_v26  ;;  %v6457_v26 = vld [vmem:[%s8964_s17 + $0x174] sm:$0xf] }
 0x53d   : > { %3586 = vmatpush.bf16.msrb.mxu2 %v5744_v38  ;;  %v5808_v15 = vor.u32 %v6457_v26, %v5805_v46  ;;  %v5621_v38 = vld [vmem:[%s8964_s17 + $0x8] sm:$0xf0]  ;;  %v6449_v46 = vld [vmem:[%s8964_s17 + $0x134] sm:$0xf] }
 0x53e   : > { %5835 = vmatmul.msk.bf16.vlgmr.msrb.gmra.mxu1 %vm1780_vm0, %v3208_v24  ;;  %v5795_v24 = vld [vmem:[%s8964_s17 + $0x160] sm:$0xf] }
 0x53f   : > { %v5796_v27 = vor.u32 %v6456_v14, %v5795_v24  ;;  %v5648_v14 = vor.u32 %v6417_v20, %v5645_v21 }
 0x540   : > { %3568 = vmatpush.bf16.msra.mxu3 %v5672_v53 }
 0x544   : > { %3569 = vmatpush.bf16.msra.mxu3 %v5664_v4  ;;  %v6411_v4 = vld [vmem:[%s8964_s17 + $0x4] sm:$0xf] }
 0x548   : > { %3570 = vmatpush.bf16.msra.mxu3 %v5656_v29 }
 0x54c   : > { %3571 = vmatpush.bf16.msra.mxu3 %v5648_v14 }
 0x54e   : > { %5836 = vmatmul.msk.bf16.gmra.mxu1 %vm1780_vm0, %v3207_v31  ;;  %v6458_v31 = vld [vmem:[%s8964_s17 + $0x174] sm:$0xf0] }
 0x54f   : > { %v5804_v11 = vor.u32 %v6458_v31, %v5803_v32  ;;  %v5733_v32 = vld [vmem:[%s8964_s17 + $0xe8] sm:$0xf0]  ;;  %v5755_v31 = vld [vmem:[%s8964_s17 + $0x110] sm:$0xf] }
 0x550   : > { %v5756_v24 = vor.u32 %v6446_v36, %v5755_v31  ;;  %3572 = vmatpush.bf16.msra.mxu3 %v5640_v42  ;;  %v6472_v36 = vld [vmem:[%s8966_s19 + $0x38] sm:$0xff] }
 0x551   : > { %3529 = vmatpush.bf16.msra.mxu0 %v5804_v11  ;;  %v5736_v11 = vor.u32 %v6439_v18, %v5733_v32  ;;  %v5789_v18 = vld [vmem:[%s8964_s17 + $0x158] sm:$0xf0]  ;;  %v5704_v32 = vor.u32 %v6431_v8, %v5701_v16  ;;  %v5749_v8 = vld [vmem:[%s8964_s17 + $0x108] sm:$0xf0] }
 0x552   : > { %v5792_v31 = vor.u32 %v6453_v17, %v5789_v18  ;;  %v6467_v17 = vld [vmem:[%s8966_s19 + $0x10] sm:$0xff] }
 0x553   : > { %3587 = vmatpush.bf16.msrb.mxu2 %v5736_v11 }
 0x554   : > { %3573 = vmatpush.bf16.msra.mxu3 %v5632_v54  ;;  %v6469_v54 = vld [vmem:[%s8966_s19 + $0x20] sm:$0xff] }
 0x555   : > { %3530 = vmatpush.bf16.msra.mxu0 %v5796_v27  ;;  %v5728_v27 = vor.u32 %v6437_v57, %v5725_v25  ;;  %v6429_v57 = vld [vmem:[%s8964_s17 + $0x94] sm:$0xf]  ;;  %v5693_v25 = vld [vmem:[%s8964_s17 + $0x98] sm:$0xf0] }
 0x556   : > { %v5696_v30 = vor.u32 %v6429_v57, %v5693_v25 }
 0x557   : > { %3588 = vmatpush.bf16.msrb.mxu2 %v5728_v27 }
 0x559   : > { %3531 = vmatpush.bf16.msra.mxu0 %v5788_v7  ;;  %v5720_v7 = vor.u32 %v6435_v35, %v5717_v3  ;;  %v6427_v35 = vld [vmem:[%s8964_s17 + $0x84] sm:$0xf]  ;;  %v5784_v3 = vor.u32 %v6451_v33, %v5781_v34 }
 0x55b   : > { %3589 = vmatpush.bf16.msrb.mxu2 %v5720_v7 }
 0x55d   : > { %3532 = vmatpush.bf16.msra.mxu0 %v5780_v47 }
 0x561   : > { %3533 = vmatpush.bf16.msra.mxu0 %v5772_v63 }
 0x565   : > { %3534 = vmatpush.bf16.msra.mxu0 %v5764_v13  ;;  %v5624_v13 = vor.u32 %v6411_v4, %v5621_v38  ;;  %v6443_v38 = vld [vmem:[%s8964_s17 + $0x104] sm:$0xf] }
 0x566   : > { %v5752_v16 = vor.u32 %v6443_v38, %v5749_v8 }
 0x567   : > { %3574 = vmatpush.bf16.msra.mxu3 %v5624_v13 }
 0x569   : > { %3535 = vmatpush.bf16.msra.mxu0 %v5756_v24 }
 0x56b   : > { %v8004_v58 = vpop.permute.xlu2 %2999 }
 0x56d   : > { %3536 = vmatpush.bf16.msra.mxu0 %v5748_v40 }
 0x571   : > { %3605 = vmatpush.bf16.msrb.mxu0 %v5808_v15  ;;  %v5773_v15 = vld [vmem:[%s8964_s17 + $0x138] sm:$0xf0] }
 0x572   : > { %v7951_v52 = vpop.permute.xlu0 %3033  ;;  %v5776_v39 = vor.u32 %v6449_v46, %v5773_v15 }
 0x575   : > { %3606 = vmatpush.bf16.msrb.mxu0 %v5800_v6 }
 0x577   : > { %v3029_v45 = vpop.permute.xlu2 %3028 }
 0x579   : > { %3607 = vmatpush.bf16.msrb.mxu0 %v5792_v31  ;;  %v6465_v31 = vld [vmem:[%s8966_s19] sm:$0xff] }
 0x57b   : > { %v2938_v62 = vpop.f32.mrf.mxu1 }
 0x57c   : > { %v7966_v2 = vadd.f32 %v2938_v62, %v7931_v44 }
 0x57d   : > { %3608 = vmatpush.bf16.msrb.mxu0 %v5784_v3 }
 0x57f   : > { %v3057_v27 = vpop.permute.xlu2 %3056 }
 0x581   : > { %3609 = vmatpush.bf16.msrb.mxu0 %v5776_v39 }
 0x582   : > { %v3002_v22 = vpop.permute.xlu0 %3001 }
 0x583   : > { %v8006_v10 = vpop.permute.xlu1 %3035  ;;  %v8008_v0 = vpop.f32.mrf.mxu1  ;;  %v3114_v12 = vsel %vm1988_vm6, %v3002_v22, %v3029_v45 }
 0x584   : > { %v3118_v20 = vsel %vm1273_vm3, %v3114_v12, %v8006_v10  ;;  %v6471_v10 = vld [vmem:[%s8966_s19 + $0x30] sm:$0xff] }
 0x58a   : > { %v2987_v56 = vpop.permute.xlu0 %2986 }
 0x58b   : > { %v3104_v47 = vsel %vm1780_vm0, %v7745_v59, %v2987_v56  ;;  %v2989_v48 = vpop.permute.xlu1 %2988  ;;  %v2943_v51 = vpop.f32.mrf.mxu1  ;;  %v5709_v59 = vld [vmem:[%s8964_s17 + $0xb8] sm:$0xf0] }
 0x58c   : > { %v3108_v50 = vsel %vm9049_vm2, %v3104_v47, %v8004_v58  ;;  %v3106_v53 = vsel %vm1780_vm0, %v7754_v19, %v2989_v48  ;;  %v8062_v62 = vadd.f32 %v2943_v51, %v7931_v44  ;;  %vm9050_vm0 = vmmov %vm9049_vm2  ;;  %v5712_v63 = vor.u32 %v6433_v55, %v5709_v59  ;;  %v6447_v47 = vld [vmem:[%s8964_s17 + $0x124] sm:$0xf]  ;;  %v5765_v48 = vld [vmem:[%s8964_s17 + $0x128] sm:$0xf0] }
 0x58d   : > { %v3197_v60 = vrot.slane %v3108_v50, 1  ;;  %v3110_v19 = vsel %vm9050_vm0, %v3106_v53, %v3002_v22  ;;  %v5768_v50 = vor.u32 %v6447_v47, %v5765_v48  ;;  %v6445_v51 = vld [vmem:[%s8964_s17 + $0x114] sm:$0xf]  ;;  %v5757_v53 = vld [vmem:[%s8964_s17 + $0x118] sm:$0xf0]  ;;  %vm9054_vm2 = vcmask 654336   ;;  %vm9055_vm0 = vmmov %vm9053_vm14 }
 0x58e   : > { %v8071_v5 = vrot.slane %v3110_v19, 1  ;;  %3590 = vmatpush.bf16.msrb.mxu2 %v5712_v63  ;;  %v5760_v59 = vor.u32 %v6445_v51, %v5757_v53  ;;  %v6468_v63 = vld [vmem:[%s8966_s19 + $0x18] sm:$0xff] }
 0x58f   : > { %3610 = vmatpush.bf16.msrb.mxu0 %v5768_v50 }
 0x590   : > { %v8091_v29 = vsel %vm1161_vm12, %v3197_v60, %v8071_v5  ;;  %v3072_v60 = vpop.permute.xlu2 %3071 }
 0x591   : > { %3499 = vmatmul.bf16.vlgmr.msrb.gmra.mxu3 %v8091_v29 }
 0x592   : > { %v3059_v11 = vpop.permute.xlu0 %3058  ;;  %3591 = vmatpush.bf16.msrb.mxu2 %v5704_v32  ;;  %3897 = vmatpush.bf16.msrb.mxu3 %v6472_v36  ;;  %v6466_v32 = vld [vmem:[%s8966_s19 + $0x8] sm:$0xff]  ;;  %v2919_v36 = vpop.f32.mrf.mxu0 }
 0x593   : > { %v3027_v21 = vpop.permute.xlu1 %3026  ;;  %v3122_v22 = vsel %vm9051_vm9, %v3118_v20, %v3059_v11  ;;  %v2945_v24 = vpop.f32.mrf.mxu1  ;;  %v3126_v1 = vsel %vm9055_vm0, %v3059_v11, %v3072_v60  ;;  %3611 = vmatpush.bf16.msrb.mxu0 %v5760_v59  ;;  %v2860_v20 = vperm.slane %v7922_v43, 0 }
 0x594   : > { %v3112_v14 = vsel %vm1988_vm6, %v8004_v58, %v3027_v21  ;;  %v8112_v28 = vadd.f32 %v2945_v24, %v7931_v44  ;;  %vm9052_vm6 = vmmov %vm9051_vm9  ;;  %v3201_v42 = vrot.slane %v3122_v22, 1 }
 0x595   : > { %v3116_v58 = vsel %vm1273_vm3, %v3112_v14, %v7951_v52  ;;  %v5685_v52 = vld [vmem:[%s8964_s17 + $0x88] sm:$0xf0]  ;;  %vm9056_vm9 = vmmov %vm9054_vm2  ;;  %v2920_v22 = vadd.f32 %v2919_v36, %v2860_v20 }
 0x596   : > { %v3120_v40 = vsel %vm9052_vm6, %v3116_v58, %v3057_v27  ;;  %3592 = vmatpush.bf16.msrb.mxu2 %v5696_v30  ;;  %v5688_v26 = vor.u32 %v6427_v35, %v5685_v52  ;;  %3898 = vmatpush.bf16.msrb.mxu3 %v6471_v10  ;;  %vm9057_vm6 = vcmask 519168  }
 0x597   : > { %v3200_v7 = vrot.slane %v3120_v40, 1  ;;  %3612 = vmatpush.bf16.msrb.mxu0 %v5752_v16  ;;  %v3683_v57 = vmax.f32 %v2920_v22, 0.0  ;;  %v3185_v40 = vld [vmem:[%s8965_s18] sm:$0x3] }
 0x598   : > { %v3187_v52 = vperm.slane %v3185_v40, 0  ;;  %v3188_v36 = vperm.slane %v3185_v40, 1 }
 0x599   : > { %v3202_v56 = vsel %vm1161_vm12, %v3200_v7, %v3201_v42 }
 0x59a   : > { %3518 = vmatmul.bf16.vlgmr.msra.gmra.mxu2 %v3202_v56  ;;  %3899 = vmatpush.bf16.msrb.mxu3 %v6470_v49  ;;  %v3091_v41 = vpop.permute.xlu0 %3090  ;;  %v2921_v11 = vpop.f32.mrf.mxu0 }
 0x59b   : > { %v3070_v45 = vpop.permute.xlu1 %3069  ;;  %3593 = vmatpush.bf16.msrb.mxu2 %v5688_v26  ;;  %v2922_v21 = vadd.f32 %v2921_v11, %v2860_v20  ;;  %v3557_v34 = vpop.f32.mrf.mxu1 }
 0x59c   : > { %v3124_v55 = vsel %vm9053_vm14, %v3057_v27, %v3070_v45  ;;  %vm9058_vm14 = vmmov %vm9057_vm6 }
 0x59d   : > { %v3128_v19 = vsel %vm9054_vm2, %v3124_v55, %v3091_v41  ;;  %v3686_v14 = vmax.f32 %v2922_v21, 0.0 }
 0x59e   : > { %3900 = vmatpush.bf16.msrb.mxu3 %v6469_v54  ;;  %v3203_v12 = vrot.slane %v3128_v19, 1 }
 0x59f   : > { %v3695_v25 = vpack.c.bf16 %v3686_v14, %v3683_v57 }
 0x5a1   : > { %3504 = vmatmul.bf16.gmra.mxu3 %v8071_v5 }
 0x5a2   : > { %3901 = vmatpush.bf16.msrb.mxu3 %v6468_v63  ;;  %v2924_v24 = vpop.f32.mrf.mxu0 }
 0x5a3   : > { %v3093_v4 = vpop.permute.xlu1 %3092  ;;  %v2925_v27 = vadd.f32 %v2924_v24, %v2860_v20  ;;  %v3559_v3 = vpop.f32.mrf.mxu1 }
 0x5a4   : > { %v3130_v6 = vsel %vm9056_vm9, %v3126_v1, %v3093_v4 }
 0x5a5   : > { %v3204_v13 = vrot.slane %v3130_v6, 1  ;;  %v3689_v30 = vmax.f32 %v2925_v27, 0.0  ;;  %v6480_v27 = vld [vmem:[%s8966_s19 + $0x78] sm:$0xff] }
 0x5a6   : > { %3902 = vmatpush.bf16.msrb.mxu3 %v6467_v17  ;;  %3916 = vmatpush.bf16.msra.mxu2 %v6480_v27 }
 0x5a7   : > { %v3205_v18 = vsel %vm1161_vm12, %v3203_v12, %v3204_v13 }
 0x5a8   : > { %3537 = vmatmul.bf16.vlgmr.msra.gmra.mxu0 %v3205_v18 }
 0x5aa   : > { %3523 = vmatmul.bf16.gmra.mxu2 %v3201_v42  ;;  %3903 = vmatpush.bf16.msrb.mxu3 %v6466_v32  ;;  %v2926_v10 = vpop.f32.mrf.mxu0 }
 0x5ab   : > { %v3562_v39 = vpop.f32.mrf.mxu1 }
 0x5ae   : > { %3904 = vmatpush.bf16.msrb.mxu3 %v6465_v31 }
 0x5b1   : > { %3575 = vmatmul.bf16.vlgmr.msra.gmra.mxu3 %v8091_v29  ;;  %v2927_v29 = vadd.f32 %v2926_v10, %v2860_v20 }
 0x5b3   : > { %v3692_v58 = vmax.f32 %v2927_v29, 0.0  ;;  %v3564_v60 = vpop.f32.mrf.mxu1 }
 0x5b5   : > { %v3698_v33 = vpack.c.bf16 %v3692_v58, %v3689_v30 }
 0x5b8   : > { %3542 = vmatmul.bf16.gmra.mxu0 %v3204_v13 }
 0x5ba   : > { %3594 = vmatmul.bf16.vlgmr.msrb.gmra.mxu2 %v3202_v56 }
 0x5c1   : > { %3580 = vmatmul.bf16.gmra.mxu3 %v8071_v5 }
 0x5c8   : > { %3613 = vmatmul.bf16.vlgmr.msrb.gmra.mxu0 %v3205_v18  ;;  %v3633_v18 = vpop.f32.mrf.mxu1 }
 0x5ca   : > { %3599 = vmatmul.bf16.gmra.mxu2 %v3201_v42 }
 0x5d0   : > { %v3635_v14 = vpop.f32.mrf.mxu1 }
 0x5d1   : > { %3905 = vmatmul.bf16.vlgmr.msrb.gmra.mxu3 %v3695_v25 }
 0x5d8   : > { %3618 = vmatmul.bf16.gmra.mxu0 %v3204_v13  ;;  %v3638_v40 = vpop.f32.mrf.mxu1 }
 0x5e1   : > { %3910 = vmatmul.bf16.gmra.mxu3 %v3698_v33  ;;  %v6479_v33 = vld [vmem:[%s8966_s19 + $0x70] sm:$0xff] }
 0x5e2   : > { %3917 = vmatpush.bf16.msra.mxu2 %v6479_v33 }
 0x614   : > { %v3500_v5 = vpop.f32.mrf.mxu3 }
 0x615   : > { %v3501_v46 = vadd.f32 %v3500_v5, %v3187_v52 }
 0x61c   : > { %v3502_v43 = vpop.f32.mrf.mxu3 }
 0x61d   : > { %v3519_v35 = vpop.f32.mrf.mxu2  ;;  %v3503_v15 = vadd.f32 %v3502_v43, %v3187_v52 }
 0x61e   : > { %v3520_v56 = vadd.f32 %v3519_v35, %v3501_v46  ;;  %v6478_v35 = vld [vmem:[%s8966_s19 + $0x68] sm:$0xff] }
 0x61f   : > { %3918 = vmatpush.bf16.msra.mxu2 %v6478_v35 }
 0x624   : > { %v3505_v42 = vpop.f32.mrf.mxu3 }
 0x625   : > { %v3521_v7 = vpop.f32.mrf.mxu2  ;;  %v3538_v26 = vpop.f32.mrf.mxu0  ;;  %v3506_v19 = vadd.f32 %v3505_v42, %v3187_v52  ;;  %v6477_v42 = vld [vmem:[%s8966_s19 + $0x60] sm:$0xff] }
 0x626   : > { %v3522_v49 = vadd.f32 %v3521_v7, %v3503_v15  ;;  %v3539_v45 = vadd.f32 %v3538_v26, %v3520_v56  ;;  %3919 = vmatpush.bf16.msra.mxu2 %v6477_v42  ;;  %v6476_v56 = vld [vmem:[%s8966_s19 + $0x58] sm:$0xff]  ;;  %v6495_v42 = vld [vmem:[%s8968_s21 + $0x34] sm:$0xf] }
 0x628   : > { %v3558_v53 = vadd.f32 %v3557_v34, %v3539_v45 }
 0x62a   : > { %3920 = vmatpush.bf16.msra.mxu2 %v6476_v56  ;;  %v6494_v56 = vld [vmem:[%s8968_s21 + $0x24] sm:$0xf0] }
 0x62c   : > { %v3507_v51 = vpop.f32.mrf.mxu3 }
 0x62d   : > { %v3524_v47 = vpop.f32.mrf.mxu2  ;;  %v3540_v48 = vpop.f32.mrf.mxu0  ;;  %v3508_v1 = vadd.f32 %v3507_v51, %v3187_v52 }
 0x62e   : > { %v3541_v50 = vadd.f32 %v3540_v48, %v3522_v49  ;;  %v3525_v4 = vadd.f32 %v3524_v47, %v3506_v19  ;;  %v3640_v48 = vpop.f32.mrf.mxu1  ;;  %v6486_v19 = vld [vmem:[%s8966_s19 + $0xa8] sm:$0xff] }
 0x630   : > { %v3560_v54 = vadd.f32 %v3559_v3, %v3541_v50  ;;  %v6475_v50 = vld [vmem:[%s8966_s19 + $0x50] sm:$0xff] }
 0x631   : > { %3921 = vmatpush.bf16.msra.mxu2 %v6475_v50  ;;  %v6492_v50 = vld [vmem:[%s8968_s21 + $0x14] sm:$0xf0] }
 0x632   : > { %v6629_v55 = vpack.i.bf16 %v3560_v54, %v3558_v53 }
 0x634   : > { %6630 = vrot.lane.b32.xlu2 %v6629_v55, %s9034_s3  ;;  %v3576_v63 = vpop.f32.mrf.mxu3  ;;  %v6474_v55 = vld [vmem:[%s8966_s19 + $0x48] sm:$0xff] }
 0x635   : > { %v3526_v59 = vpop.f32.mrf.mxu2  ;;  %v3543_v41 = vpop.f32.mrf.mxu0  ;;  %v3577_v21 = vadd.f32 %v3576_v63, %v3188_v36  ;;  %3922 = vmatpush.bf16.msra.mxu2 %v6474_v55 }
 0x636   : > { %v3527_v6 = vadd.f32 %v3526_v59, %v3508_v1  ;;  %v3544_v38 = vadd.f32 %v3543_v41, %v3525_v4  ;;  %v6473_v59 = vld [vmem:[%s8966_s19 + $0x40] sm:$0xff]  ;;  %v6488_v41 = vld [vmem:[%s8966_s19 + $0xb8] sm:$0xff]  ;;  %v2941_v1 = vadd.f32 %v8008_v0, %v7931_v44  ;;  %v6483_v0 = vld [vmem:[%s8966_s19 + $0x90] sm:$0xff] }
 0x637   : > { %3935 = vmatpush.bf16.msra.mxu0 %v6488_v41  ;;  %v6484_v44 = vld [vmem:[%s8966_s19 + $0x98] sm:$0xff]  ;;  %v5935_v41 = vld [vmem:[%s8968_s21] sm:$0xf] }
 0x638   : > { %v3563_v16 = vadd.f32 %v3562_v39, %v3544_v38 }
 0x639   : > { %3923 = vmatpush.bf16.msra.mxu2 %v6473_v59 }
 0x63c   : > { %v3578_v31 = vpop.f32.mrf.mxu3 }
 0x63d   : > { %v3545_v8 = vpop.f32.mrf.mxu0  ;;  %v3595_v12 = vpop.f32.mrf.mxu2  ;;  %v3579_v22 = vadd.f32 %v3578_v31, %v3188_v36 }
 0x63e   : > { %v3546_v13 = vadd.f32 %v3545_v8, %v3527_v6  ;;  %v3596_v24 = vadd.f32 %v3595_v12, %v3577_v21 }
 0x640   : > { %v3565_v17 = vadd.f32 %v3564_v60, %v3546_v13  ;;  %v6487_v60 = vld [vmem:[%s8966_s19 + $0xb0] sm:$0xff] }
 0x641   : > { %3936 = vmatpush.bf16.msra.mxu0 %v6487_v60  ;;  %v6490_v60 = vld [vmem:[%s8968_s21 + $0x4] sm:$0xf0] }
 0x642   : > { %v6639_v32 = vpack.i.bf16 %v3565_v17, %v3563_v16  ;;  %v6485_v17 = vld [vmem:[%s8966_s19 + $0xa0] sm:$0xff] }
 0x644   : > { %6640 = vrot.lane.b32.xlu1 %v6639_v32, %s9034_s3  ;;  %v3581_v10 = vpop.f32.mrf.mxu3 }
 0x645   : > { %v3597_v11 = vpop.f32.mrf.mxu2  ;;  %v3614_v20 = vpop.f32.mrf.mxu0  ;;  %v3582_v7 = vadd.f32 %v3581_v10, %v3188_v36  ;;  %3937 = vmatpush.bf16.msra.mxu0 %v6486_v19  ;;  %v6489_v19 = vld [vmem:[%s8968_s21 + $0x4] sm:$0xf] }
 0x646   : > { %v3598_v57 = vadd.f32 %v3597_v11, %v3579_v22  ;;  %v3615_v25 = vadd.f32 %v3614_v20, %v3596_v24 }
 0x648   : > { %v3634_v5 = vadd.f32 %v3633_v18, %v3615_v25  ;;  %v6481_v18 = vld [vmem:[%s8966_s19 + $0x80] sm:$0xff] }
 0x649   : > { %3938 = vmatpush.bf16.msra.mxu0 %v6485_v17 }
 0x64c   : > { %v3583_v52 = vpop.f32.mrf.mxu3 }
 0x64d   : > { %v3616_v29 = vpop.f32.mrf.mxu0  ;;  %v3600_v30 = vpop.f32.mrf.mxu2  ;;  %v3584_v46 = vadd.f32 %v3583_v52, %v3188_v36  ;;  %3939 = vmatpush.bf16.msra.mxu0 %v6484_v44  ;;  %v6496_v52 = vld [vmem:[%s8968_s21 + $0x34] sm:$0xf0] }
 0x64e   : > { %v3617_v58 = vadd.f32 %v3616_v29, %v3598_v57  ;;  %v3601_v15 = vadd.f32 %v3600_v30, %v3582_v7 }
 0x650   : > { %v3636_v34 = vadd.f32 %v3635_v14, %v3617_v58 }
 0x651   : > { %3940 = vmatpush.bf16.msra.mxu0 %v6483_v0 }
 0x652   : > { %v6634_v43 = vpack.i.bf16 %v3636_v34, %v3634_v5 }
 0x654   : > { %6635 = vrot.lane.b32.xlu0 %v6634_v43, %s9034_s3  ;;  %v3906_v59 = vpop.f32.mrf.mxu3 }
 0x655   : > { %v3619_v3 = vpop.f32.mrf.mxu0  ;;  %v3602_v26 = vpop.f32.mrf.mxu2 }
 0x656   : > { %v3603_v39 = vadd.f32 %v3602_v26, %v3584_v46  ;;  %v3620_v49 = vadd.f32 %v3619_v3, %v3601_v15  ;;  %v5959_v3 = vld [vmem:[%s8968_s21 + $0x30] sm:$0xf]  ;;  %v5961_v26 = vld [vmem:[%s8968_s21 + $0x38] sm:$0xf0]  ;;  %v5951_v15 = vld [vmem:[%s8968_s21 + $0x20] sm:$0xf] }
 0x657   : > { %v5960_v7 = vor.u32 %v6496_v52, %v5959_v3  ;;  %v5964_v46 = vor.u32 %v6495_v42, %v5961_v26 }
 0x658   : > { %v3639_v51 = vadd.f32 %v3638_v40, %v3620_v49  ;;  %v5952_v49 = vor.u32 %v6494_v56, %v5951_v15 }
 0x659   : > { %4048 = vmatpush.bf16.msra.mxu1 %v5960_v7  ;;  %4067 = vmatpush.bf16.msra.mxu3 %v5964_v46 }
 0x65d   : > { %v3621_v45 = vpop.f32.mrf.mxu0  ;;  %4049 = vmatpush.bf16.msra.mxu1 %v5952_v49 }
 0x65e   : > { %v3622_v47 = vadd.f32 %v3621_v45, %v3603_v39  ;;  %v6493_v39 = vld [vmem:[%s8968_s21 + $0x24] sm:$0xf]  ;;  %v5953_v45 = vld [vmem:[%s8968_s21 + $0x28] sm:$0xf0] }
 0x660   : > { %v3641_v53 = vadd.f32 %v3640_v48, %v3622_v47  ;;  %v5956_v47 = vor.u32 %v6493_v39, %v5953_v45  ;;  %v5943_v48 = vld [vmem:[%s8968_s21 + $0x10] sm:$0xf] }
 0x662   : > { %v6644_v54 = vpack.i.bf16 %v3641_v53, %v3639_v51  ;;  %4068 = vmatpush.bf16.msra.mxu3 %v5956_v47  ;;  %v6491_v51 = vld [vmem:[%s8968_s21 + $0x14] sm:$0xf]  ;;  %v5944_v53 = vor.u32 %v6492_v50, %v5943_v48  ;;  %v4126_v50 = vunpack.c.l.b16 %v4086_v23 }
 0x664   : > { %6645 = vrot.lane.b32.xlu2 %v6644_v54, %s9034_s3  ;;  %v5945_v54 = vld [vmem:[%s8968_s21 + $0x18] sm:$0xf0]  ;;  %4050 = vmatpush.bf16.msra.mxu1 %v5944_v53 }
 0x665   : > { %v5948_v55 = vor.u32 %v6491_v51, %v5945_v54 }
 0x667   : > { %4069 = vmatpush.bf16.msra.mxu3 %v5948_v55  ;;  %v3971_v55 = vld [vmem:[#allocation2 + $0x14] sm:$0x1] }
 0x68e   : > { %v6631_v63 = vpop.permute.xlu2 %6630 }
 0x68f   : > { %v6633_v4 = vunpack.i.h.bf16 %v6631_v63  ;;  %v6632_v6 = vunpack.i.l.bf16 %v6631_v63  ;;  %v5936_v63 = vor.u32 %v6490_v60, %v5935_v41 }
 0x691   : > { %v3680_v38 = vsel %vm1273_vm3, %v2941_v1, %v6633_v4  ;;  %v3679_v8 = vsel %vm1273_vm3, %v7966_v2, %v6632_v6  ;;  %v6482_v2 = vld [vmem:[%s8966_s19 + $0x88] sm:$0xff]  ;;  %4051 = vmatpush.bf16.msra.mxu1 %v5936_v63 }
 0x692   : > { %v3687_v12 = vmax.f32 %v3680_v38, 0.0  ;;  %v3684_v13 = vmax.f32 %v3679_v8, 0.0  ;;  %3941 = vmatpush.bf16.msra.mxu0 %v6482_v2  ;;  %v5937_v1 = vld [vmem:[%s8968_s21 + $0x8] sm:$0xf0]  ;;  %v6654_v38 = vld [vmem:[%s8967_s20] ss:$0 sm:$0xff] }
 0x693   : > { %v3907_v8 = vadd.f32 %v6654_v38, %v3906_v59 }
 0x694   : > { %v3696_v16 = vpack.c.bf16 %v3687_v12, %v3684_v13  ;;  %v3908_v12 = vpop.f32.mrf.mxu3 }
 0x695   : > { %v3909_v2 = vadd.f32 %v6654_v38, %v3908_v12 }
 0x696   : > { %3924 = vmatmul.bf16.vlgmr.msra.gmra.mxu2 %v3696_v16  ;;  %3942 = vmatpush.bf16.msra.mxu0 %v6481_v18 }
 0x6b6   : > { %v6641_v32 = vpop.permute.xlu1 %6640 }
 0x6b7   : > { %v6643_v31 = vunpack.i.h.bf16 %v6641_v32  ;;  %v6642_v36 = vunpack.i.l.bf16 %v6641_v32 }
 0x6b9   : > { %v3681_v11 = vsel %vm1273_vm3, %v8062_v62, %v6642_v36  ;;  %v3682_v20 = vsel %vm1273_vm3, %v8112_v28, %v6643_v31 }
 0x6ba   : > { %v3690_v21 = vmax.f32 %v3681_v11, 0.0  ;;  %v3693_v22 = vmax.f32 %v3682_v20, 0.0 }
 0x6bc   : > { %v3699_v24 = vpack.c.bf16 %v3693_v22, %v3690_v21 }
 0x6be   : > { %3929 = vmatmul.bf16.gmra.mxu2 %v3699_v24  ;;  %v6646_v33 = vpop.permute.xlu2 %6645 }
 0x6bf   : > { %v6648_v62 = vunpack.i.h.bf16 %v6646_v33  ;;  %v6647_v5 = vunpack.i.l.bf16 %v6646_v33 }
 0x6c1   : > { %v3669_v28 = vsel %vm1273_vm3, %v6642_v36, %v6647_v5  ;;  %v3670_v34 = vsel %vm1273_vm3, %v6643_v31, %v6648_v62  ;;  %v3911_v36 = vpop.f32.mrf.mxu3  ;;  %v4082_v62 = vld [vmem:[#allocation2 + $0x4] sm:$0xe] }
 0x6c2   : > { %v3691_v43 = vmax.f32 %v3669_v28, 0.0  ;;  %v3694_v35 = vmax.f32 %v3670_v34, 0.0  ;;  %v3912_v24 = vadd.f32 %v6654_v38, %v3911_v36  ;;  %v4088_v34 = vld [vmem:[#allocation2 + $0x4] sm:$0x8] }
 0x6c3   : > { %v4135_v26 = vunpack.c.l.b16 %v4088_v34 }
 0x6c4   : > { %v3700_v40 = vpack.c.bf16 %v3694_v35, %v3691_v43  ;;  %v4099_v35 = vunpack.c.l.b16 %v4082_v62 }
 0x6c6   : > { %v6636_v14 = vpop.permute.xlu0 %6635 }
 0x6c7   : > { %v6638_v57 = vunpack.i.h.bf16 %v6636_v14  ;;  %v6637_v25 = vunpack.i.l.bf16 %v6636_v14 }
 0x6c9   : > { %v3667_v10 = vsel %vm1273_vm3, %v6632_v6, %v6637_v25  ;;  %v3668_v29 = vsel %vm1273_vm3, %v6633_v4, %v6638_v57  ;;  %v5940_v4 = vor.u32 %v6489_v19, %v5937_v1 }
 0x6ca   : > { %v3685_v27 = vmax.f32 %v3667_v10, 0.0  ;;  %v3688_v58 = vmax.f32 %v3668_v29, 0.0 }
 0x6cb   : > { %4070 = vmatpush.bf16.msra.mxu3 %v5940_v4 }
 0x6cc   : > { %v3697_v30 = vpack.c.bf16 %v3688_v58, %v3685_v27  ;;  %v3913_v58 = vpop.f32.mrf.mxu3 }
 0x6cd   : > { %v3914_v9 = vadd.f32 %v6654_v38, %v3913_v58 }
 0x6ce   : > { %3943 = vmatmul.bf16.vlgmr.msra.gmra.mxu0 %v3697_v30 }
 0x6de   : > { %3948 = vmatmul.bf16.gmra.mxu0 %v3700_v40 }
 0x719   : > { %v3925_v6 = vpop.f32.mrf.mxu2 }
 0x71a   : > { %v3926_v13 = vadd.f32 %v3925_v6, %v3907_v8 }
 0x721   : > { %v3927_v44 = vpop.f32.mrf.mxu2 }
 0x722   : > { %v3928_v31 = vadd.f32 %v3927_v44, %v3909_v2 }
 0x741   : > { %v3930_v21 = vpop.f32.mrf.mxu2 }
 0x742   : > { %v3931_v25 = vadd.f32 %v3930_v21, %v3912_v24 }
 0x749   : > { %v3932_v5 = vpop.f32.mrf.mxu2 }
 0x74a   : > { %v3933_v40 = vadd.f32 %v3932_v5, %v3914_v9 }
 0x74b   : > { %v3944_v16 = vpop.f32.mrf.mxu0 }
 0x74c   : > { %v3945_v17 = vadd.f32 %v3944_v16, %v3926_v13 }
 0x74e   : > { %v3954_v0 = vmax.f32 %v3945_v17, 0.0 }
 0x750   : > { %v3958_v18 = vsel %vm6877_vm11, %v3954_v0, 0.0  ;;  %vm9059_vm11 = vmmov %vm9057_vm6 }
 0x751   : > { %v3962_v32 = vpack.c.bf16 %v3958_v18, %v3958_v18 }
 0x753   : > { %3966 = vst.msk [vmem:[#allocation2 + $0x8] sm:$0xf] %vm9057_vm6, %v3962_v32  ;;  %v3946_v11 = vpop.f32.mrf.mxu0  ;;  %v3992_v10 = vunpack.c.l.b16 %v3962_v32 }
 0x754   : > { %v3947_v20 = vadd.f32 %v3946_v11, %v3928_v31 }
 0x756   : > { %v3955_v22 = vmax.f32 %v3947_v20, 0.0 }
 0x758   : > { %v3959_v14 = vsel %vm6885_vm4, %v3955_v22, 0.0  ;;  %vm3969_vm4 = vcmask 516096  }
 0x759   : > { %v3963_v57 = vpack.c.bf16 %v3959_v14, %v3959_v14 }
 0x75a   : > { %v4091_v36 = vld [vmem:[#allocation2 + $0x8] sm:$0xc] }
 0x75b   : > { %3967 = vst.msk [vmem:[#allocation2 + $0xc] sm:$0xf] %vm9058_vm14, %v3963_v57  ;;  %v3993_v61 = vunpack.c.l.b16 %v3963_v57  ;;  %v3949_v29 = vpop.f32.mrf.mxu0  ;;  %v4093_v14 = vld [vmem:[#allocation2 + $0x8] sm:$0x8]  ;;  %v4188_v34 = vunpack.c.l.b16 %v4091_v36  ;;  %v6512_v36 = vld [vmem:[%s8970_s23 + $0x74] sm:$0xf0] }
 0x75c   : > { %v3950_v27 = vadd.f32 %v3949_v29, %v3931_v25 }
 0x75d   : > { %v8306_v30 = vpack.c.b16 %v3993_v61, %v3992_v10 }
 0x75e   : > { %v3956_v33 = vmax.f32 %v3950_v27, 0.0 }
 0x75f   : > { %5965 = vmatmul.msk.bf16.vlgmr.msra.gmra.mxu1 %vm1273_vm3, %v8306_v30  ;;  %5967 = vmatmul.msk.bf16.vlgmr.msra.gmra.mxu3 %vm1273_vm3, %v8306_v30  ;;  %v4160_v0 = vrot.slane %v8306_v30, 7 }
 0x760   : > { %v3960_v28 = vsel %vm6899_vm13, %v3956_v33, 0.0  ;;  %vm3970_vm13 = vmand %vm3969_vm4, %vm1051_vm7 }
 0x761   : > { %v3964_v43 = vpack.c.bf16 %v3960_v28, %v3960_v28 }
 0x762   : > { %v6588_v3 = vld [vmem:[#allocation2 + $0x8] sm:$0xff]  }
 0x763   : > { %3968 = vst.msk [vmem:[#allocation2 + $0x10] sm:$0xf] %vm9059_vm11, %v3964_v43  ;;  %v3951_v52 = vpop.f32.mrf.mxu0  ;;  %v4168_v42 = vshrl.u32 %v6588_v3, 16  ;;  %v6583_v7 = vunpack.c.l.b16 %v6588_v3  ;;  %v4171_v56 = vshll.u32 %v6588_v3, 16  ;;  %v3994_v54 = vunpack.c.l.b16 %v3964_v43 }
 0x764   : > { %v3952_v46 = vadd.f32 %v3951_v52, %v3933_v40  ;;  %v6584_v59 = vunpack.c.h.b16 %v6588_v3 }
 0x765   : > { %v8315_v15 = vrot.slane %v4168_v42, 7  ;;  %v8317_v39 = vpack.c.b16 %v6583_v7, %v4099_v35  ;;  %v4137_v47 = vpack.c.b16 %v6583_v7, %v4135_v26  ;;  %v4128_v8 = vpack.c.b16 %v6583_v7, %v4126_v50 }
 0x766   : > { %v3957_v49 = vmax.f32 %v3952_v46, 0.0  ;;  %v4218_v35 = vunpack.c.l.b16 %v4093_v14  ;;  %v4190_v7 = vpack.c.b16 %v6584_v59, %v4188_v34  ;;  %v6526_v34 = vld [vmem:[%s8970_s23 + $0xe4] sm:$0xf0] }
 0x767   : > { %v4173_v45 = vor.u32 %v4171_v56, %v8315_v15  ;;  %v4108_v53 = vshll.u32 %v8317_v39, 16  ;;  %v4140_v4 = vshrl.u32 %v4137_v47, 16  ;;  %v4143_v44 = vshll.u32 %v4137_v47, 16 }
 0x768   : > { %v3961_v48 = vsel %vm6911_vm5, %v3957_v49, 0.0  ;;  %v4106_v18 = vshrl.u32 %v8317_v39, 16  ;;  %v4130_v24 = vrot.slane %v4128_v8, 1  ;;  %v4220_v26 = vpack.c.b16 %v6584_v59, %v4218_v35 }
 0x769   : > { %v3965_v51 = vpack.c.bf16 %v3961_v48, %v3961_v48  ;;  %4182 = vrot.lane.b32.xlu2 %v4173_v45, %s9034_s3  ;;  %v4110_v16 = vrot.slane %v4108_v53, 1  ;;  %v4142_v31 = vrot.slane %v4140_v4, 2  ;;  %v4145_v58 = vrot.slane %v4143_v44, 3 }
 0x76a   : > { %v4085_v41 = vld [vmem:[#allocation2 + $0x10] sm:$0x3]  ;;  %v4192_v48 = vrot.slane %v4190_v7, 1  ;;  %v4222_v50 = vrot.slane %v4220_v26, 2  ;;  %vm9060_vm5 = vsmask.f32 6400 }
 0x76b   : > { %v4089_v60 = vld [vmem:[#allocation2 + $0x10] sm:$0xf]  ;;  %v3972_v19 = vsel %vm3970_vm13, %v3965_v51, %v3971_v55  ;;  %v3995_v63 = vunpack.c.l.b16 %v3965_v51  ;;  %v4102_v1 = vunpack.c.l.b16 %v4085_v41  ;;  %v4111_v57 = vor.u32 %v4110_v16, %v4106_v18  ;;  %v6504_v26 = vld [vmem:[%s8970_s23 + $0x34] sm:$0xf0] }
 0x76c   : > { %v4087_v6 = vld [vmem:[#allocation2 + $0x10] sm:$0x7]  ;;  %3973 = vst [vmem:[#allocation2 + $0x14] sm:$0x1] %v3972_v19  ;;  %v4136_v37 = vunpack.c.l.b16 %v4089_v60  ;;  %v4146_v49 = vor.u32 %v4145_v58, %v4142_v31  ;;  %v6544_v58 = vld [vmem:[%s8970_s23 + $0x174] sm:$0xf0] }
 0x76d   : > { %v4127_v38 = vunpack.c.l.b16 %v4087_v6  ;;  %v3997_v12 = vpack.c.b16 %v3995_v63, %v3994_v54  ;;  %v8325_v13 = vpack.c.b16 %v4102_v1, %v6584_v59  ;;  %v4199_v6 = vshll.u32 %v4190_v7, 16 }
 0x76e   : > { %v4138_v17 = vpack.c.b16 %v4136_v37, %v6584_v59 }
 0x76f   : > { %v8328_v2 = vpack.c.b16 %v4127_v38, %v6584_v59  ;;  %5966 = vmatmul.msk.bf16.gmra.mxu1 %vm1273_vm3, %v3997_v12  ;;  %5968 = vmatmul.msk.bf16.gmra.mxu3 %vm1273_vm3, %v3997_v12  ;;  %v4113_v32 = vshll.u32 %v8325_v13, 16  ;;  %v4161_v11 = vrot.slane %v3997_v12, 7  ;;  %v4117_v10 = vshrl.u32 %v8325_v13, 16 }
 0x770   : > { %v4148_v20 = vshrl.u32 %v4138_v17, 16  ;;  %v4151_v21 = vshll.u32 %v4138_v17, 16  ;;  %v4196_v59 = vshrl.u32 %v4190_v7, 16  ;;  %v4201_v44 = vrot.slane %v4199_v6, 2  ;;  %v5995_v7 = vld [vmem:[%s8970_s23 + $0x30] sm:$0xf] }
 0x771   : > { %v4131_v22 = vrot.slane %v8328_v2, 1  ;;  %v4115_v25 = vrot.slane %v4113_v32, 1  ;;  %v8339_v61 = vsel %vm1197_vm8, %v4160_v0, %v4161_v11  ;;  %v6133_v2 = vld [vmem:[%s8970_s23 + $0x148] sm:$0xf0] }
 0x772   : > { %v4150_v29 = vrot.slane %v4148_v20, 2  ;;  %v4153_v27 = vrot.slane %v4151_v21, 3  ;;  %v4198_v17 = vrot.slane %v4196_v59, 1  ;;  %v6019_v20 = vld [vmem:[%s8970_s23 + $0x60] sm:$0xf] }
 0x773   : > { %v8344_v33 = vsel %vm1161_vm12, %v4130_v24, %v4131_v22  ;;  %v4116_v62 = vsel %vm1135_vm10, %v4111_v57, %v4115_v25  ;;  %v4119_v5 = vor.u32 %v4117_v10, %v4115_v25  ;;  %v4090_v9 = vld [vmem:[#allocation2 + $0x14] sm:$0x1]  ;;  %v6510_v21 = vld [vmem:[%s8970_s23 + $0x64] sm:$0xf0]  ;;  %v6011_v24 = vld [vmem:[%s8970_s23 + $0x50] sm:$0xf] }
 0x774   : > { %v4092_v28 = vld [vmem:[#allocation2 + $0x14] sm:$0x7]  ;;  %4120 = vrot.lane.b32.xlu0 %v4116_v62, %s9034_s3  ;;  %v4154_v40 = vor.u32 %v4153_v27, %v4150_v29  ;;  %v4164_v3 = vunpack.c.l.b16 %v4090_v9  ;;  %v4202_v32 = vor.u32 %v4201_v44, %v4198_v17  ;;  %v6020_v14 = vor.u32 %v6510_v21, %v6019_v20  ;;  %v6508_v57 = vld [vmem:[%s8970_s23 + $0x54] sm:$0xf0]  ;;  %v6091_v25 = vld [vmem:[%s8970_s23 + $0xf0] sm:$0xf] }
 0x775   : > { %v4094_v43 = vld [vmem:[#allocation2 + $0x14] sm:$0xf]  ;;  %v4189_v52 = vunpack.c.l.b16 %v4092_v28  ;;  %4122 = vrot.lane.b32.xlu1 %v4119_v5, %s9034_s3  ;;  %v6528_v10 = vld [vmem:[%s8970_s23 + $0xf4] sm:$0xf0]  ;;  %v6155_v27 = vld [vmem:[%s8970_s23 + $0x170] sm:$0xf]  ;;  %v6012_v62 = vor.u32 %v6508_v57, %v6011_v24 }
 0x776   : > { %v4219_v42 = vunpack.c.l.b16 %v4094_v43  ;;  %4158 = vrot.lane.b32.xlu2 %v4154_v40, %s9034_s3  ;;  %v4166_v46 = vpack.c.b16 %v4164_v3, %v4136_v37  ;;  %v4155_v1 = vsel %vm1175_vm1, %v4146_v49, %v4154_v40  ;;  %v6092_v29 = vor.u32 %v6528_v10, %v6091_v25  ;;  %v6003_v9 = vld [vmem:[%s8970_s23 + $0x40] sm:$0xf]  ;;  %v6506_v43 = vld [vmem:[%s8970_s23 + $0x44] sm:$0xf0]  ;;  %v6524_v49 = vld [vmem:[%s8970_s23 + $0xd4] sm:$0xf0] }
 0x777   : > { %v8350_v56 = vpack.c.b16 %v4189_v52, %v4136_v37  ;;  %v6156_v5 = vor.u32 %v6544_v58, %v6155_v27  ;;  %v6083_v28 = vld [vmem:[%s8970_s23 + $0xe0] sm:$0xf]  ;;  %v6542_v3 = vld [vmem:[%s8970_s23 + $0x164] sm:$0xf0]  ;;  %v6536_v20 = vld [vmem:[%s8970_s23 + $0x134] sm:$0xf0] }
 0x778   : > { %v4221_v23 = vpack.c.b16 %v4219_v42, %v4136_v37  ;;  %v4175_v45 = vshrl.u32 %v4166_v46, 16  ;;  %v4178_v54 = vshll.u32 %v4166_v46, 16  ;;  %4741 = vmatpush.bf16.msrb.mxu0 %v6092_v29  ;;  %v6084_v35 = vor.u32 %v6526_v34, %v6083_v28  ;;  %v6147_v40 = vld [vmem:[%s8970_s23 + $0x160] sm:$0xf]  ;;  %v6075_v46 = vld [vmem:[%s8970_s23 + $0xd0] sm:$0xf]  ;;  %vm8823_vm1 = vmand %vm1197_vm8, %vm1051_vm7 }
 0x779   : > { %v4193_v47 = vrot.slane %v8350_v56, 1  ;;  %v4204_v55 = vshrl.u32 %v8350_v56, 16  ;;  %v4207_v41 = vshll.u32 %v8350_v56, 16  ;;  %4760 = vmatpush.bf16.msrb.mxu1 %v6156_v5  ;;  %v6148_v52 = vor.u32 %v6542_v3, %v6147_v40  ;;  %v6502_v59 = vld [vmem:[%s8970_s23 + $0x24] sm:$0xf0] }
 0x77a   : > { %v4223_v51 = vrot.slane %v4221_v23, 2  ;;  %v4177_v53 = vrot.slane %v4175_v45, 7  ;;  %v6004_v42 = vor.u32 %v6506_v43, %v6003_v9  ;;  %v5996_v23 = vor.u32 %v6504_v26, %v5995_v7  ;;  %v6139_v45 = vld [vmem:[%s8970_s23 + $0x150] sm:$0xf]  ;;  %v6558_v17 = vld [vmem:[%s8970_s23 + $0x1e4] sm:$0xf0] }
 0x77b   : > { %v8358_v60 = vsel %vm1161_vm12, %v4192_v48, %v4193_v47  ;;  %v4206_v8 = vrot.slane %v4204_v55, 1  ;;  %v4209_v12 = vrot.slane %v4207_v41, 2  ;;  %v6540_v48 = vld [vmem:[%s8970_s23 + $0x154] sm:$0xf0]  ;;  %v5987_v55 = vld [vmem:[%s8970_s23 + $0x20] sm:$0xf] }
 0x77c   : > { %v4224_v19 = vsel %vm1265_vm15, %v4222_v50, %v4223_v51  ;;  %v8361_v63 = vrot.slane %v4223_v51, 1  ;;  %v4180_v4 = vor.u32 %v4178_v54, %v4177_v53  ;;  %4742 = vmatpush.bf16.msrb.mxu0 %v6084_v35  ;;  %v6076_v50 = vor.u32 %v6524_v49, %v6075_v46  ;;  %v6219_v53 = vld [vmem:[%s8970_s23 + $0x1f0] sm:$0xf]  ;;  %v6560_v54 = vld [vmem:[%s8970_s23 + $0x1f4] sm:$0xf0] }
 0x77d   : > { %v4345_v37 = vrot.slane %v4224_v19, 1  ;;  %4156 = vrot.lane.b32.xlu1 %v4155_v1, %s9034_s3  ;;  %v4210_v18 = vor.u32 %v4209_v12, %v4206_v8  ;;  %4761 = vmatpush.bf16.msrb.mxu1 %v6148_v52  ;;  %v6140_v51 = vor.u32 %v6540_v48, %v6139_v45  ;;  %v6220_v41 = vor.u32 %v6560_v54, %v6219_v53  ;;  %v6067_v19 = vld [vmem:[%s8970_s23 + $0xc0] sm:$0xf]  ;;  %v6522_v1 = vld [vmem:[%s8970_s23 + $0xc4] sm:$0xf0] }
 0x77e   : > { %v4181_v38 = vsel %vm1051_vm7, %v8315_v15, %v4180_v4  ;;  %v6027_v15 = vld [vmem:[%s8970_s23 + $0x70] sm:$0xf]  ;;  %v5988_v4 = vor.u32 %v6502_v59, %v5987_v55  ;;  %v6068_v6 = vor.u32 %v6522_v1, %v6067_v19  ;;  %v6211_v8 = vld [vmem:[%s8970_s23 + $0x1e0] sm:$0xf]  ;;  %v6556_v57 = vld [vmem:[%s8970_s23 + $0x1d4] sm:$0xf0] }
 0x77f   : > { %v8369_v16 = vsel %vm1161_vm12, %v4345_v37, %v8361_v63  ;;  %4184 = vrot.lane.b32.xlu0 %v4181_v38, %s9034_s3  ;;  %v4211_v31 = vsel %vm9060_vm5, %v4202_v32, %v4210_v18  ;;  %v6028_v11 = vor.u32 %v6512_v36, %v6027_v15  ;;  %4779 = vmatpush.bf16.msrb.mxu3 %v6220_v41  ;;  %v6131_v37 = vld [vmem:[%s8970_s23 + $0x140] sm:$0xf]  ;;  %v6538_v38 = vld [vmem:[%s8970_s23 + $0x144] sm:$0xf0]  ;;  %v6500_v32 = vld [vmem:[%s8970_s23 + $0x14] sm:$0xf0] }
 0x780   : > { %4743 = vmatpush.bf16.msrb.mxu0 %v6076_v50  ;;  %v6132_v12 = vor.u32 %v6538_v38, %v6131_v37  ;;  %v6212_v44 = vor.u32 %v6558_v17, %v6211_v8  ;;  %v6520_v36 = vld [vmem:[%s8970_s23 + $0xb4] sm:$0xf0]  ;;  %v5971_v25 = vld [vmem:[%s8970_s23] sm:$0xf]  ;;  %v6498_v29 = vld [vmem:[%s8970_s23 + $0x4] sm:$0xf0] }
 0x781   : > { %4722 = vmatpush.bf16.msrb.mxu2 %v6028_v11  ;;  %4762 = vmatpush.bf16.msrb.mxu1 %v6140_v51  ;;  %v6123_v11 = vld [vmem:[%s8970_s23 + $0x130] sm:$0xf]  ;;  %v6051_v27 = vld [vmem:[%s8970_s23 + $0xa0] sm:$0xf]  ;;  %v6518_v58 = vld [vmem:[%s8970_s23 + $0xa4] sm:$0xf0] }
 0x782   : > { %v6124_v24 = vor.u32 %v6536_v20, %v6123_v11  ;;  %v6052_v5 = vor.u32 %v6518_v58, %v6051_v27  ;;  %v6115_v9 = vld [vmem:[%s8970_s23 + $0x120] sm:$0xf]  ;;  %v6534_v28 = vld [vmem:[%s8970_s23 + $0x124] sm:$0xf0]  ;;  %v6043_v3 = vld [vmem:[%s8970_s23 + $0x90] sm:$0xf] }
 0x783   : > { %4780 = vmatpush.bf16.msrb.mxu3 %v6212_v44  ;;  %v6195_v34 = vld [vmem:[%s8970_s23 + $0x1c0] sm:$0xf]  ;;  %v6116_v43 = vor.u32 %v6534_v28, %v6115_v9  ;;  %v6554_v35 = vld [vmem:[%s8970_s23 + $0x1c4] sm:$0xf0]  ;;  %v6516_v52 = vld [vmem:[%s8970_s23 + $0x94] sm:$0xf0] }
 0x784   : > { %4744 = vmatpush.bf16.msrb.mxu0 %v6068_v6  ;;  %v6196_v40 = vor.u32 %v6554_v35, %v6195_v34  ;;  %v6568_v7 = vld [vmem:[%s8970_s23 + $0x234] sm:$0xf0]  ;;  %v6044_v26 = vor.u32 %v6516_v52, %v6043_v3  ;;  %v6107_v46 = vld [vmem:[%s8970_s23 + $0x110] sm:$0xf]  ;;  %v6035_v51 = vld [vmem:[%s8970_s23 + $0x80] sm:$0xf] }
 0x785   : > { %4214 = vrot.lane.b32.xlu1 %v4210_v18, %s9034_s3  ;;  %4723 = vmatpush.bf16.msrb.mxu2 %v6020_v14  ;;  %v5979_v18 = vld [vmem:[%s8970_s23 + $0x10] sm:$0xf]  ;;  %v6532_v49 = vld [vmem:[%s8970_s23 + $0x114] sm:$0xf0]  ;;  %v6514_v53 = vld [vmem:[%s8970_s23 + $0x84] sm:$0xf0] }
 0x786   : > { %4763 = vmatpush.bf16.msrb.mxu1 %v6132_v12  ;;  %v5980_v15 = vor.u32 %v6500_v32, %v5979_v18  ;;  %v6203_v14 = vld [vmem:[%s8970_s23 + $0x1d0] sm:$0xf]  ;;  %v6108_v48 = vor.u32 %v6532_v49, %v6107_v46  ;;  %v6552_v50 = vld [vmem:[%s8970_s23 + $0x1b4] sm:$0xf0]  ;;  %v6036_v55 = vor.u32 %v6514_v53, %v6035_v51  ;;  %v6099_v41 = vld [vmem:[%s8970_s23 + $0x100] sm:$0xf] }
 0x787   : > { %4212 = vrot.lane.b32.xlu0 %v4211_v31, %s9034_s3  ;;  %v6059_v31 = vld [vmem:[%s8970_s23 + $0xb0] sm:$0xf]  ;;  %v6204_v10 = vor.u32 %v6556_v57, %v6203_v14  ;;  %v6530_v59 = vld [vmem:[%s8970_s23 + $0x104] sm:$0xf0]  ;;  %v6179_v19 = vld [vmem:[%s8970_s23 + $0x1a0] sm:$0xf] }
 0x788   : > { %v6060_v21 = vor.u32 %v6520_v36, %v6059_v31  ;;  %v6187_v45 = vld [vmem:[%s8970_s23 + $0x1b0] sm:$0xf]  ;;  %v6100_v1 = vor.u32 %v6530_v59, %v6099_v41  ;;  %v3982_v6 = vld [vmem:[%s8969_s22] sm:$0x3]  ;;  %v6511_v38 = vld [vmem:[%s8970_s23 + $0x74] sm:$0xf] }
 0x789   : > { %4724 = vmatpush.bf16.msrb.mxu2 %v6012_v62  ;;  %v5972_v62 = vor.u32 %v6498_v29, %v5971_v25  ;;  %4781 = vmatpush.bf16.msrb.mxu3 %v6204_v10  ;;  %v6188_v54 = vor.u32 %v6552_v50, %v6187_v45  ;;  %v6029_v8 = vld [vmem:[%s8970_s23 + $0x78] sm:$0xf0]  ;;  %v6243_v12 = vld [vmem:[%s8970_s23 + $0x220] sm:$0xf]  ;;  %v6566_v17 = vld [vmem:[%s8970_s23 + $0x224] sm:$0xf0] }
 0x78a   : > { %4745 = vmatpush.bf16.msrb.mxu0 %v6060_v21  ;;  %4764 = vmatpush.bf16.msrb.mxu1 %v6124_v24  ;;  %v6032_v44 = vor.u32 %v6511_v38, %v6029_v8  ;;  %v6171_v18 = vld [vmem:[%s8970_s23 + $0x190] sm:$0xf]  ;;  %v6244_v32 = vor.u32 %v6566_v17, %v6243_v12  ;;  %v6548_v31 = vld [vmem:[%s8970_s23 + $0x194] sm:$0xf0]  ;;  %v6093_v36 = vld [vmem:[%s8970_s23 + $0xf8] sm:$0xf0] }
 0x78b   : > { %v6172_v11 = vor.u32 %v6548_v31, %v6171_v18  ;;  %v6509_v21 = vld [vmem:[%s8970_s23 + $0x64] sm:$0xf]  ;;  %v6021_v24 = vld [vmem:[%s8970_s23 + $0x68] sm:$0xf0]  ;;  %v8594_v25 = vperm.slane %v3982_v6, 0  ;;  %v8605_v58 = vperm.slane %v3982_v6, 1 }
 0x78c   : > { %v6024_v57 = vor.u32 %v6509_v21, %v6021_v24  ;;  %v6163_v10 = vld [vmem:[%s8970_s23 + $0x180] sm:$0xf]  ;;  %v6546_v29 = vld [vmem:[%s8970_s23 + $0x184] sm:$0xf0]  ;;  %v6525_v27 = vld [vmem:[%s8970_s23 + $0xe4] sm:$0xf] }
 0x78d   : > { %4725 = vmatpush.bf16.msrb.mxu2 %v6004_v42  ;;  %v6251_v42 = vld [vmem:[%s8970_s23 + $0x230] sm:$0xf]  ;;  %4782 = vmatpush.bf16.msrb.mxu3 %v6196_v40  ;;  %v6085_v9 = vld [vmem:[%s8970_s23 + $0xe8] sm:$0xf0]  ;;  %v6507_v28 = vld [vmem:[%s8970_s23 + $0x54] sm:$0xf] }
 0x78e   : > { %4746 = vmatpush.bf16.msrb.mxu0 %v6052_v5  ;;  %4765 = vmatpush.bf16.msrb.mxu1 %v6116_v43  ;;  %v6088_v43 = vor.u32 %v6525_v27, %v6085_v9  ;;  %v6013_v35 = vld [vmem:[%s8970_s23 + $0x58] sm:$0xf0]  ;;  %v6235_v3 = vld [vmem:[%s8970_s23 + $0x210] sm:$0xf]  ;;  %v6564_v52 = vld [vmem:[%s8970_s23 + $0x214] sm:$0xf0] }
 0x78f   : > { %v6236_v46 = vor.u32 %v6564_v52, %v6235_v3  ;;  %v6543_v49 = vld [vmem:[%s8970_s23 + $0x174] sm:$0xf]  ;;  %v6157_v45 = vld [vmem:[%s8970_s23 + $0x178] sm:$0xf0]  ;;  %v6505_v53 = vld [vmem:[%s8970_s23 + $0x44] sm:$0xf] }
 0x790   : > { %v6160_v51 = vor.u32 %v6543_v49, %v6157_v45  ;;  %v6227_v38 = vld [vmem:[%s8970_s23 + $0x200] sm:$0xf]  ;;  %v6562_v8 = vld [vmem:[%s8970_s23 + $0x204] sm:$0xf0]  ;;  %v6503_v31 = vld [vmem:[%s8970_s23 + $0x34] sm:$0xf] }
 0x791   : > { %4726 = vmatpush.bf16.msrb.mxu2 %v5996_v23  ;;  %v6252_v23 = vor.u32 %v6568_v7, %v6251_v42  ;;  %4783 = vmatpush.bf16.msrb.mxu3 %v6188_v54  ;;  %v6016_v42 = vor.u32 %v6507_v28, %v6013_v35  ;;  %v6523_v7 = vld [vmem:[%s8970_s23 + $0xd4] sm:$0xf]  ;;  %v6005_v54 = vld [vmem:[%s8970_s23 + $0x48] sm:$0xf0]  ;;  %v6228_v21 = vor.u32 %v6562_v8, %v6227_v38  ;;  %v6501_v28 = vld [vmem:[%s8970_s23 + $0x24] sm:$0xf] }
 0x792   : > { %4747 = vmatpush.bf16.msrb.mxu0 %v6044_v26  ;;  %4766 = vmatpush.bf16.msrb.mxu1 %v6108_v48  ;;  %v6519_v24 = vld [vmem:[%s8970_s23 + $0xb4] sm:$0xf]  ;;  %v6517_v35 = vld [vmem:[%s8970_s23 + $0xa4] sm:$0xf]  ;;  %v6053_v52 = vld [vmem:[%s8970_s23 + $0xa8] sm:$0xf0] }
 0x793   : > { %v6213_v38 = vld [vmem:[%s8970_s23 + $0x1e8] sm:$0xf0]  ;;  %vm4943_vm10 = vcmask 1044484   ;;  %vm4944_vm15 = vsmask.f32 4352 }
 0x794   : > { %vm8832_vm2 = vmand %vm4943_vm10, %vm4944_vm15 }
 0x795   : > { %4727 = vmatpush.bf16.msrb.mxu2 %v5988_v4  ;;  %v6550_v4 = vld [vmem:[%s8970_s23 + $0x1a4] sm:$0xf0]  ;;  %vm4946_vm7 = vmor %vm8832_vm2, %vm8823_vm1 }
 0x796   : > { %4748 = vmatpush.bf16.msrb.mxu0 %v6036_v55  ;;  %v6180_v37 = vor.u32 %v6550_v4, %v6179_v19  ;;  %4767 = vmatpush.bf16.msrb.mxu1 %v6100_v1  ;;  %v6521_v55 = vld [vmem:[%s8970_s23 + $0xc4] sm:$0xf]  ;;  %v6008_v19 = vor.u32 %v6505_v53, %v6005_v54  ;;  %v6069_v1 = vld [vmem:[%s8970_s23 + $0xc8] sm:$0xf0]  ;;  %v5981_v53 = vld [vmem:[%s8970_s23 + $0x18] sm:$0xf0] }
 0x797   : > { %v6541_v4 = vld [vmem:[%s8970_s23 + $0x164] sm:$0xf]  ;;  %v6072_v18 = vor.u32 %v6521_v55, %v6069_v1 }
 0x798   : > { %4784 = vmatpush.bf16.msrb.mxu3 %v6180_v37  ;;  %v6149_v37 = vld [vmem:[%s8970_s23 + $0x168] sm:$0xf0]  ;;  %v6557_v1 = vld [vmem:[%s8970_s23 + $0x1e4] sm:$0xf] }
 0x799   : > { %4728 = vmatpush.bf16.msrb.mxu2 %v5980_v15  ;;  %v6527_v15 = vld [vmem:[%s8970_s23 + $0xf4] sm:$0xf] }
 0x79a   : > { %4817 = vmatpush.bf16.msra.mxu0 %v6032_v44  ;;  %v6096_v20 = vor.u32 %v6527_v15, %v6093_v36  ;;  %v5997_v15 = vld [vmem:[%s8970_s23 + $0x38] sm:$0xf0] }
 0x79c   : > { %4836 = vmatpush.bf16.msra.mxu1 %v6096_v20  ;;  %4785 = vmatpush.bf16.msrb.mxu3 %v6172_v11 }
 0x79d   : > { %4729 = vmatpush.bf16.msrb.mxu2 %v5972_v62  ;;  %v6164_v62 = vor.u32 %v6546_v29, %v6163_v10  ;;  %v6141_v29 = vld [vmem:[%s8970_s23 + $0x158] sm:$0xf0] }
 0x79e   : > { %4818 = vmatpush.bf16.msra.mxu0 %v6024_v57 }
 0x7a0   : > { %4786 = vmatpush.bf16.msrb.mxu3 %v6164_v62  ;;  %4837 = vmatpush.bf16.msra.mxu1 %v6088_v43 }
 0x7a1   : > { %4802 = vmatpush.bf16.msra.mxu2 %v6252_v23  ;;  %v6077_v23 = vld [vmem:[%s8970_s23 + $0xd8] sm:$0xf0] }
 0x7a2   : > { %4819 = vmatpush.bf16.msra.mxu0 %v6016_v42  ;;  %v6080_v50 = vor.u32 %v6523_v7, %v6077_v23  ;;  %v6559_v42 = vld [vmem:[%s8970_s23 + $0x1f4] sm:$0xf]  ;;  %v6221_v7 = vld [vmem:[%s8970_s23 + $0x1f8] sm:$0xf0] }
 0x7a3   : > { %v6224_v49 = vor.u32 %v6559_v42, %v6221_v7 }
 0x7a4   : > { %4855 = vmatpush.bf16.msra.mxu3 %v6160_v51  ;;  %4838 = vmatpush.bf16.msra.mxu1 %v6080_v50  ;;  %v6499_v51 = vld [vmem:[%s8970_s23 + $0x14] sm:$0xf] }
 0x7a5   : > { %4803 = vmatpush.bf16.msra.mxu2 %v6244_v32  ;;  %v6152_v32 = vor.u32 %v6541_v4, %v6149_v37  ;;  %v6045_v37 = vld [vmem:[%s8970_s23 + $0x98] sm:$0xf0] }
 0x7a6   : > { %4820 = vmatpush.bf16.msra.mxu0 %v6008_v19  ;;  %v6125_v19 = vld [vmem:[%s8970_s23 + $0x138] sm:$0xf0] }
 0x7a8   : > { %4856 = vmatpush.bf16.msra.mxu3 %v6152_v32  ;;  %4839 = vmatpush.bf16.msra.mxu1 %v6072_v18  ;;  %v6216_v18 = vor.u32 %v6557_v1, %v6213_v38  ;;  %v6549_v1 = vld [vmem:[%s8970_s23 + $0x1a4] sm:$0xf] }
 0x7a9   : > { %4804 = vmatpush.bf16.msra.mxu2 %v6236_v46 }
 0x7ad   : > { %4805 = vmatpush.bf16.msra.mxu2 %v6228_v21 }
 0x7c3   : > { %v4183_v5 = vpop.permute.xlu2 %4182 }
 0x7c4   : > { %v8697_v27 = vsel %vm1273_vm3, %v4160_v0, %v4183_v5 }
 0x7c5   : > { %v4339_v45 = vrot.slane %v8697_v27, 1 }
 0x7d0   : > { %v4159_v36 = vpop.permute.xlu2 %4158 }
 0x7d1   : > { %v4234_v43 = vsel %vm1273_vm3, %v4131_v22, %v4159_v36  ;;  %v5973_v36 = vld [vmem:[%s8970_s23 + $0x8] sm:$0xf0] }
 0x7dc   : > { %v4053_v14 = vpop.f32.mrf.mxu1 }
 0x7dd   : > { %v4054_v34 = vadd.f32 %v4053_v14, %v8594_v25  ;;  %v6061_v14 = vld [vmem:[%s8970_s23 + $0xb8] sm:$0xf0] }
 0x7de   : > { %v6064_v5 = vor.u32 %v6519_v24, %v6061_v14  ;;  %v6533_v24 = vld [vmem:[%s8970_s23 + $0x124] sm:$0xf]  ;;  %v6117_v14 = vld [vmem:[%s8970_s23 + $0x128] sm:$0xf0] }
 0x7df   : > { %v4912_v41 = vmax.f32 %v4054_v34, 0.0  ;;  %v5989_v34 = vld [vmem:[%s8970_s23 + $0x28] sm:$0xf0] }
 0x7e0   : > { %v5992_v3 = vor.u32 %v6501_v28, %v5989_v34  ;;  %4840 = vmatpush.bf16.msra.mxu1 %v6064_v5 }
 0x7e2   : > { %v4072_v40 = vpop.f32.mrf.mxu3 }
 0x7e3   : > { %v4073_v26 = vadd.f32 %v4072_v40, %v8605_v58  ;;  %v6537_v40 = vld [vmem:[%s8970_s23 + $0x144] sm:$0xf] }
 0x7e4   : > { %v4055_v48 = vpop.f32.mrf.mxu1  ;;  %v6136_v50 = vor.u32 %v6537_v40, %v6133_v2  ;;  %v6197_v2 = vld [vmem:[%s8970_s23 + $0x1c8] sm:$0xf0] }
 0x7e5   : > { %v4913_v59 = vmax.f32 %v4073_v26, 0.0  ;;  %v4056_v57 = vadd.f32 %v4055_v48, %v8594_v25  ;;  %v8734_v48 = vrot.slane %v4234_v43, 1  ;;  %v6120_v43 = vor.u32 %v6533_v24, %v6117_v14  ;;  %v6563_v24 = vld [vmem:[%s8970_s23 + $0x214] sm:$0xf]  ;;  %v6237_v14 = vld [vmem:[%s8970_s23 + $0x218] sm:$0xf0] }
 0x7e6   : > { %v4121_v6 = vpop.permute.xlu0 %4120 }
 0x7e7   : > { %v4928_v12 = vpack.c.bf16 %v4913_v59, %v4912_v41  ;;  %v4226_v17 = vsel %vm1273_vm3, %v8317_v39, %v4121_v6  ;;  %v4123_v44 = vpop.permute.xlu1 %4122  ;;  %v6000_v39 = vor.u32 %v6503_v31, %v5997_v15  ;;  %v4916_v26 = vmax.f32 %v4056_v57, 0.0  ;;  %v6535_v59 = vld [vmem:[%s8970_s23 + $0x134] sm:$0xf]  ;;  %v6497_v15 = vld [vmem:[%s8970_s23 + $0x4] sm:$0xf] }
 0x7e8   : > { %v4333_v11 = vrot.slane %v4226_v17, 1  ;;  %v4228_v20 = vsel %vm1273_vm3, %v8325_v13, %v4123_v44  ;;  %v6539_v13 = vld [vmem:[%s8970_s23 + $0x154] sm:$0xf]  ;;  %v6056_v41 = vor.u32 %v6517_v35, %v6053_v52  ;;  %v5984_v44 = vor.u32 %v6499_v51, %v5981_v53  ;;  %v6037_v57 = vld [vmem:[%s8970_s23 + $0x88] sm:$0xf0] }
 0x7e9   : > { %4936 = vst [vmem:[%s8657_s4] sm:$0xff] %v4928_v12  ;;  %v8686_v10 = vrot.slane %v4228_v20, 1  ;;  %v6144_v9 = vor.u32 %v6539_v13, %v6141_v29  ;;  %4821 = vmatpush.bf16.msra.mxu0 %v6000_v39  ;;  %v6515_v6 = vld [vmem:[%s8970_s23 + $0x94] sm:$0xf]  ;;  %v6128_v31 = vor.u32 %v6535_v59, %v6125_v19  ;;  %v6205_v29 = vld [vmem:[%s8970_s23 + $0x1d8] sm:$0xf0] }
 0x7ea   : > { %v4074_v62 = vpop.f32.mrf.mxu3  ;;  %4841 = vmatpush.bf16.msra.mxu1 %v6056_v41  ;;  %v6048_v39 = vor.u32 %v6515_v6, %v6045_v37  ;;  %v6555_v13 = vld [vmem:[%s8970_s23 + $0x1d4] sm:$0xf]  ;;  %v6109_v52 = vld [vmem:[%s8970_s23 + $0x118] sm:$0xf0]  ;;  %v6101_v51 = vld [vmem:[%s8970_s23 + $0x108] sm:$0xf0] }
 0x7eb   : > { %v4075_v30 = vadd.f32 %v4074_v62, %v8605_v58  ;;  %v8711_v0 = vsel %vm1161_vm12, %v4333_v11, %v8686_v10  ;;  %4857 = vmatpush.bf16.msra.mxu3 %v6144_v9  ;;  %v6513_v11 = vld [vmem:[%s8970_s23 + $0x84] sm:$0xf]  ;;  %v5976_v9 = vor.u32 %v6497_v15, %v5973_v36  ;;  %v6208_v28 = vor.u32 %v6555_v13, %v6205_v29  ;;  %v6189_v53 = vld [vmem:[%s8970_s23 + $0x1b8] sm:$0xf0]  ;;  %v4947_v41 = vld [vmem:[%s8657_s4 + $0x30] sm:$0x11] }
 0x7ec   : > { %v4058_v22 = vpop.f32.mrf.mxu1  ;;  %4730 = vmatmul.bf16.vlgmr.msrb.gmra.mxu2 %v8711_v0  ;;  %v6040_v40 = vor.u32 %v6513_v11, %v6037_v57  ;;  %v6165_v15 = vld [vmem:[%s8970_s23 + $0x188] sm:$0xf0]  ;;  %v6565_v36 = vld [vmem:[%s8970_s23 + $0x224] sm:$0xf]  ;;  %v6240_v57 = vor.u32 %v6563_v24, %v6237_v14 }
 0x7ed   : > { %v4917_v46 = vmax.f32 %v4075_v30, 0.0  ;;  %v4059_v23 = vadd.f32 %v4058_v22, %v8594_v25  ;;  %4874 = vmatpush.bf16.msrb.mxu2 %v6224_v49  ;;  %4822 = vmatpush.bf16.msra.mxu0 %v5992_v3  ;;  %v6553_v30 = vld [vmem:[%s8970_s23 + $0x1c4] sm:$0xf]  ;;  %v6531_v3 = vld [vmem:[%s8970_s23 + $0x114] sm:$0xf] }
 0x7ee   : > { %4842 = vmatpush.bf16.msra.mxu1 %v6048_v39  ;;  %v6200_v42 = vor.u32 %v6553_v30, %v6197_v2  ;;  %v6561_v13 = vld [vmem:[%s8970_s23 + $0x204] sm:$0xf]  ;;  %v6229_v29 = vld [vmem:[%s8970_s23 + $0x208] sm:$0xf0] }
 0x7ef   : > { %v4930_v54 = vpack.c.bf16 %v4917_v46, %v4916_v26  ;;  %v4157_v55 = vpop.permute.xlu1 %4156  ;;  %v4920_v8 = vmax.f32 %v4059_v23, 0.0  ;;  %4858 = vmatpush.bf16.msra.mxu3 %v6136_v50  ;;  %v6529_v50 = vld [vmem:[%s8970_s23 + $0x104] sm:$0xf] }
 0x7f0   : > { %v4231_v4 = vsel %vm1273_vm3, %v8344_v33, %v4157_v55  ;;  %v6104_v37 = vor.u32 %v6529_v50, %v6101_v51 }
 0x7f1   : > { %4938 = vst [vmem:[%s8657_s4 + $0x10] sm:$0xff] %v4930_v54  ;;  %v4336_v12 = vrot.slane %v4231_v4, 1  ;;  %v4185_v17 = vpop.permute.xlu0 %4184  ;;  %4875 = vmatpush.bf16.msrb.mxu2 %v6216_v18  ;;  %4823 = vmatpush.bf16.msra.mxu0 %v5984_v44  ;;  %v6181_v4 = vld [vmem:[%s8970_s23 + $0x1a8] sm:$0xf0]  ;;  %v6567_v44 = vld [vmem:[%s8970_s23 + $0x234] sm:$0xf] }
 0x7f2   : > { %v4240_v33 = vsel %vm1273_vm3, %v8339_v61, %v4185_v17  ;;  %v4077_v32 = vpop.f32.mrf.mxu3  ;;  %4843 = vmatpush.bf16.msra.mxu1 %v6040_v40  ;;  %v6184_v38 = vor.u32 %v6549_v1, %v6181_v4  ;;  %v6173_v17 = vld [vmem:[%s8970_s23 + $0x198] sm:$0xf0] }
 0x7f3   : > { %v8774_v20 = vrot.slane %v4240_v33, 1  ;;  %v4078_v21 = vadd.f32 %v4077_v32, %v8605_v58  ;;  %v8779_v61 = vsel %vm1161_vm12, %v4336_v12, %v8734_v48  ;;  %4859 = vmatpush.bf16.msra.mxu3 %v6128_v31  ;;  %v6547_v12 = vld [vmem:[%s8970_s23 + $0x194] sm:$0xf]  ;;  %v6253_v33 = vld [vmem:[%s8970_s23 + $0x238] sm:$0xf0] }
 0x7f4   : > { %4749 = vmatmul.bf16.vlgmr.msrb.gmra.mxu0 %v8779_v61  ;;  %v4060_v34 = vpop.f32.mrf.mxu1  ;;  %v6176_v18 = vor.u32 %v6547_v12, %v6173_v17  ;;  %v6256_v32 = vor.u32 %v6567_v44, %v6253_v33  ;;  %v6545_v31 = vld [vmem:[%s8970_s23 + $0x184] sm:$0xf] }
 0x7f5   : > { %v4921_v27 = vmax.f32 %v4078_v21, 0.0  ;;  %v8799_v62 = vsel %vm1161_vm12, %v4339_v45, %v8774_v20  ;;  %4876 = vmatpush.bf16.msrb.mxu2 %v6208_v28  ;;  %v4061_v7 = vadd.f32 %v4060_v34, %v8594_v25  ;;  %4824 = vmatpush.bf16.msra.mxu0 %v5976_v9  ;;  %v6168_v11 = vor.u32 %v6545_v31, %v6165_v15  ;;  %v6245_v21 = vld [vmem:[%s8970_s23 + $0x228] sm:$0xf0] }
 0x7f6   : > { %4768 = vmatmul.bf16.vlgmr.msrb.gmra.mxu1 %v8799_v62  ;;  %v6248_v39 = vor.u32 %v6565_v36, %v6245_v21 }
 0x7f7   : > { %v4932_v5 = vpack.c.bf16 %v4921_v27, %v4920_v8  ;;  %v4215_v35 = vpop.permute.xlu1 %4214  ;;  %4860 = vmatpush.bf16.msra.mxu3 %v6120_v43  ;;  %v4924_v54 = vmax.f32 %v4061_v7, 0.0  ;;  %6589 = vmatpush.bf16.msrb.mxu1 %v6256_v32  ;;  %v6232_v27 = vor.u32 %v6561_v13, %v6229_v29  ;;  %v4319_v7 = vld [vmem:[%s8971_s24] sm:$0x3] }
 0x7f8   : > { %v4246_v22 = vsel %vm1273_vm3, %v4193_v47, %v4215_v35 }
 0x7f9   : > { %4940 = vst [vmem:[%s8657_s4 + $0x20] sm:$0xff] %v4932_v5  ;;  %v4213_v26 = vpop.permute.xlu0 %4212  ;;  %v8827_v23 = vrot.slane %v4246_v22, 1  ;;  %4877 = vmatpush.bf16.msrb.mxu2 %v6200_v42  ;;  %4897 = vmatpush.bf16.msrb.mxu0 %v6256_v32 }
 0x7fa   : > { %v4243_v56 = vsel %vm1273_vm3, %v8358_v60, %v4213_v26  ;;  %v4079_v46 = vpop.f32.mrf.mxu3  ;;  %v6112_v60 = vor.u32 %v6531_v3, %v6109_v52 }
 0x7fb   : > { %v4342_v49 = vrot.slane %v4243_v56, 1  ;;  %v4080_v45 = vadd.f32 %v4079_v46, %v8605_v58  ;;  %v6551_v58 = vld [vmem:[%s8970_s23 + $0x1b4] sm:$0xf]  ;;  %6590 = vmatpush.bf16.msrb.mxu1 %v6248_v39  ;;  %v4321_v56 = vperm.slane %v4319_v7, 0 }
 0x7fc   : > { %4735 = vmatmul.bf16.gmra.mxu2 %v8686_v10  ;;  %v6192_v19 = vor.u32 %v6551_v58, %v6189_v53  ;;  %4861 = vmatpush.bf16.msra.mxu3 %v6112_v60 }
 0x7fd   : > { %v4925_v55 = vmax.f32 %v4080_v45, 0.0  ;;  %v4344_v59 = vsel %vm1161_vm12, %v4342_v49, %v8827_v23  ;;  %4898 = vmatpush.bf16.msrb.mxu0 %v6248_v39  ;;  %v4322_v45 = vperm.slane %v4319_v7, 1 }
 0x7fe   : > { %4787 = vmatmul.bf16.vlgmr.msrb.gmra.mxu3 %v4344_v59  ;;  %4878 = vmatpush.bf16.msrb.mxu2 %v6192_v19 }
 0x7ff   : > { %v4934_v6 = vpack.c.bf16 %v4925_v55, %v4924_v54  ;;  %6591 = vmatpush.bf16.msrb.mxu1 %v6240_v57 }
 0x800   : > { %4862 = vmatpush.bf16.msra.mxu3 %v6104_v37 }
 0x801   : > { %v4948_v8 = vsel %vm4946_vm7, %v4934_v6, %v4947_v41  ;;  %4899 = vmatpush.bf16.msrb.mxu0 %v6240_v57 }
 0x802   : > { %4949 = vst [vmem:[%s8657_s4 + $0x30] sm:$0x11] %v4948_v8  ;;  %4879 = vmatpush.bf16.msrb.mxu2 %v6184_v38 }
 0x803   : > { %6592 = vmatpush.bf16.msrb.mxu1 %v6232_v27 }
 0x804   : > { %4754 = vmatmul.bf16.gmra.mxu0 %v8734_v48 }
 0x805   : > { %4900 = vmatpush.bf16.msrb.mxu0 %v6232_v27 }
 0x806   : > { %4773 = vmatmul.bf16.gmra.mxu1 %v8774_v20  ;;  %4880 = vmatpush.bf16.msrb.mxu2 %v6176_v18 }
 0x80a   : > { %4881 = vmatpush.bf16.msrb.mxu2 %v6168_v11 }
 0x80c   : > { %6257 = vmatmul.msk.bf16.vlgmr.msra.gmra.mxu2 %vm1273_vm3, %v8369_v16 }
 0x80e   : > { %4792 = vmatmul.bf16.gmra.mxu3 %v8827_v23 }
 0x814   : > { %4825 = vmatmul.bf16.vlgmr.msra.gmra.mxu0 %v8711_v0 }
 0x816   : > { %4844 = vmatmul.bf16.vlgmr.msra.gmra.mxu1 %v8779_v61 }
 0x81c   : > { %6258 = vmatmul.msk.bf16.gmra.mxu2 %vm1273_vm3, %v8361_v63 }
 0x81e   : > { %4863 = vmatmul.bf16.vlgmr.msra.gmra.mxu3 %v8799_v62 }
 0x824   : > { %4830 = vmatmul.bf16.gmra.mxu0 %v8686_v10 }
 0x826   : > { %4849 = vmatmul.bf16.gmra.mxu1 %v8734_v48 }
 0x82c   : > { %4882 = vmatmul.bf16.vlgmr.msrb.gmra.mxu2 %v4344_v59 }
 0x82e   : > { %4868 = vmatmul.bf16.gmra.mxu3 %v8774_v20 }
 0x834   : > { %6259 = vmatmul.msk.bf16.vlgmr.msrb.gmra.mxu0 %vm1273_vm3, %v8369_v16 }
 0x836   : > { %6260 = vmatmul.msk.bf16.vlgmr.msrb.gmra.mxu1 %vm1273_vm3, %v8361_v63 }
 0x83c   : > { %4887 = vmatmul.bf16.gmra.mxu2 %v8827_v23 }
 0x86f   : > { %v4731_v0 = vpop.f32.mrf.mxu2 }
 0x870   : > { %v4732_v49 = vadd.f32 %v4731_v0, %v4321_v56 }
 0x871   : > { %v4750_v61 = vpop.f32.mrf.mxu0 }
 0x872   : > { %v4751_v51 = vadd.f32 %v4750_v61, %v4732_v49 }
 0x873   : > { %v4769_v9 = vpop.f32.mrf.mxu1 }
 0x874   : > { %v4770_v55 = vadd.f32 %v4769_v9, %v4751_v51 }
 0x877   : > { %v4733_v28 = vpop.f32.mrf.mxu2 }
 0x878   : > { %v4734_v41 = vadd.f32 %v4733_v28, %v4321_v56 }
 0x879   : > { %v4752_v62 = vpop.f32.mrf.mxu0 }
 0x87a   : > { %v4753_v37 = vadd.f32 %v4752_v62, %v4734_v41  ;;  %v4950_v41 = vld [vmem:[%s8657_s4 + $0x38] sm:$0x11] }
 0x87b   : > { %v4771_v34 = vpop.f32.mrf.mxu1 }
 0x87c   : > { %v4772_v33 = vadd.f32 %v4771_v34, %v4753_v37 }
 0x87f   : > { %v4736_v10 = vpop.f32.mrf.mxu2 }
 0x880   : > { %v4737_v18 = vadd.f32 %v4736_v10, %v4321_v56 }
 0x881   : > { %v4755_v43 = vpop.f32.mrf.mxu0  ;;  %v4788_v48 = vpop.f32.mrf.mxu3 }
 0x882   : > { %v4789_v19 = vadd.f32 %v4788_v48, %v4770_v55  ;;  %v4756_v24 = vadd.f32 %v4755_v43, %v4737_v18 }
 0x883   : > { %v4774_v30 = vpop.f32.mrf.mxu1 }
 0x884   : > { %v4775_v9 = vadd.f32 %v4774_v30, %v4756_v24 }
 0x887   : > { %v4738_v5 = vpop.f32.mrf.mxu2 }
 0x888   : > { %v4739_v28 = vadd.f32 %v4738_v5, %v4321_v56 }
 0x889   : > { %v8922_v20 = vpop.f32.mrf.mxu0  ;;  %v4790_v35 = vpop.f32.mrf.mxu3 }
 0x88a   : > { %v4791_v11 = vadd.f32 %v4790_v35, %v4772_v33  ;;  %v4758_v43 = vadd.f32 %v8922_v20, %v4739_v28 }
 0x88b   : > { %v8924_v16 = vpop.f32.mrf.mxu1 }
 0x88c   : > { %v4777_v30 = vadd.f32 %v8924_v16, %v4758_v43 }
 0x88f   : > { %v4807_v40 = vpop.f32.mrf.mxu2 }
 0x890   : > { %v4808_v38 = vadd.f32 %v4807_v40, %v4789_v19 }
 0x891   : > { %v4793_v63 = vpop.f32.mrf.mxu3  ;;  %v4826_v2 = vpop.f32.mrf.mxu0 }
 0x892   : > { %v4827_v58 = vadd.f32 %v4826_v2, %v4322_v45  ;;  %v4914_v32 = vmax.f32 %v4808_v38, 0.0  ;;  %v4794_v48 = vadd.f32 %v4793_v63, %v4775_v9 }
 0x893   : > { %v4845_v22 = vpop.f32.mrf.mxu1 }
 0x894   : > { %v4846_v59 = vadd.f32 %v4845_v22, %v4827_v58 }
 0x897   : > { %v4809_v3 = vpop.f32.mrf.mxu2 }
 0x898   : > { %v4810_v57 = vadd.f32 %v4809_v3, %v4791_v11 }
 0x899   : > { %v4828_v52 = vpop.f32.mrf.mxu0  ;;  %v8926_v42 = vpop.f32.mrf.mxu3 }
 0x89a   : > { %v4829_v8 = vadd.f32 %v4828_v52, %v4322_v45  ;;  %v4918_v62 = vmax.f32 %v4810_v57, 0.0  ;;  %v4796_v49 = vadd.f32 %v8926_v42, %v4777_v30 }
 0x89b   : > { %v4847_v46 = vpop.f32.mrf.mxu1 }
 0x89c   : > { %v4848_v31 = vadd.f32 %v4847_v46, %v4829_v8 }
 0x89f   : > { %v4812_v26 = vpop.f32.mrf.mxu2 }
 0x8a0   : > { %v4813_v3 = vadd.f32 %v4812_v26, %v4794_v48 }
 0x8a1   : > { %v4831_v23 = vpop.f32.mrf.mxu0  ;;  %v4864_v60 = vpop.f32.mrf.mxu3 }
 0x8a2   : > { %v4865_v1 = vadd.f32 %v4864_v60, %v4846_v59  ;;  %v4832_v13 = vadd.f32 %v4831_v23, %v4322_v45  ;;  %v4922_v5 = vmax.f32 %v4813_v3, 0.0 }
 0x8a3   : > { %v4850_v54 = vpop.f32.mrf.mxu1 }
 0x8a4   : > { %v4851_v34 = vadd.f32 %v4850_v54, %v4832_v13 }
 0x8a7   : > { %v4814_v50 = vpop.f32.mrf.mxu2 }
 0x8a8   : > { %v4815_v20 = vadd.f32 %v4814_v50, %v4796_v49 }
 0x8a9   : > { %v4833_v53 = vpop.f32.mrf.mxu0  ;;  %v4866_v4 = vpop.f32.mrf.mxu3 }
 0x8aa   : > { %v4867_v21 = vadd.f32 %v4866_v4, %v4848_v31  ;;  %v4834_v52 = vadd.f32 %v4833_v53, %v4322_v45  ;;  %v4926_v54 = vmax.f32 %v4815_v20, 0.0 }
 0x8ab   : > { %v4852_v36 = vpop.f32.mrf.mxu1 }
 0x8ac   : > { %v4853_v56 = vadd.f32 %v4852_v36, %v4834_v52 }
 0x8af   : > { %v4883_v6 = vpop.f32.mrf.mxu2 }
 0x8b0   : > { %v4884_v12 = vadd.f32 %v4883_v6, %v4865_v1 }
 0x8b1   : > { %v4902_v17 = vpop.f32.mrf.mxu0  ;;  %v4869_v27 = vpop.f32.mrf.mxu3 }
 0x8b2   : > { %v4903_v44 = vadd.f32 %v4902_v17, %v4884_v12  ;;  %v4870_v40 = vadd.f32 %v4869_v27, %v4851_v34 }
 0x8b3   : > { %v4907_v2 = vpop.f32.mrf.mxu1 }
 0x8b4   : > { %v4915_v15 = vmax.f32 %v4903_v44, 0.0 }
 0x8b6   : > { %v4929_v39 = vpack.c.bf16 %v4915_v15, %v4914_v32 }
 0x8b7   : > { %v4885_v14 = vpop.f32.mrf.mxu2 }
 0x8b8   : > { %4937 = vst [vmem:[%s8657_s4 + $0x8] sm:$0xff] %v4929_v39  ;;  %v4886_v29 = vadd.f32 %v4885_v14, %v4867_v21 }
 0x8b9   : > { %v4904_v0 = vpop.f32.mrf.mxu0  ;;  %v4871_v23 = vpop.f32.mrf.mxu3 }
 0x8ba   : > { %v4905_v61 = vadd.f32 %v4904_v0, %v4886_v29  ;;  %v4872_v60 = vadd.f32 %v4871_v23, %v4853_v56 }
 0x8bb   : > { %v4909_v45 = vpop.f32.mrf.mxu1 }
 0x8bc   : > { %v4919_v10 = vmax.f32 %v4905_v61, 0.0 }
 0x8be   : > { %v4931_v35 = vpack.c.bf16 %v4919_v10, %v4918_v62 }
 0x8bf   : > { %v4888_v22 = vpop.f32.mrf.mxu2 }
 0x8c0   : > { %4939 = vst [vmem:[%s8657_s4 + $0x18] sm:$0xff] %v4931_v35  ;;  %v4889_v7 = vadd.f32 %v4888_v22, %v4870_v40 }
 0x8c2   : > { %v4908_v46 = vadd.f32 %v4907_v2, %v4889_v7 }
 0x8c4   : > { %v4923_v63 = vmax.f32 %v4908_v46, 0.0 }
 0x8c6   : > { %v4933_v51 = vpack.c.bf16 %v4923_v63, %v4922_v5 }
 0x8c7   : > { %v4890_v58 = vpop.f32.mrf.mxu2 }
 0x8c8   : > { %4941 = vst [vmem:[%s8657_s4 + $0x28] sm:$0xff] %v4933_v51  ;;  %v4891_v26 = vadd.f32 %v4890_v58, %v4872_v60 }
 0x8ca   : > { %v4910_v53 = vadd.f32 %v4909_v45, %v4891_v26 }
 0x8cc   : > { %v4927_v55 = vmax.f32 %v4910_v53, 0.0 }
 0x8ce   : > { %v4935_v59 = vpack.c.bf16 %v4927_v55, %v4926_v54 }
 0x8d0   : > { %v4951_v16 = vsel %vm4946_vm7, %v4935_v59, %v4950_v41 }
 0x8d1   : > { %4952 = vst [vmem:[%s8657_s4 + $0x38] sm:$0x11] %v4951_v16 }
 0x8d2 PF: > { %s9065_s5 = sld [smem:[#allocation3_spill]] }
 0x8d8   : > { %s35_s29 = sadd.s32 1, %s9065_s5  }
 0x8d9   : > { %p32_p4 = scmp.ge.s32.totalorder %s35_s29, 4  }
 0x8db   :  { %34 = sbr.rel (!%p32_p4) target bundleno = 11 (0xb), region = 150 }

// kernel: squeezenet_forward.9
= control target key start
LH: loop header
LB: loop body
LE: loop exit
PB: predicated region body
PF: predicated region fallthrough
CT: control target
= control target key end

     0   :  { %8 = vsyncpa [#allocation4], 0  ;;  %s3288_s0 = inlined_call_operand.vmem [shape: bf16[2,512], index: 0, kind: input, shape index: {}]   ;;  %s3289_s1 = inlined_call_operand.vmem [shape: bf16[512,1024], index: 1, kind: input, shape index: {}]   ;;  %s3290_s2 = inlined_call_operand.vmem [shape: f32[1,1024], index: 2, kind: input, shape index: {}]   ;;  %s3291_s3 = inlined_call_operand.hbm [shape: f32[2,1024], index: 3, kind: output, shape index: {}]  }
   0x1   :  { %10 = vsyncpa [#allocation4 + $0x1], 0  ;;  %s2572_s12 = smov 0   ;;  %s2574_s13 = smov 0  }
   0x2   :  { %s2576_s14 = smov 0   ;;  %s2578_s15 = smov 0  }
   0x3   :  { %s2580_s16 = smov 0   ;;  %s2582_s17 = smov 0  }
   0x4 LB: > { %s1757_s18 = sadd.s32 4294967295, %s2547_s17   ;;  %s1758_s19 = sadd.s32 4294967294, %s2547_s17   ;;  %s2547_s17 = sphi %s2582_s17, %s16_s17   ;;  %s2543_s16 = sphi %s2580_s16, %s3298_s16   ;;  %s2539_s15 = sphi %s2578_s15, %s3297_s15   ;;  %s2535_s14 = sphi %s2576_s14, %s3296_s14   ;;  %s2531_s13 = sphi %s2574_s13, %s3295_s13   ;;  %s2527_s12 = sphi %s2572_s12, %s3294_s12  }
   0x5   : > { %s25_s20 = sadd.s32 1, %s2543_s16  ;;  %s61_s21 = sadd.s32 1, %s2535_s14 }
   0x6   : > { %p26_p0 = scmp.ge.s32.totalorder %s25_s20, 2  ;;  %p68_p1 = scmp.ne.s32.totalorder %s2535_s14, %s2531_s13 }
   0x7   : > { %p69_p2 = scmp.eq.s32.totalorder %s2547_s17, 0  ;;  %p126_p3 = scmp.eq.s32.totalorder %s1757_s18, 1 }
   0x8   : > { %s3300_s20 = smov (%p26_p0, %s25_s20), 0  ;;  %p131_p6 = scmp.ne.s32.totalorder %s2531_s13, %s2527_s12 }
   0x9   : > { %p70_p4 = por %p69_p2, %p68_p1  ;;  %p2611_p5 = por %p126_p3, %p68_p1 }
   0xa   : > { %s58_s23 = ssub.s32 %s2543_s16, %s3300_s20  ;;  %p132_p8 = scmp.eq.s32.totalorder %s1758_s19, 1 }
   0xb   : > { %p59_p7 = scmp.eq.s32.totalorder %s58_s23, 0  ;;  %p1761_p10 = scmp.ge.s32.totalorder %s2547_s17, 2 }
   0xc   : > { %p2622_p9 = por %p132_p8, %p131_p6 }
   0xd   : > { %s2620_s24 = scalar_select %p59_p7, %s2535_s14, %s61_s21  }
   0xe   : > { %161 = sbr.rel (%p1761_p10) target bundleno = 151 (0x97), region = 20 }
  0x13   : > { %164 = sbr.rel (!%p70_p4) target bundleno = 151 (0x97), region = 24  ;;  %s166_s26 = sand.u32 (%p70_p4), 1, %s2535_s14  }
  0x14   : > { %s2286_s27 = sshll.u32 (%p70_p4), %s2543_s16, 4  ;;  %s1762_s28 = sshll.u32 (%p70_p4), %s166_s26, 10 }
  0x15   : > { %s2634_s4 = scalar_lea.vmem (%p70_p4), %s3289_s1, %s2286_s27  ;;  %s2639_s5 = scalar_lea.vmem (%p70_p4), [#allocation2], %s1762_s28 }
  0x16   : > { %v184_v0 = vld [vmem:[%s2634_s4] sm:$0xff] (%p70_p4)  ;;  %v186_v1 = vld [vmem:[%s2634_s4 + $0x8] sm:$0xff] (%p70_p4) }
  0x17   : > { %v188_v2 = vld [vmem:[%s2634_s4 + $0x20] sm:$0xff] (%p70_p4)  ;;  %185 = vst [vmem:[%s2639_s5] sm:$0xff] (%p70_p4), %v184_v0  ;;  %v190_v3 = vld [vmem:[%s2634_s4 + $0x28] sm:$0xff] (%p70_p4) }
  0x18   : > { %187 = vst [vmem:[%s2639_s5 + $0x8] sm:$0xff] %v186_v1  ;;  %v192_v4 = vld [vmem:[%s2634_s4 + $0x40] sm:$0xff]  ;;  %v194_v5 = vld [vmem:[%s2634_s4 + $0x48] sm:$0xff] }
  0x19   : > { %189 = vst [vmem:[%s2639_s5 + $0x10] sm:$0xff] %v188_v2  ;;  %v196_v6 = vld [vmem:[%s2634_s4 + $0x60] sm:$0xff]  ;;  %v198_v7 = vld [vmem:[%s2634_s4 + $0x68] sm:$0xff] }
  0x1a   : > { %191 = vst [vmem:[%s2639_s5 + $0x18] sm:$0xff] %v190_v3  ;;  %v200_v8 = vld [vmem:[%s2634_s4 + $0x80] sm:$0xff]  ;;  %v202_v9 = vld [vmem:[%s2634_s4 + $0x88] sm:$0xff] }
  0x1b   : > { %193 = vst [vmem:[%s2639_s5 + $0x20] sm:$0xff] %v192_v4  ;;  %v204_v10 = vld [vmem:[%s2634_s4 + $0xa0] sm:$0xff]  ;;  %v206_v11 = vld [vmem:[%s2634_s4 + $0xa8] sm:$0xff] }
  0x1c   : > { %195 = vst [vmem:[%s2639_s5 + $0x28] sm:$0xff] %v194_v5  ;;  %v208_v12 = vld [vmem:[%s2634_s4 + $0xc0] sm:$0xff]  ;;  %v210_v13 = vld [vmem:[%s2634_s4 + $0xc8] sm:$0xff] }
  0x1d   : > { %197 = vst [vmem:[%s2639_s5 + $0x30] sm:$0xff] %v196_v6  ;;  %v212_v14 = vld [vmem:[%s2634_s4 + $0xe0] sm:$0xff]  ;;  %v214_v15 = vld [vmem:[%s2634_s4 + $0xe8] sm:$0xff] }
  0x1e   : > { %199 = vst [vmem:[%s2639_s5 + $0x38] sm:$0xff] %v198_v7  ;;  %v216_v16 = vld [vmem:[%s2634_s4 + $0x100] sm:$0xff]  ;;  %v218_v17 = vld [vmem:[%s2634_s4 + $0x108] sm:$0xff] }
  0x1f   : > { %201 = vst [vmem:[%s2639_s5 + $0x40] sm:$0xff] %v200_v8  ;;  %v220_v18 = vld [vmem:[%s2634_s4 + $0x120] sm:$0xff]  ;;  %v222_v19 = vld [vmem:[%s2634_s4 + $0x128] sm:$0xff] }
  0x20   : > { %203 = vst [vmem:[%s2639_s5 + $0x48] sm:$0xff] %v202_v9  ;;  %v224_v20 = vld [vmem:[%s2634_s4 + $0x140] sm:$0xff]  ;;  %v226_v21 = vld [vmem:[%s2634_s4 + $0x148] sm:$0xff] }
  0x21   : > { %205 = vst [vmem:[%s2639_s5 + $0x50] sm:$0xff] %v204_v10  ;;  %v228_v22 = vld [vmem:[%s2634_s4 + $0x160] sm:$0xff]  ;;  %v230_v23 = vld [vmem:[%s2634_s4 + $0x168] sm:$0xff] }
  0x22   : > { %207 = vst [vmem:[%s2639_s5 + $0x58] sm:$0xff] %v206_v11  ;;  %v232_v24 = vld [vmem:[%s2634_s4 + $0x180] sm:$0xff]  ;;  %v234_v25 = vld [vmem:[%s2634_s4 + $0x188] sm:$0xff] }
  0x23   : > { %209 = vst [vmem:[%s2639_s5 + $0x60] sm:$0xff] %v208_v12  ;;  %v236_v26 = vld [vmem:[%s2634_s4 + $0x1a0] sm:$0xff]  ;;  %v238_v27 = vld [vmem:[%s2634_s4 + $0x1a8] sm:$0xff] }
  0x24   : > { %211 = vst [vmem:[%s2639_s5 + $0x68] sm:$0xff] %v210_v13  ;;  %v240_v28 = vld [vmem:[%s2634_s4 + $0x1c0] sm:$0xff]  ;;  %v242_v29 = vld [vmem:[%s2634_s4 + $0x1c8] sm:$0xff] }
  0x25   : > { %213 = vst [vmem:[%s2639_s5 + $0x70] sm:$0xff] %v212_v14  ;;  %v244_v30 = vld [vmem:[%s2634_s4 + $0x1e0] sm:$0xff]  ;;  %v246_v31 = vld [vmem:[%s2634_s4 + $0x1e8] sm:$0xff] }
  0x26   : > { %215 = vst [vmem:[%s2639_s5 + $0x78] sm:$0xff] %v214_v15  ;;  %v248_v32 = vld [vmem:[%s2634_s4 + $0x200] sm:$0xff]  ;;  %v250_v33 = vld [vmem:[%s2634_s4 + $0x208] sm:$0xff] }
  0x27   : > { %217 = vst [vmem:[%s2639_s5 + $0x80] sm:$0xff] %v216_v16  ;;  %v252_v34 = vld [vmem:[%s2634_s4 + $0x220] sm:$0xff]  ;;  %v254_v35 = vld [vmem:[%s2634_s4 + $0x228] sm:$0xff] }
  0x28   : > { %219 = vst [vmem:[%s2639_s5 + $0x88] sm:$0xff] %v218_v17  ;;  %v256_v36 = vld [vmem:[%s2634_s4 + $0x240] sm:$0xff]  ;;  %v258_v37 = vld [vmem:[%s2634_s4 + $0x248] sm:$0xff] }
  0x29   : > { %221 = vst [vmem:[%s2639_s5 + $0x90] sm:$0xff] %v220_v18  ;;  %v260_v38 = vld [vmem:[%s2634_s4 + $0x260] sm:$0xff]  ;;  %v262_v39 = vld [vmem:[%s2634_s4 + $0x268] sm:$0xff] }
  0x2a   : > { %223 = vst [vmem:[%s2639_s5 + $0x98] sm:$0xff] %v222_v19  ;;  %v264_v40 = vld [vmem:[%s2634_s4 + $0x280] sm:$0xff]  ;;  %v266_v41 = vld [vmem:[%s2634_s4 + $0x288] sm:$0xff] }
  0x2b   : > { %225 = vst [vmem:[%s2639_s5 + $0xa0] sm:$0xff] %v224_v20  ;;  %v268_v42 = vld [vmem:[%s2634_s4 + $0x2a0] sm:$0xff]  ;;  %v270_v43 = vld [vmem:[%s2634_s4 + $0x2a8] sm:$0xff] }
  0x2c   : > { %227 = vst [vmem:[%s2639_s5 + $0xa8] sm:$0xff] %v226_v21  ;;  %v272_v44 = vld [vmem:[%s2634_s4 + $0x2c0] sm:$0xff]  ;;  %v274_v45 = vld [vmem:[%s2634_s4 + $0x2c8] sm:$0xff] }
  0x2d   : > { %229 = vst [vmem:[%s2639_s5 + $0xb0] sm:$0xff] %v228_v22  ;;  %v276_v46 = vld [vmem:[%s2634_s4 + $0x2e0] sm:$0xff]  ;;  %v278_v47 = vld [vmem:[%s2634_s4 + $0x2e8] sm:$0xff] }
  0x2e   : > { %231 = vst [vmem:[%s2639_s5 + $0xb8] sm:$0xff] %v230_v23  ;;  %v280_v48 = vld [vmem:[%s2634_s4 + $0x300] sm:$0xff]  ;;  %v282_v49 = vld [vmem:[%s2634_s4 + $0x308] sm:$0xff] }
  0x2f   : > { %233 = vst [vmem:[%s2639_s5 + $0xc0] sm:$0xff] %v232_v24  ;;  %v284_v50 = vld [vmem:[%s2634_s4 + $0x320] sm:$0xff]  ;;  %v286_v51 = vld [vmem:[%s2634_s4 + $0x328] sm:$0xff] }
  0x30   : > { %235 = vst [vmem:[%s2639_s5 + $0xc8] sm:$0xff] %v234_v25  ;;  %v288_v52 = vld [vmem:[%s2634_s4 + $0x340] sm:$0xff]  ;;  %v290_v53 = vld [vmem:[%s2634_s4 + $0x348] sm:$0xff] }
  0x31   : > { %237 = vst [vmem:[%s2639_s5 + $0xd0] sm:$0xff] %v236_v26  ;;  %v292_v54 = vld [vmem:[%s2634_s4 + $0x360] sm:$0xff]  ;;  %v294_v55 = vld [vmem:[%s2634_s4 + $0x368] sm:$0xff] }
  0x32   : > { %239 = vst [vmem:[%s2639_s5 + $0xd8] sm:$0xff] %v238_v27  ;;  %v296_v56 = vld [vmem:[%s2634_s4 + $0x380] sm:$0xff]  ;;  %v298_v57 = vld [vmem:[%s2634_s4 + $0x388] sm:$0xff] }
  0x33   : > { %241 = vst [vmem:[%s2639_s5 + $0xe0] sm:$0xff] %v240_v28  ;;  %v300_v58 = vld [vmem:[%s2634_s4 + $0x3a0] sm:$0xff]  ;;  %v302_v59 = vld [vmem:[%s2634_s4 + $0x3a8] sm:$0xff] }
  0x34   : > { %243 = vst [vmem:[%s2639_s5 + $0xe8] sm:$0xff] %v242_v29  ;;  %v304_v60 = vld [vmem:[%s2634_s4 + $0x3c0] sm:$0xff]  ;;  %v306_v61 = vld [vmem:[%s2634_s4 + $0x3c8] sm:$0xff] }
  0x35   : > { %245 = vst [vmem:[%s2639_s5 + $0xf0] sm:$0xff] %v244_v30  ;;  %v308_v62 = vld [vmem:[%s2634_s4 + $0x3e0] sm:$0xff]  ;;  %v310_v63 = vld [vmem:[%s2634_s4 + $0x3e8] sm:$0xff] }
  0x36   : > { %247 = vst [vmem:[%s2639_s5 + $0xf8] sm:$0xff] %v246_v31  ;;  %v312_v0 = vld [vmem:[%s2634_s4 + $0x400] sm:$0xff]  ;;  %v314_v1 = vld [vmem:[%s2634_s4 + $0x408] sm:$0xff] }
  0x37   : > { %249 = vst [vmem:[%s2639_s5 + $0x100] sm:$0xff] %v248_v32  ;;  %v316_v2 = vld [vmem:[%s2634_s4 + $0x420] sm:$0xff]  ;;  %v318_v3 = vld [vmem:[%s2634_s4 + $0x428] sm:$0xff] }
  0x38   : > { %251 = vst [vmem:[%s2639_s5 + $0x108] sm:$0xff] %v250_v33  ;;  %v320_v4 = vld [vmem:[%s2634_s4 + $0x440] sm:$0xff]  ;;  %v322_v5 = vld [vmem:[%s2634_s4 + $0x448] sm:$0xff] }
  0x39   : > { %253 = vst [vmem:[%s2639_s5 + $0x110] sm:$0xff] %v252_v34  ;;  %v324_v6 = vld [vmem:[%s2634_s4 + $0x460] sm:$0xff]  ;;  %v326_v7 = vld [vmem:[%s2634_s4 + $0x468] sm:$0xff] }
  0x3a   : > { %255 = vst [vmem:[%s2639_s5 + $0x118] sm:$0xff] %v254_v35  ;;  %v328_v8 = vld [vmem:[%s2634_s4 + $0x480] sm:$0xff]  ;;  %v330_v9 = vld [vmem:[%s2634_s4 + $0x488] sm:$0xff] }
  0x3b   : > { %257 = vst [vmem:[%s2639_s5 + $0x120] sm:$0xff] %v256_v36  ;;  %v332_v10 = vld [vmem:[%s2634_s4 + $0x4a0] sm:$0xff]  ;;  %v334_v11 = vld [vmem:[%s2634_s4 + $0x4a8] sm:$0xff] }
  0x3c   : > { %259 = vst [vmem:[%s2639_s5 + $0x128] sm:$0xff] %v258_v37  ;;  %v336_v12 = vld [vmem:[%s2634_s4 + $0x4c0] sm:$0xff]  ;;  %v338_v13 = vld [vmem:[%s2634_s4 + $0x4c8] sm:$0xff] }
  0x3d   : > { %261 = vst [vmem:[%s2639_s5 + $0x130] sm:$0xff] %v260_v38  ;;  %v340_v14 = vld [vmem:[%s2634_s4 + $0x4e0] sm:$0xff]  ;;  %v342_v15 = vld [vmem:[%s2634_s4 + $0x4e8] sm:$0xff] }
  0x3e   : > { %263 = vst [vmem:[%s2639_s5 + $0x138] sm:$0xff] %v262_v39  ;;  %v344_v16 = vld [vmem:[%s2634_s4 + $0x500] sm:$0xff]  ;;  %v346_v17 = vld [vmem:[%s2634_s4 + $0x508] sm:$0xff] }
  0x3f   : > { %265 = vst [vmem:[%s2639_s5 + $0x140] sm:$0xff] %v264_v40  ;;  %v348_v18 = vld [vmem:[%s2634_s4 + $0x520] sm:$0xff]  ;;  %v350_v19 = vld [vmem:[%s2634_s4 + $0x528] sm:$0xff] }
  0x40   : > { %267 = vst [vmem:[%s2639_s5 + $0x148] sm:$0xff] %v266_v41  ;;  %v352_v20 = vld [vmem:[%s2634_s4 + $0x540] sm:$0xff]  ;;  %v354_v21 = vld [vmem:[%s2634_s4 + $0x548] sm:$0xff] }
  0x41   : > { %269 = vst [vmem:[%s2639_s5 + $0x150] sm:$0xff] %v268_v42  ;;  %v356_v22 = vld [vmem:[%s2634_s4 + $0x560] sm:$0xff]  ;;  %v358_v23 = vld [vmem:[%s2634_s4 + $0x568] sm:$0xff] }
  0x42   : > { %271 = vst [vmem:[%s2639_s5 + $0x158] sm:$0xff] %v270_v43  ;;  %v360_v24 = vld [vmem:[%s2634_s4 + $0x580] sm:$0xff]  ;;  %v362_v25 = vld [vmem:[%s2634_s4 + $0x588] sm:$0xff] }
  0x43   : > { %273 = vst [vmem:[%s2639_s5 + $0x160] sm:$0xff] %v272_v44  ;;  %v364_v26 = vld [vmem:[%s2634_s4 + $0x5a0] sm:$0xff]  ;;  %v366_v27 = vld [vmem:[%s2634_s4 + $0x5a8] sm:$0xff] }
  0x44   : > { %275 = vst [vmem:[%s2639_s5 + $0x168] sm:$0xff] %v274_v45  ;;  %v368_v28 = vld [vmem:[%s2634_s4 + $0x5c0] sm:$0xff]  ;;  %v370_v29 = vld [vmem:[%s2634_s4 + $0x5c8] sm:$0xff] }
  0x45   : > { %277 = vst [vmem:[%s2639_s5 + $0x170] sm:$0xff] %v276_v46  ;;  %v372_v30 = vld [vmem:[%s2634_s4 + $0x5e0] sm:$0xff]  ;;  %v374_v31 = vld [vmem:[%s2634_s4 + $0x5e8] sm:$0xff] }
  0x46   : > { %279 = vst [vmem:[%s2639_s5 + $0x178] sm:$0xff] %v278_v47  ;;  %v376_v32 = vld [vmem:[%s2634_s4 + $0x600] sm:$0xff]  ;;  %v378_v33 = vld [vmem:[%s2634_s4 + $0x608] sm:$0xff] }
  0x47   : > { %281 = vst [vmem:[%s2639_s5 + $0x180] sm:$0xff] %v280_v48  ;;  %v380_v34 = vld [vmem:[%s2634_s4 + $0x620] sm:$0xff]  ;;  %v382_v35 = vld [vmem:[%s2634_s4 + $0x628] sm:$0xff] }
  0x48   : > { %283 = vst [vmem:[%s2639_s5 + $0x188] sm:$0xff] %v282_v49  ;;  %v384_v36 = vld [vmem:[%s2634_s4 + $0x640] sm:$0xff]  ;;  %v386_v37 = vld [vmem:[%s2634_s4 + $0x648] sm:$0xff] }
  0x49   : > { %285 = vst [vmem:[%s2639_s5 + $0x190] sm:$0xff] %v284_v50  ;;  %v388_v38 = vld [vmem:[%s2634_s4 + $0x660] sm:$0xff]  ;;  %v390_v39 = vld [vmem:[%s2634_s4 + $0x668] sm:$0xff] }
  0x4a   : > { %287 = vst [vmem:[%s2639_s5 + $0x198] sm:$0xff] %v286_v51  ;;  %v392_v40 = vld [vmem:[%s2634_s4 + $0x680] sm:$0xff]  ;;  %v394_v41 = vld [vmem:[%s2634_s4 + $0x688] sm:$0xff] }
  0x4b   : > { %289 = vst [vmem:[%s2639_s5 + $0x1a0] sm:$0xff] %v288_v52  ;;  %v396_v42 = vld [vmem:[%s2634_s4 + $0x6a0] sm:$0xff]  ;;  %v398_v43 = vld [vmem:[%s2634_s4 + $0x6a8] sm:$0xff] }
  0x4c   : > { %291 = vst [vmem:[%s2639_s5 + $0x1a8] sm:$0xff] %v290_v53  ;;  %v400_v44 = vld [vmem:[%s2634_s4 + $0x6c0] sm:$0xff]  ;;  %v402_v45 = vld [vmem:[%s2634_s4 + $0x6c8] sm:$0xff] }
  0x4d   : > { %293 = vst [vmem:[%s2639_s5 + $0x1b0] sm:$0xff] %v292_v54  ;;  %v404_v46 = vld [vmem:[%s2634_s4 + $0x6e0] sm:$0xff]  ;;  %v406_v47 = vld [vmem:[%s2634_s4 + $0x6e8] sm:$0xff] }
  0x4e   : > { %295 = vst [vmem:[%s2639_s5 + $0x1b8] sm:$0xff] %v294_v55  ;;  %v408_v48 = vld [vmem:[%s2634_s4 + $0x700] sm:$0xff]  ;;  %v410_v49 = vld [vmem:[%s2634_s4 + $0x708] sm:$0xff] }
  0x4f   : > { %297 = vst [vmem:[%s2639_s5 + $0x1c0] sm:$0xff] %v296_v56  ;;  %v412_v50 = vld [vmem:[%s2634_s4 + $0x720] sm:$0xff]  ;;  %v414_v51 = vld [vmem:[%s2634_s4 + $0x728] sm:$0xff] }
  0x50   : > { %299 = vst [vmem:[%s2639_s5 + $0x1c8] sm:$0xff] %v298_v57  ;;  %v416_v52 = vld [vmem:[%s2634_s4 + $0x740] sm:$0xff]  ;;  %v418_v53 = vld [vmem:[%s2634_s4 + $0x748] sm:$0xff] }
  0x51   : > { %301 = vst [vmem:[%s2639_s5 + $0x1d0] sm:$0xff] %v300_v58  ;;  %v420_v54 = vld [vmem:[%s2634_s4 + $0x760] sm:$0xff]  ;;  %v422_v55 = vld [vmem:[%s2634_s4 + $0x768] sm:$0xff] }
  0x52   : > { %303 = vst [vmem:[%s2639_s5 + $0x1d8] sm:$0xff] %v302_v59  ;;  %v424_v56 = vld [vmem:[%s2634_s4 + $0x780] sm:$0xff]  ;;  %v426_v57 = vld [vmem:[%s2634_s4 + $0x788] sm:$0xff] }
  0x53   : > { %305 = vst [vmem:[%s2639_s5 + $0x1e0] sm:$0xff] %v304_v60  ;;  %v428_v58 = vld [vmem:[%s2634_s4 + $0x7a0] sm:$0xff]  ;;  %v430_v59 = vld [vmem:[%s2634_s4 + $0x7a8] sm:$0xff] }
  0x54   : > { %307 = vst [vmem:[%s2639_s5 + $0x1e8] sm:$0xff] %v306_v61  ;;  %v432_v60 = vld [vmem:[%s2634_s4 + $0x7c0] sm:$0xff]  ;;  %v434_v61 = vld [vmem:[%s2634_s4 + $0x7c8] sm:$0xff] }
  0x55   : > { %309 = vst [vmem:[%s2639_s5 + $0x1f0] sm:$0xff] %v308_v62  ;;  %v436_v62 = vld [vmem:[%s2634_s4 + $0x7e0] sm:$0xff] }
  0x56   : > { %311 = vst [vmem:[%s2639_s5 + $0x1f8] sm:$0xff] %v310_v63  ;;  %v438_v63 = vld [vmem:[%s2634_s4 + $0x7e8] sm:$0xff] }
  0x57   : > { %313 = vst [vmem:[%s2639_s5 + $0x200] sm:$0xff] %v312_v0 }
  0x58   : > { %315 = vst [vmem:[%s2639_s5 + $0x208] sm:$0xff] %v314_v1 }
  0x59   : > { %317 = vst [vmem:[%s2639_s5 + $0x210] sm:$0xff] %v316_v2 }
  0x5a   : > { %319 = vst [vmem:[%s2639_s5 + $0x218] sm:$0xff] %v318_v3 }
  0x5b   : > { %321 = vst [vmem:[%s2639_s5 + $0x220] sm:$0xff] %v320_v4 }
  0x5c   : > { %323 = vst [vmem:[%s2639_s5 + $0x228] sm:$0xff] %v322_v5 }
  0x5d   : > { %325 = vst [vmem:[%s2639_s5 + $0x230] sm:$0xff] %v324_v6 }
  0x5e   : > { %327 = vst [vmem:[%s2639_s5 + $0x238] sm:$0xff] %v326_v7 }
  0x5f   : > { %329 = vst [vmem:[%s2639_s5 + $0x240] sm:$0xff] %v328_v8 }
  0x60   : > { %331 = vst [vmem:[%s2639_s5 + $0x248] sm:$0xff] %v330_v9 }
  0x61   : > { %333 = vst [vmem:[%s2639_s5 + $0x250] sm:$0xff] %v332_v10 }
  0x62   : > { %335 = vst [vmem:[%s2639_s5 + $0x258] sm:$0xff] %v334_v11 }
  0x63   : > { %337 = vst [vmem:[%s2639_s5 + $0x260] sm:$0xff] %v336_v12 }
  0x64   : > { %339 = vst [vmem:[%s2639_s5 + $0x268] sm:$0xff] %v338_v13 }
  0x65   : > { %341 = vst [vmem:[%s2639_s5 + $0x270] sm:$0xff] %v340_v14 }
  0x66   : > { %343 = vst [vmem:[%s2639_s5 + $0x278] sm:$0xff] %v342_v15 }
  0x67   : > { %345 = vst [vmem:[%s2639_s5 + $0x280] sm:$0xff] %v344_v16 }
  0x68   : > { %347 = vst [vmem:[%s2639_s5 + $0x288] sm:$0xff] %v346_v17 }
  0x69   : > { %349 = vst [vmem:[%s2639_s5 + $0x290] sm:$0xff] %v348_v18 }
  0x6a   : > { %351 = vst [vmem:[%s2639_s5 + $0x298] sm:$0xff] %v350_v19 }
  0x6b   : > { %353 = vst [vmem:[%s2639_s5 + $0x2a0] sm:$0xff] %v352_v20 }
  0x6c   : > { %355 = vst [vmem:[%s2639_s5 + $0x2a8] sm:$0xff] %v354_v21 }
  0x6d   : > { %357 = vst [vmem:[%s2639_s5 + $0x2b0] sm:$0xff] %v356_v22 }
  0x6e   : > { %359 = vst [vmem:[%s2639_s5 + $0x2b8] sm:$0xff] %v358_v23 }
  0x6f   : > { %361 = vst [vmem:[%s2639_s5 + $0x2c0] sm:$0xff] %v360_v24 }
  0x70   : > { %363 = vst [vmem:[%s2639_s5 + $0x2c8] sm:$0xff] %v362_v25 }
  0x71   : > { %365 = vst [vmem:[%s2639_s5 + $0x2d0] sm:$0xff] %v364_v26 }
  0x72   : > { %367 = vst [vmem:[%s2639_s5 + $0x2d8] sm:$0xff] %v366_v27 }
  0x73   : > { %369 = vst [vmem:[%s2639_s5 + $0x2e0] sm:$0xff] %v368_v28 }
  0x74   : > { %371 = vst [vmem:[%s2639_s5 + $0x2e8] sm:$0xff] %v370_v29 }
  0x75   : > { %373 = vst [vmem:[%s2639_s5 + $0x2f0] sm:$0xff] %v372_v30 }
  0x76   : > { %375 = vst [vmem:[%s2639_s5 + $0x2f8] sm:$0xff] %v374_v31 }
  0x77   : > { %377 = vst [vmem:[%s2639_s5 + $0x300] sm:$0xff] %v376_v32 }
  0x78   : > { %379 = vst [vmem:[%s2639_s5 + $0x308] sm:$0xff] %v378_v33 }
  0x79   : > { %381 = vst [vmem:[%s2639_s5 + $0x310] sm:$0xff] %v380_v34 }
  0x7a   : > { %383 = vst [vmem:[%s2639_s5 + $0x318] sm:$0xff] %v382_v35 }
  0x7b   : > { %385 = vst [vmem:[%s2639_s5 + $0x320] sm:$0xff] %v384_v36 }
  0x7c   : > { %387 = vst [vmem:[%s2639_s5 + $0x328] sm:$0xff] %v386_v37 }
  0x7d   : > { %389 = vst [vmem:[%s2639_s5 + $0x330] sm:$0xff] %v388_v38 }
  0x7e   : > { %391 = vst [vmem:[%s2639_s5 + $0x338] sm:$0xff] %v390_v39 }
  0x7f   : > { %393 = vst [vmem:[%s2639_s5 + $0x340] sm:$0xff] %v392_v40 }
  0x80   : > { %395 = vst [vmem:[%s2639_s5 + $0x348] sm:$0xff] %v394_v41 }
  0x81   : > { %397 = vst [vmem:[%s2639_s5 + $0x350] sm:$0xff] %v396_v42 }
  0x82   : > { %399 = vst [vmem:[%s2639_s5 + $0x358] sm:$0xff] %v398_v43 }
  0x83   : > { %401 = vst [vmem:[%s2639_s5 + $0x360] sm:$0xff] %v400_v44 }
  0x84   : > { %403 = vst [vmem:[%s2639_s5 + $0x368] sm:$0xff] %v402_v45 }
  0x85   : > { %405 = vst [vmem:[%s2639_s5 + $0x370] sm:$0xff] %v404_v46 }
  0x86   : > { %407 = vst [vmem:[%s2639_s5 + $0x378] sm:$0xff] %v406_v47 }
  0x87   : > { %409 = vst [vmem:[%s2639_s5 + $0x380] sm:$0xff] %v408_v48 }
  0x88   : > { %411 = vst [vmem:[%s2639_s5 + $0x388] sm:$0xff] %v410_v49 }
  0x89   : > { %413 = vst [vmem:[%s2639_s5 + $0x390] sm:$0xff] %v412_v50 }
  0x8a   : > { %415 = vst [vmem:[%s2639_s5 + $0x398] sm:$0xff] %v414_v51 }
  0x8b   : > { %417 = vst [vmem:[%s2639_s5 + $0x3a0] sm:$0xff] %v416_v52 }
  0x8c   : > { %419 = vst [vmem:[%s2639_s5 + $0x3a8] sm:$0xff] %v418_v53 }
  0x8d   : > { %421 = vst [vmem:[%s2639_s5 + $0x3b0] sm:$0xff] %v420_v54 }
  0x8e   : > { %423 = vst [vmem:[%s2639_s5 + $0x3b8] sm:$0xff] %v422_v55 }
  0x8f   : > { %425 = vst [vmem:[%s2639_s5 + $0x3c0] sm:$0xff] %v424_v56 }
  0x90   : > { %427 = vst [vmem:[%s2639_s5 + $0x3c8] sm:$0xff] %v426_v57 }
  0x91   : > { %429 = vst [vmem:[%s2639_s5 + $0x3d0] sm:$0xff] %v428_v58 }
  0x92   : > { %431 = vst [vmem:[%s2639_s5 + $0x3d8] sm:$0xff] %v430_v59 }
  0x93   : > { %433 = vst [vmem:[%s2639_s5 + $0x3e0] sm:$0xff] %v432_v60 }
  0x94   : > { %435 = vst [vmem:[%s2639_s5 + $0x3e8] sm:$0xff] %v434_v61 }
  0x95   : > { %437 = vst [vmem:[%s2639_s5 + $0x3f0] sm:$0xff] %v436_v62 }
  0x96   : > { %439 = vst [vmem:[%s2639_s5 + $0x3f8] sm:$0xff] %v438_v63 }
  0x97 PF: > { %p1765_p11 = scmp.ge.s32.totalorder %s2547_s17, 1  ;;  %p452_p12 = scmp.lt.s32.totalorder %s2547_s17, 3 }
  0x99   : > { %p453_p13 = pnand %p1765_p11, %p452_p12 }
  0x9a   : > { %s2897_s6 = sand.u32 (!%p453_p13), 1, %s2531_s13  }
  0x9b   : > { %456 = sbr.rel (%p453_p13) target bundleno = 464 (0x1d0), region = 51  ;;  %s1766_s7 = sshll.u32 (!%p453_p13), %s2897_s6, 10 }
  0x9c   : > { %s2900_s8 = scalar_lea.vmem (!%p453_p13), [#allocation2], %s1766_s7  ;;  %s1767_s19 = sshll.u32 (!%p453_p13), %s2897_s6, 6 }
  0x9d   : > { %s3228_s21 = scalar_lea.vmem (!%p453_p13), [#allocation3], %s1767_s19  ;;  %s1630_s23 = scalar_lea.sflag (!%p453_p13), [#allocation4], %s2897_s6 }
  0xa0   : > { %v1883_v0 = vld [vmem:[%s2900_s8 + $0xe0] sm:$0xf]  ;;  %v2317_v1 = vld [vmem:[%s2900_s8 + $0xec] sm:$0xf0]  ;;  %vm1577_vm0 = vcmask 1041408   ;;  %vm1579_vm1 = vcmask 1045508  }
  0xa1   : > { %v2011_v2 = vld [vmem:[%s2900_s8 + $0x1e0] sm:$0xf]  ;;  %v1884_v3 = vor.u32 %v2317_v1, %v1883_v0  ;;  %v2349_v4 = vld [vmem:[%s2900_s8 + $0x1ec] sm:$0xf0]  ;;  %vm1583_vm2 = vcmask 1043458   ;;  %vm1585_vm3 = vcmask 1045504  }
  0xa2   : > { %v2139_v5 = vld [vmem:[%s2900_s8 + $0x2e0] sm:$0xf]  ;;  %v2381_v6 = vld [vmem:[%s2900_s8 + $0x2ec] sm:$0xf0]  ;;  %v2012_v7 = vor.u32 %v2349_v4, %v2011_v2  ;;  %vm1581_vm4 = vcmask 1043456   ;;  %vm1587_vm5 = vcmask 1045506  }
  0xa3   : > { %v2140_v8 = vor.u32 %v2381_v6, %v2139_v5  ;;  %v2267_v9 = vld [vmem:[%s2900_s8 + $0x3e0] sm:$0xf]  ;;  %v2413_v10 = vld [vmem:[%s2900_s8 + $0x3ec] sm:$0xf0]  ;;  %1331 = vmatpush.bf16.msra.mxu0 %v1884_v3 }
  0xa4   : > { %v1867_v11 = vld [vmem:[%s2900_s8 + $0xc0] sm:$0xf]  ;;  %v2268_v12 = vor.u32 %v2413_v10, %v2267_v9  ;;  %v2313_v13 = vld [vmem:[%s2900_s8 + $0xcc] sm:$0xf0]  ;;  %1345 = vmatpush.bf16.msra.mxu1 %v2012_v7 }
  0xa5   : > { %v1995_v14 = vld [vmem:[%s2900_s8 + $0x1c0] sm:$0xf]  ;;  %v2345_v15 = vld [vmem:[%s2900_s8 + $0x1cc] sm:$0xf0]  ;;  %1359 = vmatpush.bf16.msra.mxu2 %v2140_v8  ;;  %v1868_v16 = vor.u32 %v2313_v13, %v1867_v11 }
  0xa6   : > { %v1996_v17 = vor.u32 %v2345_v15, %v1995_v14  ;;  %v2123_v18 = vld [vmem:[%s2900_s8 + $0x2c0] sm:$0xf]  ;;  %v2377_v19 = vld [vmem:[%s2900_s8 + $0x2cc] sm:$0xf0]  ;;  %1373 = vmatpush.bf16.msra.mxu3 %v2268_v12 }
  0xa7   : > { %v2251_v20 = vld [vmem:[%s2900_s8 + $0x3c0] sm:$0xf]  ;;  %v2124_v21 = vor.u32 %v2377_v19, %v2123_v18  ;;  %v2409_v22 = vld [vmem:[%s2900_s8 + $0x3cc] sm:$0xf0]  ;;  %1332 = vmatpush.bf16.msra.mxu0 %v1868_v16 }
  0xa8   : > { %v1851_v23 = vld [vmem:[%s2900_s8 + $0xa0] sm:$0xf]  ;;  %v2309_v24 = vld [vmem:[%s2900_s8 + $0xac] sm:$0xf0]  ;;  %v2252_v25 = vor.u32 %v2409_v22, %v2251_v20  ;;  %1346 = vmatpush.bf16.msra.mxu1 %v1996_v17 }
  0xa9   : > { %v1979_v26 = vld [vmem:[%s2900_s8 + $0x1a0] sm:$0xf]  ;;  %v2341_v27 = vld [vmem:[%s2900_s8 + $0x1ac] sm:$0xf0]  ;;  %v1852_v29 = vor.u32 %v2309_v24, %v1851_v23  ;;  %1360 = vmatpush.bf16.msra.mxu2 %v2124_v21 }
  0xaa   : > { %v2107_v28 = vld [vmem:[%s2900_s8 + $0x2a0] sm:$0xf]  ;;  %v2373_v30 = vld [vmem:[%s2900_s8 + $0x2ac] sm:$0xf0]  ;;  %v1980_v33 = vor.u32 %v2341_v27, %v1979_v26  ;;  %1374 = vmatpush.bf16.msra.mxu3 %v2252_v25 }
  0xab   : > { %v2235_v31 = vld [vmem:[%s2900_s8 + $0x3a0] sm:$0xf]  ;;  %v2405_v32 = vld [vmem:[%s2900_s8 + $0x3ac] sm:$0xf0]  ;;  %v2108_v34 = vor.u32 %v2373_v30, %v2107_v28  ;;  %1333 = vmatpush.bf16.msra.mxu0 %v1852_v29  ;;  %v2315_v28 = vld [vmem:[%s2900_s8 + $0xe4] sm:$0xf] }
  0xac   : > { %v1835_v35 = vld [vmem:[%s2900_s8 + $0x80] sm:$0xf]  ;;  %v2305_v36 = vld [vmem:[%s2900_s8 + $0x8c] sm:$0xf0]  ;;  %v2236_v38 = vor.u32 %v2405_v32, %v2235_v31  ;;  %1347 = vmatpush.bf16.msra.mxu1 %v1980_v33  ;;  %v1885_v29 = vld [vmem:[%s2900_s8 + $0xf0] sm:$0xf0] }
  0xad   : > { %v1963_v37 = vld [vmem:[%s2900_s8 + $0x180] sm:$0xf]  ;;  %v2337_v39 = vld [vmem:[%s2900_s8 + $0x18c] sm:$0xf0]  ;;  %v1836_v44 = vor.u32 %v2305_v36, %v1835_v35  ;;  %1361 = vmatpush.bf16.msra.mxu2 %v2108_v34  ;;  %v2347_v30 = vld [vmem:[%s2900_s8 + $0x1e4] sm:$0xf] }
  0xae   : > { %v2091_v40 = vld [vmem:[%s2900_s8 + $0x280] sm:$0xf]  ;;  %v2369_v41 = vld [vmem:[%s2900_s8 + $0x28c] sm:$0xf0]  ;;  %v1964_v45 = vor.u32 %v2337_v39, %v1963_v37  ;;  %1375 = vmatpush.bf16.msra.mxu3 %v2236_v38  ;;  %v2013_v32 = vld [vmem:[%s2900_s8 + $0x1f0] sm:$0xf0] }
  0xaf   : > { %v2219_v42 = vld [vmem:[%s2900_s8 + $0x380] sm:$0xf]  ;;  %v2401_v43 = vld [vmem:[%s2900_s8 + $0x38c] sm:$0xf0]  ;;  %v2092_v46 = vor.u32 %v2369_v41, %v2091_v40  ;;  %1334 = vmatpush.bf16.msra.mxu0 %v1836_v44  ;;  %v2379_v33 = vld [vmem:[%s2900_s8 + $0x2e4] sm:$0xf]  ;;  %v1888_v40 = vor.u32 %v2315_v28, %v1885_v29 }
  0xb0   : > { %v1819_v47 = vld [vmem:[%s2900_s8 + $0x60] sm:$0xf]  ;;  %v2301_v48 = vld [vmem:[%s2900_s8 + $0x6c] sm:$0xf0]  ;;  %v2220_v50 = vor.u32 %v2401_v43, %v2219_v42  ;;  %1348 = vmatpush.bf16.msra.mxu1 %v1964_v45  ;;  %v2141_v34 = vld [vmem:[%s2900_s8 + $0x2f0] sm:$0xf0]  ;;  %v2016_v43 = vor.u32 %v2347_v30, %v2013_v32 }
  0xb1   : > { %v1947_v49 = vld [vmem:[%s2900_s8 + $0x160] sm:$0xf]  ;;  %v2333_v51 = vld [vmem:[%s2900_s8 + $0x16c] sm:$0xf0]  ;;  %v1820_v56 = vor.u32 %v2301_v48, %v1819_v47  ;;  %1362 = vmatpush.bf16.msra.mxu2 %v2092_v46  ;;  %v2411_v37 = vld [vmem:[%s2900_s8 + $0x3e4] sm:$0xf]  ;;  %v2144_v44 = vor.u32 %v2379_v33, %v2141_v34 }
  0xb2   : > { %v2075_v52 = vld [vmem:[%s2900_s8 + $0x260] sm:$0xf]  ;;  %v2365_v53 = vld [vmem:[%s2900_s8 + $0x26c] sm:$0xf0]  ;;  %v1948_v57 = vor.u32 %v2333_v51, %v1947_v49  ;;  %1376 = vmatpush.bf16.msra.mxu3 %v2220_v50  ;;  %v2269_v38 = vld [vmem:[%s2900_s8 + $0x3f0] sm:$0xf0] }
  0xb3   : > { %v2203_v54 = vld [vmem:[%s2900_s8 + $0x360] sm:$0xf]  ;;  %v2397_v55 = vld [vmem:[%s2900_s8 + $0x36c] sm:$0xf0]  ;;  %v2076_v58 = vor.u32 %v2365_v53, %v2075_v52  ;;  %1335 = vmatpush.bf16.msra.mxu0 %v1820_v56  ;;  %v2311_v41 = vld [vmem:[%s2900_s8 + $0xc4] sm:$0xf]  ;;  %v2272_v48 = vor.u32 %v2411_v37, %v2269_v38 }
  0xb4   : > { %v1803_v59 = vld [vmem:[%s2900_s8 + $0x40] sm:$0xf]  ;;  %v2297_v60 = vld [vmem:[%s2900_s8 + $0x4c] sm:$0xf0]  ;;  %v2204_v62 = vor.u32 %v2397_v55, %v2203_v54  ;;  %1349 = vmatpush.bf16.msra.mxu1 %v1948_v57  ;;  %v1869_v42 = vld [vmem:[%s2900_s8 + $0xd0] sm:$0xf0] }
  0xb5   : > { %v1931_v61 = vld [vmem:[%s2900_s8 + $0x140] sm:$0xf]  ;;  %v2329_v63 = vld [vmem:[%s2900_s8 + $0x14c] sm:$0xf0]  ;;  %v1804_v4 = vor.u32 %v2297_v60, %v1803_v59  ;;  %1363 = vmatpush.bf16.msra.mxu2 %v2076_v58  ;;  %v2343_v45 = vld [vmem:[%s2900_s8 + $0x1c4] sm:$0xf]  ;;  %v1872_v56 = vor.u32 %v2311_v41, %v1869_v42 }
  0xb6   : > { %v2059_v0 = vld [vmem:[%s2900_s8 + $0x240] sm:$0xf]  ;;  %v2361_v1 = vld [vmem:[%s2900_s8 + $0x24c] sm:$0xf0]  ;;  %v1932_v5 = vor.u32 %v2329_v63, %v1931_v61  ;;  %1377 = vmatpush.bf16.msra.mxu3 %v2204_v62  ;;  %v1997_v46 = vld [vmem:[%s2900_s8 + $0x1d0] sm:$0xf0] }
  0xb7   : > { %v2187_v2 = vld [vmem:[%s2900_s8 + $0x340] sm:$0xf]  ;;  %v2393_v3 = vld [vmem:[%s2900_s8 + $0x34c] sm:$0xf0]  ;;  %v2060_v6 = vor.u32 %v2361_v1, %v2059_v0  ;;  %1336 = vmatpush.bf16.msra.mxu0 %v1804_v4  ;;  %v2375_v47 = vld [vmem:[%s2900_s8 + $0x2c4] sm:$0xf]  ;;  %v2000_v62 = vor.u32 %v2343_v45, %v1997_v46 }
  0xb8   : > { %v1787_v7 = vld [vmem:[%s2900_s8 + $0x20] sm:$0xf]  ;;  %v2293_v8 = vld [vmem:[%s2900_s8 + $0x2c] sm:$0xf0]  ;;  %v2188_v10 = vor.u32 %v2393_v3, %v2187_v2  ;;  %1350 = vmatpush.bf16.msra.mxu1 %v1932_v5  ;;  %v2125_v49 = vld [vmem:[%s2900_s8 + $0x2d0] sm:$0xf0] }
  0xb9   : > { %v1915_v9 = vld [vmem:[%s2900_s8 + $0x120] sm:$0xf]  ;;  %v2325_v11 = vld [vmem:[%s2900_s8 + $0x12c] sm:$0xf0]  ;;  %v1788_v16 = vor.u32 %v2293_v8, %v1787_v7  ;;  %1364 = vmatpush.bf16.msra.mxu2 %v2060_v6  ;;  %v2407_v50 = vld [vmem:[%s2900_s8 + $0x3c4] sm:$0xf]  ;;  %v2128_v63 = vor.u32 %v2375_v47, %v2125_v49 }
  0xba   : > { %v2043_v12 = vld [vmem:[%s2900_s8 + $0x220] sm:$0xf]  ;;  %v2357_v13 = vld [vmem:[%s2900_s8 + $0x22c] sm:$0xf0]  ;;  %v1916_v19 = vor.u32 %v2325_v11, %v1915_v9  ;;  %1378 = vmatpush.bf16.msra.mxu3 %v2188_v10  ;;  %v2253_v51 = vld [vmem:[%s2900_s8 + $0x3d0] sm:$0xf0] }
  0xbb   : > { %v2171_v14 = vld [vmem:[%s2900_s8 + $0x320] sm:$0xf]  ;;  %v2389_v15 = vld [vmem:[%s2900_s8 + $0x32c] sm:$0xf0]  ;;  %v2044_v20 = vor.u32 %v2357_v13, %v2043_v12  ;;  %1337 = vmatpush.bf16.msra.mxu0 %v1788_v16  ;;  %v2307_v52 = vld [vmem:[%s2900_s8 + $0xa4] sm:$0xf]  ;;  %v2256_v2 = vor.u32 %v2407_v50, %v2253_v51 }
  0xbc   : > { %v1771_v17 = vld [vmem:[%s2900_s8] sm:$0xf]  ;;  %v2289_v18 = vld [vmem:[%s2900_s8 + $0xc] sm:$0xf0]  ;;  %v2172_v24 = vor.u32 %v2389_v15, %v2171_v14  ;;  %1351 = vmatpush.bf16.msra.mxu1 %v1916_v19  ;;  %v1853_v53 = vld [vmem:[%s2900_s8 + $0xb0] sm:$0xf0] }
  0xbd   : > { %v1899_v21 = vld [vmem:[%s2900_s8 + $0x100] sm:$0xf]  ;;  %v2321_v22 = vld [vmem:[%s2900_s8 + $0x10c] sm:$0xf0]  ;;  %v1772_v31 = vor.u32 %v2289_v18, %v1771_v17  ;;  %1365 = vmatpush.bf16.msra.mxu2 %v2044_v20  ;;  %v514_v54 = vld [vmem:[%s3288_s0] sm:$0xf]  ;;  %v1856_v8 = vor.u32 %v2307_v52, %v1853_v53 }
  0xbe   : > { %v2027_v23 = vld [vmem:[%s2900_s8 + $0x200] sm:$0xf]  ;;  %v2353_v25 = vld [vmem:[%s2900_s8 + $0x20c] sm:$0xf0]  ;;  %v1900_v35 = vor.u32 %v2321_v22, %v1899_v21  ;;  %1379 = vmatpush.bf16.msra.mxu3 %v2172_v24  ;;  %v515_v55 = vld [vmem:[%s3288_s0 + $0x4] sm:$0xf] }
  0xbf   : > { %v2155_v26 = vld [vmem:[%s2900_s8 + $0x300] sm:$0xf]  ;;  %v2385_v27 = vld [vmem:[%s2900_s8 + $0x30c] sm:$0xf0]  ;;  %v2028_v36 = vor.u32 %v2353_v25, %v2027_v23  ;;  %1338 = vmatpush.bf16.msra.mxu0 %v1772_v31  ;;  %v2339_v57 = vld [vmem:[%s2900_s8 + $0x1a4] sm:$0xf] }
  0xc0   : > { %v2156_v39 = vor.u32 %v2385_v27, %v2155_v26  ;;  %1352 = vmatpush.bf16.msra.mxu1 %v1900_v35  ;;  %v1981_v58 = vld [vmem:[%s2900_s8 + $0x1b0] sm:$0xf0]  ;;  %v2371_v59 = vld [vmem:[%s2900_s8 + $0x2a4] sm:$0xf]  ;;  %v516_v61 = vld [vmem:[%s3288_s0 + $0x8] sm:$0xf] }
  0xc1   : > { %1366 = vmatpush.bf16.msra.mxu2 %v2028_v36  ;;  %v2109_v60 = vld [vmem:[%s2900_s8 + $0x2b0] sm:$0xf0]  ;;  %v2403_v0 = vld [vmem:[%s2900_s8 + $0x3a4] sm:$0xf]  ;;  %661 = vst [vmem:[#allocation1] ss:$9 sm:$0xff] %v514_v54  ;;  %v1984_v11 = vor.u32 %v2339_v57, %v1981_v58 }
  0xc2   : > { %1380 = vmatpush.bf16.msra.mxu3 %v2156_v39  ;;  %v517_v1 = vld [vmem:[%s3288_s0 + $0xc] sm:$0xf]  ;;  %v2237_v3 = vld [vmem:[%s2900_s8 + $0x3b0] sm:$0xf0]  ;;  %v518_v4 = vld [vmem:[%s3288_s0 + $0x10] sm:$0xf]  ;;  %v2112_v12 = vor.u32 %v2371_v59, %v2109_v60 }
  0xc3   : > { %1387 = vmatpush.bf16.msrb.mxu0 %v1888_v40  ;;  %664 = vst [vmem:[#allocation1 + $0x1] ss:$9 sm:$0xff] %v515_v55  ;;  %v2303_v5 = vld [vmem:[%s2900_s8 + $0x84] sm:$0xf]  ;;  %v1837_v6 = vld [vmem:[%s2900_s8 + $0x90] sm:$0xf0]  ;;  %v2240_v15 = vor.u32 %v2403_v0, %v2237_v3 }
  0xc4   : > { %1401 = vmatpush.bf16.msrb.mxu1 %v2016_v43  ;;  %v519_v7 = vld [vmem:[%s3288_s0 + $0x14] sm:$0xf]  ;;  %667 = vst [vmem:[#allocation1 + $0x2] ss:$9 sm:$0xff] %v516_v61  ;;  %v2335_v9 = vld [vmem:[%s2900_s8 + $0x184] sm:$0xf]  ;;  %v1840_v20 = vor.u32 %v2303_v5, %v1837_v6 }
  0xc5   : > { %1415 = vmatpush.bf16.msrb.mxu2 %v2144_v44  ;;  %v520_v10 = vld [vmem:[%s3288_s0 + $0x18] sm:$0xf]  ;;  %670 = vst [vmem:[#allocation1 + $0x3] ss:$9 sm:$0xff] %v517_v1  ;;  %v1965_v13 = vld [vmem:[%s2900_s8 + $0x190] sm:$0xf0] }
  0xc6   : > { %1429 = vmatpush.bf16.msrb.mxu3 %v2272_v48  ;;  %v521_v14 = vld [vmem:[%s3288_s0 + $0x1c] sm:$0xf]  ;;  %673 = vst [vmem:[#allocation1 + $0x4] ss:$9 sm:$0xff] %v518_v4  ;;  %v2367_v16 = vld [vmem:[%s2900_s8 + $0x284] sm:$0xf]  ;;  %v1968_v21 = vor.u32 %v2335_v9, %v1965_v13 }
  0xc7   : > { %1388 = vmatpush.bf16.msrb.mxu0 %v1872_v56  ;;  %v2093_v17 = vld [vmem:[%s2900_s8 + $0x290] sm:$0xf0]  ;;  %676 = vst [vmem:[#allocation1 + $0x5] ss:$9 sm:$0xff] %v519_v7  ;;  %v2399_v18 = vld [vmem:[%s2900_s8 + $0x384] sm:$0xf] }
  0xc8   : > { %1402 = vmatpush.bf16.msrb.mxu1 %v2000_v62  ;;  %v2221_v19 = vld [vmem:[%s2900_s8 + $0x390] sm:$0xf0]  ;;  %679 = vst [vmem:[#allocation1 + $0x6] ss:$9 sm:$0xff] %v520_v10  ;;  %v2096_v22 = vor.u32 %v2367_v16, %v2093_v17  ;;  %v2299_v23 = vld [vmem:[%s2900_s8 + $0x64] sm:$0xf] }
  0xc9   : > { %1416 = vmatpush.bf16.msrb.mxu2 %v2128_v63  ;;  %682 = vst [vmem:[#allocation1 + $0x7] ss:$9 sm:$0xff] %v521_v14  ;;  %v1821_v24 = vld [vmem:[%s2900_s8 + $0x70] sm:$0xf0]  ;;  %v2331_v25 = vld [vmem:[%s2900_s8 + $0x164] sm:$0xf]  ;;  %v2224_v26 = vor.u32 %v2399_v18, %v2221_v19 }
  0xca   : > { %1430 = vmatpush.bf16.msrb.mxu3 %v2256_v2  ;;  %v1949_v27 = vld [vmem:[%s2900_s8 + $0x170] sm:$0xf0]  ;;  %v2363_v28 = vld [vmem:[%s2900_s8 + $0x264] sm:$0xf]  ;;  %v1824_v32 = vor.u32 %v2299_v23, %v1821_v24  ;;  %v2318_v9 = vld [vmem:[%s2900_s8 + $0xf4] sm:$0xf0] }
  0xcb   : > { %1389 = vmatpush.bf16.msrb.mxu0 %v1856_v8  ;;  %v2077_v29 = vld [vmem:[%s2900_s8 + $0x270] sm:$0xf0]  ;;  %v2395_v30 = vld [vmem:[%s2900_s8 + $0x364] sm:$0xf]  ;;  %v1952_v34 = vor.u32 %v2331_v25, %v1949_v27  ;;  %v1891_v8 = vld [vmem:[%s2900_s8 + $0xe8] sm:$0xf] }
  0xcc   : > { %1403 = vmatpush.bf16.msrb.mxu1 %v1984_v11  ;;  %v2205_v31 = vld [vmem:[%s2900_s8 + $0x370] sm:$0xf0]  ;;  %v2295_v33 = vld [vmem:[%s2900_s8 + $0x44] sm:$0xf]  ;;  %v2080_v35 = vor.u32 %v2363_v28, %v2077_v29  ;;  %v2019_v10 = vld [vmem:[%s2900_s8 + $0x1e8] sm:$0xf] }
  0xcd   : > { %1417 = vmatpush.bf16.msrb.mxu2 %v2112_v12  ;;  %v1805_v36 = vld [vmem:[%s2900_s8 + $0x50] sm:$0xf0]  ;;  %v2327_v37 = vld [vmem:[%s2900_s8 + $0x144] sm:$0xf]  ;;  %v2208_v39 = vor.u32 %v2395_v30, %v2205_v31  ;;  %v2350_v12 = vld [vmem:[%s2900_s8 + $0x1f4] sm:$0xf0] }
  0xce   : > { %1431 = vmatpush.bf16.msrb.mxu3 %v2240_v15  ;;  %v1933_v38 = vld [vmem:[%s2900_s8 + $0x150] sm:$0xf0]  ;;  %v2359_v40 = vld [vmem:[%s2900_s8 + $0x244] sm:$0xf]  ;;  %v1808_v48 = vor.u32 %v2295_v33, %v1805_v36  ;;  %v2147_v13 = vld [vmem:[%s2900_s8 + $0x2e8] sm:$0xf] }
  0xcf   : > { %1390 = vmatpush.bf16.msrb.mxu0 %v1840_v20  ;;  %v2061_v41 = vld [vmem:[%s2900_s8 + $0x250] sm:$0xf0]  ;;  %v2391_v42 = vld [vmem:[%s2900_s8 + $0x344] sm:$0xf]  ;;  %v1936_v49 = vor.u32 %v2327_v37, %v1933_v38  ;;  %v2382_v14 = vld [vmem:[%s2900_s8 + $0x2f4] sm:$0xf0]  ;;  %v1892_v20 = vor.u32 %v2318_v9, %v1891_v8 }
  0xd0   : > { %1404 = vmatpush.bf16.msrb.mxu1 %v1968_v21  ;;  %v3037_v43 = vld [vmem:[#allocation1 + $0x12] sm:$0xff]  ;;  %v3039_v44 = vld [vmem:[#allocation1] sm:$0xff]  ;;  %v2189_v45 = vld [vmem:[%s2900_s8 + $0x350] sm:$0xf0]  ;;  %v2064_v50 = vor.u32 %v2359_v40, %v2061_v41  ;;  %v2020_v21 = vor.u32 %v2350_v12, %v2019_v10 }
  0xd1   : > { %1418 = vmatpush.bf16.msrb.mxu2 %v2096_v22  ;;  %v3043_v46 = vld [vmem:[#allocation1 + $0x1b] sm:$0xff]  ;;  %v3045_v47 = vld [vmem:[#allocation1 + $0x9] sm:$0xff]  ;;  %1339 = vmatmul.bf16.vlgmr.msra.gmra.mxu0 %v3039_v44  ;;  %v2192_v54 = vor.u32 %v2391_v42, %v2189_v45  ;;  %v2148_v22 = vor.u32 %v2382_v14, %v2147_v13 }
  0xd2   : > { %1432 = vmatpush.bf16.msrb.mxu3 %v2224_v26  ;;  %1367 = vmatmul.bf16.vlgmr.msra.gmra.mxu2 %v3037_v43  ;;  %v2291_v51 = vld [vmem:[%s2900_s8 + $0x24] sm:$0xf]  ;;  %v1789_v52 = vld [vmem:[%s2900_s8 + $0x30] sm:$0xf0]  ;;  %v2275_v17 = vld [vmem:[%s2900_s8 + $0x3e8] sm:$0xf] }
  0xd3   : > { %1391 = vmatpush.bf16.msrb.mxu0 %v1824_v32  ;;  %v2323_v53 = vld [vmem:[%s2900_s8 + $0x124] sm:$0xf]  ;;  %v1917_v55 = vld [vmem:[%s2900_s8 + $0x130] sm:$0xf0]  ;;  %1381 = vmatmul.bf16.vlgmr.msra.gmra.mxu3 %v3043_v46  ;;  %v1792_v60 = vor.u32 %v2291_v51, %v1789_v52  ;;  %v2414_v18 = vld [vmem:[%s2900_s8 + $0x3f4] sm:$0xf0] }
  0xd4   : > { %1405 = vmatpush.bf16.msrb.mxu1 %v1952_v34  ;;  %v2355_v56 = vld [vmem:[%s2900_s8 + $0x224] sm:$0xf]  ;;  %v2045_v57 = vld [vmem:[%s2900_s8 + $0x230] sm:$0xf0]  ;;  %v1920_v63 = vor.u32 %v2323_v53, %v1917_v55  ;;  %v2276_v23 = vor.u32 %v2414_v18, %v2275_v17  ;;  %v1875_v24 = vld [vmem:[%s2900_s8 + $0xc8] sm:$0xf] }
  0xd5   : > { %1419 = vmatpush.bf16.msrb.mxu2 %v2080_v35  ;;  %1353 = vmatmul.bf16.vlgmr.msra.gmra.mxu1 %v3045_v47  ;;  %v2387_v58 = vld [vmem:[%s2900_s8 + $0x324] sm:$0xf]  ;;  %v2173_v59 = vld [vmem:[%s2900_s8 + $0x330] sm:$0xf0]  ;;  %v2048_v0 = vor.u32 %v2355_v56, %v2045_v57  ;;  %v2314_v25 = vld [vmem:[%s2900_s8 + $0xd4] sm:$0xf0] }
  0xd6   : > { %1433 = vmatpush.bf16.msrb.mxu3 %v2208_v39  ;;  %v2287_v61 = vld [vmem:[%s2900_s8 + $0x4] sm:$0xf]  ;;  %v1773_v62 = vld [vmem:[%s2900_s8 + $0x10] sm:$0xf0]  ;;  %v2176_v4 = vor.u32 %v2387_v58, %v2173_v59  ;;  %v2003_v26 = vld [vmem:[%s2900_s8 + $0x1c8] sm:$0xf]  ;;  %v1876_v32 = vor.u32 %v2314_v25, %v1875_v24 }
  0xd7   : > { %1392 = vmatpush.bf16.msrb.mxu0 %v1808_v48  ;;  %v2319_v1 = vld [vmem:[%s2900_s8 + $0x104] sm:$0xf]  ;;  %v1901_v2 = vld [vmem:[%s2900_s8 + $0x110] sm:$0xf0]  ;;  %v1776_v11 = vor.u32 %v2287_v61, %v1773_v62  ;;  %v2346_v27 = vld [vmem:[%s2900_s8 + $0x1d4] sm:$0xf0] }
  0xd8   : > { %1406 = vmatpush.bf16.msrb.mxu1 %v1936_v49  ;;  %v2351_v3 = vld [vmem:[%s2900_s8 + $0x204] sm:$0xf]  ;;  %v2029_v5 = vld [vmem:[%s2900_s8 + $0x210] sm:$0xf0]  ;;  %v1904_v15 = vor.u32 %v2319_v1, %v1901_v2  ;;  %v2131_v28 = vld [vmem:[%s2900_s8 + $0x2c8] sm:$0xf]  ;;  %v2004_v33 = vor.u32 %v2346_v27, %v2003_v26 }
  0xd9   : > { %1420 = vmatpush.bf16.msrb.mxu2 %v2064_v50  ;;  %v2383_v6 = vld [vmem:[%s2900_s8 + $0x304] sm:$0xf]  ;;  %v2157_v7 = vld [vmem:[%s2900_s8 + $0x310] sm:$0xf0]  ;;  %v2032_v16 = vor.u32 %v2351_v3, %v2029_v5  ;;  %v2378_v29 = vld [vmem:[%s2900_s8 + $0x2d4] sm:$0xf0] }
  0xda   : > { %1434 = vmatpush.bf16.msrb.mxu3 %v2192_v54  ;;  %v2160_v19 = vor.u32 %v2383_v6, %v2157_v7  ;;  %v2259_v30 = vld [vmem:[%s2900_s8 + $0x3c8] sm:$0xf]  ;;  %v2410_v31 = vld [vmem:[%s2900_s8 + $0x3d4] sm:$0xf0]  ;;  %v2132_v34 = vor.u32 %v2378_v29, %v2131_v28 }
  0xdb   : > { %1393 = vmatpush.bf16.msrb.mxu0 %v1792_v60  ;;  %v1859_v35 = vld [vmem:[%s2900_s8 + $0xa8] sm:$0xf]  ;;  %v2310_v36 = vld [vmem:[%s2900_s8 + $0xb4] sm:$0xf0]  ;;  %v2260_v38 = vor.u32 %v2410_v31, %v2259_v30 }
  0xdc   : > { %1407 = vmatpush.bf16.msrb.mxu1 %v1920_v63  ;;  %v1987_v37 = vld [vmem:[%s2900_s8 + $0x1a8] sm:$0xf]  ;;  %v2342_v39 = vld [vmem:[%s2900_s8 + $0x1b4] sm:$0xf0]  ;;  %v1860_v48 = vor.u32 %v2310_v36, %v1859_v35 }
  0xdd   : > { %1421 = vmatpush.bf16.msrb.mxu2 %v2048_v0  ;;  %v2115_v40 = vld [vmem:[%s2900_s8 + $0x2a8] sm:$0xf]  ;;  %v2374_v41 = vld [vmem:[%s2900_s8 + $0x2b4] sm:$0xf0]  ;;  %v1988_v49 = vor.u32 %v2342_v39, %v1987_v37 }
  0xde   : > { %1435 = vmatpush.bf16.msrb.mxu3 %v2176_v4  ;;  %v2243_v42 = vld [vmem:[%s2900_s8 + $0x3a8] sm:$0xf]  ;;  %v2406_v45 = vld [vmem:[%s2900_s8 + $0x3b4] sm:$0xf0]  ;;  %v2116_v50 = vor.u32 %v2374_v41, %v2115_v40 }
  0xdf   : > { %1394 = vmatpush.bf16.msrb.mxu0 %v1776_v11  ;;  %v1843_v51 = vld [vmem:[%s2900_s8 + $0x88] sm:$0xf]  ;;  %v2306_v52 = vld [vmem:[%s2900_s8 + $0x94] sm:$0xf0]  ;;  %v2244_v54 = vor.u32 %v2406_v45, %v2243_v42 }
  0xe0   : > { %1408 = vmatpush.bf16.msrb.mxu1 %v1904_v15  ;;  %v1971_v53 = vld [vmem:[%s2900_s8 + $0x188] sm:$0xf]  ;;  %v2338_v55 = vld [vmem:[%s2900_s8 + $0x194] sm:$0xf0]  ;;  %v1844_v60 = vor.u32 %v2306_v52, %v1843_v51  ;;  %v2021_v52 = vld [vmem:[%s2900_s8 + $0x1f8] sm:$0xf0] }
  0xe1   : > { %1422 = vmatpush.bf16.msrb.mxu2 %v2032_v16  ;;  %v2099_v56 = vld [vmem:[%s2900_s8 + $0x288] sm:$0xf]  ;;  %v2370_v57 = vld [vmem:[%s2900_s8 + $0x294] sm:$0xf0]  ;;  %v1972_v61 = vor.u32 %v2338_v55, %v1971_v53  ;;  %v2380_v53 = vld [vmem:[%s2900_s8 + $0x2ec] sm:$0xf] }
  0xe2   : > { %1436 = vmatpush.bf16.msrb.mxu3 %v2160_v19  ;;  %1395 = vmatmul.bf16.vlgmr.msrb.gmra.mxu0 %v3039_v44  ;;  %v2227_v58 = vld [vmem:[%s2900_s8 + $0x388] sm:$0xf]  ;;  %v2402_v59 = vld [vmem:[%s2900_s8 + $0x394] sm:$0xf0]  ;;  %v2100_v62 = vor.u32 %v2370_v57, %v2099_v56  ;;  %v2412_v57 = vld [vmem:[%s2900_s8 + $0x3ec] sm:$0xf] }
  0xe3   : > { %1443 = vmatpush.bf16.msra.mxu0 %v1892_v20  ;;  %v1827_v63 = vld [vmem:[%s2900_s8 + $0x68] sm:$0xf]  ;;  %v2302_v0 = vld [vmem:[%s2900_s8 + $0x74] sm:$0xf0]  ;;  %v2228_v2 = vor.u32 %v2402_v59, %v2227_v58  ;;  %v2277_v58 = vld [vmem:[%s2900_s8 + $0x3f8] sm:$0xf0] }
  0xe4   : > { %1457 = vmatpush.bf16.msra.mxu1 %v2020_v21  ;;  %1423 = vmatmul.bf16.vlgmr.msrb.gmra.mxu2 %v3037_v43  ;;  %v1955_v1 = vld [vmem:[%s2900_s8 + $0x168] sm:$0xf]  ;;  %v2334_v3 = vld [vmem:[%s2900_s8 + $0x174] sm:$0xf0]  ;;  %v1828_v8 = vor.u32 %v2302_v0, %v1827_v63  ;;  %v2312_v63 = vld [vmem:[%s2900_s8 + $0xcc] sm:$0xf] }
  0xe5   : > { %1471 = vmatpush.bf16.msra.mxu2 %v2148_v22  ;;  %1437 = vmatmul.bf16.vlgmr.msrb.gmra.mxu3 %v3043_v46  ;;  %v2083_v4 = vld [vmem:[%s2900_s8 + $0x268] sm:$0xf]  ;;  %v2366_v5 = vld [vmem:[%s2900_s8 + $0x274] sm:$0xf0]  ;;  %v1956_v9 = vor.u32 %v2334_v3, %v1955_v1  ;;  %v1877_v0 = vld [vmem:[%s2900_s8 + $0xd8] sm:$0xf0] }
  0xe6   : > { %1485 = vmatpush.bf16.msra.mxu3 %v2276_v23  ;;  %1409 = vmatmul.bf16.vlgmr.msrb.gmra.mxu1 %v3045_v47  ;;  %v2211_v6 = vld [vmem:[%s2900_s8 + $0x368] sm:$0xf]  ;;  %v2398_v7 = vld [vmem:[%s2900_s8 + $0x374] sm:$0xf0]  ;;  %v2084_v10 = vor.u32 %v2366_v5, %v2083_v4  ;;  %v2344_v1 = vld [vmem:[%s2900_s8 + $0x1cc] sm:$0xf] }
  0xe7   : > { %1444 = vmatpush.bf16.msra.mxu0 %v1876_v32  ;;  %v1811_v11 = vld [vmem:[%s2900_s8 + $0x48] sm:$0xf]  ;;  %v2298_v12 = vld [vmem:[%s2900_s8 + $0x54] sm:$0xf0]  ;;  %v2212_v14 = vor.u32 %v2398_v7, %v2211_v6  ;;  %v2005_v3 = vld [vmem:[%s2900_s8 + $0x1d8] sm:$0xf0] }
  0xe8   : > { %1458 = vmatpush.bf16.msra.mxu1 %v2004_v33  ;;  %v1939_v13 = vld [vmem:[%s2900_s8 + $0x148] sm:$0xf]  ;;  %v2330_v15 = vld [vmem:[%s2900_s8 + $0x154] sm:$0xf0]  ;;  %v1812_v20 = vor.u32 %v2298_v12, %v1811_v11  ;;  %v2376_v4 = vld [vmem:[%s2900_s8 + $0x2cc] sm:$0xf] }
  0xe9   : > { %1472 = vmatpush.bf16.msra.mxu2 %v2132_v34  ;;  %v2067_v16 = vld [vmem:[%s2900_s8 + $0x248] sm:$0xf]  ;;  %v2362_v17 = vld [vmem:[%s2900_s8 + $0x254] sm:$0xf0]  ;;  %v1940_v21 = vor.u32 %v2330_v15, %v1939_v13  ;;  %v2133_v5 = vld [vmem:[%s2900_s8 + $0x2d8] sm:$0xf0] }
  0xea   : > { %1486 = vmatpush.bf16.msra.mxu3 %v2260_v38  ;;  %v2195_v18 = vld [vmem:[%s2900_s8 + $0x348] sm:$0xf]  ;;  %v2394_v19 = vld [vmem:[%s2900_s8 + $0x354] sm:$0xf0]  ;;  %v2068_v22 = vor.u32 %v2362_v17, %v2067_v16  ;;  %v2408_v6 = vld [vmem:[%s2900_s8 + $0x3cc] sm:$0xf] }
  0xeb   : > { %1445 = vmatpush.bf16.msra.mxu0 %v1860_v48  ;;  %v1795_v23 = vld [vmem:[%s2900_s8 + $0x28] sm:$0xf]  ;;  %v2294_v24 = vld [vmem:[%s2900_s8 + $0x34] sm:$0xf0]  ;;  %v2196_v26 = vor.u32 %v2394_v19, %v2195_v18  ;;  %v2316_v48 = vld [vmem:[%s2900_s8 + $0xec] sm:$0xf] }
  0xec   : > { %1459 = vmatpush.bf16.msra.mxu1 %v1988_v49  ;;  %v1923_v25 = vld [vmem:[%s2900_s8 + $0x128] sm:$0xf]  ;;  %v2326_v27 = vld [vmem:[%s2900_s8 + $0x134] sm:$0xf0]  ;;  %v1796_v32 = vor.u32 %v2294_v24, %v1795_v23  ;;  %v1893_v49 = vld [vmem:[%s2900_s8 + $0xf8] sm:$0xf0] }
  0xed   : > { %1473 = vmatpush.bf16.msra.mxu2 %v2116_v50  ;;  %v2051_v28 = vld [vmem:[%s2900_s8 + $0x228] sm:$0xf]  ;;  %v2358_v29 = vld [vmem:[%s2900_s8 + $0x234] sm:$0xf0]  ;;  %v1924_v35 = vor.u32 %v2326_v27, %v1923_v25  ;;  %v2348_v50 = vld [vmem:[%s2900_s8 + $0x1ec] sm:$0xf] }
  0xee   : > { %1487 = vmatpush.bf16.msra.mxu3 %v2244_v54  ;;  %v2179_v30 = vld [vmem:[%s2900_s8 + $0x328] sm:$0xf]  ;;  %v2390_v31 = vld [vmem:[%s2900_s8 + $0x334] sm:$0xf0]  ;;  %v2052_v36 = vor.u32 %v2358_v29, %v2051_v28  ;;  %v2149_v54 = vld [vmem:[%s2900_s8 + $0x2f8] sm:$0xf0] }
  0xef   : > { %1446 = vmatpush.bf16.msra.mxu0 %v1844_v60  ;;  %v1779_v33 = vld [vmem:[%s2900_s8 + $0x8] sm:$0xf]  ;;  %v2290_v34 = vld [vmem:[%s2900_s8 + $0x14] sm:$0xf0]  ;;  %v2180_v40 = vor.u32 %v2390_v31, %v2179_v30  ;;  %v1896_v60 = vor.u32 %v2316_v48, %v1893_v49  ;;  %v2261_v7 = vld [vmem:[%s2900_s8 + $0x3d8] sm:$0xf0] }
  0xf0   : > { %1460 = vmatpush.bf16.msra.mxu1 %v1972_v61  ;;  %v1907_v37 = vld [vmem:[%s2900_s8 + $0x108] sm:$0xf]  ;;  %v2322_v38 = vld [vmem:[%s2900_s8 + $0x114] sm:$0xf0]  ;;  %v1780_v51 = vor.u32 %v2290_v34, %v1779_v33  ;;  %v2024_v61 = vor.u32 %v2348_v50, %v2021_v52  ;;  %v2308_v11 = vld [vmem:[%s2900_s8 + $0xac] sm:$0xf] }
  0xf1   : > { %1474 = vmatpush.bf16.msra.mxu2 %v2100_v62  ;;  %v2035_v39 = vld [vmem:[%s2900_s8 + $0x208] sm:$0xf]  ;;  %v2354_v41 = vld [vmem:[%s2900_s8 + $0x214] sm:$0xf0]  ;;  %v1908_v55 = vor.u32 %v2322_v38, %v1907_v37  ;;  %v2152_v62 = vor.u32 %v2380_v53, %v2149_v54  ;;  %v1861_v12 = vld [vmem:[%s2900_s8 + $0xb8] sm:$0xf0] }
  0xf2   : > { %1488 = vmatpush.bf16.msra.mxu3 %v2228_v2  ;;  %v2163_v42 = vld [vmem:[%s2900_s8 + $0x308] sm:$0xf]  ;;  %v2386_v45 = vld [vmem:[%s2900_s8 + $0x314] sm:$0xf0]  ;;  %v2036_v56 = vor.u32 %v2354_v41, %v2035_v39  ;;  %v2280_v2 = vor.u32 %v2412_v57, %v2277_v58  ;;  %v2340_v13 = vld [vmem:[%s2900_s8 + $0x1ac] sm:$0xf] }
  0xf3   : > { %1447 = vmatpush.bf16.msra.mxu0 %v1828_v8  ;;  %v2164_v59 = vor.u32 %v2386_v45, %v2163_v42  ;;  %v1880_v8 = vor.u32 %v2312_v63, %v1877_v0  ;;  %v1989_v15 = vld [vmem:[%s2900_s8 + $0x1b8] sm:$0xf0]  ;;  %v2372_v16 = vld [vmem:[%s2900_s8 + $0x2ac] sm:$0xf] }
  0xf4   : > { %1461 = vmatpush.bf16.msra.mxu1 %v1956_v9  ;;  %v2008_v9 = vor.u32 %v2344_v1, %v2005_v3  ;;  %v2117_v17 = vld [vmem:[%s2900_s8 + $0x2b8] sm:$0xf0]  ;;  %v2404_v18 = vld [vmem:[%s2900_s8 + $0x3ac] sm:$0xf] }
  0xf5   : > { %1475 = vmatpush.bf16.msra.mxu2 %v2084_v10  ;;  %v2136_v10 = vor.u32 %v2376_v4, %v2133_v5  ;;  %v2245_v19 = vld [vmem:[%s2900_s8 + $0x3b8] sm:$0xf0]  ;;  %v2304_v23 = vld [vmem:[%s2900_s8 + $0x8c] sm:$0xf] }
  0xf6   : > { %1489 = vmatpush.bf16.msra.mxu3 %v2212_v14  ;;  %v2264_v14 = vor.u32 %v2408_v6, %v2261_v7  ;;  %v1845_v24 = vld [vmem:[%s2900_s8 + $0x98] sm:$0xf0]  ;;  %v2336_v25 = vld [vmem:[%s2900_s8 + $0x18c] sm:$0xf] }
  0xf7   : > { %1448 = vmatpush.bf16.msra.mxu0 %v1812_v20  ;;  %v1864_v20 = vor.u32 %v2308_v11, %v1861_v12  ;;  %v1973_v27 = vld [vmem:[%s2900_s8 + $0x198] sm:$0xf0]  ;;  %v2368_v28 = vld [vmem:[%s2900_s8 + $0x28c] sm:$0xf] }
  0xf8   : > { %1462 = vmatpush.bf16.msra.mxu1 %v1940_v21  ;;  %v1992_v21 = vor.u32 %v2340_v13, %v1989_v15  ;;  %v2101_v29 = vld [vmem:[%s2900_s8 + $0x298] sm:$0xf0]  ;;  %v2400_v30 = vld [vmem:[%s2900_s8 + $0x38c] sm:$0xf]  ;;  %v1976_v33 = vor.u32 %v2336_v25, %v1973_v27 }
  0xf9   : > { %1476 = vmatpush.bf16.msra.mxu2 %v2068_v22  ;;  %v2120_v22 = vor.u32 %v2372_v16, %v2117_v17  ;;  %v2229_v31 = vld [vmem:[%s2900_s8 + $0x398] sm:$0xf0]  ;;  %v2104_v34 = vor.u32 %v2368_v28, %v2101_v29  ;;  %v2332_v37 = vld [vmem:[%s2900_s8 + $0x16c] sm:$0xf] }
  0xfa   : > { %1490 = vmatpush.bf16.msra.mxu3 %v2196_v26  ;;  %v2248_v26 = vor.u32 %v2404_v18, %v2245_v19  ;;  %v2232_v38 = vor.u32 %v2400_v30, %v2229_v31  ;;  %v1957_v39 = vld [vmem:[%s2900_s8 + $0x178] sm:$0xf0]  ;;  %v2396_v42 = vld [vmem:[%s2900_s8 + $0x36c] sm:$0xf] }
  0xfb   : > { %1449 = vmatpush.bf16.msra.mxu0 %v1796_v32  ;;  %v1848_v32 = vor.u32 %v2304_v23, %v1845_v24  ;;  %v2085_v41 = vld [vmem:[%s2900_s8 + $0x278] sm:$0xf0]  ;;  %v1960_v49 = vor.u32 %v2332_v37, %v1957_v39  ;;  %v2328_v53 = vld [vmem:[%s2900_s8 + $0x14c] sm:$0xf] }
  0xfc   : > { %1463 = vmatpush.bf16.msra.mxu1 %v1924_v35  ;;  %v2300_v35 = vld [vmem:[%s2900_s8 + $0x6c] sm:$0xf]  ;;  %v2213_v45 = vld [vmem:[%s2900_s8 + $0x378] sm:$0xf0] }
  0xfd   : > { %1477 = vmatpush.bf16.msra.mxu2 %v2052_v36  ;;  %v1829_v36 = vld [vmem:[%s2900_s8 + $0x78] sm:$0xf0]  ;;  %v2216_v54 = vor.u32 %v2396_v42, %v2213_v45  ;;  %v2392_v58 = vld [vmem:[%s2900_s8 + $0x34c] sm:$0xf] }
  0xfe   : > { %1491 = vmatpush.bf16.msra.mxu3 %v2180_v40  ;;  %v2364_v40 = vld [vmem:[%s2900_s8 + $0x26c] sm:$0xf]  ;;  %v1832_v48 = vor.u32 %v2300_v35, %v1829_v36  ;;  %v1813_v52 = vld [vmem:[%s2900_s8 + $0x58] sm:$0xf0] }
  0xff   : > { %1450 = vmatpush.bf16.msra.mxu0 %v1780_v51  ;;  %v2088_v50 = vor.u32 %v2364_v40, %v2085_v41  ;;  %v2296_v51 = vld [vmem:[%s2900_s8 + $0x4c] sm:$0xf]  ;;  %v2069_v57 = vld [vmem:[%s2900_s8 + $0x258] sm:$0xf0] }
 0x100   : > { %1464 = vmatpush.bf16.msra.mxu1 %v1908_v55  ;;  %v1941_v55 = vld [vmem:[%s2900_s8 + $0x158] sm:$0xf0]  ;;  %v2292_v63 = vld [vmem:[%s2900_s8 + $0x2c] sm:$0xf] }
 0x101   : > { %1478 = vmatpush.bf16.msra.mxu2 %v2036_v56  ;;  %v2360_v56 = vld [vmem:[%s2900_s8 + $0x24c] sm:$0xf]  ;;  %v1797_v0 = vld [vmem:[%s2900_s8 + $0x38] sm:$0xf0] }
 0x102   : > { %1492 = vmatpush.bf16.msra.mxu3 %v2164_v59  ;;  %1451 = vmatmul.bf16.vlgmr.msra.gmra.mxu0 %v3039_v44  ;;  %v2197_v59 = vld [vmem:[%s2900_s8 + $0x358] sm:$0xf0]  ;;  %v2324_v1 = vld [vmem:[%s2900_s8 + $0x12c] sm:$0xf] }
 0x103   : > { %1499 = vmatpush.bf16.msrb.mxu0 %v1896_v60  ;;  %1465 = vmatmul.bf16.vlgmr.msra.gmra.mxu1 %v3045_v47  ;;  %v1816_v60 = vor.u32 %v2296_v51, %v1813_v52  ;;  %v1925_v3 = vld [vmem:[%s2900_s8 + $0x138] sm:$0xf0]  ;;  %v2356_v4 = vld [vmem:[%s2900_s8 + $0x22c] sm:$0xf] }
 0x104   : > { %1513 = vmatpush.bf16.msrb.mxu1 %v2024_v61  ;;  %1479 = vmatmul.bf16.vlgmr.msra.gmra.mxu2 %v3037_v43  ;;  %v1944_v61 = vor.u32 %v2328_v53, %v1941_v55  ;;  %v2053_v5 = vld [vmem:[%s2900_s8 + $0x238] sm:$0xf0]  ;;  %v2388_v6 = vld [vmem:[%s2900_s8 + $0x32c] sm:$0xf] }
 0x105   : > { %1527 = vmatpush.bf16.msrb.mxu2 %v2152_v62  ;;  %1493 = vmatmul.bf16.vlgmr.msra.gmra.mxu3 %v3043_v46  ;;  %v2072_v62 = vor.u32 %v2360_v56, %v2069_v57  ;;  %v2181_v7 = vld [vmem:[%s2900_s8 + $0x338] sm:$0xf0]  ;;  %v2288_v11 = vld [vmem:[%s2900_s8 + $0xc] sm:$0xf] }
 0x106   : > { %1541 = vmatpush.bf16.msrb.mxu3 %v2280_v2  ;;  %v2200_v2 = vor.u32 %v2392_v58, %v2197_v59  ;;  %v1781_v12 = vld [vmem:[%s2900_s8 + $0x18] sm:$0xf0]  ;;  %v2320_v13 = vld [vmem:[%s2900_s8 + $0x10c] sm:$0xf] }
 0x107   : > { %1500 = vmatpush.bf16.msrb.mxu0 %v1880_v8  ;;  %v1800_v8 = vor.u32 %v2292_v63, %v1797_v0  ;;  %v1909_v15 = vld [vmem:[%s2900_s8 + $0x118] sm:$0xf0]  ;;  %v2352_v16 = vld [vmem:[%s2900_s8 + $0x20c] sm:$0xf] }
 0x108   : > { %1514 = vmatpush.bf16.msrb.mxu1 %v2008_v9  ;;  %v1928_v9 = vor.u32 %v2324_v1, %v1925_v3  ;;  %v2037_v17 = vld [vmem:[%s2900_s8 + $0x218] sm:$0xf0]  ;;  %v2384_v18 = vld [vmem:[%s2900_s8 + $0x30c] sm:$0xf] }
 0x109   : > { %1528 = vmatpush.bf16.msrb.mxu2 %v2136_v10  ;;  %v2056_v10 = vor.u32 %v2356_v4, %v2053_v5  ;;  %v2165_v19 = vld [vmem:[%s2900_s8 + $0x318] sm:$0xf0]  ;;  %s1768_s8 = sshll.u32 %s2539_s15, 2 }
 0x10a   : > { %1542 = vmatpush.bf16.msrb.mxu3 %v2264_v14  ;;  %v2184_v14 = vor.u32 %v2388_v6, %v2181_v7  ;;  %v2168_v23 = vor.u32 %v2384_v18, %v2165_v19  ;;  %p505_p0 = scmp.lt.s32.totalorder %s1768_s8, 7 }
 0x10b   : > { %1501 = vmatpush.bf16.msrb.mxu0 %v1864_v20  ;;  %v1784_v20 = vor.u32 %v2288_v11, %v1781_v12 }
 0x10c   : > { %1515 = vmatpush.bf16.msrb.mxu1 %v1992_v21  ;;  %v1912_v21 = vor.u32 %v2320_v13, %v1909_v15  ;;  %s3302_s8 = smov (!%p505_p0, %s1768_s8), 7 }
 0x10d   : > { %1529 = vmatpush.bf16.msrb.mxu2 %v2120_v22  ;;  %v2040_v22 = vor.u32 %v2352_v16, %v2037_v17  ;;  %s507_s18 = scalar_lea.vmem %s3290_s2, %s3302_s8 }
 0x10e   : > { %1543 = vmatpush.bf16.msrb.mxu3 %v2248_v26  ;;  %v650_v37 = vld [vmem:[%s507_s18] sm:$0xf] }
 0x10f   : > { %1502 = vmatpush.bf16.msrb.mxu0 %v1848_v32  ;;  %v654_v42 = vperm.slane %v650_v37, 2  ;;  %v652_v45 = vperm.slane %v650_v37, 0  ;;  %v655_v55 = vperm.slane %v650_v37, 3 }
 0x110   : > { %1516 = vmatpush.bf16.msrb.mxu1 %v1976_v33 }
 0x111   : > { %1530 = vmatpush.bf16.msrb.mxu2 %v2104_v34 }
 0x112   : > { %1544 = vmatpush.bf16.msrb.mxu3 %v2232_v38  ;;  %v653_v38 = vperm.slane %v650_v37, 1 }
 0x113   : > { %1503 = vmatpush.bf16.msrb.mxu0 %v1832_v48 }
 0x114   : > { %1517 = vmatpush.bf16.msrb.mxu1 %v1960_v49 }
 0x115   : > { %1531 = vmatpush.bf16.msrb.mxu2 %v2088_v50 }
 0x116   : > { %1545 = vmatpush.bf16.msrb.mxu3 %v2216_v54 }
 0x117   : > { %1504 = vmatpush.bf16.msrb.mxu0 %v1816_v60 }
 0x118   : > { %1518 = vmatpush.bf16.msrb.mxu1 %v1944_v61 }
 0x119   : > { %1532 = vmatpush.bf16.msrb.mxu2 %v2072_v62 }
 0x11a   : > { %1546 = vmatpush.bf16.msrb.mxu3 %v2200_v2 }
 0x11b   : > { %1505 = vmatpush.bf16.msrb.mxu0 %v1800_v8 }
 0x11c   : > { %1519 = vmatpush.bf16.msrb.mxu1 %v1928_v9 }
 0x11d   : > { %1533 = vmatpush.bf16.msrb.mxu2 %v2056_v10 }
 0x11e   : > { %1547 = vmatpush.bf16.msrb.mxu3 %v2184_v14 }
 0x11f   : > { %1506 = vmatpush.bf16.msrb.mxu0 %v1784_v20 }
 0x120   : > { %1520 = vmatpush.bf16.msrb.mxu1 %v1912_v21 }
 0x121   : > { %1534 = vmatpush.bf16.msrb.mxu2 %v2040_v22 }
 0x122   : > { %1548 = vmatpush.bf16.msrb.mxu3 %v2168_v23  ;;  %1507 = vmatmul.bf16.vlgmr.msrb.gmra.mxu0 %v3039_v44 }
 0x123   : > { %1521 = vmatmul.bf16.vlgmr.msrb.gmra.mxu1 %v3045_v47 }
 0x124   : > { %1535 = vmatmul.bf16.vlgmr.msrb.gmra.mxu2 %v3037_v43 }
 0x125   : > { %1549 = vmatmul.bf16.vlgmr.msrb.gmra.mxu3 %v3043_v46 }
 0x14e   : > { %v1340_v24 = vpop.f32.mrf.mxu0 }
 0x14f   : > { %v1341_v52 = vadd.f32 %v1340_v24, %v652_v45 }
 0x152   : > { %v1354_v25 = vpop.f32.mrf.mxu1 }
 0x153   : > { %v1355_v57 = vadd.f32 %v1354_v25, %v1341_v52 }
 0x155   : > { %v1368_v26 = vpop.f32.mrf.mxu2 }
 0x156   : > { %v1382_v27 = vpop.f32.mrf.mxu3  ;;  %v1342_v28 = vpop.f32.mrf.mxu0  ;;  %v1369_v1 = vadd.f32 %v1368_v26, %v1355_v57 }
 0x157   : > { %v1343_v6 = vadd.f32 %v1342_v28, %v652_v45 }
 0x158   : > { %v1383_v9 = vadd.f32 %v1382_v27, %v1369_v1 }
 0x15a   : > { %v1356_v29 = vpop.f32.mrf.mxu1  ;;  %v1555_v20 = vmax.f32 %v1383_v9, 0.0 }
 0x15b   : > { %v1357_v15 = vadd.f32 %v1356_v29, %v1343_v6 }
 0x15d   : > { %v3206_v30 = vpop.f32.mrf.mxu2 }
 0x15e   : > { %v3208_v31 = vpop.f32.mrf.mxu3  ;;  %v1371_v25 = vadd.f32 %v3206_v30, %v1357_v15 }
 0x15f   : > { %v1396_v32 = vpop.f32.mrf.mxu0 }
 0x160   : > { %v1397_v40 = vadd.f32 %v1396_v32, %v653_v38 }
 0x163   : > { %v1410_v33 = vpop.f32.mrf.mxu1 }
 0x164   : > { %v1411_v50 = vadd.f32 %v1410_v33, %v1397_v40 }
 0x167   : > { %v1424_v44 = vpop.f32.mrf.mxu2  ;;  %v1398_v34 = vpop.f32.mrf.mxu0 }
 0x168   : > { %v1438_v47 = vpop.f32.mrf.mxu3  ;;  %v1425_v54 = vadd.f32 %v1424_v44, %v1411_v50  ;;  %v1399_v58 = vadd.f32 %v1398_v34, %v653_v38  ;;  %v1385_v50 = vadd.f32 %v3208_v31, %v1371_v25 }
 0x16a   : > { %v1439_v61 = vadd.f32 %v1438_v47, %v1425_v54 }
 0x16b   : > { %v1412_v43 = vpop.f32.mrf.mxu1 }
 0x16c   : > { %v1413_v2 = vadd.f32 %v1412_v43, %v1399_v58  ;;  %v1556_v7 = vmax.f32 %v1439_v61, 0.0 }
 0x16e   : > { %v1571_v16 = vrot.slane %v1556_v7, 6 }
 0x16f   : > { %v1426_v46 = vpop.f32.mrf.mxu2 }
 0x170   : > { %v1440_v36 = vpop.f32.mrf.mxu3  ;;  %v1427_v10 = vadd.f32 %v1426_v46, %v1413_v2  ;;  %v1578_v26 = vsel %vm1577_vm0, %v1555_v20, %v1571_v16  ;;  %v1584_v27 = vsel %vm1583_vm2, %v1555_v20, %v1571_v16  ;;  %v1590_v28 = vsel %vm1579_vm1, %v1555_v20, %v1571_v16 }
 0x171   : > { %v1594_v44 = vsel %vm1585_vm3, %v1571_v16, %v1555_v20 }
 0x172   : > { %v1441_v21 = vadd.f32 %v1440_v36, %v1427_v10 }
 0x174   : > { %v1560_v47 = vmax.f32 %v1441_v21, 0.0 }
 0x176   : > { %v1574_v54 = vrot.slane %v1560_v47, 6 }
 0x17f   : > { %v1452_v35 = vpop.f32.mrf.mxu0 }
 0x180   : > { %v1466_v39 = vpop.f32.mrf.mxu1  ;;  %v1453_v51 = vadd.f32 %v1452_v35, %v654_v42 }
 0x182   : > { %v1467_v56 = vadd.f32 %v1466_v39, %v1453_v51 }
 0x187   : > { %v1480_v41 = vpop.f32.mrf.mxu2  ;;  %v1454_v49 = vpop.f32.mrf.mxu0 }
 0x188   : > { %v1494_v48 = vpop.f32.mrf.mxu3  ;;  %v1468_v53 = vpop.f32.mrf.mxu1  ;;  %v1481_v0 = vadd.f32 %v1480_v41, %v1467_v56  ;;  %v1455_v3 = vadd.f32 %v1454_v49, %v654_v42  ;;  %v1559_v56 = vmax.f32 %v1385_v50, 0.0 }
 0x18a   : > { %v1495_v8 = vadd.f32 %v1494_v48, %v1481_v0  ;;  %v1469_v11 = vadd.f32 %v1468_v53, %v1455_v3  ;;  %v1605_v31 = vsel %vm1579_vm1, %v1559_v56, %v1574_v54  ;;  %v1609_v61 = vsel %vm1585_vm3, %v1574_v54, %v1559_v56 }
 0x18c   : > { %v1557_v18 = vmax.f32 %v1495_v8, 0.0 }
 0x18e   : > { %v1572_v29 = vrot.slane %v1557_v18, 4 }
 0x18f   : > { %v1482_v59 = vpop.f32.mrf.mxu2 }
 0x190   : > { %v1496_v62 = vpop.f32.mrf.mxu3  ;;  %v1483_v22 = vadd.f32 %v1482_v59, %v1469_v11  ;;  %v1598_v59 = vsel %vm1577_vm0, %v1559_v56, %v1574_v54 }
 0x192   : > { %v1497_v34 = vadd.f32 %v1496_v62, %v1483_v22 }
 0x194   : > { %v1561_v52 = vmax.f32 %v1497_v34, 0.0 }
 0x196   : > { %v1575_v57 = vrot.slane %v1561_v52, 4 }
 0x19f   : > { %v1508_v60 = vpop.f32.mrf.mxu0 }
 0x1a0   : > { %v1509_v63 = vadd.f32 %v1508_v60, %v655_v55  ;;  %v1522_v4 = vpop.f32.mrf.mxu1  ;;  %v1601_v60 = vsel %vm1583_vm2, %v1559_v56, %v1574_v54 }
 0x1a2   : > { %v1523_v5 = vadd.f32 %v1522_v4, %v1509_v63 }
 0x1a7   : > { %v1536_v12 = vpop.f32.mrf.mxu2  ;;  %v1510_v14 = vpop.f32.mrf.mxu0 }
 0x1a8   : > { %v1537_v13 = vadd.f32 %v1536_v12, %v1523_v5  ;;  %v1550_v17 = vpop.f32.mrf.mxu3  ;;  %v1511_v23 = vadd.f32 %v1510_v14, %v655_v55  ;;  %v1524_v33 = vpop.f32.mrf.mxu1 }
 0x1aa   : > { %v1551_v19 = vadd.f32 %v1550_v17, %v1537_v13  ;;  %v1525_v43 = vadd.f32 %v1524_v33, %v1511_v23 }
 0x1ac   : > { %v1558_v24 = vmax.f32 %v1551_v19, 0.0 }
 0x1ae   : > { %v1573_v32 = vrot.slane %v1558_v24, 2 }
 0x1af   : > { %v1538_v46 = vpop.f32.mrf.mxu2 }
 0x1b0   : > { %v1580_v35 = vsel %vm1579_vm1, %v1572_v29, %v1573_v32  ;;  %v1586_v30 = vsel %vm1585_vm3, %v1573_v32, %v1572_v29  ;;  %v1591_v36 = vsel %vm1577_vm0, %v1572_v29, %v1573_v32  ;;  %v1595_v37 = vsel %vm1583_vm2, %v1572_v29, %v1573_v32  ;;  %v1552_v51 = vpop.f32.mrf.mxu3 }
 0x1b1   : > { %v1582_v38 = vsel %vm1581_vm4, %v1578_v26, %v1580_v35  ;;  %v1588_v39 = vsel %vm1587_vm5, %v1584_v27, %v1586_v30  ;;  %v1592_v40 = vsel %vm1581_vm4, %v1591_v36, %v1590_v28  ;;  %v1596_v41 = vsel %vm1587_vm5, %v1595_v37, %v1594_v44 }
 0x1b2   : > { %v1589_v42 = vrot.slane %v1588_v39, 2  ;;  %v1593_v45 = vrot.slane %v1592_v40, 4  ;;  %v1597_v48 = vrot.slane %v1596_v41, 6  ;;  %1621 = vst [vmem:[%s3228_s21] sm:$0xff] %v1582_v38  ;;  %v1539_v49 = vadd.f32 %v1538_v46, %v1525_v43 }
 0x1b4   : > { %1622 = vst [vmem:[%s3228_s21 + $0x8] sm:$0xff] %v1589_v42  ;;  %v1553_v53 = vadd.f32 %v1552_v51, %v1539_v49 }
 0x1b5   : > { %1623 = vst [vmem:[%s3228_s21 + $0x10] sm:$0xff] %v1593_v45 }
 0x1b6   : > { %1624 = vst [vmem:[%s3228_s21 + $0x18] sm:$0xff] %v1597_v48  ;;  %v1562_v55 = vmax.f32 %v1553_v53, 0.0 }
 0x1b8   : > { %v1576_v58 = vrot.slane %v1562_v55, 2 }
 0x1ba   : > { %v1599_v62 = vsel %vm1579_vm1, %v1575_v57, %v1576_v58  ;;  %v1602_v63 = vsel %vm1585_vm3, %v1576_v58, %v1575_v57  ;;  %v1606_v0 = vsel %vm1577_vm0, %v1575_v57, %v1576_v58  ;;  %v1610_v1 = vsel %vm1583_vm2, %v1575_v57, %v1576_v58 }
 0x1bb   : > { %v1600_v2 = vsel %vm1581_vm4, %v1598_v59, %v1599_v62  ;;  %v1603_v3 = vsel %vm1587_vm5, %v1601_v60, %v1602_v63  ;;  %v1607_v4 = vsel %vm1581_vm4, %v1606_v0, %v1605_v31  ;;  %v1611_v5 = vsel %vm1587_vm5, %v1610_v1, %v1609_v61 }
 0x1bc   : > { %v1604_v6 = vrot.slane %v1603_v3, 2  ;;  %v1608_v7 = vrot.slane %v1607_v4, 4  ;;  %v1612_v8 = vrot.slane %v1611_v5, 6  ;;  %1625 = vst [vmem:[%s3228_s21 + $0x20] sm:$0xff] %v1600_v2  ;;  %1636 = sbr.rel (!%p2611_p5) target bundleno = 464 (0x1d0), region = 59 }
 0x1be   : > { %1626 = vst [vmem:[%s3228_s21 + $0x28] sm:$0xff] %v1604_v6 }
 0x1bf   : > { %1627 = vst [vmem:[%s3228_s21 + $0x30] sm:$0xff] %v1608_v7 }
 0x1c0   : > { %1628 = vst [vmem:[%s3228_s21 + $0x38] sm:$0xff] %v1612_v8 }
 0x1c1   : > { %1644 = vsyncadd %s1630_s23, 896  ;;  %s2415_s26 = sshll.u32 %s2539_s15, 3  ;;  %s1651_s27 = sshll.u32 %s3228_s21, 4  ;;  %s1652_s27 = int_to_ptr.vmem [resolvable:$true] %s1651_s27 }
 0x1c2   : > { %s1649_s30 = scalar_lea.hbm %s3291_s3, %s2415_s26  ;;  %s2489_s22 = scalar_lea.hbm %s3291_s3, 16 }
 0x1c3   : > { %s1653_s4 = sshll.u32 %s1649_s30, 4  ;;  %s1654_s4 = int_to_ptr.hbm [resolvable:$true] %s1653_s4 }
 0x1c4   : > { %s2485_s5 = sshra.s32 %s1654_s4, 4  ;;  %s2486_s5 = int_to_ptr.hbm [resolvable:$true] %s2485_s5 }
 0x1c5   : > { %s2487_s7 = scalar_lea.hbm %s2486_s5, 8  ;;  %p2490_p2 = scmp.lt.s32.totalorder %s2486_s5, %s3291_s3 }
 0x1c6   : > { %p2488_p1 = scmp.ne.s32.totalorder %s2486_s5, %s2487_s7  ;;  %p2491_p3 = scmp.lt.s32.totalorder %s2489_s22, %s2487_s7 }
 0x1c8   : > { %p2492_p4 = por %p2491_p3, %p2490_p2 }
 0x1ca   : > { %p2493_p5 = pnand %p2492_p4, %p2488_p1 }
 0x1cc   : > { %2496 = shalt.err (!%p2493_p5)
}
 0x1cd   : > { %s2549_s15 = smov 128   ;;  %s2550_s11 = smov 256  }
 0x1ce   : > { %s2551_s18 = smov 8  }
 0x1cf   : > { %1659 = dma.vmem_to_hbm [thread:$0]  %s1652_s27, 128, %s1654_s4, %s1630_s23, %s2549_s15, %s2550_s11, %s2551_s18  }
 0x1d0 PF: > { %s1668_s19 = sand.u32 1, %s2527_s12   ;;  %p2418_p6 = pnand %p1761_p10, %p2622_p9 }
 0x1d1   : > { %s1669_s21 = scalar_lea.sflag [#allocation4], %s1668_s19 }
 0x1d2   : > { %p2419_p7 = pneg %p2418_p6 }
 0x1d4   : > { %2522 = dma.done.wait (%p2419_p7), %s1669_s21, 1024  }
 0x1d5   : > { %2524 = vsyncadd (%p2419_p7), %s1669_s21, 4294966272  ;;  %s16_s17 = sadd.s32 1, %s2547_s17   ;;  %s3294_s12 = smov %s2531_s13 }
 0x1d6   : > { %p13_p8 = scmp.ge.s32.totalorder %s16_s17, 4   ;;  %s3295_s13 = smov %s2535_s14 }
 0x1d7   : > { %s3296_s14 = smov %s2620_s24  ;;  %s3297_s15 = smov %s2543_s16 }
 0x1d8   : > { %s3298_s16 = smov %s3300_s20  ;;  %15 = sbr.rel (!%p13_p8) target bundleno = 4 (0x4), region = 108 }
 0x1dd   :  { %1675 = vsyncpa [#allocation4], 1 }
 0x1de   :  { %1677 = vsyncpa [#allocation4 + $0x1], 1 }

</bundles_post_ra>
